<compile_context>
chip_gen: v5e
topology: v5e:2x2
jax: 0.10.0
libtpu: 0.0.40
codegen_flags: <defaults>
</compile_context>

<pallas_src>
import functools
import math

import jax
import jax.numpy as jnp
import numpy as np
from jax.experimental import pallas as pl
from jax.experimental.pallas import tpu as pltpu


def _mha_kernel(xq_ref, xkv_ref, wq_ref, wkv_ref, bq_ref, bkv_ref,
                wo_ref, bo_ref, out_ref, attnw_ref, *, num_heads):
    """One batch element of multi-head cross-attention, channel-major layout.

    xq_ref  : (1, C, L)  query tokens, channel-major, f32
    xkv_ref : (1, C, S)  key/value tokens, channel-major, f32
    wq_ref  : (C, C)     bf16, 1/sqrt(dh) pre-folded
    wkv_ref : (2C, C)    bf16, [Wk; Wv] stacked on the output-channel axis
    bq_ref  : (C, 1)     f32 (scale pre-folded)
    bkv_ref : (2C, 1)    f32
    wo_ref  : (C, C)     bf16 output projection (used as out^T = Wo @ ctx^T)
    bo_ref  : (C, 1)     f32
    out_ref : (1, C, L)  attention output, channel-major
    attnw_ref: (1, L, S) attention weights averaged over heads
    """
    H = num_heads
    xq_t = xq_ref[0]                      # (C, L)
    xkv_t = xkv_ref[0]                    # (C, S)
    C, L = xq_t.shape
    S = xkv_t.shape[1]
    dh = C // H
    f32, bf16 = jnp.float32, jnp.bfloat16

    # Fused, full contraction-depth projections (bf16 MXU operands, f32 acc).
    q_t = jnp.dot(wq_ref[...], xq_t.astype(bf16),
                  preferred_element_type=f32) + bq_ref[...]             # (C, L)
    kv_t = jnp.dot(wkv_ref[...], xkv_t.astype(bf16),
                   preferred_element_type=f32) + bkv_ref[...]           # (2C, S)

    # One head-split relayout per tensor: sublane-aligned splits of the
    # channel (second-minor) axis; the lane axis is untouched.
    q3 = jnp.transpose(q_t.reshape(H, dh, L), (0, 2, 1)).astype(bf16)   # (H, L, dh)
    k3 = kv_t[:C].reshape(H, dh, S).astype(bf16)                        # (H, dh, S)
    v3 = kv_t[C:].reshape(H, dh, S).astype(bf16)                        # (H, dh, S)

    # All heads in a single batched MXU contraction (head axis = batch dim).
    scores = jnp.einsum('hld,hds->hls', q3, k3,
                        preferred_element_type=f32)                     # (H, L, S)

    # Softmax over the key axis; statistics in f32, exact normalization
    # (denominator is only (H, L, 1), so the exact reciprocal is free).
    m = jnp.max(scores, axis=-1, keepdims=True)
    p = jnp.exp(scores - m)
    denom = jnp.sum(p, axis=-1, keepdims=True)
    attn = p * (1.0 / denom)                                            # (H, L, S)

    # Context directly in channel-major per-head layout: (H, dh, L).
    ctx_t = jnp.einsum('hds,hls->hdl', v3, attn.astype(bf16),
                       preferred_element_type=f32)                      # (H, dh, L)

    # Fused output projection: merge heads (sublane merge) and one full-depth
    # (C x C)·(C x L) matmul — no (H, L, C) temporary, no cross-head reduce.
    out_t = jnp.dot(wo_ref[...], ctx_t.reshape(C, L).astype(bf16),
                    preferred_element_type=f32) + bo_ref[...]           # (C, L)

    out_ref[0] = out_t.astype(out_ref.dtype)
    # PyTorch default (average_attn_weights=True): mean over heads -> (L, S).
    attnw_ref[0] = (jnp.sum(attn, axis=0) * (1.0 / H)).astype(attnw_ref.dtype)


def flash_cross_attention(query, key_value, params, num_heads=8):
    """query, key_value: (B, C, H, W) NCHW. Returns (out (B,C,H,W), attn (B,L,S))."""
    B, C, Hq, Wq = query.shape
    Bk, Ck, Hk, Wk = key_value.shape
    assert B == Bk and C == Ck and C % num_heads == 0
    L = Hq * Wq
    S = Hk * Wk
    dh = C // num_heads
    scale = 1.0 / math.sqrt(dh)

    # (B, C, H, W) -> (B, C, L): pure reshape, no transpose — the kernel both
    # consumes and produces the channel-major layout directly.
    xq = query.reshape(B, C, L)
    xkv = key_value.reshape(B, C, S)

    w_in = params["w_in"].astype(jnp.float32)             # (3C, C) = [Wq; Wk; Wv]
    b_in = params["b_in"].reshape(3 * C).astype(jnp.float32)
    wo = params["wo"].astype(jnp.float32)                 # (C, C)
    bo = params["bo"].reshape(C, 1).astype(jnp.float32)

    # Query scale folded into weights/bias; MXU operands pre-cast to bf16.
    wq = (w_in[0:C] * scale).astype(jnp.bfloat16)         # (C, C)
    wkv = w_in[C:3 * C].astype(jnp.bfloat16)              # (2C, C) = [Wk; Wv]
    bq = (b_in[0:C] * scale).reshape(C, 1)                # f32
    bkv = b_in[C:3 * C].reshape(2 * C, 1)                 # f32
    wo_b = wo.astype(jnp.bfloat16)                        # (C, C)

    kernel = functools.partial(_mha_kernel, num_heads=num_heads)
    const2 = lambda b: (0, 0)

    out_t, attnw = pl.pallas_call(
        kernel,
        out_shape=(
            jax.ShapeDtypeStruct((B, C, L), query.dtype),
            jax.ShapeDtypeStruct((B, L, S), jnp.float32),
        ),
        grid=(B,),
        in_specs=[
            pl.BlockSpec((1, C, L), lambda b: (b, 0, 0)),
            pl.BlockSpec((1, C, S), lambda b: (b, 0, 0)),
            pl.BlockSpec((C, C), const2),
            pl.BlockSpec((2 * C, C), const2),
            pl.BlockSpec((C, 1), const2),
            pl.BlockSpec((2 * C, 1), const2),
            pl.BlockSpec((C, C), const2),
            pl.BlockSpec((C, 1), const2),
        ],
        out_specs=(
            pl.BlockSpec((1, C, L), lambda b: (b, 0, 0)),
            pl.BlockSpec((1, L, S), lambda b: (b, 0, 0)),
        ),
        compiler_params=pltpu.CompilerParams(
            dimension_semantics=("parallel",)),
    )(xq, xkv, wq, wkv, bq, bkv, wo_b, bo)

    attn_output = out_t.reshape(B, C, Hq, Wq)   # already channel-major
    return attn_output, attnw


def reference(query, key_value, params, num_heads=8):
    """Pure-JAX reference of nn.MultiheadAttention forward used for checking."""
    B, C, Hq, Wq = query.shape
    L = Hq * Wq
    S = key_value.shape[2] * key_value.shape[3]
    xq = query.reshape(B, C, L).transpose(0, 2, 1).astype(jnp.float32)
    xkv = key_value.reshape(B, C, S).transpose(0, 2, 1).astype(jnp.float32)
    w_in, b_in, wo, bo = (params["w_in"], params["b_in"][0],
                          params["wo"], params["bo"][0])
    dh = C // num_heads
    q = xq @ w_in[:C].T + b_in[:C]
    k = xkv @ w_in[C:2 * C].T + b_in[C:2 * C]
    v = xkv @ w_in[2 * C:].T + b_in[2 * C:]
    qh = q.reshape(B, L, num_heads, dh).transpose(0, 2, 1, 3) / math.sqrt(dh)
    kh = k.reshape(B, S, num_heads, dh).transpose(0, 2, 1, 3)
    vh = v.reshape(B, S, num_heads, dh).transpose(0, 2, 1, 3)
    scores = jnp.einsum("bhld,bhsd->bhls", qh, kh)
    attn = jax.nn.softmax(scores, axis=-1)
    ctx = jnp.einsum("bhls,bhsd->bhld", attn, vh)
    ctx = ctx.transpose(0, 2, 1, 3).reshape(B, L, C)
    out = ctx @ wo.T + bo
    out = out.transpose(0, 2, 1).reshape(B, C, Hq, Wq)
    return out, attn.mean(axis=1)


if __name__ == "__main__":
    # embed_dim C = 128 (8 heads, dh = 16); query 8x8, key/value 16x16 so the
    # kv length S=256 and the attnw store are lane-dense 128-multiples.
    B, C = 2, 128
    num_heads = 8
    Hq = Wq = 8
    Hk = Wk = 16

    key = jax.random.PRNGKey(0)
    kq, kkv, kw1, kw2, kb = jax.random.split(key, 5)

    query = jax.random.normal(kq, (B, C, Hq, Wq), jnp.float32)
    key_value = jax.random.normal(kkv, (B, C, Hk, Wk), jnp.float32)

    # Deterministic parameters (shapes match nn.MultiheadAttention(C, 8)):
    #   in_proj_weight (3C, C), in_proj_bias (3C,), out_proj (C, C) + bias (C,)
    params = {
        "w_in": jax.random.normal(kw1, (3 * C, C), jnp.float32) * (1.0 / math.sqrt(C)),
        "b_in": jax.random.normal(kb, (1, 3 * C), jnp.float32) * 0.02,
        "wo": jax.random.normal(kw2, (C, C), jnp.float32) * (1.0 / math.sqrt(C)),
        "bo": jnp.zeros((1, C), jnp.float32),
    }

    attn_output, attn_weight = flash_cross_attention(
        query, key_value, params, num_heads=num_heads)
    attn_output = jax.block_until_ready(attn_output)
    attn_weight = jax.block_until_ready(attn_weight)

    ref_out, ref_w = reference(query, key_value, params, num_heads=num_heads)
    # Tolerances account for bf16 MXU operands (f32 accumulation, f32 softmax).
    np.testing.assert_allclose(np.asarray(attn_output), np.asarray(ref_out),
                               atol=2e-2, rtol=2e-2)
    np.testing.assert_allclose(np.asarray(attn_weight), np.asarray(ref_w),
                               atol=3e-3, rtol=2e-2)

    assert attn_output.shape == (B, C, Hq, Wq)
    assert attn_weight.shape == (B, Hq * Wq, Hk * Wk)
    print("KERNEL_OK")
</pallas_src>

<mosaic_0001>
module attributes {stable_mosaic.version = 11 : i64} {
  func.func @_mha_kernel(%arg0: i32, %arg1: memref<1x128x64xf32, #tpu.memory_space<vmem>>, %arg2: memref<1x128x256xf32, #tpu.memory_space<vmem>>, %arg3: memref<128x128xbf16, #tpu.memory_space<vmem>>, %arg4: memref<256x128xbf16, #tpu.memory_space<vmem>>, %arg5: memref<128x1xf32, #tpu.memory_space<vmem>>, %arg6: memref<256x1xf32, #tpu.memory_space<vmem>>, %arg7: memref<128x128xbf16, #tpu.memory_space<vmem>>, %arg8: memref<128x1xf32, #tpu.memory_space<vmem>>, %arg9: memref<1x128x64xf32, #tpu.memory_space<vmem>>, %arg10: memref<1x64x256xf32, #tpu.memory_space<vmem>>) attributes {dimension_semantics = [#tpu.dimension_semantics<parallel>], iteration_bounds = array<i64: 2>, scalar_prefetch = 0 : i64, scratch_operands = 0 : i64, tpu.core_type = #tpu.core_type<tc>, window_params = [{transform_indices = @transform_0, window_bounds = array<i64: 1, 128, 64>}, {transform_indices = @transform_1, window_bounds = array<i64: 1, 128, 256>}, {pipeline_mode = #tpu.pipeline_mode<synchronous>, transform_indices = @transform_2, window_bounds = array<i64: 128, 128>}, {pipeline_mode = #tpu.pipeline_mode<synchronous>, transform_indices = @transform_3, window_bounds = array<i64: 256, 128>}, {pipeline_mode = #tpu.pipeline_mode<synchronous>, transform_indices = @transform_4, window_bounds = array<i64: 128, 1>}, {pipeline_mode = #tpu.pipeline_mode<synchronous>, transform_indices = @transform_5, window_bounds = array<i64: 256, 1>}, {pipeline_mode = #tpu.pipeline_mode<synchronous>, transform_indices = @transform_6, window_bounds = array<i64: 128, 128>}, {pipeline_mode = #tpu.pipeline_mode<synchronous>, transform_indices = @transform_7, window_bounds = array<i64: 128, 1>}, {transform_indices = @transform_8, window_bounds = array<i64: 1, 128, 64>}, {transform_indices = @transform_9, window_bounds = array<i64: 1, 64, 256>}]} {
    %c0 = arith.constant 0 : index
    %c0_0 = arith.constant 0 : index
    %c0_1 = arith.constant 0 : index
    %0 = vector.load %arg1[%c0, %c0_0, %c0_1] : memref<1x128x64xf32, #tpu.memory_space<vmem>>, vector<1x128x64xf32>
    %1 = vector.shape_cast %0 : vector<1x128x64xf32> to vector<128x64xf32>
    %c0_2 = arith.constant 0 : index
    %c0_3 = arith.constant 0 : index
    %c0_4 = arith.constant 0 : index
    %2 = vector.load %arg2[%c0_2, %c0_3, %c0_4] : memref<1x128x256xf32, #tpu.memory_space<vmem>>, vector<1x128x256xf32>
    %3 = vector.shape_cast %2 : vector<1x128x256xf32> to vector<128x256xf32>
    %c0_5 = arith.constant 0 : index
    %c0_6 = arith.constant 0 : index
    %4 = vector.load %arg3[%c0_5, %c0_6] : memref<128x128xbf16, #tpu.memory_space<vmem>>, vector<128x128xbf16>
    %5 = arith.truncf %1 : vector<128x64xf32> to vector<128x64xbf16>
    %cst = arith.constant dense<0.000000e+00> : vector<128x64xf32>
    %6 = tpu.matmul %4, %5, %cst {dimension_numbers = #tpu.dot_dimension_numbers<[1], [0], [0], [1], [0, 0, 1, 1], [], []>} : vector<128x128xbf16>, vector<128x64xbf16>, vector<128x64xf32> -> vector<128x64xf32>
    %c0_7 = arith.constant 0 : index
    %c0_8 = arith.constant 0 : index
    %7 = vector.load %arg5[%c0_7, %c0_8] : memref<128x1xf32, #tpu.memory_space<vmem>>, vector<128x1xf32>
    %8 = vector.broadcast %7 : vector<128x1xf32> to vector<128x64xf32>
    %9 = arith.addf %6, %8 : vector<128x64xf32>
    %c0_9 = arith.constant 0 : index
    %c0_10 = arith.constant 0 : index
    %10 = vector.load %arg4[%c0_9, %c0_10] : memref<256x128xbf16, #tpu.memory_space<vmem>>, vector<256x128xbf16>
    %11 = arith.truncf %3 : vector<128x256xf32> to vector<128x256xbf16>
    %cst_11 = arith.constant dense<0.000000e+00> : vector<256x256xf32>
    %12 = tpu.matmul %10, %11, %cst_11 {dimension_numbers = #tpu.dot_dimension_numbers<[1], [0], [0], [1], [0, 0, 1, 1], [], []>} : vector<256x128xbf16>, vector<128x256xbf16>, vector<256x256xf32> -> vector<256x256xf32>
    %c0_12 = arith.constant 0 : index
    %c0_13 = arith.constant 0 : index
    %13 = vector.load %arg6[%c0_12, %c0_13] : memref<256x1xf32, #tpu.memory_space<vmem>>, vector<256x1xf32>
    %14 = vector.broadcast %13 : vector<256x1xf32> to vector<256x256xf32>
    %15 = arith.addf %12, %14 : vector<256x256xf32>
    %16 = vector.shape_cast %9 : vector<128x64xf32> to vector<8x16x64xf32>
    %17 = tpu.transpose %16, [0, 2, 1] : vector<8x16x64xf32> -> vector<8x64x16xf32>
    %18 = arith.truncf %17 : vector<8x64x16xf32> to vector<8x64x16xbf16>
    %19 = vector.extract_strided_slice %15 {offsets = [0, 0], sizes = [128, 256], strides = [1, 1]} : vector<256x256xf32> to vector<128x256xf32>
    %20 = vector.shape_cast %19 : vector<128x256xf32> to vector<8x16x256xf32>
    %21 = arith.truncf %20 : vector<8x16x256xf32> to vector<8x16x256xbf16>
    %22 = vector.extract_strided_slice %15 {offsets = [128, 0], sizes = [128, 256], strides = [1, 1]} : vector<256x256xf32> to vector<128x256xf32>
    %23 = vector.shape_cast %22 : vector<128x256xf32> to vector<8x16x256xf32>
    %24 = arith.truncf %23 : vector<8x16x256xf32> to vector<8x16x256xbf16>
    "tpu.trace_start"() <{level = 10 : i32, message = "hld,hds->hls"}> : () -> ()
    %cst_14 = arith.constant dense<0.000000e+00> : vector<8x64x256xf32>
    %25 = tpu.matmul %18, %21, %cst_14 {dimension_numbers = #tpu.dot_dimension_numbers<[2], [1], [1], [2], [0, 0, 0, 1, 1, 2], [0], [0]>} : vector<8x64x16xbf16>, vector<8x16x256xbf16>, vector<8x64x256xf32> -> vector<8x64x256xf32>
    "tpu.trace_stop"() : () -> ()
    %cst_15 = arith.constant dense<0xFF800000> : vector<8x64xf32>
    %26 = vector.multi_reduction <maximumf>, %25, %cst_15 [2] : vector<8x64x256xf32> to vector<8x64xf32>
    %27 = vector.shape_cast %26 : vector<8x64xf32> to vector<8x64x1xf32>
    %28 = vector.broadcast %27 : vector<8x64x1xf32> to vector<8x64x256xf32>
    %29 = arith.subf %25, %28 : vector<8x64x256xf32>
    %30 = math.exp %29 : vector<8x64x256xf32>
    %cst_16 = arith.constant dense<0.000000e+00> : vector<8x64xf32>
    %31 = vector.multi_reduction <add>, %30, %cst_16 [2] : vector<8x64x256xf32> to vector<8x64xf32>
    %32 = vector.shape_cast %31 : vector<8x64xf32> to vector<8x64x1xf32>
    %cst_17 = arith.constant 1.000000e+00 : f32
    %33 = vector.broadcast %cst_17 : f32 to vector<8x64x1xf32>
    %34 = arith.divf %33, %32 : vector<8x64x1xf32>
    %35 = vector.broadcast %34 : vector<8x64x1xf32> to vector<8x64x256xf32>
    %36 = arith.mulf %30, %35 : vector<8x64x256xf32>
    %37 = arith.truncf %36 : vector<8x64x256xf32> to vector<8x64x256xbf16>
    "tpu.trace_start"() <{level = 10 : i32, message = "hds,hls->hdl"}> : () -> ()
    %cst_18 = arith.constant dense<0.000000e+00> : vector<8x16x64xf32>
    %38 = tpu.matmul %24, %37, %cst_18 {dimension_numbers = #tpu.dot_dimension_numbers<[2], [2], [1], [1], [0, 0, 0, 1, 1, 1], [0], [0]>} : vector<8x16x256xbf16>, vector<8x64x256xbf16>, vector<8x16x64xf32> -> vector<8x16x64xf32>
    "tpu.trace_stop"() : () -> ()
    %c0_19 = arith.constant 0 : index
    %c0_20 = arith.constant 0 : index
    %39 = vector.load %arg7[%c0_19, %c0_20] : memref<128x128xbf16, #tpu.memory_space<vmem>>, vector<128x128xbf16>
    %40 = vector.shape_cast %38 : vector<8x16x64xf32> to vector<128x64xf32>
    %41 = arith.truncf %40 : vector<128x64xf32> to vector<128x64xbf16>
    %cst_21 = arith.constant dense<0.000000e+00> : vector<128x64xf32>
    %42 = tpu.matmul %39, %41, %cst_21 {dimension_numbers = #tpu.dot_dimension_numbers<[1], [0], [0], [1], [0, 0, 1, 1], [], []>} : vector<128x128xbf16>, vector<128x64xbf16>, vector<128x64xf32> -> vector<128x64xf32>
    %c0_22 = arith.constant 0 : index
    %c0_23 = arith.constant 0 : index
    %43 = vector.load %arg8[%c0_22, %c0_23] : memref<128x1xf32, #tpu.memory_space<vmem>>, vector<128x1xf32>
    %44 = vector.broadcast %43 : vector<128x1xf32> to vector<128x64xf32>
    %45 = arith.addf %42, %44 : vector<128x64xf32>
    %c0_24 = arith.constant 0 : index
    %c0_25 = arith.constant 0 : index
    %c0_26 = arith.constant 0 : index
    %46 = vector.load %arg9[%c0_24, %c0_25, %c0_26] : memref<1x128x64xf32, #tpu.memory_space<vmem>>, vector<1x128x64xf32>
    %47 = vector.shape_cast %46 : vector<1x128x64xf32> to vector<128x64xf32>
    %48 = vector.shape_cast %45 : vector<128x64xf32> to vector<1x128x64xf32>
    tpu.vector_store %arg9[%c0_24, %c0_25, %c0_26], %48 {strides = array<i32>} : memref<1x128x64xf32, #tpu.memory_space<vmem>>, vector<1x128x64xf32>,
    %cst_27 = arith.constant dense<0.000000e+00> : vector<64x256xf32>
    %49 = vector.multi_reduction <add>, %36, %cst_27 [0] : vector<8x64x256xf32> to vector<64x256xf32>
    %cst_28 = arith.constant 1.250000e-01 : f32
    %50 = vector.broadcast %cst_28 : f32 to vector<64x256xf32>
    %51 = arith.mulf %49, %50 : vector<64x256xf32>
    %c0_29 = arith.constant 0 : index
    %c0_30 = arith.constant 0 : index
    %c0_31 = arith.constant 0 : index
    %52 = vector.load %arg10[%c0_29, %c0_30, %c0_31] : memref<1x64x256xf32, #tpu.memory_space<vmem>>, vector<1x64x256xf32>
    %53 = vector.shape_cast %52 : vector<1x64x256xf32> to vector<64x256xf32>
    %54 = vector.shape_cast %51 : vector<64x256xf32> to vector<1x64x256xf32>
    tpu.vector_store %arg10[%c0_29, %c0_30, %c0_31], %54 {strides = array<i32>} : memref<1x64x256xf32, #tpu.memory_space<vmem>>, vector<1x64x256xf32>,
    return
  }
  func.func @transform_0(%arg0: i32) -> (i32, i32, i32) {
    %c0_i32 = arith.constant 0 : i32
    %c0_i32_0 = arith.constant 0 : i32
    %c0_i32_1 = arith.constant 0 : i32
    return %arg0, %c0_i32, %c0_i32_0 : i32, i32, i32
  }
  func.func @transform_1(%arg0: i32) -> (i32, i32, i32) {
    %c0_i32 = arith.constant 0 : i32
    %c0_i32_0 = arith.constant 0 : i32
    %c0_i32_1 = arith.constant 0 : i32
    return %arg0, %c0_i32, %c0_i32_0 : i32, i32, i32
  }
  func.func @transform_2(%arg0: i32) -> (i32, i32) {
    %c0_i32 = arith.constant 0 : i32
    %c0_i32_0 = arith.constant 0 : i32
    %c0_i32_1 = arith.constant 0 : i32
    return %c0_i32, %c0_i32_0 : i32, i32
  }
  func.func @transform_3(%arg0: i32) -> (i32, i32) {
    %c0_i32 = arith.constant 0 : i32
    %c0_i32_0 = arith.constant 0 : i32
    %c0_i32_1 = arith.constant 0 : i32
    return %c0_i32, %c0_i32_0 : i32, i32
  }
  func.func @transform_4(%arg0: i32) -> (i32, i32) {
    %c0_i32 = arith.constant 0 : i32
    %c0_i32_0 = arith.constant 0 : i32
    %c0_i32_1 = arith.constant 0 : i32
    return %c0_i32, %c0_i32_0 : i32, i32
  }
  func.func @transform_5(%arg0: i32) -> (i32, i32) {
    %c0_i32 = arith.constant 0 : i32
    %c0_i32_0 = arith.constant 0 : i32
    %c0_i32_1 = arith.constant 0 : i32
    return %c0_i32, %c0_i32_0 : i32, i32
  }
  func.func @transform_6(%arg0: i32) -> (i32, i32) {
    %c0_i32 = arith.constant 0 : i32
    %c0_i32_0 = arith.constant 0 : i32
    %c0_i32_1 = arith.constant 0 : i32
    return %c0_i32, %c0_i32_0 : i32, i32
  }
  func.func @transform_7(%arg0: i32) -> (i32, i32) {
    %c0_i32 = arith.constant 0 : i32
    %c0_i32_0 = arith.constant 0 : i32
    %c0_i32_1 = arith.constant 0 : i32
    return %c0_i32, %c0_i32_0 : i32, i32
  }
  func.func @transform_8(%arg0: i32) -> (i32, i32, i32) {
    %c0_i32 = arith.constant 0 : i32
    %c0_i32_0 = arith.constant 0 : i32
    %c0_i32_1 = arith.constant 0 : i32
    return %arg0, %c0_i32, %c0_i32_0 : i32, i32, i32
  }
  func.func @transform_9(%arg0: i32) -> (i32, i32, i32) {
    %c0_i32 = arith.constant 0 : i32
    %c0_i32_0 = arith.constant 0 : i32
    %c0_i32_1 = arith.constant 0 : i32
    return %arg0, %c0_i32, %c0_i32_0 : i32, i32, i32
  }
}

</mosaic_0001>

<bundles_post_ra>
// kernel: tpu_custom_call.1
= control target key start
LH: loop header
LB: loop body
LE: loop exit
PB: predicated region body
PF: predicated region fallthrough
CT: control target
= control target key end

     0   :  { %s10495_s0 = inlined_call_operand.vmem [shape: f32[2,128,64], index: 0, kind: input, shape index: {}]   ;;  %s10496_s1 = inlined_call_operand.vmem [shape: f32[2,128,256], index: 1, kind: input, shape index: {}]   ;;  %s10497_s2 = inlined_call_operand.vmem [shape: bf16[128,128], index: 2, kind: input, shape index: {}]   ;;  %s10498_s3 = inlined_call_operand.vmem [shape: bf16[256,128], index: 3, kind: input, shape index: {}]   ;;  %s10499_s4 = inlined_call_operand.vmem [shape: f32[128,1], index: 4, kind: input, shape index: {}]   ;;  %s10500_s5 = inlined_call_operand.vmem [shape: f32[256,1], index: 5, kind: input, shape index: {}]   ;;  %s10501_s6 = inlined_call_operand.vmem [shape: bf16[128,128], index: 6, kind: input, shape index: {}]   ;;  %s10502_s7 = inlined_call_operand.vmem [shape: f32[128,1], index: 7, kind: input, shape index: {}]   ;;  %s10503_s8 = inlined_call_operand.vmem [shape: f32[2,128,64], index: 8, kind: output, shape index: {0}]   ;;  %s10504_s9 = inlined_call_operand.hbm [shape: f32[2,64,256], index: 9, kind: output, shape index: {1}]  }
   0x1   :  { %10792 = sst [smem:[#allocation147_spill]] %s10495_s0 }
   0x2   :  { %10793 = sst [smem:[#allocation148_spill]] %s10496_s1 }
   0x3   :  { %10794 = sst [smem:[#allocation149_spill]] %s10497_s2 }
   0x4   :  { %15 = vsyncpa [#allocation3], 0 }
   0x5   :  { %17 = vsyncpa [#allocation3 + $0x1], 0  ;;  %s6230_s30 = smov 0   ;;  %s6232_s10 = smov 0  }
   0x6   :  { %s6234_s11 = smov 0   ;;  %s6236_s12 = smov 0  }
   0x7 LB: > { %s6251_s13 = sadd.s32 4294967295, %s6175_s12   ;;  %s5342_s14 = sadd.s32 4294967294, %s6175_s12   ;;  %s6175_s12 = sphi %s6236_s12, %s11713_s12   ;;  %s6171_s11 = sphi %s6234_s11, %s11712_s11   ;;  %s6167_s10 = sphi %s6232_s10, %s11711_s10   ;;  %s6163_s30 = sphi %s6230_s30, %s11710_s30  }
   0x8   : > { %s6255_s15 = sadd.s32 1, %s6175_s12   ;;  %s234_s16 = sadd.s32 1, %s6171_s11 }
   0x9   : > { %s231_s17 = ssub.s32 %s6175_s12, %s6255_s15  ;;  %p244_p0 = scmp.ne.s32.totalorder %s6171_s11, %s6167_s10 }
   0xa   : > { %p232_p1 = scmp.eq.s32.totalorder %s231_s17, 0  ;;  %p245_p2 = scmp.eq.s32.totalorder %s6251_s13, 1 }
   0xb   : > { %p250_p3 = scmp.ne.s32.totalorder %s6167_s10, %s6163_s30  ;;  %p251_p4 = scmp.eq.s32.totalorder %s5342_s14, 1 }
   0xc   : > { %s6266_s18 = scalar_select %p232_p1, %s6171_s11, %s234_s16  }
   0xd   : > { %p6268_p5 = por %p245_p2, %p244_p0  ;;  %p6272_p6 = por %p251_p4, %p250_p3 }
   0xe   : > { %p5345_p7 = scmp.ge.s32.totalorder %s6175_s12, 1  ;;  %p303_p8 = scmp.lt.s32.totalorder %s6175_s12, 3 }
  0x10   : > { %p304_p9 = pnand %p5345_p7, %p303_p8 }
  0x12   : > { %307 = sbr.rel (%p304_p9) target bundleno = 2143 (0x85f), region = 52 }
  0x17   : > { %v678_v0 = vld [vmem:[%s10500_s5] sm:$0xff]  ;;  %p349_p10 = scmp.lt.s32.totalorder %s6251_s13, 1  ;;  %v6177_v2 = vmov 0   ;;  %s10797_s0 = sld [smem:[#allocation147_spill]]  ;;  %v679_v3 = vld [vmem:[%s10500_s5 + $0x8] sm:$0xff]  ;;  %v440_v25 = vld [vmem:[%s10499_s4 + $0x18] sm:$0xff] }
  0x18   : > { %v437_v1 = vld [vmem:[%s10499_s4] sm:$0xff]  ;;  %5639 = vset.pattern.permute.xlu1 %v6177_v2  ;;  %5638 = vset.pattern.permute.xlu0 %v6177_v2  ;;  %s10798_s1 = sld [smem:[#allocation148_spill]]  ;;  %v438_v12 = vld [vmem:[%s10499_s4 + $0x8] sm:$0xff]  ;;  %v439_v28 = vld [vmem:[%s10499_s4 + $0x10] sm:$0xff]  ;;  %vm1526_vm0 = vcmask 130048   ;;  %s10791_s17 = sand.u32 1, %s6167_s10  }
  0x19   : > { %712 = vperm.xlu1 %5639, %v678_v0   ;;  %455 = vperm.xlu0 %5638, %v437_v1   ;;  %s6286_s25 = scalar_select %p349_p10, %s6251_s13, 1  ;;  %v443_v39 = vld [vmem:[%s10499_s4 + $0x30] sm:$0xff]  ;;  %v681_v42 = vld [vmem:[%s10500_s5 + $0x18] sm:$0xff]  ;;  %v446_v50 = vld [vmem:[%s10499_s4 + $0x48] sm:$0xff] }
  0x1a   : > { %5640 = vset.pattern.permute.xlu2 %v6177_v2  ;;  %v441_v58 = vld [vmem:[%s10499_s4 + $0x20] sm:$0xff]  ;;  %s10799_s2 = sld [smem:[#allocation149_spill]]  ;;  %s5585_s23 = sshll.u32 %s6251_s13, 7 }
  0x1b   : > { %s10790_s26 = sshll.u32 %s6286_s25, 7  ;;  %s5551_s27 = sshll.u32 %s6286_s25, 8  ;;  %v5561_v2 = vld [vmem:[%s10498_s3] sm:$0xff] }
  0x1c   : > { %s11708_s29 = sand.u32 1, %s6167_s10   ;;  %s6133_s13 = scalar_lea.hbm %s10504_s9, 256 }
  0x1d   : > { %s6295_s14 = scalar_lea.vmem %s10797_s0, %s10790_s26  ;;  %s5239_s0 = scalar_lea.hbm %s10504_s9, %s5585_s23 }
  0x1e   : > { %s6300_s21 = scalar_lea.vmem %s10798_s1, %s5551_s27  ;;  %v379_v4 = vld [vmem:[%s6295_s14 + $0x70] sm:$0xff]  ;;  %v380_v5 = vld [vmem:[%s6295_s14 + $0x78] sm:$0xff]  ;;  %v377_v9 = vld [vmem:[%s6295_s14 + $0x60] sm:$0xff]  ;;  %s5225_s1 = scalar_lea.sflag [#allocation3], %s11708_s29 }
  0x1f   : > { %v410_v6 = vld [vmem:[%s6300_s21 + $0xe8] sm:$0xff]  ;;  %v436_v7 = vpack.c.bf16 %v380_v5, %v379_v4  ;;  %v412_v8 = vld [vmem:[%s6300_s21 + $0xf8] sm:$0xff]  ;;  %v375_v17 = vld [vmem:[%s6295_s14 + $0x50] sm:$0xff] }
  0x20   : > { %v378_v10 = vld [vmem:[%s6295_s14 + $0x68] sm:$0xff]  ;;  %v677_v11 = vpack.c.bf16 %v412_v8, %v410_v6  ;;  %v408_v14 = vld [vmem:[%s6300_s21 + $0xd8] sm:$0xff]  ;;  %v373_v23 = vld [vmem:[%s6295_s14 + $0x40] sm:$0xff] }
  0x21   : > { %v406_v13 = vld [vmem:[%s6300_s21 + $0xc8] sm:$0xff]  ;;  %581 = vmatpush.bf16.msra.mxu0 %v436_v7  ;;  %5586 = vmatpush.bf16.msra.mxu1 %v436_v7  ;;  %v435_v15 = vpack.c.bf16 %v378_v10, %v377_v9  ;;  %v376_v18 = vld [vmem:[%s6295_s14 + $0x58] sm:$0xff]  ;;  %v371_v31 = vld [vmem:[%s6295_s14 + $0x30] sm:$0xff] }
  0x22   : > { %1055 = vmatpush.bf16.msra.mxu2 %v677_v11  ;;  %717 = vperm.xlu1 %5639, %v679_v3   ;;  %v675_v16 = vpack.c.bf16 %v408_v14, %v406_v13  ;;  %v402_v19 = vld [vmem:[%s6300_s21 + $0xa8] sm:$0xff]  ;;  %v404_v20 = vld [vmem:[%s6300_s21 + $0xb8] sm:$0xff]  ;;  %v434_v21 = vpack.c.bf16 %v376_v18, %v375_v17  ;;  %v369_v37 = vld [vmem:[%s6295_s14 + $0x20] sm:$0xff] }
  0x23   : > { %460 = vperm.xlu0 %5638, %v438_v12   ;;  %v673_v22 = vpack.c.bf16 %v404_v20, %v402_v19  ;;  %v374_v24 = vld [vmem:[%s6295_s14 + $0x48] sm:$0xff]  ;;  %v400_v27 = vld [vmem:[%s6300_s21 + $0x98] sm:$0xff]  ;;  %v367_v45 = vld [vmem:[%s6295_s14 + $0x10] sm:$0xff] }
  0x24   : > { %v398_v26 = vld [vmem:[%s6300_s21 + $0x88] sm:$0xff]  ;;  %v433_v29 = vpack.c.bf16 %v374_v24, %v373_v23  ;;  %v372_v32 = vld [vmem:[%s6295_s14 + $0x38] sm:$0xff]  ;;  %v365_v52 = vld [vmem:[%s6295_s14] sm:$0xff] }
  0x25   : > { %582 = vmatpush.bf16.msra.mxu0 %v435_v15  ;;  %5587 = vmatpush.bf16.msra.mxu1 %v435_v15  ;;  %v671_v30 = vpack.c.bf16 %v400_v27, %v398_v26  ;;  %v394_v33 = vld [vmem:[%s6300_s21 + $0x68] sm:$0xff]  ;;  %v396_v34 = vld [vmem:[%s6300_s21 + $0x78] sm:$0xff]  ;;  %v432_v35 = vpack.c.bf16 %v372_v32, %v371_v31  ;;  %v409_v56 = vld [vmem:[%s6300_s21 + $0xe0] sm:$0xff] }
  0x26   : > { %1056 = vmatpush.bf16.msra.mxu2 %v675_v16  ;;  %v669_v36 = vpack.c.bf16 %v396_v34, %v394_v33  ;;  %v370_v38 = vld [vmem:[%s6295_s14 + $0x28] sm:$0xff]  ;;  %v392_v41 = vld [vmem:[%s6300_s21 + $0x58] sm:$0xff]  ;;  %v411_v57 = vld [vmem:[%s6300_s21 + $0xf0] sm:$0xff] }
  0x27   : > { %v390_v40 = vld [vmem:[%s6300_s21 + $0x48] sm:$0xff]  ;;  %v431_v43 = vpack.c.bf16 %v370_v38, %v369_v37  ;;  %v368_v46 = vld [vmem:[%s6295_s14 + $0x18] sm:$0xff]  ;;  %v676_v61 = vpack.c.bf16 %v411_v57, %v409_v56  ;;  %v405_v62 = vld [vmem:[%s6300_s21 + $0xc0] sm:$0xff] }
  0x28   : > { %v667_v44 = vpack.c.bf16 %v392_v41, %v390_v40  ;;  %v386_v47 = vld [vmem:[%s6300_s21 + $0x28] sm:$0xff]  ;;  %v388_v48 = vld [vmem:[%s6300_s21 + $0x38] sm:$0xff]  ;;  %v430_v49 = vpack.c.bf16 %v368_v46, %v367_v45  ;;  %v407_v63 = vld [vmem:[%s6300_s21 + $0xd0] sm:$0xff] }
  0x29   : > { %583 = vmatpush.bf16.msra.mxu0 %v434_v21  ;;  %5588 = vmatpush.bf16.msra.mxu1 %v434_v21  ;;  %v665_v51 = vpack.c.bf16 %v388_v48, %v386_v47  ;;  %v366_v53 = vld [vmem:[%s6295_s14 + $0x8] sm:$0xff]  ;;  %v384_v55 = vld [vmem:[%s6300_s21 + $0x18] sm:$0xff]  ;;  %v5553_v0 = vld [vmem:[%s10799_s2] sm:$0xff]  ;;  %v674_v3 = vpack.c.bf16 %v407_v63, %v405_v62  ;;  %s5346_s14 = sshll.u32 %s10791_s17, 7 }
  0x2a   : > { %1057 = vmatpush.bf16.msra.mxu2 %v673_v22  ;;  %470 = vperm.xlu1 %5639, %v440_v25   ;;  %v382_v54 = vld [vmem:[%s6300_s21 + $0x8] sm:$0xff]  ;;  %v429_v59 = vpack.c.bf16 %v366_v53, %v365_v52  ;;  %v5559_v1 = vld [vmem:[%s10799_s2 + $0x30] sm:$0xff]  ;;  %v686_v4 = vld [vmem:[%s10500_s5 + $0x40] sm:$0xff]  ;;  %s9715_s24 = scalar_lea.vmem [#allocation2], %s5346_s14 }
  0x2b   : > { %465 = vperm.xlu0 %5638, %v439_v28   ;;  %v663_v60 = vpack.c.bf16 %v384_v55, %v382_v54  ;;  %v401_v5 = vld [vmem:[%s6300_s21 + $0xa0] sm:$0xff]  ;;  %v403_v6 = vld [vmem:[%s6300_s21 + $0xb0] sm:$0xff]  ;;  %v442_v7 = vld [vmem:[%s10499_s4 + $0x28] sm:$0xff]  ;;  %s5240_s27 = sshll.u32 %s9715_s24, 4  ;;  %s5241_s27 = int_to_ptr.vmem [resolvable:$true] %s5240_s27 }
  0x2c   : > { %v672_v8 = vpack.c.bf16 %v403_v6, %v401_v5  ;;  %v397_v9 = vld [vmem:[%s6300_s21 + $0x80] sm:$0xff]  ;;  %v399_v10 = vld [vmem:[%s6300_s21 + $0x90] sm:$0xff]  ;;  %v687_v12 = vld [vmem:[%s10500_s5 + $0x48] sm:$0xff] }
  0x2d   : > { %584 = vmatpush.bf16.msra.mxu0 %v433_v29  ;;  %5589 = vmatpush.bf16.msra.mxu1 %v433_v29  ;;  %v670_v11 = vpack.c.bf16 %v399_v10, %v397_v9  ;;  %v393_v13 = vld [vmem:[%s6300_s21 + $0x60] sm:$0xff]  ;;  %v395_v14 = vld [vmem:[%s6300_s21 + $0x70] sm:$0xff]  ;;  %v5554_v19 = vld [vmem:[%s10799_s2 + $0x8] sm:$0xff] }
  0x2e   : > { %1058 = vmatpush.bf16.msra.mxu2 %v671_v30  ;;  %v682_v15 = vld [vmem:[%s10500_s5 + $0x20] sm:$0xff]  ;;  %v668_v16 = vpack.c.bf16 %v395_v14, %v393_v13  ;;  %v391_v18 = vld [vmem:[%s6300_s21 + $0x50] sm:$0xff]  ;;  %v5560_v20 = vld [vmem:[%s10799_s2 + $0x38] sm:$0xff] }
  0x2f   : > { %v389_v17 = vld [vmem:[%s6300_s21 + $0x40] sm:$0xff]  ;;  %v5562_v21 = vld [vmem:[%s10498_s3 + $0x8] sm:$0xff]  ;;  %v448_v23 = vld [vmem:[%s10499_s4 + $0x58] sm:$0xff] }
  0x30   : > { %v666_v22 = vpack.c.bf16 %v391_v18, %v389_v17  ;;  %v385_v24 = vld [vmem:[%s6300_s21 + $0x20] sm:$0xff]  ;;  %v387_v25 = vld [vmem:[%s6300_s21 + $0x30] sm:$0xff]  ;;  %v683_v26 = vld [vmem:[%s10500_s5 + $0x28] sm:$0xff] }
  0x31   : > { %585 = vmatpush.bf16.msra.mxu0 %v432_v35  ;;  %5590 = vmatpush.bf16.msra.mxu1 %v432_v35  ;;  %v664_v27 = vpack.c.bf16 %v387_v25, %v385_v24  ;;  %v680_v28 = vld [vmem:[%s10500_s5 + $0x10] sm:$0xff]  ;;  %v381_v29 = vld [vmem:[%s6300_s21] sm:$0xff]  ;;  %v444_v33 = vld [vmem:[%s10499_s4 + $0x38] sm:$0xff] }
  0x32   : > { %1059 = vmatpush.bf16.msra.mxu2 %v669_v36  ;;  %485 = vperm.xlu1 %5639, %v443_v39   ;;  %v383_v30 = vld [vmem:[%s6300_s21 + $0x10] sm:$0xff]  ;;  %v689_v36 = vld [vmem:[%s10500_s5 + $0x58] sm:$0xff]  ;;  %v449_v38 = vld [vmem:[%s10499_s4 + $0x60] sm:$0xff]  ;;  %s5242_s21 = sshll.u32 %s5239_s0, 4  ;;  %s5243_s21 = int_to_ptr.hbm [resolvable:$true] %s5242_s21 }
  0x33   : > { %727 = vperm.xlu0 %5638, %v681_v42   ;;  %722 = vperm.xlu2 %5640, %v680_v28   ;;  %v662_v31 = vpack.c.bf16 %v383_v30, %v381_v29  ;;  %v688_v32 = vld [vmem:[%s10500_s5 + $0x50] sm:$0xff]  ;;  %v685_v39 = vld [vmem:[%s10500_s5 + $0x38] sm:$0xff]  ;;  %v450_v42 = vld [vmem:[%s10499_s4 + $0x68] sm:$0xff]  ;;  %s6127_s26 = sshra.s32 %s5243_s21, 4  ;;  %s6128_s26 = int_to_ptr.hbm [resolvable:$true] %s6127_s26 }
  0x34   : > { %v5555_v34 = vld [vmem:[%s10799_s2 + $0x10] sm:$0xff]  ;;  %v5556_v40 = vld [vmem:[%s10799_s2 + $0x18] sm:$0xff]  ;;  %v5565_v45 = vld [vmem:[%s10498_s3 + $0x20] sm:$0xff]  ;;  %s6129_s16 = scalar_lea.hbm %s6128_s26, 128  ;;  %p6134_p0 = scmp.lt.s32.totalorder %s6128_s26, %s10504_s9 }
  0x35   : > { %586 = vmatpush.bf16.msra.mxu0 %v431_v43  ;;  %5591 = vmatpush.bf16.msra.mxu1 %v431_v43  ;;  %v5563_v35 = vld [vmem:[%s10498_s3 + $0x10] sm:$0xff]  ;;  %v5564_v41 = vld [vmem:[%s10498_s3 + $0x18] sm:$0xff]  ;;  %v690_v43 = vld [vmem:[%s10500_s5 + $0x60] sm:$0xff]  ;;  %p6130_p11 = scmp.ne.s32.totalorder %s6128_s26, %s6129_s16  ;;  %p6135_p1 = scmp.lt.s32.totalorder %s6133_s13, %s6129_s16 }
  0x36   : > { %1060 = vmatpush.bf16.msra.mxu2 %v667_v44  ;;  %v684_v37 = vld [vmem:[%s10500_s5 + $0x30] sm:$0xff]  ;;  %v5557_v44 = vld [vmem:[%s10799_s2 + $0x20] sm:$0xff]  ;;  %v691_v46 = vld [vmem:[%s10500_s5 + $0x68] sm:$0xff] }
  0x37   : > { %v451_v47 = vld [vmem:[%s10499_s4 + $0x70] sm:$0xff]  ;;  %p6131_p12 = pnand %p6130_p11, %p6268_p5  ;;  %p6136_p2 = por %p6135_p1, %p6134_p0 }
  0x38   : > { %v5567_v53 = vld [vmem:[%s10498_s3 + $0x30] sm:$0xff] }
  0x39   : > { %587 = vmatpush.bf16.msra.mxu0 %v430_v49  ;;  %5592 = vmatpush.bf16.msra.mxu1 %v430_v49  ;;  %v5558_v49 = vld [vmem:[%s10799_s2 + $0x28] sm:$0xff]  ;;  %p6132_p13 = pneg %p6131_p12 }
  0x3a   : > { %1061 = vmatpush.bf16.msra.mxu2 %v665_v51  ;;  %500 = vperm.xlu1 %5639, %v446_v50   ;;  %v5566_v50 = vld [vmem:[%s10498_s3 + $0x28] sm:$0xff] }
  0x3b   : > { %475 = vperm.xlu0 %5638, %v441_v58   ;;  %742 = vperm.xlu2 %5640, %v684_v37   ;;  %p6137_p3 = pnand %p6136_p2, %p6132_p13 }
  0x3d   : > { %588 = vmatpush.bf16.msra.mxu0 %v429_v59  ;;  %5593 = vmatpush.bf16.msra.mxu1 %v429_v59 }
  0x3e   : > { %1062 = vmatpush.bf16.msra.mxu2 %v663_v60 }
  0x40   : > { %589 = vmatmul.bf16.vlgmr.msra.gmra.mxu0 %v5553_v0  ;;  %619 = vmatmul.bf16.vlgmr.msra.gmra.mxu1 %v5559_v1 }
  0x41   : > { %966 = vmatpush.bf16.msrb.mxu1 %v676_v61  ;;  %1063 = vmatmul.bf16.vlgmr.msra.gmra.mxu2 %v5561_v2 }
  0x42   : > { %752 = vperm.xlu1 %5639, %v686_v4  }
  0x43   : > { %480 = vperm.xlu0 %5638, %v442_v7   ;;  %747 = vperm.xlu2 %5640, %v685_v39  }
  0x45   : > { %967 = vmatpush.bf16.msrb.mxu1 %v674_v3 }
  0x49   : > { %968 = vmatpush.bf16.msrb.mxu1 %v672_v8 }
  0x4a   : > { %757 = vperm.xlu1 %5639, %v687_v12  }
  0x4b   : > { %732 = vperm.xlu0 %5638, %v682_v15  }
  0x4d   : > { %969 = vmatpush.bf16.msrb.mxu1 %v670_v11 }
  0x50   : > { %594 = vmatmul.bf16.gmra.mxu0 %v5554_v19  ;;  %624 = vmatmul.bf16.gmra.mxu1 %v5560_v20 }
  0x51   : > { %970 = vmatpush.bf16.msrb.mxu1 %v668_v16  ;;  %1068 = vmatmul.bf16.gmra.mxu2 %v5562_v21 }
  0x52   : > { %510 = vperm.xlu1 %5639, %v448_v23  }
  0x53   : > { %737 = vperm.xlu0 %5638, %v683_v26  }
  0x55   : > { %971 = vmatpush.bf16.msrb.mxu1 %v666_v22 }
  0x59   : > { %972 = vmatpush.bf16.msrb.mxu1 %v664_v27 }
  0x5a   : > { %762 = vperm.xlu1 %5639, %v688_v32  }
  0x5b   : > { %490 = vperm.xlu0 %5638, %v444_v33  }
  0x5d   : > { %973 = vmatpush.bf16.msrb.mxu1 %v662_v31 }
  0x60   : > { %599 = vmatmul.bf16.gmra.mxu0 %v5555_v34  ;;  %974 = vmatmul.bf16.vlgmr.msrb.gmra.mxu1 %v5561_v2 }
  0x61   : > { %1073 = vmatmul.bf16.gmra.mxu2 %v5563_v35 }
  0x62   : > { %767 = vperm.xlu1 %5639, %v689_v36  }
  0x6a   : > { %515 = vperm.xlu1 %5639, %v449_v38  }
  0x70   : > { %604 = vmatmul.bf16.gmra.mxu0 %v5556_v40  ;;  %979 = vmatmul.bf16.gmra.mxu1 %v5562_v21 }
  0x71   : > { %1078 = vmatmul.bf16.gmra.mxu2 %v5564_v41 }
  0x72   : > { %520 = vperm.xlu1 %5639, %v450_v42  }
  0x7a   : > { %772 = vperm.xlu1 %5639, %v690_v43  }
  0x80   : > { %609 = vmatmul.bf16.gmra.mxu0 %v5557_v44  ;;  %984 = vmatmul.bf16.gmra.mxu1 %v5563_v35 }
  0x81   : > { %1083 = vmatmul.bf16.gmra.mxu2 %v5565_v45 }
  0x82   : > { %777 = vperm.xlu1 %5639, %v691_v46  }
  0x8a   : > { %525 = vperm.xlu1 %5639, %v451_v47  }
  0x8b   : > { %v713_v48 = vpop.permute.xlu1 %712  ;;  %v456_v56 = vpop.permute.xlu0 %455 }
  0x8d   : > { %v723_v42 = vpop.permute.xlu2 %722 }
  0x90   : > { %614 = vmatmul.bf16.gmra.mxu0 %v5558_v49  ;;  %989 = vmatmul.bf16.gmra.mxu1 %v5564_v41 }
  0x91   : > { %1088 = vmatmul.bf16.gmra.mxu2 %v5566_v50 }
  0x94   : > { %v718_v51 = vpop.permute.xlu1 %717 }
  0x95   : > { %v461_v59 = vpop.permute.xlu0 %460 }
  0x9c   : > { %v471_v52 = vpop.permute.xlu1 %470 }
  0x9d   : > { %v466_v4 = vpop.permute.xlu0 %465 }
  0xa0   : > { %994 = vmatmul.bf16.gmra.mxu1 %v5565_v45 }
  0xa1   : > { %1093 = vmatmul.bf16.gmra.mxu2 %v5567_v53 }
  0xa4   : > { %v6470_v54 = vpop.permute.xlu1 %485 }
  0xa5   : > { %v728_v10 = vpop.permute.xlu0 %727 }
  0xac   : > { %v6472_v55 = vpop.permute.xlu1 %500 }
  0xad   : > { %v476_v16 = vpop.permute.xlu0 %475 }
  0xb0   : > { %999 = vmatmul.bf16.gmra.mxu1 %v5566_v50 }
  0xb4   : > { %v6474_v57 = vpop.permute.xlu1 %752 }
  0xb5   : > { %v481_v24 = vpop.permute.xlu0 %480 }
  0xbc   : > { %v6476_v58 = vpop.permute.xlu1 %757 }
  0xbd   : > { %v590_v60 = vpop.f32.mrf.mxu0  ;;  %v6478_v62 = vpop.f32.mrf.mxu1 }
  0xbe   : > { %v591_v61 = vadd.f32 %v590_v60, %v456_v56  ;;  %v733_v41 = vpop.permute.xlu0 %732 }
  0xc0   : > { %1004 = vmatmul.bf16.gmra.mxu1 %v5567_v53  ;;  %1144 = vxpose.xlu2.b32.start [1/2] (short) (narrow) %v591_v61, 64 }
  0xc4   : > { %v1064_v63 = vpop.f32.mrf.mxu2  ;;  %v6480_v0 = vpop.permute.xlu1 %510 }
  0xc5   : > { %v592_v1 = vpop.f32.mrf.mxu0  ;;  %v6482_v3 = vpop.f32.mrf.mxu1  ;;  %v1065_v22 = vadd.f32 %v1064_v63, %v713_v48 }
  0xc6   : > { %v593_v2 = vadd.f32 %v592_v1, %v461_v59  ;;  %v6498_v53 = vpop.permute.xlu0 %737 }
  0xc8   : > { %1145 = vxpose.xlu2.b32.end [2/2] (short) (narrow) %v593_v2, 64 }
  0xcc   : > { %v1066_v5 = vpop.f32.mrf.mxu2  ;;  %v6484_v6 = vpop.permute.xlu1 %762 }
  0xcd   : > { %v595_v7 = vpop.f32.mrf.mxu0  ;;  %v6486_v9 = vpop.f32.mrf.mxu1  ;;  %v1067_v25 = vadd.f32 %v1066_v5, %v718_v51 }
  0xce   : > { %v596_v8 = vadd.f32 %v595_v7, %v466_v4 }
  0xd0   : > { %1176 = vxpose.xlu1.b32.start [1/2] (short) (narrow) %v596_v8, 64 }
  0xd4   : > { %v6488_v11 = vpop.permute.xlu1 %767  ;;  %v1069_v13 = vpop.f32.mrf.mxu2 }
  0xd5   : > { %v597_v12 = vpop.f32.mrf.mxu0  ;;  %v6490_v15 = vpop.f32.mrf.mxu1  ;;  %v1070_v46 = vadd.f32 %v1069_v13, %v723_v42 }
  0xd6   : > { %v598_v14 = vadd.f32 %v597_v12, %v471_v52 }
  0xd8   : > { %1177 = vxpose.xlu1.b32.end [2/2] (short) (narrow) %v598_v14, 64  ;;  %v491_v14 = vpop.permute.xlu0 %490 }
  0xdc   : > { %v516_v20 = vpop.permute.xlu1 %515  ;;  %v1071_v21 = vpop.f32.mrf.mxu2 }
  0xdd   : > { %v600_v17 = vpop.f32.mrf.mxu0  ;;  %v975_v19 = vpop.f32.mrf.mxu1 }
  0xde   : > { %v601_v18 = vadd.f32 %v600_v17, %v476_v16  ;;  %v976_v23 = vadd.f32 %v975_v19, %v713_v48  ;;  %v1072_v48 = vadd.f32 %v1071_v21, %v728_v10 }
  0xe0   : > { %1208 = vxpose.xlu0.b32.start [1/2] (short) (narrow) %v601_v18, 64  ;;  %v1464_v26 = vpack.c.bf16 %v1065_v22, %v976_v23  ;;  %v743_v22 = vpop.permute.xlu2 %742 }
  0xe2   : > { %v1518_v33 = vunpack.c.l.b16 %v1464_v26  ;;  %v1519_v34 = vunpack.c.h.b16 %v1464_v26 }
  0xe4   : > { %v6492_v31 = vpop.permute.xlu1 %520  ;;  %v1074_v35 = vpop.f32.mrf.mxu2 }
  0xe5   : > { %v602_v27 = vpop.f32.mrf.mxu0  ;;  %v977_v29 = vpop.f32.mrf.mxu1  ;;  %v1075_v8 = vadd.f32 %v1074_v35, %v733_v41 }
  0xe6   : > { %v603_v28 = vadd.f32 %v602_v27, %v481_v24  ;;  %v978_v30 = vadd.f32 %v977_v29, %v718_v51 }
  0xe8   : > { %1209 = vxpose.xlu0.b32.end [2/2] (short) (narrow) %v603_v28, 64  ;;  %v1465_v32 = vpack.c.bf16 %v1067_v25, %v978_v30 }
  0xea   : > { %v1520_v36 = vunpack.c.l.b16 %v1465_v32  ;;  %v1521_v37 = vunpack.c.h.b16 %v1465_v32 }
  0xec   : > { %v1522_v38 = vpack.c.b16 %v1520_v36, %v1518_v33  ;;  %v1523_v39 = vpack.c.b16 %v1521_v37, %v1519_v34  ;;  %v6494_v43 = vpop.permute.xlu1 %772  ;;  %v6496_v45 = vpop.f32.mrf.mxu2 }
  0xed   : > { %v980_v40 = vpop.f32.mrf.mxu1  ;;  %v605_v51 = vpop.f32.mrf.mxu0 }
  0xee   : > { %1546 = vmatpush.bf16.msrb.mxu0 %v1522_v38  ;;  %1575 = vmatpush.bf16.msra.mxu3 %v1523_v39  ;;  %v981_v44 = vadd.f32 %v980_v40, %v723_v42  ;;  %v606_v4 = vadd.f32 %v605_v51, %v6470_v54  ;;  %v621_v54 = vadd.f32 %v6478_v62, %v516_v20 }
  0xf0   : > { %v1466_v49 = vpack.c.bf16 %v1070_v46, %v981_v44 }
  0xf2   : > { %v1620_v56 = vunpack.c.h.b16 %v1466_v49  ;;  %v1619_v60 = vunpack.c.l.b16 %v1466_v49 }
  0xf4   : > { %v778_v63 = vpop.permute.xlu1 %777  ;;  %v1079_v5 = vpop.f32.mrf.mxu2 }
  0xf5   : > { %v982_v47 = vpop.f32.mrf.mxu1  ;;  %v607_v13 = vpop.f32.mrf.mxu0  ;;  %v1080_v25 = vadd.f32 %v1079_v5, %v743_v22 }
  0xf6   : > { %v983_v50 = vadd.f32 %v982_v47, %v728_v10  ;;  %v608_v16 = vadd.f32 %v607_v13, %v491_v14  ;;  %v748_v14 = vpop.permute.xlu2 %747 }
  0xf8   : > { %v1467_v52 = vpack.c.bf16 %v1072_v48, %v983_v50 }
  0xfa   : > { %v1622_v59 = vunpack.c.h.b16 %v1467_v52  ;;  %v1621_v61 = vunpack.c.l.b16 %v1467_v52 }
  0xfc   : > { %v1623_v1 = vpack.c.b16 %v1621_v61, %v1619_v60  ;;  %v1624_v2 = vpack.c.b16 %v1622_v59, %v1620_v56  ;;  %v526_v18 = vpop.permute.xlu1 %525  ;;  %v6503_v19 = vpop.f32.mrf.mxu2 }
  0xfd   : > { %v985_v7 = vpop.f32.mrf.mxu1  ;;  %v626_v21 = vadd.f32 %v6486_v9, %v526_v18 }
  0xfe   : > { %v986_v12 = vadd.f32 %v985_v7, %v733_v41  ;;  %1646 = vmatpush.bf16.msrb.mxu3 %v1623_v1  ;;  %1675 = vmatpush.bf16.msra.mxu0 %v1624_v2 }
  0xff   : > { %v5685_v23 = vpack.i.bf16 %v626_v21, %v621_v54 }
 0x100   : > { %1240 = vxpose.xlu2.b32.start [1/2] (short) (narrow) %v606_v4, 64  ;;  %v6501_v10 = vpack.c.bf16 %v1075_v8, %v986_v12 }
 0x104   : > { %v1084_v28 = vpop.f32.mrf.mxu2 }
 0x105   : > { %v987_v17 = vpop.f32.mrf.mxu1  ;;  %v1085_v34 = vadd.f32 %v1084_v28, %v6474_v57  ;;  %v1719_v28 = vunpack.c.l.b16 %v6501_v10 }
 0x106   : > { %v988_v18 = vadd.f32 %v987_v17, %v6498_v53 }
 0x108   : > { %1241 = vxpose.xlu2.b32.end [2/2] (short) (narrow) %v608_v16, 64 }
 0x10c   : > { %v1086_v30 = vpop.f32.mrf.mxu2 }
 0x10d   : > { %v990_v24 = vpop.f32.mrf.mxu1  ;;  %v1087_v62 = vadd.f32 %v1086_v30, %v6476_v58  ;;  %v1720_v30 = vunpack.c.h.b16 %v6501_v10 }
 0x10e   : > { %v991_v26 = vadd.f32 %v990_v24, %v743_v22 }
 0x110   : > { %5686 = vxpose.xlu1.b32.start [1/2] (short) (narrow) %v5685_v23, 64  ;;  %v6507_v27 = vpack.c.bf16 %v1080_v25, %v991_v26 }
 0x114   : > { %v1089_v9 = vpop.f32.mrf.mxu2 }
 0x115   : > { %v6509_v29 = vpop.f32.mrf.mxu1  ;;  %v1090_v47 = vadd.f32 %v1089_v9, %v6484_v6 }
 0x11d   : > { %v995_v32 = vpop.f32.mrf.mxu1 }
 0x11e   : > { %v996_v33 = vadd.f32 %v995_v32, %v6474_v57  ;;  %v6517_v57 = vpop.f32.mrf.mxu2 }
 0x120   : > { %v1472_v20 = vpack.c.bf16 %v1085_v34, %v996_v33 }
 0x122   : > { %v1919_v38 = vunpack.c.l.b16 %v1472_v20  ;;  %v1920_v40 = vunpack.c.h.b16 %v1472_v20 }
 0x125   : > { %v997_v35 = vpop.f32.mrf.mxu1 }
 0x126   : > { %v998_v36 = vadd.f32 %v997_v35, %v6476_v58  ;;  %v1094_v58 = vpop.f32.mrf.mxu2 }
 0x127   : > { %v1095_v59 = vadd.f32 %v1094_v58, %v6494_v43 }
 0x128   : > { %v1473_v37 = vpack.c.bf16 %v1087_v62, %v998_v36 }
 0x12a   : > { %v1921_v39 = vunpack.c.l.b16 %v1473_v37  ;;  %v1922_v41 = vunpack.c.h.b16 %v1473_v37 }
 0x12c   : > { %v1923_v42 = vpack.c.b16 %v1921_v39, %v1919_v38  ;;  %v1924_v44 = vpack.c.b16 %v1922_v41, %v1920_v40 }
 0x12d   : > { %v1000_v46 = vpop.f32.mrf.mxu1 }
 0x12e   : > { %v1001_v48 = vadd.f32 %v1000_v46, %v6484_v6  ;;  %1946 = vmatpush.bf16.msra.mxu1 %v1923_v42  ;;  %1975 = vmatpush.bf16.msrb.mxu2 %v1924_v44  ;;  %v1096_v56 = vpop.f32.mrf.mxu2 }
 0x12f   : > { %v1097_v61 = vadd.f32 %v1096_v56, %v778_v63 }
 0x130   : > { %v6519_v49 = vpack.c.bf16 %v1090_v47, %v1001_v48 }
 0x135   : > { %v6521_v50 = vpop.f32.mrf.mxu1 }
 0x13d   : > { %v1005_v51 = vpop.f32.mrf.mxu1 }
 0x13e   : > { %v1006_v52 = vadd.f32 %v1005_v51, %v6494_v43  ;;  %v1077_v43 = vadd.f32 %v6496_v45, %v6498_v53 }
 0x140   : > { %v1476_v1 = vpack.c.bf16 %v1095_v59, %v1006_v52  ;;  %v1469_v54 = vpack.c.bf16 %v1077_v43, %v988_v18  ;;  %v1819_v18 = vunpack.c.l.b16 %v6507_v27 }
 0x142   : > { %v2119_v4 = vunpack.c.l.b16 %v1476_v1  ;;  %v2120_v5 = vunpack.c.h.b16 %v1476_v1  ;;  %v1721_v24 = vunpack.c.l.b16 %v1469_v54  ;;  %v1722_v25 = vunpack.c.h.b16 %v1469_v54 }
 0x144   : > { %v1723_v33 = vpack.c.b16 %v1721_v24, %v1719_v28  ;;  %v1724_v34 = vpack.c.b16 %v1722_v25, %v1720_v30 }
 0x145   : > { %v1007_v60 = vpop.f32.mrf.mxu1 }
 0x146   : > { %v1008_v2 = vadd.f32 %v1007_v60, %v778_v63  ;;  %v993_v60 = vadd.f32 %v6509_v29, %v748_v14  ;;  %v1820_v29 = vunpack.c.h.b16 %v6507_v27 }
 0x148   : > { %v1477_v6 = vpack.c.bf16 %v1097_v61, %v1008_v2  ;;  %v1082_v2 = vadd.f32 %v6503_v19, %v748_v14  ;;  %v447_v19 = vld [vmem:[%s10499_s4 + $0x50] sm:$0xff] }
 0x14a   : > { %v2121_v7 = vunpack.c.l.b16 %v1477_v6  ;;  %v2122_v8 = vunpack.c.h.b16 %v1477_v6  ;;  %v445_v6 = vld [vmem:[%s10499_s4 + $0x40] sm:$0xff] }
 0x14c   : > { %v2123_v12 = vpack.c.b16 %v2121_v7, %v2119_v4  ;;  %v2124_v13 = vpack.c.b16 %v2122_v8, %v2120_v5  ;;  %v1471_v4 = vpack.c.bf16 %v1082_v2, %v993_v60 }
 0x14e   : > { %2146 = vmatpush.bf16.msrb.mxu1 %v2123_v12  ;;  %2175 = vmatpush.bf16.msra.mxu2 %v2124_v13  ;;  %v1821_v12 = vunpack.c.l.b16 %v1471_v4  ;;  %v1822_v13 = vunpack.c.h.b16 %v1471_v4  ;;  %v2019_v4 = vunpack.c.l.b16 %v6519_v49 }
 0x150   : > { %v1823_v43 = vpack.c.b16 %v1821_v12, %v1819_v18 }
 0x159   : > { %v1160_v16 = vpop.trf.xlu2 }
 0x15a   : > { %v1400_v21 = vpack.c.bf16 %v1160_v16, %v1160_v16 }
 0x15c   : > { %v1504_v63 = vunpack.c.l.b16 %v1400_v21  ;;  %v1824_v21 = vpack.c.b16 %v1822_v13, %v1820_v29 }
 0x161   : > { %v1161_v22 = vpop.trf.xlu2 }
 0x162   : > { %v1401_v23 = vpack.c.bf16 %v1161_v22, %v1161_v22 }
 0x164   : > { %v1505_v26 = vunpack.c.l.b16 %v1401_v23 }
 0x166   : > { %v1512_v32 = vpack.c.b16 %v1505_v26, %v1504_v63 }
 0x168   : > { %5449 = vmatmul.msk.bf16.vlgmr.msrb.gmra.mxu0 %vm1526_vm0, %v1512_v32  ;;  %5453 = vmatmul.msk.bf16.vlgmr.msra.gmra.mxu3 %vm1526_vm0, %v1512_v32  ;;  %v6556_v32 = vpop.f32.mrf.mxu0 }
 0x169   : > { %1746 = vmatpush.bf16.msra.mxu3 %v1723_v33  ;;  %1775 = vmatpush.bf16.msrb.mxu0 %v1724_v34  ;;  %v1162_v45 = vpop.trf.xlu2 }
 0x16a   : > { %v1402_v53 = vpack.c.bf16 %v1162_v45, %v1162_v45 }
 0x16c   : > { %v1506_v9 = vunpack.c.l.b16 %v1402_v53 }
 0x171   : > { %v1163_v17 = vpop.trf.xlu2 }
 0x172   : > { %v1403_v35 = vpack.c.bf16 %v1163_v17, %v1163_v17 }
 0x174   : > { %v1507_v62 = vunpack.c.l.b16 %v1403_v35  ;;  %v1192_v40 = vpop.trf.xlu1  ;;  %v6562_v35 = vpop.f32.mrf.mxu0 }
 0x175   : > { %v1408_v61 = vpack.c.bf16 %v1192_v40, %v1192_v40 }
 0x176   : > { %v1513_v20 = vpack.c.b16 %v1507_v62, %v1506_v9 }
 0x177   : > { %v1605_v5 = vunpack.c.l.b16 %v1408_v61 }
 0x178   : > { %5450 = vmatmul.msk.bf16.gmra.mxu0 %vm1526_vm0, %v1513_v20  ;;  %5454 = vmatmul.msk.bf16.gmra.mxu3 %vm1526_vm0, %v1513_v20 }
 0x179   : > { %v1164_v10 = vpop.trf.xlu2 }
 0x17a   : > { %v1404_v36 = vpack.c.bf16 %v1164_v10, %v1164_v10 }
 0x17c   : > { %v1508_v38 = vunpack.c.l.b16 %v1404_v36  ;;  %v1193_v46 = vpop.trf.xlu1  ;;  %v615_v40 = vpop.f32.mrf.mxu0 }
 0x17d   : > { %v1409_v1 = vpack.c.bf16 %v1193_v46, %v1193_v46  ;;  %v1003_v46 = vadd.f32 %v6521_v50, %v6488_v11 }
 0x17f   : > { %v1606_v7 = vunpack.c.l.b16 %v1409_v1 }
 0x181   : > { %v1165_v37 = vpop.trf.xlu2  ;;  %v1613_v16 = vpack.c.b16 %v1606_v7, %v1605_v5  ;;  %v2020_v5 = vunpack.c.h.b16 %v6519_v49 }
 0x182   : > { %v1405_v39 = vpack.c.bf16 %v1165_v37, %v1165_v37 }
 0x184   : > { %v1509_v41 = vunpack.c.l.b16 %v1405_v39  ;;  %v1194_v59 = vpop.trf.xlu1  ;;  %v1224_v17 = vpop.trf.xlu0 }
 0x185   : > { %v1410_v54 = vpack.c.bf16 %v1194_v59, %v1194_v59 }
 0x186   : > { %v1514_v42 = vpack.c.b16 %v1509_v41, %v1508_v38 }
 0x187   : > { %v1607_v23 = vunpack.c.l.b16 %v1410_v54 }
 0x188   : > { %5451 = vmatmul.msk.bf16.gmra.mxu0 %vm1526_vm0, %v1514_v42  ;;  %5455 = vmatmul.msk.bf16.gmra.mxu3 %vm1526_vm0, %v1514_v42 }
 0x189   : > { %v1166_v44 = vpop.trf.xlu2 }
 0x18a   : > { %v1406_v47 = vpack.c.bf16 %v1166_v44, %v1166_v44 }
 0x18c   : > { %v1510_v58 = vunpack.c.l.b16 %v1406_v47  ;;  %v1195_v8 = vpop.trf.xlu1  ;;  %v1225_v37 = vpop.trf.xlu0  ;;  %v1416_v47 = vpack.c.bf16 %v1224_v17, %v1224_v17 }
 0x18d   : > { %v1411_v22 = vpack.c.bf16 %v1195_v8, %v1195_v8 }
 0x18e   : > { %v1705_v59 = vunpack.c.l.b16 %v1416_v47 }
 0x18f   : > { %v1608_v27 = vunpack.c.l.b16 %v1411_v22 }
 0x191   : > { %v1167_v48 = vpop.trf.xlu2  ;;  %v1614_v24 = vpack.c.b16 %v1608_v27, %v1607_v23 }
 0x192   : > { %v1407_v51 = vpack.c.bf16 %v1167_v48, %v1167_v48  ;;  %v1417_v48 = vpack.c.bf16 %v1225_v37, %v1225_v37 }
 0x194   : > { %v1511_v52 = vunpack.c.l.b16 %v1407_v51  ;;  %v1196_v14 = vpop.trf.xlu1  ;;  %v1226_v44 = vpop.trf.xlu0  ;;  %v1092_v51 = vadd.f32 %v6517_v57, %v6488_v11  ;;  %v1706_v60 = vunpack.c.l.b16 %v1417_v48 }
 0x195   : > { %v1412_v28 = vpack.c.bf16 %v1196_v14, %v1196_v14  ;;  %v1418_v13 = vpack.c.bf16 %v1226_v44, %v1226_v44 }
 0x196   : > { %v1515_v56 = vpack.c.b16 %v1511_v52, %v1510_v58  ;;  %v617_v58 = vpop.f32.mrf.mxu0  ;;  %v1475_v52 = vpack.c.bf16 %v1092_v51, %v1003_v46 }
 0x197   : > { %v1609_v34 = vunpack.c.l.b16 %v1412_v28  ;;  %v1707_v49 = vunpack.c.l.b16 %v1418_v13 }
 0x198   : > { %5452 = vmatmul.msk.bf16.gmra.mxu0 %vm1526_vm0, %v1515_v56  ;;  %5456 = vmatmul.msk.bf16.gmra.mxu3 %vm1526_vm0, %v1515_v56  ;;  %v2021_v1 = vunpack.c.l.b16 %v1475_v52  ;;  %v2022_v2 = vunpack.c.h.b16 %v1475_v52 }
 0x199   : > { %v6550_v63 = vpop.trf.xlu2 }
 0x19a   : > { %v2023_v7 = vpack.c.b16 %v2021_v1, %v2019_v4  ;;  %v2024_v8 = vpack.c.b16 %v2022_v2, %v2020_v5 }
 0x19c   : > { %v1197_v25 = vpop.trf.xlu1  ;;  %v1227_v61 = vpop.trf.xlu0 }
 0x19d   : > { %v1413_v30 = vpack.c.bf16 %v1197_v25, %v1197_v25 }
 0x19f   : > { %v1610_v45 = vunpack.c.l.b16 %v1413_v30 }
 0x1a1   : > { %495 = vperm.xlu2 %5640, %v445_v6   ;;  %v6552_v26 = vpop.trf.xlu2  ;;  %v1615_v9 = vpack.c.b16 %v1610_v45, %v1609_v34  ;;  %v1713_v6 = vpack.c.b16 %v1706_v60, %v1705_v59 }
 0x1a2   : > { %v1425_v60 = vpack.c.bf16 %v6552_v26, %v6552_v26 }
 0x1a4   : > { %v1198_v33 = vpop.trf.xlu1  ;;  %v1228_v12 = vpop.trf.xlu0  ;;  %v1806_v1 = vunpack.c.l.b16 %v1425_v60 }
 0x1a5   : > { %v1414_v10 = vpack.c.bf16 %v1198_v33, %v1198_v33  ;;  %v1420_v27 = vpack.c.bf16 %v1228_v12, %v1228_v12 }
 0x1a7   : > { %v1611_v38 = vunpack.c.l.b16 %v1414_v10  ;;  %v1709_v30 = vunpack.c.l.b16 %v1420_v27 }
 0x1a8   : > { %5457 = vmatmul.msk.bf16.vlgmr.msrb.gmra.mxu3 %vm1526_vm0, %v1613_v16  ;;  %5461 = vmatmul.msk.bf16.vlgmr.msra.gmra.mxu0 %vm1526_vm0, %v1613_v16  ;;  %v1419_v16 = vpack.c.bf16 %v1227_v61, %v1227_v61 }
 0x1a9   : > { %1846 = vmatpush.bf16.msrb.mxu3 %v1823_v43  ;;  %1875 = vmatpush.bf16.msra.mxu0 %v1824_v21  ;;  %v6558_v53 = vpop.trf.xlu2 }
 0x1aa   : > { %505 = vperm.xlu2 %5640, %v447_v19   ;;  %v1708_v29 = vunpack.c.l.b16 %v1419_v16 }
 0x1ac   : > { %v1199_v62 = vpop.trf.xlu1  ;;  %v1714_v19 = vpack.c.b16 %v1708_v29, %v1707_v49  ;;  %v1229_v54 = vpop.trf.xlu0  ;;  %v5571_v29 = vld [vmem:[%s10498_s3 + $0x50] sm:$0xff] }
 0x1ad   : > { %v1415_v36 = vpack.c.bf16 %v1199_v62, %v1199_v62 }
 0x1af   : > { %v1612_v39 = vunpack.c.l.b16 %v1415_v36 }
 0x1b1   : > { %v6564_v20 = vpop.trf.xlu2  ;;  %v1616_v41 = vpack.c.b16 %v1612_v39, %v1611_v38  ;;  %v618_v38 = vadd.f32 %v617_v58, %v6480_v0 }
 0x1b4   : > { %v1230_v28 = vpop.trf.xlu0 }
 0x1b5   : > { %v1422_v44 = vpack.c.bf16 %v1230_v28, %v1230_v28  ;;  %v5572_v28 = vld [vmem:[%s10498_s3 + $0x58] sm:$0xff] }
 0x1b7   : > { %v1711_v48 = vunpack.c.l.b16 %v1422_v44 }
 0x1b8   : > { %5458 = vmatmul.msk.bf16.gmra.mxu3 %vm1526_vm0, %v1614_v24  ;;  %5462 = vmatmul.msk.bf16.gmra.mxu0 %vm1526_vm0, %v1614_v24  ;;  %v1421_v24 = vpack.c.bf16 %v1229_v54, %v1229_v54 }
 0x1b9   : > { %v6566_v42 = vpop.trf.xlu2 }
 0x1ba   : > { %v1710_v33 = vunpack.c.l.b16 %v1421_v24 }
 0x1bc   : > { %v1715_v17 = vpack.c.b16 %v1710_v33, %v1709_v30  ;;  %v1231_v37 = vpop.trf.xlu0 }
 0x1c1   : > { %v6574_v56 = vpop.trf.xlu2 }
 0x1c8   : > { %5459 = vmatmul.msk.bf16.gmra.mxu3 %vm1526_vm0, %v1615_v9  ;;  %5463 = vmatmul.msk.bf16.gmra.mxu0 %vm1526_vm0, %v1615_v9 }
 0x1c9   : > { %v6582_v11 = vpop.trf.xlu2 }
 0x1d1   : > { %v6588_v43 = vpop.trf.xlu2 }
 0x1d2   : > { %v1431_v30 = vpack.c.bf16 %v6588_v43, %v6588_v43 }
 0x1d8   : > { %5460 = vmatmul.msk.bf16.gmra.mxu3 %vm1526_vm0, %v1616_v41  ;;  %5464 = vmatmul.msk.bf16.gmra.mxu0 %vm1526_vm0, %v1616_v41  ;;  %v5568_v41 = vld [vmem:[%s10498_s3 + $0x38] sm:$0xff] }
 0x1d9   : > { %1098 = vmatmul.bf16.gmra.mxu2 %v5568_v41  ;;  %1009 = vmatmul.bf16.gmra.mxu1 %v5568_v41 }
 0x1e5   : > { %v6578_v50 = vpop.f32.mrf.mxu0 }
 0x1e8   : > { %5465 = vmatmul.msk.bf16.vlgmr.msra.gmra.mxu3 %vm1526_vm0, %v1713_v6  ;;  %5469 = vmatmul.msk.bf16.vlgmr.msrb.gmra.mxu0 %vm1526_vm0, %v1713_v6 }
 0x1e9   : > { %2046 = vmatpush.bf16.msra.mxu3 %v2023_v7  ;;  %2075 = vmatpush.bf16.msrb.mxu0 %v2024_v8  ;;  %v1426_v7 = vpack.c.bf16 %v6558_v53, %v6558_v53  ;;  %v1427_v8 = vpack.c.bf16 %v6564_v20, %v6564_v20  ;;  %v1428_v20 = vpack.c.bf16 %v6566_v42, %v6566_v42 }
 0x1eb   : > { %v6584_v57 = vpop.f32.mrf.mxu3  ;;  %v1807_v12 = vunpack.c.l.b16 %v1426_v7  ;;  %v1808_v13 = vunpack.c.l.b16 %v1427_v8  ;;  %v1809_v54 = vunpack.c.l.b16 %v1428_v20  ;;  %v452_v7 = vld [vmem:[%s10499_s4 + $0x78] sm:$0xff] }
 0x1ec   : > { %v2297_v42 = vmax.f32 %v6578_v50, %v6584_v57 }
 0x1ed   : > { %v6586_v18 = vpop.f32.mrf.mxu0  ;;  %v1814_v49 = vpack.c.b16 %v1808_v13, %v1807_v12 }
 0x1f3   : > { %v6590_v21 = vpop.f32.mrf.mxu3 }
 0x1f5   : > { %v6592_v14 = vpop.f32.mrf.mxu0 }
 0x1f8   : > { %5466 = vmatmul.msk.bf16.gmra.mxu3 %vm1526_vm0, %v1714_v19  ;;  %5470 = vmatmul.msk.bf16.gmra.mxu0 %vm1526_vm0, %v1714_v19  ;;  %v1429_v19 = vpack.c.bf16 %v6574_v56, %v6574_v56  ;;  %v1430_v56 = vpack.c.bf16 %v6582_v11, %v6582_v11  ;;  %v5574_v11 = vld [vmem:[%s10498_s3 + $0x68] sm:$0xff] }
 0x1fa   : > { %v1811_v33 = vunpack.c.l.b16 %v1430_v56 }
 0x1fb   : > { %v6596_v22 = vpop.f32.mrf.mxu3  ;;  %v496_v23 = vpop.permute.xlu2 %495 }
 0x1fc   : > { %v611_v9 = vadd.f32 %v6556_v32, %v496_v23  ;;  %v1423_v32 = vpack.c.bf16 %v1231_v37, %v1231_v37  ;;  %v2303_v53 = vmax.f32 %v6592_v14, %v6596_v22  ;;  %v1810_v23 = vunpack.c.l.b16 %v1429_v19 }
 0x1fd   : > { %v6598_v25 = vpop.f32.mrf.mxu0 }
 0x1fe   : > { %v1712_v51 = vunpack.c.l.b16 %v1423_v32  ;;  %v1815_v24 = vpack.c.b16 %v1810_v23, %v1809_v54 }
 0x200   : > { %v1716_v58 = vpack.c.b16 %v1712_v51, %v1711_v48 }
 0x203   : > { %v6600_v34 = vpop.f32.mrf.mxu3 }
 0x204   : > { %v506_v45 = vpop.permute.xlu2 %505  ;;  %v2306_v27 = vmax.f32 %v6598_v25, %v6600_v34 }
 0x205   : > { %v616_v62 = vadd.f32 %v615_v40, %v506_v45  ;;  %v6603_v10 = vpop.f32.mrf.mxu0  ;;  %v613_v40 = vadd.f32 %v6562_v35, %v6472_v55  ;;  %v5569_v55 = vld [vmem:[%s10498_s3 + $0x40] sm:$0xff]  ;;  %v1424_v35 = vpack.c.bf16 %v6550_v63, %v6550_v63  ;;  %v5570_v63 = vld [vmem:[%s10498_s3 + $0x48] sm:$0xff]  ;;  %v1812_v45 = vunpack.c.l.b16 %v1431_v30 }
 0x206   : > { %1103 = vmatmul.bf16.gmra.mxu2 %v5569_v55  ;;  %1014 = vmatmul.bf16.gmra.mxu1 %v5569_v55 }
 0x207   : > { %v5641_v36 = vpack.i.bf16 %v616_v62, %v611_v9  ;;  %v5643_v46 = vpack.i.bf16 %v618_v38, %v613_v40  ;;  %v1805_v61 = vunpack.c.l.b16 %v1424_v35  ;;  %v1816_v9 = vpack.c.b16 %v1812_v45, %v1811_v33  ;;  %v5573_v62 = vld [vmem:[%s10498_s3 + $0x60] sm:$0xff]  ;;  %v5575_v38 = vld [vmem:[%s10498_s3 + $0x70] sm:$0xff]  ;;  %v5576_v40 = vld [vmem:[%s10498_s3 + $0x78] sm:$0xff] }
 0x208   : > { %5467 = vmatmul.msk.bf16.gmra.mxu3 %vm1526_vm0, %v1715_v17  ;;  %5471 = vmatmul.msk.bf16.gmra.mxu0 %vm1526_vm0, %v1715_v17  ;;  %v2300_v17 = vmax.f32 %v6586_v18, %v6590_v21 }
 0x209   : > { %5642 = vxpose.xlu0.b32.start [1/2] (short) (narrow) %v5641_v36, 64  ;;  %v1813_v5 = vpack.c.b16 %v1806_v1, %v1805_v61 }
 0x20b   : > { %v6608_v39 = vpop.f32.mrf.mxu3 }
 0x20c   : > { %v2309_v26 = vmax.f32 %v6603_v10, %v6608_v39 }
 0x20d   : > { %v6615_v47 = vpop.f32.mrf.mxu0 }
 0x211   : > { %5644 = vxpose.xlu0.b32.end [2/2] (short) (narrow) %v5643_v46, 64 }
 0x213   : > { %v6617_v0 = vpop.f32.mrf.mxu3 }
 0x214   : > { %v2312_v16 = vmax.f32 %v6615_v47, %v6617_v0 }
 0x215   : > { %v6621_v52 = vpop.f32.mrf.mxu0 }
 0x216   : > { %1108 = vmatmul.bf16.gmra.mxu2 %v5570_v63  ;;  %1019 = vmatmul.bf16.gmra.mxu1 %v5570_v63 }
 0x218   : > { %5468 = vmatmul.msk.bf16.gmra.mxu3 %vm1526_vm0, %v1716_v58  ;;  %5472 = vmatmul.msk.bf16.gmra.mxu0 %vm1526_vm0, %v1716_v58 }
 0x21b   : > { %v6623_v59 = vpop.f32.mrf.mxu3 }
 0x21d   : > { %v6632_v2 = vpop.f32.mrf.mxu0 }
 0x223   : > { %v6634_v6 = vpop.f32.mrf.mxu3 }
 0x224   : > { %v2318_v4 = vmax.f32 %v6632_v2, %v6634_v6 }
 0x225   : > { %v6685_v43 = vpop.f32.mrf.mxu0 }
 0x226   : > { %2319 = vmax.xlane.f32.xlu2 %v2318_v4  ;;  %1113 = vmatmul.bf16.gmra.mxu2 %v5571_v29 }
 0x227   : > { %1024 = vmatmul.bf16.gmra.mxu1 %v5571_v29 }
 0x228   : > { %5473 = vmatmul.msk.bf16.vlgmr.msrb.gmra.mxu3 %vm1526_vm0, %v1813_v5  ;;  %5477 = vmatmul.msk.bf16.vlgmr.msra.gmra.mxu0 %vm1526_vm0, %v1813_v5 }
 0x22b   : > { %v6687_v36 = vpop.f32.mrf.mxu3 }
 0x22d   : > { %v6689_v37 = vpop.f32.mrf.mxu0 }
 0x22e   : > { %2310 = vmax.xlane.f32.xlu2 %v2309_v26  ;;  %10800 = vst [vmem:[#allocation5_spill] sm:$0xff] %v6689_v37 }
 0x233   : > { %v6694_v41 = vpop.f32.mrf.mxu3 }
 0x234   : > { %10801 = vst [vmem:[#allocation6_spill] sm:$0xff] %v6694_v41 }
 0x235   : > { %v6696_v44 = vpop.f32.mrf.mxu0 }
 0x236   : > { %2313 = vmax.xlane.f32.xlu2 %v2312_v16  ;;  %1118 = vmatmul.bf16.gmra.mxu2 %v5572_v28  ;;  %10802 = vst [vmem:[#allocation7_spill] sm:$0xff] %v6696_v44 }
 0x237   : > { %1029 = vmatmul.bf16.gmra.mxu1 %v5572_v28 }
 0x238   : > { %5474 = vmatmul.msk.bf16.gmra.mxu3 %vm1526_vm0, %v1814_v49  ;;  %5478 = vmatmul.msk.bf16.gmra.mxu0 %vm1526_vm0, %v1814_v49 }
 0x23b   : > { %v6698_v32 = vpop.f32.mrf.mxu3 }
 0x23c   : > { %10803 = vst [vmem:[#allocation8_spill] sm:$0xff] %v6698_v32 }
 0x23d   : > { %v6703_v46 = vpop.f32.mrf.mxu0 }
 0x23e   : > { %2304 = vmax.xlane.f32.xlu2 %v2303_v53 }
 0x243   : > { %v6709_v58 = vpop.f32.mrf.mxu3 }
 0x245   : > { %v6715_v60 = vpop.f32.mrf.mxu0 }
 0x246   : > { %2307 = vmax.xlane.f32.xlu2 %v2306_v27  ;;  %1123 = vmatmul.bf16.gmra.mxu2 %v5573_v62  ;;  %10804 = vst [vmem:[#allocation9_spill] sm:$0xff] %v6715_v60 }
 0x247   : > { %1034 = vmatmul.bf16.gmra.mxu1 %v5573_v62 }
 0x248   : > { %5475 = vmatmul.msk.bf16.gmra.mxu3 %vm1526_vm0, %v1815_v24  ;;  %5479 = vmatmul.msk.bf16.gmra.mxu0 %vm1526_vm0, %v1815_v24 }
 0x24b   : > { %v6717_v61 = vpop.f32.mrf.mxu3 }
 0x24c   : > { %10805 = vst [vmem:[#allocation10_spill] sm:$0xff] %v6717_v61 }
 0x24d   : > { %v6723_v5 = vpop.f32.mrf.mxu0 }
 0x24e   : > { %2298 = vmax.xlane.f32.xlu2 %v2297_v42 }
 0x253   : > { %v6725_v63 = vpop.f32.mrf.mxu3 }
 0x255   : > { %v6734_v13 = vpop.f32.mrf.mxu0 }
 0x256   : > { %2301 = vmax.xlane.f32.xlu2 %v2300_v17  ;;  %1128 = vmatmul.bf16.gmra.mxu2 %v5574_v11  ;;  %v6705_v48 = vpop.f32.mrf.mxu1  ;;  %10810 = vst [vmem:[#allocation15_spill] sm:$0xff] %v6734_v13 }
 0x257   : > { %1039 = vmatmul.bf16.gmra.mxu1 %v5574_v11 }
 0x258   : > { %5476 = vmatmul.msk.bf16.gmra.mxu3 %vm1526_vm0, %v1816_v9  ;;  %5480 = vmatmul.msk.bf16.gmra.mxu0 %vm1526_vm0, %v1816_v9 }
 0x25b   : > { %v6736_v16 = vpop.f32.mrf.mxu3 }
 0x25c   : > { %v6707_v51 = vpop.f32.mrf.mxu2  ;;  %10811 = vst [vmem:[#allocation16_spill] sm:$0xff] %v6736_v16 }
 0x25d   : > { %v6742_v56 = vpop.f32.mrf.mxu0 }
 0x25e   : > { %v6711_v55 = vpop.f32.mrf.mxu1 }
 0x263   : > { %v6744_v45 = vpop.f32.mrf.mxu3 }
 0x264   : > { %v6713_v35 = vpop.f32.mrf.mxu2 }
 0x266   : > { %1133 = vmatmul.bf16.gmra.mxu2 %v5575_v38 }
 0x267   : > { %1044 = vmatmul.bf16.gmra.mxu1 %v5575_v38 }
 0x276   : > { %1138 = vmatmul.bf16.gmra.mxu2 %v5576_v40 }
 0x277   : > { %1049 = vmatmul.bf16.gmra.mxu1 %v5576_v40 }
 0x283   : > { %v6719_v1 = vpop.f32.mrf.mxu1 }
 0x284   : > { %10806 = vst [vmem:[#allocation11_spill] sm:$0xff] %v6719_v1  ;;  %v2330_v1 = vmax.f32 %v6709_v58, %v6703_v46 }
 0x289   : > { %v6721_v4 = vpop.f32.mrf.mxu2 }
 0x28a   : > { %10807 = vst [vmem:[#allocation12_spill] sm:$0xff] %v6721_v4 }
 0x28b   : > { %v6727_v26 = vpop.f32.mrf.mxu1 }
 0x28c   : > { %10808 = vst [vmem:[#allocation13_spill] sm:$0xff] %v6727_v26 }
 0x291   : > { %v6732_v8 = vpop.f32.mrf.mxu2 }
 0x292   : > { %10809 = vst [vmem:[#allocation14_spill] sm:$0xff] %v6732_v8 }
 0x293   : > { %v6738_v53 = vpop.f32.mrf.mxu1 }
 0x294   : > { %10812 = vst [vmem:[#allocation17_spill] sm:$0xff] %v6738_v53 }
 0x299   : > { %v6740_v27 = vpop.f32.mrf.mxu2 }
 0x29a   : > { %10813 = vst [vmem:[#allocation18_spill] sm:$0xff] %v6740_v27 }
 0x29b   : > { %v6746_v9 = vpop.f32.mrf.mxu1 }
 0x29c   : > { %10814 = vst [vmem:[#allocation19_spill] sm:$0xff] %v6746_v9 }
 0x2ad   : > { %v5645_v12 = vpop.trf.xlu0 }
 0x2ae   : > { %v5649_v49 = vunpack.i.h.bf16 %v5645_v12  ;;  %v5646_v29 = vunpack.i.l.bf16 %v5645_v12 }
 0x2af   : > { %530 = vperm.xlu0 %5638, %v452_v7   ;;  %v6752_v7 = vpop.f32.mrf.mxu2 }
 0x2b0   : > { %v1440_v20 = vpack.c.bf16 %v5649_v49, %v5649_v49  ;;  %v1432_v19 = vpack.c.bf16 %v5646_v29, %v5646_v29  ;;  %10815 = vst [vmem:[#allocation20_spill] sm:$0xff] %v6752_v7  ;;  %v6754_v29 = vpop.f32.mrf.mxu0 }
 0x2b2   : > { %v2005_v28 = vunpack.c.l.b16 %v1440_v20  ;;  %v1905_v30 = vunpack.c.l.b16 %v1432_v19  ;;  %v6756_v20 = vpop.f32.mrf.mxu3  ;;  %v6758_v19 = vpop.f32.mrf.mxu1 }
 0x2b3   : > { %10816 = vst [vmem:[#allocation21_spill] sm:$0xff] %v6758_v19 }
 0x2b5   : > { %v5650_v54 = vpop.trf.xlu0 }
 0x2b6   : > { %v5654_v23 = vunpack.i.h.bf16 %v5650_v54  ;;  %v5651_v24 = vunpack.i.l.bf16 %v5650_v54 }
 0x2b8   : > { %v1441_v42 = vpack.c.bf16 %v5654_v23, %v5654_v23  ;;  %v1433_v33 = vpack.c.bf16 %v5651_v24, %v5651_v24  ;;  %v6762_v9 = vpop.f32.mrf.mxu0 }
 0x2b9   : > { %10818 = vst [vmem:[#allocation23_spill] sm:$0xff] %v6762_v9 }
 0x2ba   : > { %v2006_v17 = vunpack.c.l.b16 %v1441_v42  ;;  %v1906_v62 = vunpack.c.l.b16 %v1433_v33  ;;  %v6764_v4 = vpop.f32.mrf.mxu3 }
 0x2bb   : > { %10819 = vst [vmem:[#allocation24_spill] sm:$0xff] %v6764_v4 }
 0x2bc   : > { %v2013_v11 = vpack.c.b16 %v2006_v17, %v2005_v28  ;;  %v1913_v38 = vpack.c.b16 %v1906_v62, %v1905_v30 }
 0x2bd   : > { %v5655_v40 = vpop.trf.xlu0 }
 0x2be   : > { %5489 = vmatmul.msk.bf16.vlgmr.msra.gmra.mxu3 %vm1526_vm0, %v2013_v11  ;;  %5493 = vmatmul.msk.bf16.vlgmr.msrb.gmra.mxu0 %vm1526_vm0, %v2013_v11  ;;  %v5659_v12 = vunpack.i.h.bf16 %v5655_v40  ;;  %v5656_v49 = vunpack.i.l.bf16 %v5655_v40  ;;  %v6760_v11 = vpop.f32.mrf.mxu2 }
 0x2bf   : > { %5485 = vmatmul.msk.bf16.vlgmr.msrb.gmra.mxu2 %vm1526_vm0, %v1913_v38  ;;  %5481 = vmatmul.msk.bf16.vlgmr.msra.gmra.mxu1 %vm1526_vm0, %v1913_v38  ;;  %10817 = vst [vmem:[#allocation22_spill] sm:$0xff] %v6760_v11 }
 0x2c0   : > { %v1442_v54 = vpack.c.bf16 %v5659_v12, %v5659_v12  ;;  %v1434_v23 = vpack.c.bf16 %v5656_v49, %v5656_v49  ;;  %v6766_v12 = vpop.f32.mrf.mxu1 }
 0x2c1   : > { %10820 = vst [vmem:[#allocation25_spill] sm:$0xff] %v6766_v12 }
 0x2c2   : > { %v1907_v17 = vunpack.c.l.b16 %v1434_v23  ;;  %v2007_v62 = vunpack.c.l.b16 %v1442_v54 }
 0x2c5   : > { %v5660_v24 = vpop.trf.xlu0 }
 0x2c6   : > { %v5664_v28 = vunpack.i.h.bf16 %v5660_v24  ;;  %v5661_v42 = vunpack.i.l.bf16 %v5660_v24  ;;  %v6772_v24 = vpop.f32.mrf.mxu2 }
 0x2c7   : > { %10821 = vst [vmem:[#allocation26_spill] sm:$0xff] %v6772_v24 }
 0x2c8   : > { %v1443_v30 = vpack.c.bf16 %v5664_v28, %v5664_v28  ;;  %v1435_v33 = vpack.c.bf16 %v5661_v42, %v5661_v42 }
 0x2ca   : > { %v2008_v38 = vunpack.c.l.b16 %v1443_v30  ;;  %v1908_v7 = vunpack.c.l.b16 %v1435_v33 }
 0x2cc   : > { %v2014_v40 = vpack.c.b16 %v2008_v38, %v2007_v62  ;;  %v1914_v53 = vpack.c.b16 %v1908_v7, %v1907_v17  ;;  %v2339_v7 = vmax.f32 %v6736_v16, %v6734_v13  ;;  %v6776_v17 = vpop.f32.mrf.mxu0  ;;  %v6778_v62 = vpop.f32.mrf.mxu3 }
 0x2cd   : > { %v5665_v27 = vpop.trf.xlu0  ;;  %10822 = vst [vmem:[#allocation27_spill] sm:$0xff] %v6776_v17 }
 0x2ce   : > { %5490 = vmatmul.msk.bf16.gmra.mxu3 %vm1526_vm0, %v2014_v40  ;;  %5494 = vmatmul.msk.bf16.gmra.mxu0 %vm1526_vm0, %v2014_v40  ;;  %v5666_v49 = vunpack.i.l.bf16 %v5665_v27  ;;  %v5669_v54 = vunpack.i.h.bf16 %v5665_v27  ;;  %10823 = vst [vmem:[#allocation28_spill] sm:$0xff] %v6778_v62 }
 0x2cf   : > { %5486 = vmatmul.msk.bf16.gmra.mxu2 %vm1526_vm0, %v1914_v53  ;;  %5482 = vmatmul.msk.bf16.gmra.mxu1 %vm1526_vm0, %v1914_v53  ;;  %v6780_v53 = vpop.f32.mrf.mxu1 }
 0x2d0   : > { %v1436_v23 = vpack.c.bf16 %v5666_v49, %v5666_v49  ;;  %v1444_v28 = vpack.c.bf16 %v5669_v54, %v5669_v54  ;;  %10824 = vst [vmem:[#allocation29_spill] sm:$0xff] %v6780_v53 }
 0x2d2   : > { %v1909_v11 = vunpack.c.l.b16 %v1436_v23  ;;  %v2009_v27 = vunpack.c.l.b16 %v1444_v28 }
 0x2d5   : > { %v5670_v42 = vpop.trf.xlu0 }
 0x2d6   : > { %v5674_v30 = vunpack.i.h.bf16 %v5670_v42  ;;  %v5671_v33 = vunpack.i.l.bf16 %v5670_v42  ;;  %v6784_v42 = vpop.f32.mrf.mxu2 }
 0x2d7   : > { %10825 = vst [vmem:[#allocation30_spill] sm:$0xff] %v6784_v42 }
 0x2d8   : > { %v1445_v38 = vpack.c.bf16 %v5674_v30, %v5674_v30  ;;  %v1437_v40 = vpack.c.bf16 %v5671_v33, %v5671_v33 }
 0x2d9   : > { %2340 = vmax.xlane.f32.xlu0 %v2339_v7  ;;  %v6790_v7 = vpop.f32.mrf.mxu0 }
 0x2da   : > { %v1910_v49 = vunpack.c.l.b16 %v1437_v40  ;;  %v2010_v19 = vunpack.c.l.b16 %v1445_v38  ;;  %10826 = vst [vmem:[#allocation31_spill] sm:$0xff] %v6790_v7  ;;  %v2324_v40 = vmax.f32 %v6694_v41, %v6689_v37 }
 0x2dc   : > { %v1915_v54 = vpack.c.b16 %v1910_v49, %v1909_v11  ;;  %v2015_v24 = vpack.c.b16 %v2010_v19, %v2009_v27  ;;  %v6792_v19 = vpop.f32.mrf.mxu3  ;;  %v6794_v11 = vpop.f32.mrf.mxu1 }
 0x2dd   : > { %v5675_v12 = vpop.trf.xlu0  ;;  %10827 = vst [vmem:[#allocation32_spill] sm:$0xff] %v6792_v19 }
 0x2de   : > { %5491 = vmatmul.msk.bf16.gmra.mxu3 %vm1526_vm0, %v2015_v24  ;;  %5495 = vmatmul.msk.bf16.gmra.mxu0 %vm1526_vm0, %v2015_v24  ;;  %v5679_v23 = vunpack.i.h.bf16 %v5675_v12  ;;  %v5676_v28 = vunpack.i.l.bf16 %v5675_v12  ;;  %10828 = vst [vmem:[#allocation33_spill] sm:$0xff] %v6794_v11  ;;  %v6798_v53 = vpop.f32.mrf.mxu2 }
 0x2df   : > { %5487 = vmatmul.msk.bf16.gmra.mxu2 %vm1526_vm0, %v1915_v54  ;;  %5483 = vmatmul.msk.bf16.gmra.mxu1 %vm1526_vm0, %v1915_v54  ;;  %10829 = vst [vmem:[#allocation34_spill] sm:$0xff] %v6798_v53 }
 0x2e0   : > { %v1446_v30 = vpack.c.bf16 %v5679_v23, %v5679_v23  ;;  %v1438_v33 = vpack.c.bf16 %v5676_v28, %v5676_v28 }
 0x2e1   : > { %2331 = vmax.xlane.f32.xlu0 %v2330_v1  ;;  %v6800_v26 = vpop.f32.mrf.mxu0 }
 0x2e2   : > { %v1911_v54 = vunpack.c.l.b16 %v1438_v33  ;;  %v2011_v12 = vunpack.c.l.b16 %v1446_v30  ;;  %10830 = vst [vmem:[#allocation35_spill] sm:$0xff] %v6800_v26  ;;  %v2351_v30 = vmax.f32 %v6778_v62, %v6776_v17 }
 0x2e4   : > { %v6802_v11 = vpop.f32.mrf.mxu3  ;;  %v6804_v28 = vpop.f32.mrf.mxu1 }
 0x2e5   : > { %v5680_v38 = vpop.trf.xlu0  ;;  %10831 = vst [vmem:[#allocation36_spill] sm:$0xff] %v6802_v11 }
 0x2e6   : > { %v5684_v24 = vunpack.i.h.bf16 %v5680_v38  ;;  %v5681_v27 = vunpack.i.l.bf16 %v5680_v38  ;;  %10832 = vst [vmem:[#allocation37_spill] sm:$0xff] %v6804_v28  ;;  %v2357_v38 = vmax.f32 %v6802_v11, %v6800_v26 }
 0x2e8   : > { %v1447_v49 = vpack.c.bf16 %v5684_v24, %v5684_v24  ;;  %v1439_v42 = vpack.c.bf16 %v5681_v27, %v5681_v27 }
 0x2e9   : > { %2325 = vmax.xlane.f32.xlu0 %v2324_v40 }
 0x2ea   : > { %v1912_v1 = vunpack.c.l.b16 %v1439_v42  ;;  %v2012_v8 = vunpack.c.l.b16 %v1447_v49  ;;  %v6812_v42 = vpop.f32.mrf.mxu2 }
 0x2eb   : > { %10833 = vst [vmem:[#allocation38_spill] sm:$0xff] %v6812_v42 }
 0x2ec   : > { %v1916_v23 = vpack.c.b16 %v1912_v1, %v1911_v54  ;;  %v2016_v13 = vpack.c.b16 %v2012_v8, %v2011_v12  ;;  %v6816_v33 = vpop.f32.mrf.mxu1 }
 0x2ed   : > { %10834 = vst [vmem:[#allocation39_spill] sm:$0xff] %v6816_v33 }
 0x2ee   : > { %5492 = vmatmul.msk.bf16.gmra.mxu3 %vm1526_vm0, %v2016_v13  ;;  %5496 = vmatmul.msk.bf16.gmra.mxu0 %vm1526_vm0, %v2016_v13 }
 0x2ef   : > { %5488 = vmatmul.msk.bf16.gmra.mxu2 %vm1526_vm0, %v1916_v23  ;;  %5484 = vmatmul.msk.bf16.gmra.mxu1 %vm1526_vm0, %v1916_v23  ;;  %v623_v23 = vadd.f32 %v6482_v3, %v6492_v31  ;;  %v2336_v3 = vmax.f32 %v6725_v63, %v6723_v5 }
 0x2f1   : > { %2358 = vmax.xlane.f32.xlu0 %v2357_v38 }
 0x2f2   : > { %v6818_v8 = vpop.f32.mrf.mxu2 }
 0x2f3   : > { %10835 = vst [vmem:[#allocation40_spill] sm:$0xff] %v6818_v8 }
 0x2f4   : > { %v6820_v40 = vpop.f32.mrf.mxu1 }
 0x2f5   : > { %10836 = vst [vmem:[#allocation41_spill] sm:$0xff] %v6820_v40 }
 0x2f9   : > { %2352 = vmax.xlane.f32.xlu0 %v2351_v30  ;;  %v2333_v30 = vmax.f32 %v6717_v61, %v6715_v60 }
 0x2fa   : > { %v6822_v24 = vpop.f32.mrf.mxu2 }
 0x2fb   : > { %10837 = vst [vmem:[#allocation42_spill] sm:$0xff] %v6822_v24  ;;  %2334 = vmax.xlane.f32.xlu2 %v2333_v30 }
 0x2fc   : > { %v6824_v13 = vpop.f32.mrf.mxu1 }
 0x2fd   : > { %10838 = vst [vmem:[#allocation43_spill] sm:$0xff] %v6824_v13 }
 0x302   : > { %v6826_v27 = vpop.f32.mrf.mxu2 }
 0x303   : > { %10839 = vst [vmem:[#allocation44_spill] sm:$0xff] %v6826_v27 }
 0x304   : > { %v6828_v49 = vpop.f32.mrf.mxu1 }
 0x305   : > { %10840 = vst [vmem:[#allocation45_spill] sm:$0xff] %v6828_v49 }
 0x30a   : > { %v6830_v54 = vpop.f32.mrf.mxu2 }
 0x30b   : > { %10841 = vst [vmem:[#allocation46_spill] sm:$0xff] %v6830_v54  ;;  %v2342_v54 = vmax.f32 %v6744_v45, %v6742_v56 }
 0x30c   : > { %v6832_v12 = vpop.f32.mrf.mxu1 }
 0x30d   : > { %10842 = vst [vmem:[#allocation47_spill] sm:$0xff] %v6832_v12  ;;  %2343 = vmax.xlane.f32.xlu2 %v2342_v54  ;;  %v2321_v54 = vmax.f32 %v6687_v36, %v6685_v43 }
 0x312   : > { %v6839_v28 = vpop.f32.mrf.mxu2 }
 0x313   : > { %10843 = vst [vmem:[#allocation48_spill] sm:$0xff] %v6839_v28 }
 0x314   : > { %v6841_v8 = vpop.f32.mrf.mxu1 }
 0x315   : > { %10844 = vst [vmem:[#allocation49_spill] sm:$0xff] %v6841_v8  ;;  %2337 = vmax.xlane.f32.xlu2 %v2336_v3 }
 0x31a   : > { %v6845_v49 = vpop.f32.mrf.mxu2 }
 0x31b   : > { %10845 = vst [vmem:[#allocation50_spill] sm:$0xff] %v6845_v49  ;;  %v6877_v49 = vpop.f32.mrf.mxu0 }
 0x31c   : > { %v6847_v12 = vpop.f32.mrf.mxu1  ;;  %10858 = vst [vmem:[#allocation63_spill] sm:$0xff] %v6877_v49 }
 0x31d   : > { %10846 = vst [vmem:[#allocation51_spill] sm:$0xff] %v6847_v12  ;;  %v6873_v12 = vpop.f32.mrf.mxu3 }
 0x31e   : > { %10856 = vst [vmem:[#allocation61_spill] sm:$0xff] %v6873_v12 }
 0x321   : > { %v531_v1 = vpop.permute.xlu0 %530 }
 0x322   : > { %v628_v38 = vadd.f32 %v6490_v15, %v531_v1  ;;  %v6851_v15 = vpop.f32.mrf.mxu2 }
 0x323   : > { %10847 = vst [vmem:[#allocation52_spill] sm:$0xff] %v6851_v15  ;;  %v6885_v40 = vpop.f32.mrf.mxu0 }
 0x324   : > { %v5687_v42 = vpack.i.bf16 %v628_v38, %v623_v23  ;;  %10862 = vst [vmem:[#allocation67_spill] sm:$0xff] %v6885_v40 }
 0x325   : > { %v6883_v24 = vpop.f32.mrf.mxu3 }
 0x326   : > { %5688 = vxpose.xlu1.b32.end [2/2] (short) (narrow) %v5687_v42, 64  ;;  %v2327_v42 = vmax.f32 %v6698_v32, %v6696_v44  ;;  %10861 = vst [vmem:[#allocation66_spill] sm:$0xff] %v6883_v24  ;;  %v2363_v16 = vmax.f32 %v6883_v24, %v6885_v40 }
 0x328   : > { %2328 = vmax.xlane.f32.xlu2 %v2327_v42 }
 0x32b   : > { %v6893_v62 = vpop.f32.mrf.mxu0 }
 0x32d   : > { %v6891_v17 = vpop.f32.mrf.mxu3 }
 0x330   : > { %2322 = vmax.xlane.f32.xlu2 %v2321_v54  ;;  %v2320_v54 = vpop.xlane.xlu2 %2319 }
 0x331   : > { %v2503_v32 = vsub.f32 %v6632_v2, %v2320_v54  ;;  %v2504_v41 = vsub.f32 %v6634_v6, %v2320_v54  ;;  %v2348_v54 = vmax.f32 %v6764_v4, %v6762_v9 }
 0x335   : > { %v6903_v60 = vpop.f32.mrf.mxu3 }
 0x336   : > { %10867 = vst [vmem:[#allocation72_spill] sm:$0xff] %v6903_v60 }
 0x338   : > { %v2311_v53 = vpop.xlane.xlu2 %2310 }
 0x339   : > { %v2497_v2 = vsub.f32 %v6603_v10, %v2311_v53  ;;  %v2498_v6 = vsub.f32 %v6608_v39, %v2311_v53 }
 0x33c   : > { %v6853_v31 = vpop.f32.mrf.mxu1 }
 0x33d   : > { %10848 = vst [vmem:[#allocation53_spill] sm:$0xff] %v6853_v31 }
 0x340   : > { %v2314_v37 = vpop.xlane.xlu2 %2313 }
 0x341   : > { %v2499_v39 = vsub.f32 %v6615_v47, %v2314_v37 }
 0x342   : > { %v6857_v1 = vpop.f32.mrf.mxu2 }
 0x343   : > { %10849 = vst [vmem:[#allocation54_spill] sm:$0xff] %v6857_v1  ;;  %v6911_v1 = vpop.f32.mrf.mxu0 }
 0x344   : > { %v6859_v23 = vpop.f32.mrf.mxu1  ;;  %10869 = vst [vmem:[#allocation74_spill] sm:$0xff] %v6911_v1  ;;  %v2369_v53 = vmax.f32 %v6903_v60, %v6911_v1 }
 0x345   : > { %10850 = vst [vmem:[#allocation55_spill] sm:$0xff] %v6859_v23 }
 0x348   : > { %v2305_v40 = vpop.xlane.xlu2 %2304 }
 0x34a   : > { %v6863_v38 = vpop.f32.mrf.mxu2 }
 0x34b   : > { %10851 = vst [vmem:[#allocation56_spill] sm:$0xff] %v6863_v38 }
 0x34c   : > { %v6865_v30 = vpop.f32.mrf.mxu1 }
 0x34d   : > { %10852 = vst [vmem:[#allocation57_spill] sm:$0xff] %v6865_v30 }
 0x352   : > { %v6867_v3 = vpop.f32.mrf.mxu2 }
 0x353   : > { %10853 = vst [vmem:[#allocation58_spill] sm:$0xff] %v6867_v3 }
 0x354   : > { %v6869_v28 = vpop.f32.mrf.mxu1 }
 0x355   : > { %10854 = vst [vmem:[#allocation59_spill] sm:$0xff] %v6869_v28 }
 0x35a   : > { %v6871_v15 = vpop.f32.mrf.mxu2 }
 0x35b   : > { %10855 = vst [vmem:[#allocation60_spill] sm:$0xff] %v6871_v15 }
 0x35c   : > { %v6875_v42 = vpop.f32.mrf.mxu1 }
 0x35d   : > { %10857 = vst [vmem:[#allocation62_spill] sm:$0xff] %v6875_v42 }
 0x362   : > { %v6879_v8 = vpop.f32.mrf.mxu2 }
 0x363   : > { %10859 = vst [vmem:[#allocation64_spill] sm:$0xff] %v6879_v8 }
 0x364   : > { %v6881_v33 = vpop.f32.mrf.mxu1 }
 0x365   : > { %10860 = vst [vmem:[#allocation65_spill] sm:$0xff] %v6881_v33 }
 0x36a   : > { %v6887_v27 = vpop.f32.mrf.mxu2 }
 0x36b   : > { %10863 = vst [vmem:[#allocation68_spill] sm:$0xff] %v6887_v27 }
 0x36c   : > { %v6889_v13 = vpop.f32.mrf.mxu1 }
 0x36d   : > { %10864 = vst [vmem:[#allocation69_spill] sm:$0xff] %v6889_v13 }
 0x372   : > { %v6895_v26 = vpop.f32.mrf.mxu2 }
 0x373   : > { %10865 = vst [vmem:[#allocation70_spill] sm:$0xff] %v6895_v26  ;;  %v2411_v11 = vmax.f32 %v6889_v13, %v6895_v26  ;;  %v2647_v26 = vmul.f32 1.442695, %v2504_v41  ;;  %v2366_v13 = vmax.f32 %v6891_v17, %v6893_v62  ;;  %v6921_v41 = vpop.f32.mrf.mxu0 }
 0x374   : > { %v6899_v44 = vpop.f32.mrf.mxu1 }
 0x375   : > { %2412 = vmax.xlane.f32.xlu2 %v2411_v11  ;;  %10866 = vst [vmem:[#allocation71_spill] sm:$0xff] %v6899_v44  ;;  %v2645_v11 = vmul.f32 1.442695, %v2503_v32  ;;  %v2635_v32 = vmul.f32 1.442695, %v2498_v6 }
 0x377   : > { %5729 = vpow2.f32 %v2645_v11 }
 0x378   : > { %5731 = vpow2.f32 %v2647_v26  ;;  %v2500_v26 = vsub.f32 %v6617_v0, %v2314_v37  ;;  %v2405_v0 = vmax.f32 %v6875_v42, %v6879_v8 }
 0x37a   : > { %v6905_v61 = vpop.f32.mrf.mxu2  ;;  %v2639_v11 = vmul.f32 1.442695, %v2500_v26 }
 0x37b   : > { %10868 = vst [vmem:[#allocation73_spill] sm:$0xff] %v6905_v61  ;;  %v2414_v31 = vmax.f32 %v6899_v44, %v6905_v61  ;;  %v6919_v61 = vpop.f32.mrf.mxu3  ;;  %v2633_v44 = vmul.f32 1.442695, %v2497_v2  ;;  %v6933_v2 = vpop.xlane.xlu2 %2307 }
 0x37d   : > { %2364 = vmax.xlane.f32.xlu2 %v2363_v16  ;;  %2415 = vmax.xlane.f32.xlu0 %v2414_v31  ;;  %v6923_v16 = vpop.eup %5729  ;;  %5733 = vpow2.f32 %v2633_v44 }
 0x37e   : > { %v6925_v10 = vpop.eup %5731  ;;  %5735 = vpow2.f32 %v2635_v32 }
 0x37f   : > { %v2894_v31 = vadd.f32 %v6925_v10, %v6923_v16 }
 0x383   : > { %v6935_v6 = vpop.f32.mrf.mxu3  ;;  %v6937_v44 = vpop.eup %5733 }
 0x384   : > { %10870 = vst [vmem:[#allocation75_spill] sm:$0xff] %v6935_v6  ;;  %v6939_v47 = vpop.eup %5735  ;;  %v2299_v26 = vpop.xlane.xlu2 %2298 }
 0x385   : > { %2349 = vmax.xlane.f32.xlu2 %v2348_v54  ;;  %2367 = vmax.xlane.f32.xlu0 %v2366_v13  ;;  %v2637_v13 = vmul.f32 1.442695, %v2499_v39  ;;  %10871 = vst [vmem:[#allocation76_spill] sm:$0xff] %v6937_v44  ;;  %v6941_v54 = vpop.f32.mrf.mxu0  ;;  %v2885_v37 = vadd.f32 %v6939_v47, %v6937_v44 }
 0x386   : > { %10872 = vst [vmem:[#allocation77_spill] sm:$0xff] %v6939_v47  ;;  %v2375_v1 = vmax.f32 %v6935_v6, %v6941_v54  ;;  %v2489_v47 = vsub.f32 %v6578_v50, %v2299_v26 }
 0x387   : > { %10873 = vst [vmem:[#allocation78_spill] sm:$0xff] %v6941_v54  ;;  %5737 = vpow2.f32 %v2637_v13  ;;  %v2399_v13 = vmax.f32 %v6865_v30, %v6867_v3 }
 0x388   : > { %5739 = vpow2.f32 %v2639_v11 }
 0x38c   : > { %v6961_v8 = vpop.xlane.xlu2 %2301 }
 0x38d   : > { %2370 = vmax.xlane.f32.xlu0 %v2369_v53  ;;  %2895 = vadd.xlane.f32.xlu2 %v2894_v31  ;;  %v6947_v32 = vpop.eup %5737  ;;  %v6951_v53 = vpop.f32.mrf.mxu3 }
 0x38e   : > { %v6949_v39 = vpop.eup %5739  ;;  %10874 = vst [vmem:[#allocation79_spill] sm:$0xff] %v6951_v53  ;;  %v6953_v31 = vpop.f32.mrf.mxu0 }
 0x38f   : > { %10875 = vst [vmem:[#allocation80_spill] sm:$0xff] %v6953_v31  ;;  %v2888_v11 = vadd.f32 %v6949_v39, %v6947_v32  ;;  %v2378_v60 = vmax.f32 %v6951_v53, %v6953_v31 }
 0x395   : > { %2406 = vmax.xlane.f32.xlu0 %v2405_v0  ;;  %2886 = vadd.xlane.f32.xlu2 %v2885_v37  ;;  %v2493_v0 = vsub.f32 %v6592_v14, %v2305_v40  ;;  %v2494_v37 = vsub.f32 %v6596_v22, %v2305_v40  ;;  %v6963_v42 = vpop.f32.mrf.mxu3  ;;  %v6971_v14 = vpop.xlane.xlu2 %2334  ;;  %v2402_v22 = vmax.f32 %v6869_v28, %v6871_v15 }
 0x396   : > { %v6969_v3 = vpop.f32.mrf.mxu0  ;;  %10876 = vst [vmem:[#allocation81_spill] sm:$0xff] %v6971_v14 }
 0x397   : > { %v2625_v30 = vmul.f32 1.442695, %v2493_v0 }
 0x399   : > { %5741 = vpow2.f32 %v2625_v30 }
 0x39d   : > { %2400 = vmax.xlane.f32.xlu2 %v2399_v13  ;;  %2889 = vadd.xlane.f32.xlu0 %v2888_v11  ;;  %v2627_v13 = vmul.f32 1.442695, %v2494_v37  ;;  %v6975_v40 = vpop.f32.mrf.mxu3  ;;  %v692_v11 = vld [vmem:[%s10500_s5 + $0x70] sm:$0xff]  ;;  %v2344_v30 = vpop.xlane.xlu2 %2343  ;;  %v693_v37 = vld [vmem:[%s10500_s5 + $0x78] sm:$0xff] }
 0x39e   : > { %v6980_v9 = vpop.f32.mrf.mxu0  ;;  %v2520_v28 = vsub.f32 %v6742_v56, %v2344_v30 }
 0x39f   : > { %5743 = vpow2.f32 %v2627_v13  ;;  %v6982_v0 = vpop.eup %5741 }
 0x3a0   : > { %10877 = vst [vmem:[#allocation82_spill] sm:$0xff] %v6982_v0 }
 0x3a5   : > { %2376 = vmax.xlane.f32.xlu2 %v2375_v1  ;;  %2379 = vmax.xlane.f32.xlu0 %v2378_v60  ;;  %v6984_v60 = vpop.eup %5743  ;;  %v6991_v13 = vpop.f32.mrf.mxu3 }
 0x3a6   : > { %10878 = vst [vmem:[#allocation83_spill] sm:$0xff] %v6984_v60  ;;  %v2879_v1 = vadd.f32 %v6984_v60, %v6982_v0  ;;  %v6994_v15 = vpop.f32.mrf.mxu0  ;;  %v2679_v60 = vmul.f32 1.442695, %v2520_v28  ;;  %v7001_v0 = vpop.xlane.xlu0 %2340  ;;  %v2617_v28 = vmul.f32 1.442695, %v2489_v47 }
 0x3a7   : > { %10879 = vst [vmem:[#allocation84_spill] sm:$0xff] %v6991_v13 }
 0x3a8   : > { %10880 = vst [vmem:[#allocation85_spill] sm:$0xff] %v6994_v15 }
 0x3ad   : > { %2403 = vmax.xlane.f32.xlu0 %v2402_v22  ;;  %v2519_v22 = vsub.f32 %v6744_v45, %v2344_v30  ;;  %v2490_v45 = vsub.f32 %v6584_v57, %v2299_v26 }
 0x3ae   : > { %v7005_v44 = vpop.f32.mrf.mxu0 }
 0x3af   : > { %v2677_v4 = vmul.f32 1.442695, %v2519_v22  ;;  %10882 = vst [vmem:[#allocation87_spill] sm:$0xff] %v7005_v44 }
 0x3b0   : > { %782 = vperm.xlu1 %5639, %v692_v11   ;;  %v2396_v11 = vmax.f32 %v6859_v23, %v6863_v38  ;;  %v7020_v38 = vpop.xlane.xlu0 %2331 }
 0x3b1   : > { %5745 = vpow2.f32 %v2677_v4  ;;  %v2338_v4 = vpop.xlane.xlu2 %2337 }
 0x3b2   : > { %5747 = vpow2.f32 %v2679_v60  ;;  %v2515_v60 = vsub.f32 %v6725_v63, %v2338_v4  ;;  %v2516_v57 = vsub.f32 %v6723_v5, %v2338_v4 }
 0x3b3   : > { %5749 = vpow2.f32 %v2617_v28 }
 0x3b4   : > { %v2669_v47 = vmul.f32 1.442695, %v2515_v60 }
 0x3b5   : > { %2880 = vadd.xlane.f32.xlu0 %v2879_v1  ;;  %v6999_v1 = vpop.f32.mrf.mxu3 }
 0x3b6   : > { %10881 = vst [vmem:[#allocation86_spill] sm:$0xff] %v6999_v1  ;;  %v2390_v56 = vmax.f32 %v6999_v1, %v7005_v44 }
 0x3b7   : > { %v7011_v30 = vpop.eup %5745 }
 0x3b8   : > { %787 = vperm.xlu1 %5639, %v693_v37   ;;  %v7013_v22 = vpop.eup %5747 }
 0x3b9   : > { %v2918_v26 = vadd.f32 %v7013_v22, %v7011_v30  ;;  %v7025_v63 = vpop.eup %5749 }
 0x3ba   : > { %10883 = vst [vmem:[#allocation88_spill] sm:$0xff] %v7025_v63 }
 0x3bd   : > { %2397 = vmax.xlane.f32.xlu0 %v2396_v11  ;;  %v2619_v11 = vmul.f32 1.442695, %v2490_v45  ;;  %v2671_v45 = vmul.f32 1.442695, %v2516_v57 }
 0x3bf   : > { %5751 = vpow2.f32 %v2619_v11 }
 0x3c0   : > { %5753 = vpow2.f32 %v2669_v47 }
 0x3c1   : > { %5755 = vpow2.f32 %v2671_v45 }
 0x3c2   : > { %v7007_v37 = vpop.trf.xlu1 }
 0x3c3   : > { %v5690_v50 = vunpack.i.l.bf16 %v7007_v37 }
 0x3c5   : > { %2391 = vmax.xlane.f32.xlu0 %v2390_v56  ;;  %v1448_v56 = vpack.c.bf16 %v5690_v50, %v5690_v50  ;;  %v7027_v28 = vpop.eup %5751 }
 0x3c6   : > { %10884 = vst [vmem:[#allocation89_spill] sm:$0xff] %v7027_v28  ;;  %v2873_v60 = vadd.f32 %v7027_v28, %v7025_v63  ;;  %v7037_v50 = vpop.eup %5753 }
 0x3c7   : > { %v2105_v31 = vunpack.c.l.b16 %v1448_v56 }
 0x3ca   : > { %v7022_v23 = vpop.trf.xlu1 }
 0x3cb   : > { %v5695_v44 = vunpack.i.l.bf16 %v7022_v23 }
 0x3cd   : > { %v1449_v1 = vpack.c.bf16 %v5695_v44, %v5695_v44  ;;  %2919 = vadd.xlane.f32.xlu0 %v2918_v26  ;;  %v7035_v44 = vpop.xlane.xlu0 %2325 }
 0x3ce   : > { %10885 = vst [vmem:[#allocation90_spill] sm:$0xff] %v7035_v44 }
 0x3cf   : > { %v2106_v5 = vunpack.c.l.b16 %v1449_v1  ;;  %v7039_v1 = vpop.eup %5755 }
 0x3d1   : > { %v2113_v4 = vpack.c.b16 %v2106_v5, %v2105_v31  ;;  %v2912_v31 = vadd.f32 %v7039_v1, %v7037_v50 }
 0x3d2   : > { %v7029_v11 = vpop.trf.xlu1 }
 0x3d3   : > { %5497 = vmatmul.msk.bf16.vlgmr.msrb.gmra.mxu1 %vm1526_vm0, %v2113_v4  ;;  %5501 = vmatmul.msk.bf16.vlgmr.msra.gmra.mxu2 %vm1526_vm0, %v2113_v4  ;;  %v5700_v57 = vunpack.i.l.bf16 %v7029_v11 }
 0x3d5   : > { %2874 = vadd.xlane.f32.xlu0 %v2873_v60  ;;  %v1450_v47 = vpack.c.bf16 %v5700_v57, %v5700_v57  ;;  %v7047_v5 = vpop.xlane.xlu0 %2358  ;;  %v2315_v60 = vmax.f32 %v6621_v52, %v6623_v59 }
 0x3d6   : > { %10886 = vst [vmem:[#allocation91_spill] sm:$0xff] %v7047_v5 }
 0x3d7   : > { %v2107_v4 = vunpack.c.l.b16 %v1450_v47 }
 0x3da   : > { %v7044_v26 = vpop.trf.xlu1 }
 0x3db   : > { %v5705_v56 = vunpack.i.l.bf16 %v7044_v26 }
 0x3dd   : > { %v1451_v45 = vpack.c.bf16 %v5705_v56, %v5705_v56  ;;  %2913 = vadd.xlane.f32.xlu0 %v2912_v31  ;;  %v7053_v57 = vpop.xlane.xlu0 %2352  ;;  %v2360_v31 = vmax.f32 %v6873_v12, %v6877_v49 }
 0x3de   : > { %10887 = vst [vmem:[#allocation92_spill] sm:$0xff] %v7053_v57 }
 0x3df   : > { %v2108_v28 = vunpack.c.l.b16 %v1451_v45 }
 0x3e1   : > { %v2114_v63 = vpack.c.b16 %v2108_v28, %v2107_v4 }
 0x3e2   : > { %2316 = vmax.xlane.f32.xlu1 %v2315_v60  ;;  %v5709_v53 = vpop.trf.xlu1 }
 0x3e3   : > { %5498 = vmatmul.msk.bf16.gmra.mxu1 %vm1526_vm0, %v2114_v63  ;;  %5502 = vmatmul.msk.bf16.gmra.mxu2 %vm1526_vm0, %v2114_v63  ;;  %v5713_v24 = vunpack.i.h.bf16 %v5709_v53  ;;  %v5710_v44 = vunpack.i.l.bf16 %v5709_v53  ;;  %v2354_v53 = vmax.f32 %v6792_v19, %v6790_v7 }
 0x3e5   : > { %v1460_v56 = vpack.c.bf16 %v5713_v24, %v5713_v24  ;;  %v1452_v5 = vpack.c.bf16 %v5710_v44, %v5710_v44 }
 0x3e7   : > { %v2209_v60 = vunpack.c.l.b16 %v1460_v56  ;;  %v2109_v14 = vunpack.c.l.b16 %v1452_v5 }
 0x3ea   : > { %2361 = vmax.xlane.f32.xlu1 %v2360_v31  ;;  %v5714_v47 = vpop.trf.xlu1 }
 0x3eb   : > { %v5718_v45 = vunpack.i.h.bf16 %v5714_v47  ;;  %v5715_v54 = vunpack.i.l.bf16 %v5714_v47 }
 0x3ed   : > { %v1461_v28 = vpack.c.bf16 %v5718_v45, %v5718_v45  ;;  %v1453_v4 = vpack.c.bf16 %v5715_v54, %v5715_v54 }
 0x3ef   : > { %v2210_v6 = vunpack.c.l.b16 %v1461_v28  ;;  %v2110_v13 = vunpack.c.l.b16 %v1453_v4 }
 0x3f0   : > { %v7057_v63 = vpop.xlane.xlu0 %2415 }
 0x3f1   : > { %10888 = vst [vmem:[#allocation93_spill] sm:$0xff] %v7057_v63  ;;  %v7061_v57 = vpack.c.b16 %v2210_v6, %v2209_v60  ;;  %v2115_v49 = vpack.c.b16 %v2110_v13, %v2109_v14  ;;  %v7067_v60 = vpop.xlane.xlu2 %2328 }
 0x3f2   : > { %2355 = vmax.xlane.f32.xlu1 %v2354_v53  ;;  %v5719_v31 = vpop.trf.xlu1  ;;  %10889 = vst [vmem:[#allocation94_spill] sm:$0xff] %v7067_v60 }
 0x3f3   : > { %5499 = vmatmul.msk.bf16.gmra.mxu1 %vm1526_vm0, %v2115_v49  ;;  %5503 = vmatmul.msk.bf16.gmra.mxu2 %vm1526_vm0, %v2115_v49  ;;  %v5723_v24 = vunpack.i.h.bf16 %v5719_v31  ;;  %v5720_v54 = vunpack.i.l.bf16 %v5719_v31 }
 0x3f5   : > { %v1462_v47 = vpack.c.bf16 %v5723_v24, %v5723_v24  ;;  %v1454_v45 = vpack.c.bf16 %v5720_v54, %v5720_v54 }
 0x3f7   : > { %v2211_v53 = vunpack.c.l.b16 %v1462_v47  ;;  %v2111_v14 = vunpack.c.l.b16 %v1454_v45 }
 0x3f8   : > { %v7065_v44 = vpop.xlane.xlu0 %2367 }
 0x3f9   : > { %v7077_v24 = vpop.xlane.xlu2 %2322 }
 0x3fa   : > { %v5724_v5 = vpop.trf.xlu1 }
 0x3fb   : > { %v5728_v56 = vunpack.i.h.bf16 %v5724_v5  ;;  %v5725_v28 = vunpack.i.l.bf16 %v5724_v5 }
 0x3fd   : > { %v1463_v4 = vpack.c.bf16 %v5728_v56, %v5728_v56  ;;  %v1455_v63 = vpack.c.bf16 %v5725_v28, %v5725_v28 }
 0x3ff   : > { %v2212_v6 = vunpack.c.l.b16 %v1463_v4  ;;  %v2112_v13 = vunpack.c.l.b16 %v1455_v63 }
 0x400   : > { %v7069_v12 = vpop.xlane.xlu0 %2370 }
 0x401   : > { %10890 = vst [vmem:[#allocation95_spill] sm:$0xff] %v7069_v12  ;;  %v2116_v49 = vpack.c.b16 %v2112_v13, %v2111_v14  ;;  %v7071_v7 = vpack.c.b16 %v2212_v6, %v2211_v53  ;;  %v7081_v5 = vpop.xlane.xlu2 %2412  ;;  %v5698_v53 = vunpack.i.h.bf16 %v7022_v23  ;;  %v5693_v13 = vunpack.i.h.bf16 %v7007_v37 }
 0x402   : > { %10892 = vst [vmem:[#allocation97_spill] sm:$0xff] %v7081_v5 }
 0x403   : > { %5500 = vmatmul.msk.bf16.gmra.mxu1 %vm1526_vm0, %v2116_v49  ;;  %5504 = vmatmul.msk.bf16.gmra.mxu2 %vm1526_vm0, %v2116_v49 }
 0x408   : > { %v7075_v31 = vpop.xlane.xlu0 %2406 }
 0x409   : > { %10891 = vst [vmem:[#allocation96_spill] sm:$0xff] %v7075_v31  ;;  %v7085_v63 = vpop.xlane.xlu2 %2364 }
 0x40a   : > { %10894 = vst [vmem:[#allocation99_spill] sm:$0xff] %v7085_v63  ;;  %v1456_v63 = vpack.c.bf16 %v5693_v13, %v5693_v13 }
 0x40c   : > { %v2205_v37 = vunpack.c.l.b16 %v1456_v63 }
 0x410   : > { %v7079_v54 = vpop.xlane.xlu0 %2889 }
 0x411   : > { %v7089_v28 = vpop.xlane.xlu2 %2349  ;;  %vm3145_vm10 = vweird.f32 %v7079_v54 }
 0x412   : > { %10896 = vst [vmem:[#allocation101_spill] sm:$0xff] %v7089_v28 }
 0x418   : > { %v7083_v47 = vpop.xlane.xlu0 %2379 }
 0x419   : > { %10893 = vst [vmem:[#allocation98_spill] sm:$0xff] %v7083_v47 }
 0x420   : > { %v7087_v56 = vpop.xlane.xlu0 %2403 }
 0x421   : > { %10895 = vst [vmem:[#allocation100_spill] sm:$0xff] %v7087_v56  ;;  %v1457_v56 = vpack.c.bf16 %v5698_v53, %v5698_v53 }
 0x422   : > { %v783_v45 = vpop.permute.xlu1 %782 }
 0x423   : > { %v1011_v4 = vadd.f32 %v6705_v48, %v783_v45  ;;  %v1100_v6 = vadd.f32 %v6707_v51, %v783_v45  ;;  %v2206_v51 = vunpack.c.l.b16 %v1457_v56  ;;  %v2896_v45 = vpop.xlane.xlu2 %2895 }
 0x424   : > { %5757 = vrcp.f32 %v2896_v45  ;;  %vm3175_vm2 = vweird.f32 %v2896_v45 }
 0x425   : > { %v1478_v31 = vpack.c.bf16 %v1100_v6, %v1011_v4  ;;  %v7111_v4 = vpop.f32.mrf.mxu3 }
 0x427   : > { %v2219_v28 = vunpack.c.l.b16 %v1478_v31  ;;  %v2220_v19 = vunpack.c.h.b16 %v1478_v31 }
 0x428   : > { %v7094_v14 = vpop.xlane.xlu0 %2880 }
 0x429   : > { %10897 = vst [vmem:[#allocation102_spill] sm:$0xff] %v7094_v14 }
 0x42a   : > { %v788_v49 = vpop.permute.xlu1 %787  ;;  %v5758_v31 = vpop.eup %5757 }
 0x42b   : > { %v1013_v12 = vadd.f32 %v6711_v55, %v788_v49  ;;  %v1102_v5 = vadd.f32 %v6713_v35, %v788_v49  ;;  %v2213_v55 = vpack.c.b16 %v2206_v51, %v2205_v37  ;;  %v5708_v35 = vunpack.i.h.bf16 %v7044_v26 }
 0x42c   : > { %vm3176_vm1 = vweird.f32 %v5758_v31  ;;  %v3179_v51 = vand.u32 2147483647, %v2896_v45  ;;  %v3181_v37 = vand.u32 2147483648, %v2896_v45 }
 0x42d   : > { %v1479_v47 = vpack.c.bf16 %v1102_v5, %v1013_v12  ;;  %v3171_v5 = vmul.f32 %v5758_v31, %v2896_v45  ;;  %vm3177_vm5 = vmor %vm3175_vm2, %vm3176_vm1 }
 0x42e   : > { %vm3180_vm7 = vcmp.eq.f32.partialorder %v3179_v51, 8.507059e+37 }
 0x42f   : > { %v2221_v48 = vunpack.c.l.b16 %v1479_v47  ;;  %v2222_v60 = vunpack.c.h.b16 %v1479_v47  ;;  %v3172_v63 = vsub.f32 1.0, %v3171_v5 }
 0x430   : > { %v7099_v23 = vpop.xlane.xlu0 %2397 }
 0x431   : > { %10898 = vst [vmem:[#allocation103_spill] sm:$0xff] %v7099_v23  ;;  %v2223_v14 = vpack.c.b16 %v2221_v48, %v2219_v28  ;;  %v2224_v15 = vpack.c.b16 %v2222_v60, %v2220_v19  ;;  %v5703_v19 = vunpack.i.h.bf16 %v7029_v11  ;;  %v1459_v60 = vpack.c.bf16 %v5708_v35, %v5708_v35  ;;  %v7109_v28 = vpop.f32.mrf.mxu0 }
 0x432   : > { %v3173_v26 = vmul.f32 %v5758_v31, %v3172_v63 }
 0x433   : > { %2246 = vmatpush.bf16.msrb.mxu2 %v2223_v14  ;;  %5594 = vmatpush.bf16.msrb.mxu3 %v2223_v14  ;;  %v1458_v47 = vpack.c.bf16 %v5703_v19, %v5703_v19 }
 0x434   : > { %2275 = vmatpush.bf16.msra.mxu0 %v2224_v15  ;;  %v2208_v15 = vunpack.c.l.b16 %v1459_v60  ;;  %v3174_v13 = vadd.f32 %v5758_v31, %v3173_v26 }
 0x435   : > { %v2207_v6 = vunpack.c.l.b16 %v1458_v47  ;;  %v7126_v47 = vpop.f32.mrf.mxu3 }
 0x436   : > { %5505 = vmatmul.msk.bf16.vlgmr.msrb.gmra.mxu2 %vm1526_vm0, %v2213_v55  ;;  %5507 = vmatmul.msk.bf16.vlgmr.msrb.gmra.mxu3 %vm1526_vm0, %v7061_v57  ;;  %10902 = vst [vmem:[#allocation107_spill] sm:$0xff] %v7126_v47  ;;  %v3178_v63 = vsel %vm3177_vm5, %v5758_v31, %v3174_v13 }
 0x437   : > { %5509 = vmatmul.msk.bf16.vlgmr.msra.gmra.mxu0 %vm1526_vm0, %v2213_v55  ;;  %v2214_v53 = vpack.c.b16 %v2208_v15, %v2207_v6  ;;  %v3182_v6 = vor.u32 1.1754944e-38, %v3181_v37 }
 0x438   : > { %v7106_v12 = vpop.xlane.xlu0 %2391 }
 0x439   : > { %10899 = vst [vmem:[#allocation104_spill] sm:$0xff] %v7106_v12  ;;  %v7122_v60 = vpop.f32.mrf.mxu0 }
 0x43a   : > { %10901 = vst [vmem:[#allocation106_spill] sm:$0xff] %v7122_v60 }
 0x440   : > { %v2920_v56 = vpop.xlane.xlu0 %2919 }
 0x441   : > { %5759 = vrcp.f32 %v2920_v56  ;;  %v3301_v55 = vand.u32 2147483648, %v2920_v56  ;;  %vm3295_vm3 = vweird.f32 %v2920_v56  ;;  %v3299_v19 = vand.u32 2147483647, %v2920_v56 }
 0x442   : > { %5761 = vrcp.f32 %v7079_v54 }
 0x443   : > { %v3302_v26 = vor.u32 1.1754944e-38, %v3301_v55  ;;  %vm3300_vm8 = vcmp.eq.f32.partialorder %v3299_v19, 8.507059e+37  ;;  %v7153_v55 = vpop.f32.mrf.mxu3 }
 0x446   : > { %5506 = vmatmul.msk.bf16.gmra.mxu2 %vm1526_vm0, %v2214_v53  ;;  %5508 = vmatmul.msk.bf16.gmra.mxu3 %vm1526_vm0, %v7071_v7 }
 0x447   : > { %v5760_v11 = vpop.eup %5759  ;;  %5510 = vmatmul.msk.bf16.gmra.mxu0 %vm1526_vm0, %v2214_v53  ;;  %v3183_v53 = vsel %vm3180_vm7, %v3182_v6, %v3178_v63 }
 0x448   : > { %v7118_v14 = vpop.eup %5761  ;;  %v3291_v49 = vmul.f32 %v5760_v11, %v2920_v56  ;;  %v7120_v48 = vpop.xlane.xlu0 %2874  ;;  %vm3296_vm4 = vweird.f32 %v5760_v11  ;;  %v7131_v60 = vmul.f32 %v6923_v16, %v3183_v53  ;;  %v7134_v31 = vmul.f32 %v6925_v10, %v3183_v53 }
 0x449   : > { %10900 = vst [vmem:[#allocation105_spill] sm:$0xff] %v7120_v48  ;;  %v3141_v5 = vmul.f32 %v7118_v14, %v7079_v54  ;;  %vm3297_vm6 = vmor %vm3295_vm3, %vm3296_vm4  ;;  %v7151_v16 = vpop.f32.mrf.mxu0  ;;  %vm3146_vm9 = vweird.f32 %v7118_v14 }
 0x44a   : > { %v3292_v35 = vsub.f32 1.0, %v3291_v49  ;;  %10906 = vst [vmem:[#allocation111_spill] sm:$0xff] %v7151_v16  ;;  %vm7168_vm12 = vmor %vm3145_vm10, %vm3146_vm9 }
 0x44b   : > { %v3142_v49 = vsub.f32 1.0, %v3141_v5  ;;  %v3151_v5 = vand.u32 2147483648, %v7079_v54 }
 0x44c   : > { %v3293_v15 = vmul.f32 %v5760_v11, %v3292_v35 }
 0x44d   : > { %v3143_v37 = vmul.f32 %v7118_v14, %v3142_v49 }
 0x44e   : > { %v3294_v45 = vadd.f32 %v5760_v11, %v3293_v15 }
 0x44f   : > { %v3144_v19 = vadd.f32 %v7118_v14, %v3143_v37  ;;  %v3152_v37 = vor.u32 1.1754944e-38, %v3151_v5 }
 0x450   : > { %v3298_v23 = vsel %vm3297_vm6, %v5760_v11, %v3294_v45  ;;  %v2914_v56 = vpop.xlane.xlu0 %2913  ;;  %v7128_v12 = vpop.f32.mrf.mxu1 }
 0x451   : > { %10903 = vst [vmem:[#allocation108_spill] sm:$0xff] %v7128_v12  ;;  %v3303_v48 = vsel %vm3300_vm8, %v3302_v26, %v3298_v23  ;;  %5763 = vrcp.f32 %v2914_v56  ;;  %vm3265_vm11 = vweird.f32 %v2914_v56  ;;  %v3148_v49 = vsel %vm7168_vm12, %v7118_v14, %v3144_v19  ;;  %v7186_v19 = vpop.f32.mrf.mxu0 }
 0x452   : > { %v7137_v13 = vmul.f32 %v7011_v30, %v3303_v48  ;;  %v7140_v51 = vmul.f32 %v7013_v22, %v3303_v48  ;;  %10914 = vst [vmem:[#allocation115_spill] sm:$0xff] %v7186_v19 }
 0x454   : > { %10904 = vst [vmem:[#allocation109_spill] sm:$0xff] %v7137_v13  ;;  %v7145_v11 = vadd.f32 %v7137_v13, %v7131_v60  ;;  %v7149_v23 = vadd.f32 %v7140_v51, %v7134_v31 }
 0x455   : > { %10905 = vst [vmem:[#allocation110_spill] sm:$0xff] %v7140_v51  ;;  %v2317_v10 = vpop.xlane.xlu1 %2316 }
 0x456   : > { %v2501_v30 = vsub.f32 %v6621_v52, %v2317_v10  ;;  %v2502_v22 = vsub.f32 %v6623_v59, %v2317_v10  ;;  %v7157_v48 = vpop.f32.mrf.mxu2  ;;  %v3149_v52 = vand.u32 2147483647, %v7079_v54  ;;  %v3271_v59 = vand.u32 2147483648, %v2914_v56 }
 0x457   : > { %10907 = vst [vmem:[#allocation112_spill] sm:$0xff] %v7157_v48  ;;  %v5764_v35 = vpop.eup %5763  ;;  %5511 = vmatmul.msk.bf16.gmra.mxu0 %vm1526_vm0, %v7061_v57  ;;  %v3269_v57 = vand.u32 2147483647, %v2914_v56  ;;  %v2511_v54 = vsub.f32 %v6709_v58, %v7020_v38  ;;  %v7190_v58 = vpop.f32.mrf.mxu3 }
 0x458   : > { %v3261_v63 = vmul.f32 %v5764_v35, %v2914_v56  ;;  %v2641_v15 = vmul.f32 1.442695, %v2501_v30  ;;  %v7165_v6 = vpop.f32.mrf.mxu1  ;;  %v2643_v26 = vmul.f32 1.442695, %v2502_v22  ;;  %vm3266_vm13 = vweird.f32 %v5764_v35  ;;  %10915 = vst [vmem:[#allocation116_spill] sm:$0xff] %v7190_v58 }
 0x459   : > { %10908 = vst [vmem:[#allocation113_spill] sm:$0xff] %v7165_v6  ;;  %v2512_v30 = vsub.f32 %v6703_v46, %v7020_v38  ;;  %vm3150_vm14 = vcmp.eq.f32.partialorder %v3149_v52, 8.507059e+37  ;;  %vm7180_vm15 = vmor %vm3265_vm11, %vm3266_vm13  ;;  %vm3270_vm1 = vcmp.eq.f32.partialorder %v3269_v57, 8.507059e+37  ;;  %v2661_v52 = vmul.f32 1.442695, %v2511_v54 }
 0x45a   : > { %v3262_v53 = vsub.f32 1.0, %v3261_v63  ;;  %5765 = vpow2.f32 %v2641_v15  ;;  %v3272_v63 = vor.u32 1.1754944e-38, %v3271_v59  ;;  %v3153_v14 = vsel %vm3150_vm14, %v3152_v37, %v3148_v49 }
 0x45b   : > { %5767 = vpow2.f32 %v2643_v26  ;;  %v2663_v59 = vmul.f32 1.442695, %v2512_v30  ;;  %v7199_v26 = vmul.f32 %v6947_v32, %v3153_v14  ;;  %v7204_v49 = vmul.f32 %v6949_v39, %v3153_v14  ;;  %v7230_v30 = vpop.f32.mrf.mxu0 }
 0x45c   : > { %v3263_v10 = vmul.f32 %v5764_v35, %v3262_v53  ;;  %5769 = vpow2.f32 %v2661_v52  ;;  %10923 = vst [vmem:[#allocation124_spill] sm:$0xff] %v7230_v30  ;;  %v2345_v22 = vmax.f32 %v6756_v20, %v6754_v29  ;;  %v2506_v14 = vsub.f32 %v6685_v43, %v7077_v24 }
 0x45d   : > { %5771 = vpow2.f32 %v2663_v59  ;;  %v2535_v43 = vsub.f32 %v6891_v17, %v7065_v44 }
 0x45e   : > { %v3264_v15 = vadd.f32 %v5764_v35, %v3263_v10  ;;  %v7184_v45 = vpop.f32.mrf.mxu2 }
 0x45f   : > { %10913 = vst [vmem:[#allocation114_spill] sm:$0xff] %v7184_v45 }
 0x460   : > { %v7188_v5 = vpop.eup %5765  ;;  %v3268_v46 = vsel %vm7180_vm15, %v5764_v35, %v3264_v15  ;;  %v7194_v38 = vpop.f32.mrf.mxu1 }
 0x461   : > { %10916 = vst [vmem:[#allocation117_spill] sm:$0xff] %v7194_v38  ;;  %v7196_v56 = vpop.eup %5767  ;;  %v3273_v53 = vsel %vm3270_vm1, %v3272_v63, %v3268_v46 }
 0x462   : > { %v2891_v57 = vadd.f32 %v7196_v56, %v7188_v5  ;;  %v7207_v37 = vmul.f32 %v7037_v50, %v3273_v53  ;;  %v7210_v35 = vmul.f32 %v7039_v1, %v3273_v53  ;;  %v7228_v1 = vpop.f32.mrf.mxu3  ;;  %v7234_v63 = vpop.eup %5769 }
 0x463   : > { %v7236_v15 = vpop.eup %5771 }
 0x464   : > { %10917 = vst [vmem:[#allocation118_spill] sm:$0xff] %v7207_v37  ;;  %2892 = vadd.xlane.f32.xlu1 %v2891_v57  ;;  %v7214_v10 = vadd.f32 %v7207_v37, %v7199_v26  ;;  %v7218_v32 = vadd.f32 %v7210_v35, %v7204_v49  ;;  %v2906_v52 = vadd.f32 %v7236_v15, %v7234_v63  ;;  %v2651_v57 = vmul.f32 1.442695, %v2506_v14  ;;  %v10949_v37 = vld [vmem:[#allocation75_spill] sm:$0xff] }
 0x465   : > { %10918 = vst [vmem:[#allocation119_spill] sm:$0xff] %v7210_v35  ;;  %v2709_v14 = vmul.f32 1.442695, %v2535_v43 }
 0x466   : > { %10919 = vst [vmem:[#allocation120_spill] sm:$0xff] %v7214_v10  ;;  %v7220_v54 = vpop.f32.mrf.mxu2 }
 0x467   : > { %10920 = vst [vmem:[#allocation121_spill] sm:$0xff] %v7218_v32  ;;  %5512 = vmatmul.msk.bf16.gmra.mxu0 %vm1526_vm0, %v7071_v7  ;;  %v2447_v39 = vmax.f32 %v7194_v38, %v7220_v54  ;;  %v2505_v7 = vsub.f32 %v6687_v36, %v7077_v24  ;;  %v2536_v36 = vsub.f32 %v6893_v62, %v7065_v44 }
 0x468   : > { %10921 = vst [vmem:[#allocation122_spill] sm:$0xff] %v7220_v54  ;;  %v7226_v50 = vpop.f32.mrf.mxu1  ;;  %v7252_v54 = vpop.f32.mrf.mxu0  ;;  %v2408_v38 = vmax.f32 %v6881_v33, %v6887_v27 }
 0x469   : > { %10922 = vst [vmem:[#allocation123_spill] sm:$0xff] %v7226_v50  ;;  %2448 = vmax.xlane.f32.xlu0 %v2447_v39  ;;  %v2649_v59 = vmul.f32 1.442695, %v2505_v7  ;;  %v2372_v39 = vmax.f32 %v6919_v61, %v6921_v41 }
 0x46a   : > { %10927 = vst [vmem:[#allocation128_spill] sm:$0xff] %v7252_v54 }
 0x46b   : > { %5773 = vpow2.f32 %v2649_v59 }
 0x46c   : > { %2346 = vmax.xlane.f32.xlu1 %v2345_v22  ;;  %v7250_v22 = vpop.f32.mrf.mxu3  ;;  %5775 = vpow2.f32 %v2651_v57 }
 0x46d   : > { %10926 = vst [vmem:[#allocation127_spill] sm:$0xff] %v7250_v22  ;;  %v2432_v7 = vmax.f32 %v7250_v22, %v7252_v54  ;;  %5777 = vpow2.f32 %v2709_v14 }
 0x46e   : > { %v7242_v46 = vpop.f32.mrf.mxu2 }
 0x46f   : > { %10924 = vst [vmem:[#allocation125_spill] sm:$0xff] %v7242_v46 }
 0x470   : > { %v7246_v53 = vpop.f32.mrf.mxu1  ;;  %v7320_v35 = vpop.f32.mrf.mxu0 }
 0x471   : > { %10925 = vst [vmem:[#allocation126_spill] sm:$0xff] %v7246_v53  ;;  %2907 = vadd.xlane.f32.xlu0 %v2906_v52  ;;  %v2711_v52 = vmul.f32 1.442695, %v2536_v36 }
 0x473   : > { %5779 = vpow2.f32 %v2711_v52 }
 0x474   : > { %2373 = vmax.xlane.f32.xlu1 %v2372_v39  ;;  %v7264_v39 = vpop.eup %5773 }
 0x475   : > { %10929 = vst [vmem:[#allocation130_spill] sm:$0xff] %v7264_v39  ;;  %v7268_v17 = vpop.eup %5775 }
 0x476   : > { %v7258_v24 = vpop.f32.mrf.mxu2  ;;  %10931 = vst [vmem:[#allocation132_spill] sm:$0xff] %v7268_v17  ;;  %v2897_v44 = vadd.f32 %v7268_v17, %v7264_v39  ;;  %v7274_v57 = vpop.eup %5777 }
 0x477   : > { %10928 = vst [vmem:[#allocation129_spill] sm:$0xff] %v7258_v24 }
 0x478   : > { %v7266_v59 = vpop.f32.mrf.mxu1 }
 0x479   : > { %2433 = vmax.xlane.f32.xlu0 %v2432_v7  ;;  %10930 = vst [vmem:[#allocation131_spill] sm:$0xff] %v7266_v59  ;;  %v7276_v43 = vpop.eup %5779  ;;  %v2495_v7 = vsub.f32 %v6598_v25, %v6933_v2 }
 0x47a   : > { %v2942_v52 = vadd.f32 %v7276_v43, %v7274_v57 }
 0x47b   : > { %v2629_v32 = vmul.f32 1.442695, %v2495_v7  ;;  %v10937_v7 = vld [vmem:[#allocation54_spill] sm:$0xff] }
 0x47c   : > { %2409 = vmax.xlane.f32.xlu1 %v2408_v38  ;;  %v2496_v38 = vsub.f32 %v6600_v34, %v6933_v2  ;;  %v2381_v34 = vmax.f32 %v6963_v42, %v6969_v3 }
 0x47d   : > { %5781 = vpow2.f32 %v2629_v32  ;;  %v2491_v32 = vsub.f32 %v6586_v18, %v6961_v8  ;;  %v10940_v18 = vld [vmem:[#allocation15_spill] sm:$0xff] }
 0x47e   : > { %v7270_v62 = vpop.f32.mrf.mxu2  ;;  %v2631_v10 = vmul.f32 1.442695, %v2496_v38  ;;  %v10938_v38 = vld [vmem:[#allocation53_spill] sm:$0xff] }
 0x47f   : > { %10932 = vst [vmem:[#allocation133_spill] sm:$0xff] %v7270_v62 }
 0x480   : > { %v7278_v36 = vpop.f32.mrf.mxu1  ;;  %5783 = vpow2.f32 %v2631_v10  ;;  %v2492_v10 = vsub.f32 %v6590_v21, %v6961_v8  ;;  %v2518_v21 = vsub.f32 %v10940_v18, %v7001_v0  ;;  %v2384_v8 = vmax.f32 %v6975_v40, %v6980_v9 }
 0x481   : > { %2898 = vadd.xlane.f32.xlu0 %v2897_v44  ;;  %10933 = vst [vmem:[#allocation134_spill] sm:$0xff] %v7278_v36 }
 0x483   : > { %v7298_v39 = vpop.eup %5781 }
 0x486   : > { %v7284_v14 = vpop.f32.mrf.mxu2 }
 0x487   : > { %10934 = vst [vmem:[#allocation135_spill] sm:$0xff] %v7284_v14  ;;  %v2459_v44 = vmax.f32 %v7278_v36, %v7284_v14  ;;  %v7310_v36 = vpop.xlane.xlu2 %2886 }
 0x488   : > { %v7290_v17 = vpop.f32.mrf.mxu1  ;;  %vm3130_vm4 = vweird.f32 %v7310_v36 }
 0x489   : > { %2943 = vadd.xlane.f32.xlu0 %v2942_v52  ;;  %2460 = vmax.xlane.f32.xlu1 %v2459_v44  ;;  %10935 = vst [vmem:[#allocation136_spill] sm:$0xff] %v7290_v17  ;;  %v7300_v52 = vpop.eup %5783  ;;  %v2393_v44 = vmax.f32 %v10938_v38, %v10937_v7  ;;  %v2453_v7 = vmax.f32 %v7246_v53, %v7258_v24  ;;  %v10947_v24 = vld [vmem:[#allocation10_spill] sm:$0xff] }
 0x48a   : > { %v2882_v14 = vadd.f32 %v7300_v52, %v7298_v39 }
 0x48e   : > { %v7292_v25 = vpop.f32.mrf.mxu2 }
 0x48f   : > { %10936 = vst [vmem:[#allocation137_spill] sm:$0xff] %v7292_v25  ;;  %v2462_v2 = vmax.f32 %v7290_v17, %v7292_v25  ;;  %v10939_v25 = vld [vmem:[#allocation16_spill] sm:$0xff] }
 0x490   : > { %v2517_v17 = vsub.f32 %v10939_v25, %v7001_v0  ;;  %10941 = vst [vmem:[#allocation16_spill] sm:$0xff] %v7320_v35  ;;  %v10943_v0 = vld [vmem:[#allocation85_spill] sm:$0xff] }
 0x491   : > { %2382 = vmax.xlane.f32.xlu1 %v2381_v34  ;;  %2463 = vmax.xlane.f32.xlu2 %v2462_v2  ;;  %v2621_v34 = vmul.f32 1.442695, %v2491_v32  ;;  %v2623_v2 = vmul.f32 1.442695, %v2492_v10  ;;  %v7322_v32 = vpop.xlane.xlu2 %2400 }
 0x492   : > { %v2673_v38 = vmul.f32 1.442695, %v2517_v17 }
 0x493   : > { %5785 = vpow2.f32 %v2621_v34 }
 0x494   : > { %5787 = vpow2.f32 %v2623_v2 }
 0x495   : > { %5789 = vpow2.f32 %v2673_v38  ;;  %v10948_v38 = vld [vmem:[#allocation9_spill] sm:$0xff] }
 0x499   : > { %2394 = vmax.xlane.f32.xlu2 %v2393_v44  ;;  %2883 = vadd.xlane.f32.xlu1 %v2882_v14  ;;  %v2675_v14 = vmul.f32 1.442695, %v2518_v21  ;;  %v7324_v10 = vpop.eup %5785  ;;  %v10944_v44 = vld [vmem:[#allocation84_spill] sm:$0xff]  ;;  %v2377_v21 = vpop.xlane.xlu2 %2376 }
 0x49a   : > { %v7326_v25 = vpop.eup %5787  ;;  %v2387_v34 = vmax.f32 %v10944_v44, %v10943_v0  ;;  %v2541_v51 = vsub.f32 %v10949_v37, %v2377_v21  ;;  %v2456_v37 = vmax.f32 %v7266_v59, %v7270_v62  ;;  %v7380_v62 = vpop.f32.mrf.mxu3 }
 0x49b   : > { %10942 = vst [vmem:[#allocation15_spill] sm:$0xff] %v7326_v25  ;;  %5791 = vpow2.f32 %v2675_v14  ;;  %v2876_v2 = vadd.f32 %v7326_v25, %v7324_v10  ;;  %v7332_v17 = vpop.eup %5789 }
 0x49c   : > { %v2721_v22 = vmul.f32 1.442695, %v2541_v51 }
 0x4a1   : > { %2385 = vmax.xlane.f32.xlu2 %v2384_v8  ;;  %2454 = vmax.xlane.f32.xlu1 %v2453_v7  ;;  %v7334_v7 = vpop.f32.mrf.mxu0  ;;  %v7336_v18 = vpop.eup %5791  ;;  %v10946_v8 = vld [vmem:[#allocation81_spill] sm:$0xff] }
 0x4a2   : > { %10945 = vst [vmem:[#allocation85_spill] sm:$0xff] %v7334_v7  ;;  %v2513_v53 = vsub.f32 %v10947_v24, %v10946_v8  ;;  %v2514_v14 = vsub.f32 %v10948_v38, %v10946_v8  ;;  %v2915_v13 = vadd.f32 %v7336_v18, %v7332_v17  ;;  %v2450_v8 = vmax.f32 %v7226_v50, %v7242_v46 }
 0x4a4   : > { %v2665_v33 = vmul.f32 1.442695, %v2513_v53  ;;  %v2667_v54 = vmul.f32 1.442695, %v2514_v14 }
 0x4a6   : > { %5793 = vpow2.f32 %v2665_v33  ;;  %v10955_v33 = vld [vmem:[#allocation6_spill] sm:$0xff] }
 0x4a7   : > { %5795 = vpow2.f32 %v2667_v54  ;;  %10964 = vst [vmem:[#allocation6_spill] sm:$0xff] %v7380_v62 }
 0x4a8   : > { %5797 = vpow2.f32 %v2721_v22 }
 0x4a9   : > { %2388 = vmax.xlane.f32.xlu2 %v2387_v34  ;;  %2877 = vadd.xlane.f32.xlu1 %v2876_v2  ;;  %v2417_v34 = vmax.f32 %v7111_v4, %v7109_v28  ;;  %v10950_v2 = vld [vmem:[#allocation78_spill] sm:$0xff] }
 0x4aa   : > { %v2542_v27 = vsub.f32 %v10950_v2, %v2377_v21  ;;  %v10958_v21 = vld [vmem:[#allocation5_spill] sm:$0xff]  ;;  %v10960_v2 = vld [vmem:[#allocation94_spill] sm:$0xff] }
 0x4ac   : > { %v2723_v24 = vmul.f32 1.442695, %v2542_v27  ;;  %v7358_v51 = vpop.eup %5793  ;;  %v10954_v27 = vld [vmem:[#allocation90_spill] sm:$0xff] }
 0x4ad   : > { %10953 = vst [vmem:[#allocation10_spill] sm:$0xff] %v7358_v51  ;;  %v2507_v54 = vsub.f32 %v10955_v33, %v10954_v27  ;;  %v7364_v22 = vpop.eup %5795  ;;  %v2508_v14 = vsub.f32 %v10958_v21, %v10954_v27  ;;  %v2423_v33 = vmax.f32 %v7153_v55, %v7151_v16 }
 0x4ae   : > { %5799 = vpow2.f32 %v2723_v24  ;;  %10957 = vst [vmem:[#allocation75_spill] sm:$0xff] %v7364_v22  ;;  %v10961_v24 = vld [vmem:[#allocation8_spill] sm:$0xff] }
 0x4af   : > { %v2653_v46 = vmul.f32 1.442695, %v2507_v54  ;;  %v2655_v50 = vmul.f32 1.442695, %v2508_v14  ;;  %v7386_v54 = vpop.xlane.xlu1 %2361  ;;  %v10968_v14 = vld [vmem:[#allocation35_spill] sm:$0xff] }
 0x4b1   : > { %2916 = vadd.xlane.f32.xlu2 %v2915_v13  ;;  %2418 = vmax.xlane.f32.xlu1 %v2417_v34  ;;  %v7368_v34 = vpop.eup %5797  ;;  %5801 = vpow2.f32 %v2653_v46 }
 0x4b2   : > { %10959 = vst [vmem:[#allocation78_spill] sm:$0xff] %v7368_v34  ;;  %5803 = vpow2.f32 %v2655_v50 }
 0x4b4   : > { %v7348_v25 = vpop.f32.mrf.mxu0 }
 0x4b5   : > { %10951 = vst [vmem:[#allocation84_spill] sm:$0xff] %v7348_v25 }
 0x4b9   : > { %v7354_v38 = vpop.f32.mrf.mxu2  ;;  %2457 = vmax.xlane.f32.xlu2 %v2456_v37  ;;  %2451 = vmax.xlane.f32.xlu1 %v2450_v8  ;;  %v7372_v37 = vpop.eup %5799  ;;  %v10963_v8 = vld [vmem:[#allocation7_spill] sm:$0xff] }
 0x4ba   : > { %10952 = vst [vmem:[#allocation81_spill] sm:$0xff] %v7354_v38  ;;  %v2465_v13 = vmax.f32 %v7354_v38, %v7348_v25  ;;  %v2509_v25 = vsub.f32 %v10961_v24, %v10960_v2  ;;  %v2510_v38 = vsub.f32 %v10963_v8, %v10960_v2  ;;  %v2951_v21 = vadd.f32 %v7372_v37, %v7368_v34  ;;  %v10966_v2 = vld [vmem:[#allocation91_spill] sm:$0xff]  ;;  %v10967_v8 = vld [vmem:[#allocation36_spill] sm:$0xff] }
 0x4bb   : > { %10962 = vst [vmem:[#allocation90_spill] sm:$0xff] %v7372_v37 }
 0x4bc   : > { %v7362_v53 = vpop.f32.mrf.mxu0  ;;  %2466 = vmax.xlane.f32.xlu0 %v2465_v13  ;;  %v2909_v13 = vadd.f32 %v7364_v22, %v7358_v51  ;;  %v2657_v27 = vmul.f32 1.442695, %v2509_v25  ;;  %v2659_v24 = vmul.f32 1.442695, %v2510_v38  ;;  %v2529_v22 = vsub.f32 %v10967_v8, %v10966_v2  ;;  %v7396_v38 = vpop.eup %5801  ;;  %v10972_v8 = vld [vmem:[#allocation92_spill] sm:$0xff] }
 0x4bd   : > { %10956 = vst [vmem:[#allocation9_spill] sm:$0xff] %v7362_v53  ;;  %v2530_v25 = vsub.f32 %v10968_v14, %v10966_v2  ;;  %v7398_v50 = vpop.eup %5803  ;;  %v7406_v14 = vpop.f32.mrf.mxu3 }
 0x4be   : > { %5805 = vpow2.f32 %v2657_v27  ;;  %10970 = vst [vmem:[#allocation94_spill] sm:$0xff] %v7396_v38  ;;  %v10973_v27 = vld [vmem:[#allocation28_spill] sm:$0xff] }
 0x4bf   : > { %5807 = vpow2.f32 %v2659_v24  ;;  %10971 = vst [vmem:[#allocation8_spill] sm:$0xff] %v7398_v50  ;;  %v2699_v37 = vmul.f32 1.442695, %v2530_v25  ;;  %v2525_v34 = vsub.f32 %v10973_v27, %v10972_v8  ;;  %v10975_v24 = vld [vmem:[#allocation27_spill] sm:$0xff]  ;;  %v2900_v25 = vadd.f32 %v7398_v50, %v7396_v38 }
 0x4c0   : > { %v2526_v2 = vsub.f32 %v10975_v24, %v10972_v8  ;;  %10976 = vst [vmem:[#allocation91_spill] sm:$0xff] %v7406_v14  ;;  %v10979_v8 = vld [vmem:[#allocation32_spill] sm:$0xff] }
 0x4c1   : > { %2424 = vmax.xlane.f32.xlu1 %v2423_v33  ;;  %2910 = vadd.xlane.f32.xlu2 %v2909_v13  ;;  %v2441_v33 = vmax.f32 %v7128_v12, %v7157_v48  ;;  %v10969_v13 = vld [vmem:[#allocation106_spill] sm:$0xff] }
 0x4c2   : > { %v2420_v46 = vmax.f32 %v7126_v47, %v10969_v13 }
 0x4c4   : > { %v7384_v59 = vpop.f32.mrf.mxu0  ;;  %2952 = vadd.xlane.f32.xlu0 %v2951_v21  ;;  %v2697_v21 = vmul.f32 1.442695, %v2529_v22  ;;  %v7402_v51 = vpop.eup %5805  ;;  %v2689_v22 = vmul.f32 1.442695, %v2525_v34 }
 0x4c5   : > { %10965 = vst [vmem:[#allocation5_spill] sm:$0xff] %v7384_v59  ;;  %v7410_v12 = vpop.eup %5807 }
 0x4c6   : > { %10974 = vst [vmem:[#allocation7_spill] sm:$0xff] %v7402_v51  ;;  %5809 = vpow2.f32 %v2697_v21  ;;  %v2903_v27 = vadd.f32 %v7410_v12, %v7402_v51  ;;  %v7421_v21 = vpop.f32.mrf.mxu3 }
 0x4c7   : > { %10978 = vst [vmem:[#allocation35_spill] sm:$0xff] %v7410_v12  ;;  %5811 = vpow2.f32 %v2699_v37  ;;  %v10981_v37 = vld [vmem:[#allocation31_spill] sm:$0xff] }
 0x4c8   : > { %5813 = vrcp.f32 %v7310_v36  ;;  %10982 = vst [vmem:[#allocation28_spill] sm:$0xff] %v7421_v21 }
 0x4c9   : > { %2442 = vmax.xlane.f32.xlu1 %v2441_v33  ;;  %2421 = vmax.xlane.f32.xlu2 %v2420_v46  ;;  %v2356_v33 = vpop.xlane.xlu1 %2355  ;;  %v2691_v46 = vmul.f32 1.442695, %v2526_v2  ;;  %5815 = vpow2.f32 %v2689_v22 }
 0x4ca   : > { %v2527_v24 = vsub.f32 %v10979_v8, %v2356_v33  ;;  %v2528_v34 = vsub.f32 %v10981_v37, %v2356_v33 }
 0x4cb   : > { %5817 = vpow2.f32 %v2691_v46 }
 0x4cc   : > { %v7408_v48 = vpop.f32.mrf.mxu0  ;;  %v7418_v13 = vpop.eup %5809  ;;  %v2695_v46 = vmul.f32 1.442695, %v2528_v34 }
 0x4cd   : > { %10977 = vst [vmem:[#allocation36_spill] sm:$0xff] %v7408_v48  ;;  %v7425_v47 = vpop.eup %5811 }
 0x4ce   : > { %10980 = vst [vmem:[#allocation92_spill] sm:$0xff] %v7418_v13  ;;  %v7429_v38 = vpop.eup %5813  ;;  %v2933_v33 = vadd.f32 %v7425_v47, %v7418_v13 }
 0x4cf   : > { %10984 = vst [vmem:[#allocation32_spill] sm:$0xff] %v7425_v47  ;;  %v7435_v8 = vpop.eup %5815  ;;  %v3126_v37 = vmul.f32 %v7429_v38, %v7310_v36  ;;  %vm3131_vm2 = vweird.f32 %v7429_v38 }
 0x4d0   : > { %10985 = vst [vmem:[#allocation31_spill] sm:$0xff] %v7435_v8  ;;  %vm7477_vm7 = vmor %vm3130_vm4, %vm3131_vm2 }
 0x4d1   : > { %2901 = vadd.xlane.f32.xlu1 %v2900_v25  ;;  %2904 = vadd.xlane.f32.xlu2 %v2903_v27  ;;  %v2693_v25 = vmul.f32 1.442695, %v2527_v24  ;;  %v2426_v27 = vmax.f32 %v7190_v58, %v7186_v19  ;;  %v7439_v12 = vpop.eup %5817  ;;  %v10987_v24 = vld [vmem:[#allocation99_spill] sm:$0xff]  ;;  %v3127_v47 = vsub.f32 1.0, %v3126_v37 }
 0x4d2   : > { %10986 = vst [vmem:[#allocation138_spill] sm:$0xff] %v7439_v12  ;;  %v2927_v13 = vadd.f32 %v7439_v12, %v7435_v8 }
 0x4d4   : > { %v7423_v2 = vpop.f32.mrf.mxu0 }
 0x4d5   : > { %10983 = vst [vmem:[#allocation27_spill] sm:$0xff] %v7423_v2  ;;  %v2477_v50 = vmax.f32 %v7421_v21, %v7423_v2  ;;  %v10988_v2 = vld [vmem:[#allocation66_spill] sm:$0xff]  ;;  %v10989_v21 = vld [vmem:[#allocation67_spill] sm:$0xff] }
 0x4d6   : > { %v2534_v34 = vsub.f32 %v10989_v21, %v10987_v24  ;;  %v3128_v21 = vmul.f32 %v7429_v38, %v3127_v47 }
 0x4d7   : > { %v2893_v22 = vpop.xlane.xlu1 %2892  ;;  %2478 = vmax.xlane.f32.xlu0 %v2477_v50  ;;  %v2533_v50 = vsub.f32 %v10988_v2, %v10987_v24  ;;  %v2435_v2 = vmax.f32 %v7380_v62, %v7320_v35  ;;  %v3134_v35 = vand.u32 2147483647, %v7310_v36  ;;  %v10996_v62 = vld [vmem:[#allocation80_spill] sm:$0xff] }
 0x4d8   : > { %5819 = vrcp.f32 %v2893_v22  ;;  %v3164_v12 = vand.u32 2147483647, %v2893_v22  ;;  %v3129_v47 = vadd.f32 %v7429_v38, %v3128_v21  ;;  %vm3160_vm3 = vweird.f32 %v2893_v22 }
 0x4d9   : > { %2934 = vadd.xlane.f32.xlu1 %v2933_v33  ;;  %2427 = vmax.xlane.f32.xlu2 %v2426_v27  ;;  %5821 = vpow2.f32 %v2693_v25  ;;  %v2705_v58 = vmul.f32 1.442695, %v2533_v50  ;;  %v2429_v27 = vmax.f32 %v7228_v1, %v7230_v30  ;;  %v2707_v25 = vmul.f32 1.442695, %v2534_v34 }
 0x4da   : > { %5823 = vpow2.f32 %v2695_v46  ;;  %vm3165_vm6 = vcmp.eq.f32.partialorder %v3164_v12, 8.507059e+37  ;;  %v3133_v12 = vsel %vm7477_vm7, %v7429_v38, %v3129_v47  ;;  %vm3135_vm8 = vcmp.eq.f32.partialorder %v3134_v35, 8.507059e+37  ;;  %v11005_v35 = vld [vmem:[#allocation63_spill] sm:$0xff] }
 0x4db   : > { %5825 = vpow2.f32 %v2705_v58  ;;  %v3136_v58 = vand.u32 2147483648, %v7310_v36 }
 0x4dc   : > { %v7445_v51 = vpop.xlane.xlu0 %2448  ;;  %5827 = vpow2.f32 %v2707_v25 }
 0x4dd   : > { %10990 = vst [vmem:[#allocation99_spill] sm:$0xff] %v7445_v51  ;;  %v3166_v51 = vand.u32 2147483648, %v2893_v22 }
 0x4de   : > { %v5820_v19 = vpop.eup %5819 }
 0x4df   : > { %v3156_v16 = vmul.f32 %v5820_v19, %v2893_v22  ;;  %2928 = vadd.xlane.f32.xlu0 %v2927_v13  ;;  %v7453_v33 = vpop.eup %5821  ;;  %v7456_v37 = vpop.xlane.xlu1 %2346  ;;  %vm3161_vm0 = vweird.f32 %v5820_v19  ;;  %v3167_v25 = vor.u32 1.1754944e-38, %v3166_v51 }
 0x4e0   : > { %10991 = vst [vmem:[#allocation66_spill] sm:$0xff] %v7453_v33  ;;  %v7458_v24 = vpop.eup %5823  ;;  %v7460_v13 = vpop.f32.mrf.mxu2  ;;  %vm3162_vm5 = vmor %vm3160_vm3, %vm3161_vm0 }
 0x4e1   : > { %v3157_v46 = vsub.f32 1.0, %v3156_v16  ;;  %10992 = vst [vmem:[#allocation67_spill] sm:$0xff] %v7458_v24  ;;  %2436 = vmax.xlane.f32.xlu1 %v2435_v2  ;;  %2430 = vmax.xlane.f32.xlu2 %v2429_v27  ;;  %v2930_v8 = vadd.f32 %v7458_v24, %v7453_v33  ;;  %v10994_v27 = vld [vmem:[#allocation98_spill] sm:$0xff]  ;;  %v10995_v2 = vld [vmem:[#allocation79_spill] sm:$0xff]  ;;  %v2468_v51 = vmax.f32 %v7460_v13, %v7362_v53  ;;  %v7485_v36 = vpop.eup %5825 }
 0x4e2   : > { %10993 = vst [vmem:[#allocation139_spill] sm:$0xff] %v7460_v13  ;;  %v2544_v30 = vsub.f32 %v10996_v62, %v10994_v27 }
 0x4e3   : > { %v3158_v50 = vmul.f32 %v5820_v19, %v3157_v46  ;;  %v2543_v46 = vsub.f32 %v10995_v2, %v10994_v27  ;;  %10999 = vst [vmem:[#allocation98_spill] sm:$0xff] %v7485_v36  ;;  %v3137_v27 = vor.u32 1.1754944e-38, %v3136_v58 }
 0x4e4   : > { %v7463_v34 = vpop.xlane.xlu0 %2907 }
 0x4e5   : > { %v3159_v16 = vadd.f32 %v5820_v19, %v3158_v50  ;;  %v2444_v50 = vmax.f32 %v7165_v6, %v7184_v45  ;;  %v2725_v45 = vmul.f32 1.442695, %v2543_v46  ;;  %v11007_v6 = vld [vmem:[#allocation77_spill] sm:$0xff]  ;;  %vm3235_vm2 = vweird.f32 %v7463_v34 }
 0x4e7   : > { %v3163_v21 = vsel %vm3162_vm5, %v5820_v19, %v3159_v16  ;;  %2931 = vadd.xlane.f32.xlu0 %v2930_v8  ;;  %v4160_v8 = vpack.c.bf16 %v7134_v31, %v7131_v60  ;;  %v7498_v16 = vpop.eup %5827  ;;  %5829 = vpow2.f32 %v2725_v45  ;;  %v11004_v31 = vld [vmem:[#allocation61_spill] sm:$0xff] }
 0x4e8   : > { %v3168_v2 = vsel %vm3165_vm6, %v3167_v25, %v3163_v21  ;;  %11002 = vst [vmem:[#allocation140_spill] sm:$0xff] %v7498_v16  ;;  %v2727_v25 = vmul.f32 1.442695, %v2544_v30  ;;  %v7500_v21 = vpop.xlane.xlu1 %2373  ;;  %v7506_v47 = vpop.f32.mrf.mxu2  ;;  %v2531_v58 = vsub.f32 %v11004_v31, %v7386_v54  ;;  %v2532_v30 = vsub.f32 %v11005_v35, %v7386_v54 }
 0x4e9   : > { %v7491_v19 = vmul.f32 %v7188_v5, %v3168_v2  ;;  %v7494_v62 = vmul.f32 %v7196_v56, %v3168_v2  ;;  %2469 = vmax.xlane.f32.xlu1 %v2468_v51  ;;  %2445 = vmax.xlane.f32.xlu2 %v2444_v50  ;;  %v3138_v56 = vsel %vm3135_vm8, %v3137_v27, %v3133_v12  ;;  %v4249_v22 = vunpack.c.l.b16 %v4160_v8  ;;  %v11006_v51 = vld [vmem:[#allocation76_spill] sm:$0xff] }
 0x4ea   : > { %11003 = vst [vmem:[#allocation141_spill] sm:$0xff] %v7506_v47  ;;  %v4250_v60 = vunpack.c.h.b16 %v4160_v8  ;;  %5831 = vpow2.f32 %v2727_v25  ;;  %v7513_v2 = vmul.f32 %v11006_v51, %v3138_v56  ;;  %v7516_v53 = vmul.f32 %v11007_v6, %v3138_v56 }
 0x4eb   : > { %11000 = vst [vmem:[#allocation79_spill] sm:$0xff] %v7491_v19  ;;  %v4159_v5 = vpack.c.bf16 %v7494_v62, %v7491_v19  ;;  %v2471_v12 = vmax.f32 %v7506_v47, %v7384_v59  ;;  %v2939_v45 = vadd.f32 %v7498_v16, %v7485_v36  ;;  %v4158_v25 = vpack.c.bf16 %v7204_v49, %v7199_v26  ;;  %v11017_v59 = vld [vmem:[#allocation93_spill] sm:$0xff] }
 0x4ec   : > { %11001 = vst [vmem:[#allocation80_spill] sm:$0xff] %v7494_v62  ;;  %v7504_v38 = vpop.xlane.xlu0 %2433  ;;  %v2703_v54 = vmul.f32 1.442695, %v2532_v30  ;;  %v4157_v6 = vpack.c.bf16 %v7516_v53, %v7513_v2 }
 0x4ed   : > { %v4247_v46 = vunpack.c.l.b16 %v4159_v5  ;;  %v4248_v50 = vunpack.c.h.b16 %v4159_v5  ;;  %11008 = vst [vmem:[#allocation61_spill] sm:$0xff] %v7516_v53  ;;  %v2701_v5 = vmul.f32 1.442695, %v2531_v58  ;;  %v7526_v56 = vpop.eup %5829  ;;  %v2438_v58 = vmax.f32 %v7406_v14, %v7334_v7 }
 0x4ee   : > { %11009 = vst [vmem:[#allocation63_spill] sm:$0xff] %v7526_v56  ;;  %v4243_v26 = vunpack.c.l.b16 %v4157_v6  ;;  %v4244_v49 = vunpack.c.h.b16 %v4157_v6 }
 0x4ef   : > { %v4257_v8 = vpack.c.b16 %v4249_v22, %v4247_v46  ;;  %v4258_v27 = vpack.c.b16 %v4250_v60, %v4248_v50  ;;  %v4245_v60 = vunpack.c.l.b16 %v4158_v25  ;;  %v4246_v46 = vunpack.c.h.b16 %v4158_v25  ;;  %v11014_v25 = vld [vmem:[#allocation70_spill] sm:$0xff] }
 0x4f0   : > { %v7530_v35 = vpop.eup %5831  ;;  %v7532_v22 = vpop.xlane.xlu1 %2409  ;;  %5833 = vpow2.f32 %v2701_v5 }
 0x4f1   : > { %2472 = vmax.xlane.f32.xlu1 %v2471_v12  ;;  %2940 = vadd.xlane.f32.xlu2 %v2939_v45  ;;  %11010 = vst [vmem:[#allocation76_spill] sm:$0xff] %v7530_v35  ;;  %5835 = vpow2.f32 %v2703_v54  ;;  %v2954_v50 = vadd.f32 %v7530_v35, %v7526_v56  ;;  %v4255_v30 = vpack.c.b16 %v4245_v60, %v4243_v26  ;;  %v11011_v12 = vld [vmem:[#allocation97_spill] sm:$0xff]  ;;  %v11015_v54 = vld [vmem:[#allocation102_spill] sm:$0xff]  ;;  %v11018_v60 = vld [vmem:[#allocation71_spill] sm:$0xff]  ;;  %v7549_v26 = vpop.f32.mrf.mxu0 }
 0x4f2   : > { %4271 = vmatpush.bf16.xpose.msra.mxu1 %v4257_v8  ;;  %4285 = vmatpush.bf16.xpose.msra.mxu2 %v4258_v27  ;;  %v4256_v51 = vpack.c.b16 %v4246_v46, %v4244_v49  ;;  %v11012_v45 = vld [vmem:[#allocation69_spill] sm:$0xff]  ;;  %v2566_v5 = vsub.f32 %v11014_v25, %v11011_v12  ;;  %5837 = vrcp.f32 %v11015_v54  ;;  %v2567_v46 = vsub.f32 %v11018_v60, %v11017_v59 }
 0x4f3   : > { %v2565_v8 = vsub.f32 %v11012_v45, %v11011_v12  ;;  %11019 = vst [vmem:[#allocation69_spill] sm:$0xff] %v7549_v26  ;;  %v11021_v45 = vld [vmem:[#allocation73_spill] sm:$0xff]  ;;  %vm3100_vm14 = vweird.f32 %v11015_v54 }
 0x4f4   : > { %v7528_v31 = vpop.xlane.xlu0 %2898  ;;  %v2568_v25 = vsub.f32 %v11021_v45, %v11017_v59  ;;  %v2773_v47 = vmul.f32 1.442695, %v2567_v46 }
 0x4f6   : > { %v7540_v27 = vpop.eup %5833  ;;  %v2775_v56 = vmul.f32 1.442695, %v2568_v25  ;;  %v11027_v25 = vld [vmem:[#allocation72_spill] sm:$0xff] }
 0x4f7   : > { %11013 = vst [vmem:[#allocation77_spill] sm:$0xff] %v7540_v27  ;;  %v7545_v13 = vpop.eup %5835 }
 0x4f8   : > { %11016 = vst [vmem:[#allocation97_spill] sm:$0xff] %v7545_v13  ;;  %v2936_v12 = vadd.f32 %v7545_v13, %v7540_v27  ;;  %v7562_v60 = vpop.eup %5837 }
 0x4f9   : > { %2955 = vadd.xlane.f32.xlu1 %v2954_v50  ;;  %2439 = vmax.xlane.f32.xlu2 %v2438_v58  ;;  %v2769_v58 = vmul.f32 1.442695, %v2565_v8  ;;  %v7553_v50 = vpop.f32.mrf.mxu3  ;;  %v3096_v59 = vmul.f32 %v7562_v60, %v11015_v54  ;;  %vm3101_vm13 = vweird.f32 %v7562_v60 }
 0x4fa   : > { %4272 = vmatpush.bf16.xpose.msra.mxu1 %v4255_v30  ;;  %4286 = vmatpush.bf16.xpose.msra.mxu2 %v4256_v51  ;;  %11020 = vst [vmem:[#allocation70_spill] sm:$0xff] %v7553_v50  ;;  %v2771_v30 = vmul.f32 1.442695, %v2566_v5  ;;  %v2480_v51 = vmax.f32 %v7553_v50, %v7549_v26  ;;  %v7564_v5 = vpop.f32.mrf.mxu2  ;;  %v11023_v26 = vld [vmem:[#allocation101_spill] sm:$0xff]  ;;  %v11024_v50 = vld [vmem:[#allocation24_spill] sm:$0xff]  ;;  %vm7634_vm15 = vmor %vm3100_vm14, %vm3101_vm13 }
 0x4fb   : > { %11022 = vst [vmem:[#allocation102_spill] sm:$0xff] %v7564_v5  ;;  %v2523_v13 = vsub.f32 %v11024_v50, %v11023_v26  ;;  %v2474_v50 = vmax.f32 %v7564_v5, %v7408_v48  ;;  %v11033_v5 = vld [vmem:[#allocation62_spill] sm:$0xff] }
 0x4fc   : > { %v2944_v6 = vpop.xlane.xlu0 %2943  ;;  %v7551_v49 = vpop.xlane.xlu1 %2460 }
 0x4fd   : > { %5839 = vrcp.f32 %v2944_v6  ;;  %v3419_v16 = vand.u32 2147483647, %v2944_v6  ;;  %v3421_v36 = vand.u32 2147483648, %v2944_v6  ;;  %vm3415_vm10 = vweird.f32 %v2944_v6 }
 0x4fe   : > { %5841 = vrcp.f32 %v7463_v34 }
 0x4ff   : > { %5843 = vpow2.f32 %v2769_v58  ;;  %vm3420_vm12 = vcmp.eq.f32.partialorder %v3419_v16, 8.507059e+37 }
 0x500   : > { %5845 = vpow2.f32 %v2771_v30 }
 0x501   : > { %2481 = vmax.xlane.f32.xlu1 %v2480_v51  ;;  %2937 = vadd.xlane.f32.xlu2 %v2936_v12  ;;  %5847 = vpow2.f32 %v2773_v47  ;;  %v11025_v51 = vld [vmem:[#allocation23_spill] sm:$0xff] }
 0x502   : > { %v2524_v12 = vsub.f32 %v11025_v51, %v11023_v26  ;;  %v11026_v47 = vld [vmem:[#allocation95_spill] sm:$0xff]  ;;  %5849 = vpow2.f32 %v2775_v56 }
 0x503   : > { %v5840_v8 = vpop.eup %5839  ;;  %v2537_v33 = vsub.f32 %v11027_v25, %v11026_v47 }
 0x504   : > { %v3411_v35 = vmul.f32 %v5840_v8, %v2944_v6  ;;  %v2383_v46 = vpop.xlane.xlu1 %2382  ;;  %v7570_v45 = vpop.xlane.xlu2 %2463  ;;  %vm3416_vm9 = vweird.f32 %v5840_v8  ;;  %v11035_v6 = vld [vmem:[#allocation105_spill] sm:$0xff] }
 0x505   : > { %v2545_v58 = vsub.f32 %v6963_v42, %v2383_v46  ;;  %v2546_v30 = vsub.f32 %v6969_v3, %v2383_v46  ;;  %v7576_v24 = vpop.eup %5841  ;;  %v2685_v42 = vmul.f32 1.442695, %v2523_v13  ;;  %v11029_v3 = vld [vmem:[#allocation74_spill] sm:$0xff]  ;;  %v3097_v46 = vsub.f32 1.0, %v3096_v59  ;;  %vm3417_vm11 = vmor %vm3415_vm10, %vm3416_vm9 }
 0x506   : > { %v3412_v27 = vsub.f32 1.0, %v3411_v35  ;;  %v7582_v26 = vpop.eup %5843  ;;  %v2538_v35 = vsub.f32 %v11029_v3, %v11026_v47  ;;  %v3231_v25 = vmul.f32 %v7576_v24, %v7463_v34  ;;  %v3422_v13 = vor.u32 1.1754944e-38, %v3421_v36  ;;  %v11034_v47 = vld [vmem:[#allocation64_spill] sm:$0xff] }
 0x507   : > { %v2729_v19 = vmul.f32 1.442695, %v2545_v58  ;;  %v2731_v7 = vmul.f32 1.442695, %v2546_v30  ;;  %11028 = vst [vmem:[#allocation93_spill] sm:$0xff] %v7582_v26  ;;  %v7586_v51 = vpop.eup %5845  ;;  %v11032_v30 = vld [vmem:[#allocation96_spill] sm:$0xff]  ;;  %vm3236_vm1 = vweird.f32 %v7576_v24  ;;  %vm3070_vm10 = vweird.f32 %v11035_v6 }
 0x508   : > { %v3413_v62 = vmul.f32 %v5840_v8, %v3412_v27  ;;  %11030 = vst [vmem:[#allocation71_spill] sm:$0xff] %v7586_v51  ;;  %v7590_v27 = vpop.eup %5847  ;;  %v2687_v58 = vmul.f32 1.442695, %v2524_v12  ;;  %v2561_v56 = vsub.f32 %v11033_v5, %v11032_v30  ;;  %v2713_v59 = vmul.f32 1.442695, %v2537_v33  ;;  %vm7669_vm3 = vmor %vm3235_vm2, %vm3236_vm1 }
 0x509   : > { %5851 = vpow2.f32 %v2729_v19  ;;  %2475 = vmax.xlane.f32.xlu2 %v2474_v50  ;;  %11031 = vst [vmem:[#allocation73_spill] sm:$0xff] %v7590_v27  ;;  %v2562_v3 = vsub.f32 %v11034_v47, %v11032_v30  ;;  %v3098_v19 = vmul.f32 %v7562_v60, %v3097_v46  ;;  %v3232_v5 = vsub.f32 1.0, %v3231_v25 }
 0x50a   : > { %v3414_v48 = vadd.f32 %v5840_v8, %v3413_v62  ;;  %5853 = vpow2.f32 %v2731_v7  ;;  %v2715_v62 = vmul.f32 1.442695, %v2538_v35  ;;  %v2761_v33 = vmul.f32 1.442695, %v2561_v56 }
 0x50b   : > { %5855 = vrcp.f32 %v11035_v6  ;;  %v3099_v35 = vadd.f32 %v7562_v60, %v3098_v19  ;;  %v3233_v46 = vmul.f32 %v7576_v24, %v3232_v5  ;;  %v7640_v56 = vadd.f32 %v7586_v51, %v7582_v26  ;;  %v11053_v26 = vld [vmem:[#allocation58_spill] sm:$0xff] }
 0x50c   : > { %v3418_v14 = vsel %vm3417_vm11, %v5840_v8, %v3414_v48  ;;  %v7599_v12 = vpop.xlane.xlu1 %2883  ;;  %v7601_v53 = vpop.xlane.xlu2 %2394 }
 0x50d   : > { %v3423_v50 = vsel %vm3420_vm12, %v3422_v13, %v3418_v14  ;;  %11036 = vst [vmem:[#allocation101_spill] sm:$0xff] %v7601_v53  ;;  %5857 = vrcp.f32 %v7599_v12  ;;  %v7610_v48 = vpop.eup %5849  ;;  %v2763_v14 = vmul.f32 1.442695, %v2562_v3  ;;  %vm3115_vm5 = vweird.f32 %v7599_v12 }
 0x50e   : > { %v7604_v36 = vmul.f32 %v7274_v57, %v3423_v50  ;;  %v7607_v7 = vmul.f32 %v7276_v43, %v3423_v50  ;;  %11037 = vst [vmem:[#allocation24_spill] sm:$0xff] %v7610_v48  ;;  %5859 = vpow2.f32 %v2685_v42  ;;  %v3106_v42 = vand.u32 2147483648, %v11015_v54 }
 0x50f   : > { %v7612_v16 = vpop.eup %5851  ;;  %5861 = vpow2.f32 %v2687_v58 }
 0x510   : > { %11038 = vst [vmem:[#allocation23_spill] sm:$0xff] %v7612_v16  ;;  %v7616_v8 = vadd.f32 %v7145_v11, %v7604_v36  ;;  %v7620_v57 = vadd.f32 %v7149_v23, %v7607_v7  ;;  %v7622_v43 = vpop.eup %5853  ;;  %5863 = vpow2.f32 %v2713_v59  ;;  %v3104_v23 = vand.u32 2147483647, %v11015_v54  ;;  %v11045_v59 = vld [vmem:[#allocation57_spill] sm:$0xff] }
 0x511   : > { %11041 = vst [vmem:[#allocation74_spill] sm:$0xff] %v7622_v43  ;;  %5865 = vpow2.f32 %v2715_v62  ;;  %v2957_v11 = vadd.f32 %v7622_v43, %v7612_v16  ;;  %v7630_v25 = vpop.eup %5855  ;;  %v2557_v47 = vsub.f32 %v11045_v59, %v7322_v32  ;;  %v3103_v54 = vsel %vm7634_vm15, %v7562_v60, %v3099_v35 }
 0x512   : > { %11039 = vst [vmem:[#allocation95_spill] sm:$0xff] %v7616_v8  ;;  %5867 = vpow2.f32 %v2761_v33  ;;  %v3107_v3 = vor.u32 1.1754944e-38, %v3106_v42  ;;  %v3234_v33 = vadd.f32 %v7576_v24, %v3233_v46  ;;  %vm3105_vm0 = vcmp.eq.f32.partialorder %v3104_v23, 8.507059e+37 }
 0x513   : > { %11040 = vst [vmem:[#allocation72_spill] sm:$0xff] %v7620_v57  ;;  %v5858_v58 = vpop.eup %5857  ;;  %5869 = vpow2.f32 %v2763_v14  ;;  %2958 = vadd.xlane.f32.xlu2 %v2957_v11  ;;  %v3066_v60 = vmul.f32 %v7630_v25, %v11035_v6  ;;  %v3241_v35 = vand.u32 2147483648, %v7463_v34  ;;  %v3239_v46 = vand.u32 2147483647, %v7463_v34 }
 0x514   : > { %v7642_v13 = vpop.eup %5859  ;;  %v3111_v62 = vmul.f32 %v5858_v58, %v7599_v12  ;;  %v7650_v19 = vpop.xlane.xlu1 %2454  ;;  %v3108_v8 = vsel %vm3105_vm0, %v3107_v3, %v3103_v54  ;;  %vm3116_vm4 = vweird.f32 %v5858_v58  ;;  %v2558_v43 = vsub.f32 %v11053_v26, %v7322_v32  ;;  %v11057_v26 = vld [vmem:[#allocation83_spill] sm:$0xff] }
 0x515   : > { %11044 = vst [vmem:[#allocation96_spill] sm:$0xff] %v7642_v13  ;;  %v2386_v50 = vpop.xlane.xlu2 %2385  ;;  %v7652_v5 = vpop.eup %5861  ;;  %v2753_v16 = vmul.f32 1.442695, %v2557_v47  ;;  %v3238_v34 = vsel %vm7669_vm3, %v7576_v24, %v3234_v33  ;;  %v3119_v54 = vand.u32 2147483647, %v7599_v12  ;;  %v3067_v3 = vsub.f32 1.0, %v3066_v60  ;;  %vm7683_vm7 = vmor %vm3115_vm5, %vm3116_vm4 }
 0x516   : > { %11046 = vst [vmem:[#allocation62_spill] sm:$0xff] %v7652_v5  ;;  %v2547_v14 = vsub.f32 %v6975_v40, %v2386_v50  ;;  %v2548_v11 = vsub.f32 %v6980_v9, %v2386_v50  ;;  %v7658_v59 = vpop.eup %5863  ;;  %v3112_v42 = vsub.f32 1.0, %v3111_v62  ;;  %v3121_v50 = vand.u32 2147483648, %v7599_v12 }
 0x517   : > { %11047 = vst [vmem:[#allocation64_spill] sm:$0xff] %v7658_v59  ;;  %v7663_v30 = vpop.eup %5865  ;;  %vm3240_vm6 = vcmp.eq.f32.partialorder %v3239_v46, 8.507059e+37  ;;  %v7691_v47 = vmul.f32 %v11057_v26, %v3108_v8  ;;  %v2755_v46 = vmul.f32 1.442695, %v2558_v43  ;;  %vm3120_vm8 = vcmp.eq.f32.partialorder %v3119_v54, 8.507059e+37 }
 0x518   : > { %11048 = vst [vmem:[#allocation105_spill] sm:$0xff] %v7663_v30  ;;  %v2733_v57 = vmul.f32 1.442695, %v2547_v14  ;;  %v7667_v40 = vpop.eup %5867  ;;  %v3113_v23 = vmul.f32 %v5858_v58, %v3112_v42  ;;  %v2735_v51 = vmul.f32 1.442695, %v2548_v11  ;;  %v3242_v14 = vor.u32 1.1754944e-38, %v3241_v35 }
 0x519   : > { %11049 = vst [vmem:[#allocation57_spill] sm:$0xff] %v7667_v40  ;;  %v7674_v62 = vpop.eup %5869  ;;  %v11056_v42 = vld [vmem:[#allocation82_spill] sm:$0xff]  ;;  %v3122_v33 = vor.u32 1.1754944e-38, %v3121_v50  ;;  %vm3071_vm9 = vweird.f32 %v7630_v25  ;;  %vm3190_vm5 = vweird.f32 %v7528_v31 }
 0x51a   : > { %11052 = vst [vmem:[#allocation142_spill] sm:$0xff] %v7674_v62  ;;  %v3114_v53 = vadd.f32 %v5858_v58, %v3113_v23  ;;  %5871 = vpow2.f32 %v2733_v57  ;;  %v7688_v32 = vmul.f32 %v11056_v42, %v3108_v8  ;;  %v3243_v35 = vsel %vm3240_vm6, %v3242_v14, %v3238_v34  ;;  %v11060_v14 = vld [vmem:[#allocation59_spill] sm:$0xff]  ;;  %vm7746_vm11 = vmor %vm3070_vm10, %vm3071_vm9 }
 0x51b   : > { %5873 = vpow2.f32 %v2735_v51  ;;  %v7700_v57 = vadd.f32 %v7610_v48, %v7590_v27  ;;  %v3068_v8 = vmul.f32 %v7630_v25, %v3067_v3  ;;  %v7708_v43 = vmul.f32 %v7234_v63, %v3243_v35 }
 0x51c   : > { %v3118_v24 = vsel %vm7683_vm7, %v5858_v58, %v3114_v53  ;;  %v7695_v60 = vpop.xlane.xlu1 %2877  ;;  %v7711_v50 = vmul.f32 %v7236_v15, %v3243_v35  ;;  %v4155_v3 = vpack.c.bf16 %v7691_v47, %v7688_v32  ;;  %v3076_v42 = vand.u32 2147483648, %v11035_v6 }
 0x51d   : > { %v2389_v12 = vpop.xlane.xlu2 %2388  ;;  %5875 = vrcp.f32 %v7695_v60  ;;  %v3123_v58 = vsel %vm3120_vm8, %v3122_v33, %v3118_v24  ;;  %v3074_v35 = vand.u32 2147483647, %v11035_v6  ;;  %vm3085_vm14 = vweird.f32 %v7695_v60 }
 0x51e   : > { %v2549_v9 = vsub.f32 %v10944_v44, %v2389_v12  ;;  %v2550_v53 = vsub.f32 %v10943_v0, %v2389_v12  ;;  %v4031_v51 = vmul.f32 %v7298_v39, %v3123_v58  ;;  %v4032_v23 = vmul.f32 %v7300_v52, %v3123_v58  ;;  %v11059_v0 = vld [vmem:[#allocation100_spill] sm:$0xff] }
 0x51f   : > { %5877 = vpow2.f32 %v2753_v16  ;;  %v2559_v11 = vsub.f32 %v11060_v14, %v11059_v0  ;;  %v3069_v16 = vadd.f32 %v7630_v25, %v3068_v8  ;;  %v4239_v58 = vunpack.c.l.b16 %v4155_v3 }
 0x520   : > { %v2737_v34 = vmul.f32 1.442695, %v2549_v9  ;;  %v2739_v54 = vmul.f32 1.442695, %v2550_v53  ;;  %v7715_v44 = vpop.eup %5871  ;;  %v4156_v39 = vpack.c.bf16 %v4032_v23, %v4031_v51  ;;  %v7720_v52 = vadd.f32 %v7708_v43, %v4031_v51  ;;  %v11063_v51 = vld [vmem:[#allocation60_spill] sm:$0xff] }
 0x521   : > { %11058 = vst [vmem:[#allocation58_spill] sm:$0xff] %v7715_v44  ;;  %v7723_v63 = vadd.f32 %v7711_v50, %v4032_v23  ;;  %v7725_v15 = vpop.eup %5873  ;;  %v2560_v23 = vsub.f32 %v11063_v51, %v11059_v0  ;;  %v4240_v6 = vunpack.c.h.b16 %v4155_v3  ;;  %v7755_v14 = vadd.f32 %v7652_v5, %v7642_v13 }
 0x522   : > { %11062 = vst [vmem:[#allocation83_spill] sm:$0xff] %v7725_v15  ;;  %5879 = vpow2.f32 %v2737_v34  ;;  %v2960_v24 = vadd.f32 %v7725_v15, %v7715_v44  ;;  %v4241_v33 = vunpack.c.l.b16 %v4156_v39  ;;  %v4242_v12 = vunpack.c.h.b16 %v4156_v39  ;;  %v7762_v44 = vpop.f32.mrf.mxu3 }
 0x523   : > { %11061 = vst [vmem:[#allocation82_spill] sm:$0xff] %v7723_v63  ;;  %v7730_v26 = vpop.eup %5875  ;;  %5881 = vpow2.f32 %v2739_v54  ;;  %v7750_v54 = vpop.f32.mrf.mxu0  ;;  %v3073_v0 = vsel %vm7746_vm11, %v7630_v25, %v3069_v16  ;;  %v2757_v27 = vmul.f32 1.442695, %v2559_v11  ;;  %v3077_v15 = vor.u32 1.1754944e-38, %v3076_v42  ;;  %v695_v25 = vld [vmem:[%s10500_s5 + $0x88] sm:$0xff] }
 0x524   : > { %v3081_v8 = vmul.f32 %v7730_v26, %v7695_v60  ;;  %v7738_v9 = vpop.xlane.xlu1 %2418  ;;  %11066 = vst [vmem:[#allocation100_spill] sm:$0xff] %v7750_v54  ;;  %2961 = vadd.xlane.f32.xlu0 %v2960_v24  ;;  %v4253_v48 = vpack.c.b16 %v4241_v33, %v4239_v58  ;;  %v2521_v3 = vsub.f32 %v6756_v20, %v7456_v37  ;;  %vm3075_vm12 = vcmp.eq.f32.partialorder %v3074_v35, 8.507059e+37 }
 0x525   : > { %v7740_v53 = vpop.xlane.xlu2 %2916  ;;  %v7757_v39 = vpop.eup %5877  ;;  %11068 = vst [vmem:[#allocation60_spill] sm:$0xff] %v7762_v44  ;;  %v4254_v24 = vpack.c.b16 %v4242_v12, %v4240_v6  ;;  %vm3086_vm13 = vweird.f32 %v7730_v26  ;;  %v2759_v16 = vmul.f32 1.442695, %v2560_v23  ;;  %v2539_v20 = vsub.f32 %v6919_v61, %v7500_v21  ;;  %v11074_v6 = vld [vmem:[#allocation88_spill] sm:$0xff] }
 0x526   : > { %5883 = vrcp.f32 %v7740_v53  ;;  %11067 = vst [vmem:[#allocation59_spill] sm:$0xff] %v7757_v39  ;;  %v3082_v51 = vsub.f32 1.0, %v3081_v8  ;;  %4273 = vmatpush.bf16.xpose.msra.mxu1 %v4253_v48  ;;  %v3089_v42 = vand.u32 2147483647, %v7695_v60  ;;  %v3078_v33 = vsel %vm3075_vm12, %v3077_v15, %v3073_v0  ;;  %vm7792_vm15 = vmor %vm3085_vm14, %vm3086_vm13 }
 0x527   : > { %5885 = vpow2.f32 %v2755_v46  ;;  %v3091_v46 = vand.u32 2147483648, %v7695_v60  ;;  %4287 = vmatpush.bf16.xpose.msra.mxu2 %v4254_v24  ;;  %v2540_v12 = vsub.f32 %v6921_v41, %v7500_v21  ;;  %v2522_v58 = vsub.f32 %v6754_v29, %v7456_v37 }
 0x528   : > { %v7766_v63 = vpop.eup %5879  ;;  %v3083_v5 = vmul.f32 %v7730_v26, %v3082_v51  ;;  %v2681_v23 = vmul.f32 1.442695, %v2521_v3  ;;  %v2483_v61 = vmax.f32 %v7762_v44, %v7750_v54  ;;  %5887 = vrcp.f32 %v7528_v31  ;;  %v11076_v51 = vld [vmem:[#allocation89_spill] sm:$0xff] }
 0x529   : > { %11069 = vst [vmem:[#allocation143_spill] sm:$0xff] %v7766_v63  ;;  %v7774_v11 = vpop.eup %5881  ;;  %5889 = vpow2.f32 %v2757_v27  ;;  %v3092_v37 = vor.u32 1.1754944e-38, %v3091_v46  ;;  %v2717_v34 = vmul.f32 1.442695, %v2539_v20  ;;  %vm3090_vm1 = vcmp.eq.f32.partialorder %v3089_v42, 8.507059e+37  ;;  %v11078_v46 = vld [vmem:[#allocation104_spill] sm:$0xff] }
 0x52a   : > { %11070 = vst [vmem:[#allocation144_spill] sm:$0xff] %v7774_v11  ;;  %v3084_v35 = vadd.f32 %v7730_v26, %v3083_v5  ;;  %v2963_v48 = vadd.f32 %v7774_v11, %v7766_v63  ;;  %v7807_v0 = vmul.f32 %v11074_v6, %v3078_v33  ;;  %v7810_v27 = vmul.f32 %v11076_v51, %v3078_v33 }
 0x52b   : > { %797 = vperm.xlu2 %5640, %v695_v25   ;;  %5891 = vpow2.f32 %v2759_v16  ;;  %v2719_v3 = vmul.f32 1.442695, %v2540_v12  ;;  %v11079_v25 = vld [vmem:[#allocation86_spill] sm:$0xff]  ;;  %v7814_v41 = vpop.f32.mrf.mxu0  ;;  %v3286_v20 = vand.u32 2147483648, %v7740_v53  ;;  %v11081_v12 = vld [vmem:[#allocation87_spill] sm:$0xff]  ;;  %vm3280_vm2 = vweird.f32 %v7740_v53 }
 0x52c   : > { %v5884_v8 = vpop.eup %5883  ;;  %v3088_v29 = vsel %vm7792_vm15, %v7730_v26, %v3084_v35  ;;  %2964 = vadd.xlane.f32.xlu1 %v2963_v48  ;;  %v7802_v60 = vpop.xlane.xlu1 %2451  ;;  %2484 = vmax.xlane.f32.xlu0 %v2483_v61  ;;  %11075 = vst [vmem:[#allocation88_spill] sm:$0xff] %v7807_v0  ;;  %v2551_v35 = vsub.f32 %v11079_v25, %v11078_v46  ;;  %5893 = vpow2.f32 %v2681_v23  ;;  %v2683_v48 = vmul.f32 1.442695, %v2522_v58  ;;  %v11083_v58 = vld [vmem:[#allocation15_spill] sm:$0xff] }
 0x52d   : > { %v7796_v21 = vpop.eup %5885  ;;  %v3276_v5 = vmul.f32 %v5884_v8, %v7740_v53  ;;  %v7804_v15 = vpop.xlane.xlu2 %2457  ;;  %11077 = vst [vmem:[#allocation89_spill] sm:$0xff] %v7810_v27  ;;  %v3093_v24 = vsel %vm3090_vm1, %v3092_v37, %v3088_v29  ;;  %vm3281_vm0 = vweird.f32 %v5884_v8  ;;  %v3284_v61 = vand.u32 2147483647, %v7740_v53 }
 0x52e   : > { %11073 = vst [vmem:[#allocation145_spill] sm:$0xff] %v7796_v21  ;;  %v7819_v33 = vmul.f32 %v7324_v10, %v3093_v24  ;;  %v7821_v16 = vpop.eup %5887  ;;  %v2552_v29 = vsub.f32 %v11081_v12, %v11078_v46  ;;  %v7825_v37 = vpop.f32.mrf.mxu3  ;;  %5895 = vpow2.f32 %v2717_v34  ;;  %v7828_v23 = vmul.f32 %v11083_v58, %v3093_v24  ;;  %v11086_v34 = vld [vmem:[#allocation128_spill] sm:$0xff]  ;;  %vm3282_vm3 = vmor %vm3280_vm2, %vm3281_vm0 }
 0x52f   : > { %v3277_v26 = vsub.f32 1.0, %v3276_v5  ;;  %11080 = vst [vmem:[#allocation104_spill] sm:$0xff] %v7814_v41  ;;  %v4153_v5 = vpack.c.bf16 %v7810_v27, %v7807_v0  ;;  %v7832_v6 = vpop.eup %5889  ;;  %5897 = vpow2.f32 %v2719_v3  ;;  %v2486_v10 = vmax.f32 %v7825_v37, %v7814_v41  ;;  %v11091_v27 = vld [vmem:[#allocation109_spill] sm:$0xff]  ;;  %v11092_v0 = vld [vmem:[#allocation110_spill] sm:$0xff]  ;;  %v11152_v41 = vld [vmem:[#allocation8_spill] sm:$0xff] }
 0x530   : > { %11082 = vst [vmem:[#allocation86_spill] sm:$0xff] %v7825_v37  ;;  %5899 = vpow2.f32 %v2683_v48  ;;  %v2580_v24 = vsub.f32 %v11086_v34, %v7504_v38  ;;  %v3287_v25 = vor.u32 1.1754944e-38, %v3286_v20  ;;  %v3186_v3 = vmul.f32 %v7821_v16, %v7528_v31  ;;  %v11089_v20 = vld [vmem:[#allocation65_spill] sm:$0xff] }
 0x531   : > { %v3278_v42 = vmul.f32 %v5884_v8, %v3277_v26  ;;  %11084 = vst [vmem:[#allocation87_spill] sm:$0xff] %v7832_v6  ;;  %v11085_v26 = vld [vmem:[#allocation127_spill] sm:$0xff]  ;;  %v7842_v12 = vpop.eup %5891  ;;  %vm3285_vm4 = vcmp.eq.f32.partialorder %v3284_v61, 8.507059e+37  ;;  %v4154_v48 = vpack.c.bf16 %v7828_v23, %v7819_v33  ;;  %v2563_v34 = vsub.f32 %v11089_v20, %v7532_v22 }
 0x532   : > { %v2579_v46 = vsub.f32 %v11085_v26, %v7504_v38  ;;  %11087 = vst [vmem:[#allocation15_spill] sm:$0xff] %v7842_v12  ;;  %v7852_v26 = vpop.eup %5893  ;;  %v2741_v38 = vmul.f32 1.442695, %v2551_v35  ;;  %v2743_v61 = vmul.f32 1.442695, %v2552_v29  ;;  %v4168_v11 = vpack.c.bf16 %v11092_v0, %v11091_v27  ;;  %v7877_v29 = vpop.xlane.xlu0 %2466 }
 0x533   : > { %v3279_v51 = vadd.f32 %v5884_v8, %v3278_v42  ;;  %11088 = vst [vmem:[#allocation127_spill] sm:$0xff] %v7852_v26  ;;  %v7867_v35 = vadd.f32 %v7674_v62, %v7667_v40  ;;  %v2799_v0 = vmul.f32 1.442695, %v2580_v24  ;;  %v3187_v27 = vsub.f32 1.0, %v3186_v3 }
 0x534   : > { %2487 = vmax.xlane.f32.xlu1 %v2486_v10  ;;  %v7846_v42 = vpop.xlane.xlu1 %2424  ;;  %2988 = vadd.xlane.f32.xlu0 %v7640_v56  ;;  %v11090_v10 = vld [vmem:[#allocation68_spill] sm:$0xff]  ;;  %v7869_v63 = vpop.eup %5895  ;;  %v4235_v20 = vunpack.c.l.b16 %v4153_v5  ;;  %vm3191_vm6 = vweird.f32 %v7821_v16 }
 0x535   : > { %v3283_v58 = vsel %vm3282_vm3, %v5884_v8, %v3279_v51  ;;  %v7848_v53 = vpop.xlane.xlu2 %2910  ;;  %v7859_v8 = vadd.f32 %v7663_v30, %v7658_v59  ;;  %v2564_v51 = vsub.f32 %v11090_v10, %v7532_v22  ;;  %11093 = vst [vmem:[#allocation128_spill] sm:$0xff] %v7869_v63  ;;  %v7880_v22 = vpop.eup %5897  ;;  %v4237_v10 = vunpack.c.l.b16 %v4154_v48  ;;  %vm7948_vm9 = vmor %vm3190_vm5, %vm3191_vm6 }
 0x536   : > { %v3288_v13 = vsel %vm3285_vm4, %v3287_v25, %v3283_v58  ;;  %v2797_v25 = vmul.f32 1.442695, %v2579_v46  ;;  %5901 = vrcp.f32 %v7848_v53  ;;  %11094 = vst [vmem:[#allocation65_spill] sm:$0xff] %v7880_v22  ;;  %v7882_v30 = vpop.eup %5899  ;;  %v2765_v46 = vmul.f32 1.442695, %v2563_v34 }
 0x537   : > { %v7872_v56 = vmul.f32 %v7332_v17, %v3288_v13  ;;  %v7875_v58 = vmul.f32 %v7336_v18, %v3288_v13  ;;  %11095 = vst [vmem:[#allocation68_spill] sm:$0xff] %v7882_v30  ;;  %5903 = vpow2.f32 %v2741_v38  ;;  %v4236_v59 = vunpack.c.h.b16 %v4153_v5 }
 0x538   : > { %v4238_v17 = vunpack.c.h.b16 %v4154_v48  ;;  %5905 = vpow2.f32 %v2743_v61  ;;  %v2767_v62 = vmul.f32 1.442695, %v2564_v51  ;;  %v4251_v18 = vpack.c.b16 %v4237_v10, %v4235_v20 }
 0x539   : > { %v7886_v13 = vadd.f32 %v7796_v21, %v7757_v39  ;;  %5907 = vpow2.f32 %v2797_v25  ;;  %v2948_v24 = vadd.f32 %v7880_v22, %v7869_v63  ;;  %v4167_v3 = vpack.c.bf16 %v7875_v58, %v7872_v56  ;;  %v11104_v21 = vld [vmem:[#allocation136_spill] sm:$0xff] }
 0x53a   : > { %v4252_v40 = vpack.c.b16 %v4238_v17, %v4236_v59  ;;  %5909 = vpow2.f32 %v2799_v0  ;;  %v3188_v38 = vmul.f32 %v7821_v16, %v3187_v27  ;;  %4274 = vmatpush.bf16.xpose.msra.mxu1 %v4251_v18  ;;  %v4327_v34 = vunpack.c.l.b16 %v4168_v11  ;;  %v11097_v0 = vld [vmem:[#allocation118_spill] sm:$0xff] }
 0x53b   : > { %v7900_v59 = vadd.f32 %v7842_v12, %v7832_v6  ;;  %5911 = vpow2.f32 %v2765_v46  ;;  %v4328_v51 = vunpack.c.h.b16 %v4168_v11  ;;  %v2921_v25 = vadd.f32 %v7882_v30, %v7852_v26  ;;  %v11101_v46 = vld [vmem:[#allocation135_spill] sm:$0xff] }
 0x53c   : > { %2991 = vadd.xlane.f32.xlu1 %v7700_v57  ;;  %v7894_v5 = vpop.xlane.xlu1 %2442  ;;  %v7902_v61 = vpop.eup %5901  ;;  %4288 = vmatpush.bf16.xpose.msra.mxu2 %v4252_v40  ;;  %v11098_v57 = vld [vmem:[#allocation119_spill] sm:$0xff]  ;;  %5913 = vpow2.f32 %v2767_v62  ;;  %v3194_v20 = vand.u32 2147483647, %v7528_v31  ;;  %v4325_v17 = vunpack.c.l.b16 %v4167_v3  ;;  %v11100_v40 = vld [vmem:[#allocation134_spill] sm:$0xff]  ;;  %v4326_v22 = vunpack.c.h.b16 %v4167_v3 }
 0x53d   : > { %11096 = vst [vmem:[#allocation109_spill] sm:$0xff] %v7894_v5  ;;  %v7896_v48 = vpop.xlane.xlu2 %2421  ;;  %2949 = vadd.xlane.f32.xlu0 %v2948_v24  ;;  %v7908_v27 = vpack.c.bf16 %v11098_v57, %v11097_v0  ;;  %v3246_v10 = vmul.f32 %v7902_v61, %v7848_v53  ;;  %v7913_v18 = vpop.eup %5903  ;;  %v2597_v11 = vsub.f32 %v11100_v40, %v7551_v49  ;;  %v3196_v6 = vand.u32 2147483648, %v7528_v31  ;;  %v11105_v40 = vld [vmem:[#allocation137_spill] sm:$0xff]  ;;  %v11142_v5 = vld [vmem:[#allocation126_spill] sm:$0xff] }
 0x53e   : > { %11099 = vst [vmem:[#allocation110_spill] sm:$0xff] %v7913_v18  ;;  %v2598_v24 = vsub.f32 %v11101_v46, %v7551_v49  ;;  %v7920_v0 = vpop.eup %5905  ;;  %v3189_v62 = vadd.f32 %v7821_v16, %v3188_v38  ;;  %v4335_v63 = vpack.c.b16 %v4327_v34, %v4325_v17  ;;  %v2599_v39 = vsub.f32 %v11104_v21, %v7570_v45  ;;  %v7931_v49 = vpop.xlane.xlu0 %2952 }
 0x53f   : > { %11102 = vst [vmem:[#allocation118_spill] sm:$0xff] %v7920_v0  ;;  %v3247_v57 = vsub.f32 1.0, %v3246_v10  ;;  %v7924_v12 = vpop.eup %5907  ;;  %v2600_v30 = vsub.f32 %v11105_v40, %v7570_v45  ;;  %v4336_v3 = vpack.c.b16 %v4328_v51, %v4326_v22  ;;  %vm7935_vm7 = vcmp.eq.f32.partialorder %v3194_v20, 8.507059e+37 }
 0x540   : > { %11103 = vst [vmem:[#allocation119_spill] sm:$0xff] %v7924_v12  ;;  %v7933_v46 = vpop.eup %5909  ;;  %vm3251_vm8 = vweird.f32 %v7902_v61  ;;  %v3256_v10 = vand.u32 2147483648, %v7848_v53  ;;  %v2833_v22 = vmul.f32 1.442695, %v2597_v11  ;;  %v2835_v51 = vmul.f32 1.442695, %v2598_v24 }
 0x541   : > { %11106 = vst [vmem:[#allocation134_spill] sm:$0xff] %v7933_v46  ;;  %v3248_v34 = vmul.f32 %v7902_v61, %v3247_v57  ;;  %v7942_v21 = vpop.eup %5911  ;;  %v2569_v20 = vsub.f32 %v7111_v4, %v7738_v9  ;;  %v3254_v17 = vand.u32 2147483647, %v7848_v53  ;;  %v2570_v31 = vsub.f32 %v7109_v28, %v7738_v9 }
 0x542   : > { %4349 = vmatpush.bf16.xpose.msrb.mxu1 %v4335_v63  ;;  %11109 = vst [vmem:[#allocation135_spill] sm:$0xff] %v7942_v21  ;;  %v7955_v57 = vpop.eup %5913  ;;  %v3193_v63 = vsel %vm7948_vm9, %v7821_v16, %v3189_v62  ;;  %vm3250_vm10 = vweird.f32 %v7848_v53  ;;  %v3197_v24 = vor.u32 1.1754944e-38, %v3196_v6  ;;  %v2839_v26 = vmul.f32 1.442695, %v2600_v30  ;;  %v11113_v6 = vld [vmem:[#allocation111_spill] sm:$0xff] }
 0x543   : > { %11112 = vst [vmem:[#allocation136_spill] sm:$0xff] %v7955_v57  ;;  %v3249_v40 = vadd.f32 %v7902_v61, %v3248_v34  ;;  %vm3252_vm11 = vmor %vm3250_vm10, %vm3251_vm8  ;;  %v2573_v28 = vsub.f32 %v7153_v55, %v7846_v42  ;;  %v3257_v16 = vor.u32 1.1754944e-38, %v3256_v10  ;;  %v2777_v53 = vmul.f32 1.442695, %v2569_v20  ;;  %v11114_v55 = vld [vmem:[#allocation10_spill] sm:$0xff]  ;;  %v11115_v34 = vld [vmem:[#allocation75_spill] sm:$0xff] }
 0x544   : > { %4363 = vmatpush.bf16.xpose.msrb.mxu2 %v4336_v3  ;;  %2982 = vadd.xlane.f32.xlu1 %v7867_v35  ;;  %v7965_v11 = vpop.xlane.xlu1 %2901  ;;  %v2837_v3 = vmul.f32 1.442695, %v2599_v39  ;;  %vm3255_vm12 = vcmp.eq.f32.partialorder %v3254_v17, 8.507059e+37  ;;  %v3198_v30 = vsel %vm7935_vm7, %v3197_v24, %v3193_v63  ;;  %v2779_v39 = vmul.f32 1.442695, %v2570_v31  ;;  %v11118_v20 = vld [vmem:[#allocation132_spill] sm:$0xff] }
 0x545   : > { %v7967_v4 = vpop.xlane.xlu2 %2904  ;;  %2922 = vadd.xlane.f32.xlu0 %v2921_v25  ;;  %5915 = vrcp.f32 %v7965_v11  ;;  %v3253_v9 = vsel %vm3252_vm11, %v7902_v61, %v3249_v40  ;;  %v2574_v35 = vsub.f32 %v11113_v6, %v7846_v42  ;;  %v2966_v45 = vadd.f32 %v7920_v0, %v7913_v18 }
 0x546   : > { %5917 = vrcp.f32 %v7967_v4  ;;  %v3258_v25 = vsel %vm3255_vm12, %v3257_v16, %v3253_v9  ;;  %v2785_v38 = vmul.f32 1.442695, %v2573_v28  ;;  %v7994_v42 = vmul.f32 %v11118_v20, %v3198_v30  ;;  %v11125_v20 = vld [vmem:[#allocation116_spill] sm:$0xff] }
 0x547   : > { %5919 = vpow2.f32 %v2833_v22  ;;  %v7983_v61 = vmul.f32 %v11114_v55, %v3258_v25  ;;  %v7986_v10 = vmul.f32 %v11115_v34, %v3258_v25  ;;  %v11116_v22 = vld [vmem:[#allocation130_spill] sm:$0xff]  ;;  %v4323_v63 = vunpack.c.l.b16 %v7908_v27 }
 0x548   : > { %5921 = vpow2.f32 %v2835_v51  ;;  %v7991_v51 = vmul.f32 %v11116_v22, %v3198_v30  ;;  %11119 = vst [vmem:[#allocation111_spill] sm:$0xff] %v7994_v42  ;;  %v4324_v31 = vunpack.c.h.b16 %v7908_v27  ;;  %v8002_v40 = vpack.c.bf16 %v7711_v50, %v7708_v43 }
 0x549   : > { %5923 = vpow2.f32 %v2837_v3  ;;  %v4165_v16 = vpack.c.bf16 %v7986_v10, %v7983_v61  ;;  %v2984_v43 = vadd.f32 %v7955_v57, %v7942_v21  ;;  %v8022_v50 = vadd.f32 %v7933_v46, %v7924_v12  ;;  %v11126_v12 = vld [vmem:[#allocation115_spill] sm:$0xff] }
 0x54a   : > { %v7980_v62 = vpop.xlane.xlu0 %2478  ;;  %5925 = vpow2.f32 %v2839_v26  ;;  %11117 = vst [vmem:[#allocation137_spill] sm:$0xff] %v7991_v51  ;;  %v2787_v26 = vmul.f32 1.442695, %v2574_v35  ;;  %v11123_v35 = vld [vmem:[#allocation133_spill] sm:$0xff]  ;;  %vm3220_vm14 = vweird.f32 %v7967_v4  ;;  %vm3205_vm2 = vweird.f32 %v7965_v11 }
 0x54b   : > { %v7996_v17 = vpop.eup %5915  ;;  %5927 = vpow2.f32 %v2777_v53  ;;  %v2596_v25 = vsub.f32 %v11123_v35, %v7804_v15 }
 0x54c   : > { %v8004_v24 = vpop.eup %5917  ;;  %5929 = vpow2.f32 %v2779_v39  ;;  %v3201_v3 = vmul.f32 %v7996_v17, %v7965_v11  ;;  %v8008_v28 = vpop.xlane.xlu1 %2934  ;;  %v11122_v39 = vld [vmem:[#allocation131_spill] sm:$0xff]  ;;  %vm3206_vm0 = vweird.f32 %v7996_v17 }
 0x54d   : > { %v2428_v9 = vpop.xlane.xlu2 %2427  ;;  %v8012_v53 = vpop.eup %5919  ;;  %v3216_v27 = vmul.f32 %v8004_v24, %v7967_v4  ;;  %2925 = vadd.xlane.f32.xlu0 %v7755_v14  ;;  %5931 = vrcp.f32 %v8008_v28  ;;  %v2595_v6 = vsub.f32 %v11122_v39, %v7804_v15  ;;  %v8032_v14 = vpack.c.bf16 %v7994_v42, %v7991_v51  ;;  %vm8098_vm3 = vmor %vm3205_vm2, %vm3206_vm0 }
 0x54e   : > { %11120 = vst [vmem:[#allocation10_spill] sm:$0xff] %v8012_v53  ;;  %v8024_v30 = vpop.eup %5921  ;;  %5933 = vpow2.f32 %v2785_v38  ;;  %v3202_v34 = vsub.f32 1.0, %v3201_v3  ;;  %v2575_v46 = vsub.f32 %v11125_v20, %v2428_v9  ;;  %v2576_v57 = vsub.f32 %v11126_v12, %v2428_v9 }
 0x54f   : > { %11121 = vst [vmem:[#allocation75_spill] sm:$0xff] %v8024_v30  ;;  %v8034_v55 = vpop.eup %5923  ;;  %v3217_v22 = vsub.f32 1.0, %v3216_v27  ;;  %5935 = vpow2.f32 %v2787_v26  ;;  %vm3221_vm13 = vweird.f32 %v8004_v24  ;;  %v3226_v15 = vand.u32 2147483648, %v7967_v4 }
 0x550   : > { %11124 = vst [vmem:[#allocation130_spill] sm:$0xff] %v8034_v55  ;;  %v8038_v21 = vpop.eup %5925  ;;  %v4321_v38 = vunpack.c.l.b16 %v4165_v16  ;;  %v2789_v0 = vmul.f32 1.442695, %v2575_v46  ;;  %v2791_v18 = vmul.f32 1.442695, %v2576_v57  ;;  %v4322_v3 = vunpack.c.h.b16 %v4165_v16  ;;  %vm8060_vm15 = vmor %vm3220_vm14, %vm3221_vm13 }
 0x551   : > { %11127 = vst [vmem:[#allocation132_spill] sm:$0xff] %v8038_v21  ;;  %v8042_v39 = vpop.eup %5927  ;;  %v3218_v35 = vmul.f32 %v8004_v24, %v3217_v22  ;;  %v3224_v12 = vand.u32 2147483647, %v7967_v4  ;;  %v3203_v42 = vmul.f32 %v7996_v17, %v3202_v34  ;;  %v2829_v16 = vmul.f32 1.442695, %v2595_v6 }
 0x552   : > { %11128 = vst [vmem:[#allocation131_spill] sm:$0xff] %v8042_v39  ;;  %v8045_v27 = vpop.xlane.xlu0 %2928  ;;  %v8047_v20 = vpop.eup %5929  ;;  %v4333_v26 = vpack.c.b16 %v4323_v63, %v4321_v38  ;;  %v4334_v46 = vpack.c.b16 %v4324_v31, %v4322_v3  ;;  %v2831_v38 = vmul.f32 1.442695, %v2596_v25  ;;  %v3227_v31 = vor.u32 1.1754944e-38, %v3226_v15 }
 0x553   : > { %11129 = vst [vmem:[#allocation133_spill] sm:$0xff] %v8047_v20  ;;  %5937 = vrcp.f32 %v8045_v27  ;;  %v8052_v9 = vpop.eup %5931  ;;  %v3219_v22 = vadd.f32 %v8004_v24, %v3218_v35  ;;  %vm3225_vm1 = vcmp.eq.f32.partialorder %v3224_v12, 8.507059e+37  ;;  %v11134_v35 = vld [vmem:[#allocation124_spill] sm:$0xff]  ;;  %v3204_v25 = vadd.f32 %v7996_v17, %v3203_v42 }
 0x554   : > { %5939 = vpow2.f32 %v2789_v0  ;;  %v8056_v57 = vpop.eup %5933  ;;  %4350 = vmatpush.bf16.xpose.msrb.mxu1 %v4333_v26  ;;  %2967 = vadd.xlane.f32.xlu2 %v2966_v45  ;;  %v8078_v26 = vpop.xlane.xlu1 %2436  ;;  %v3211_v15 = vand.u32 2147483648, %v7965_v11  ;;  %v3209_v42 = vand.u32 2147483647, %v7965_v11  ;;  %vm3370_vm5 = vweird.f32 %v8008_v28 }
 0x555   : > { %11130 = vst [vmem:[#allocation116_spill] sm:$0xff] %v8056_v57  ;;  %5941 = vpow2.f32 %v2791_v18  ;;  %v2431_v4 = vpop.xlane.xlu2 %2430  ;;  %v3223_v0 = vsel %vm8060_vm15, %v8004_v24, %v3219_v22  ;;  %4364 = vmatpush.bf16.xpose.msrb.mxu2 %v4334_v46  ;;  %2985 = vadd.xlane.f32.xlu0 %v2984_v43  ;;  %v8070_v6 = vpop.eup %5935  ;;  %v3366_v18 = vmul.f32 %v8052_v9, %v8008_v28  ;;  %vm3371_vm6 = vweird.f32 %v8052_v9 }
 0x556   : > { %5943 = vrcp.f32 %v7931_v49  ;;  %11133 = vst [vmem:[#allocation115_spill] sm:$0xff] %v8070_v6  ;;  %v2577_v45 = vsub.f32 %v7228_v1, %v2431_v4  ;;  %v2578_v3 = vsub.f32 %v11134_v35, %v2431_v4  ;;  %v3228_v51 = vsel %vm3225_vm1, %v3227_v31, %v3223_v0  ;;  %v11147_v31 = vld [vmem:[#allocation16_spill] sm:$0xff]  ;;  %vm8181_vm8 = vmor %vm3370_vm5, %vm3371_vm6 }
 0x557   : > { %v8086_v1 = vpack.c.bf16 %v7607_v7, %v7604_v36  ;;  %5945 = vpow2.f32 %v2829_v16  ;;  %v3367_v36 = vsub.f32 1.0, %v3366_v18  ;;  %v11139_v16 = vld [vmem:[#allocation7_spill] sm:$0xff]  ;;  %v3212_v34 = vor.u32 1.1754944e-38, %v3211_v15 }
 0x558   : > { %v2793_v12 = vmul.f32 1.442695, %v2577_v45  ;;  %v2795_v22 = vmul.f32 1.442695, %v2578_v3  ;;  %5947 = vpow2.f32 %v2831_v38  ;;  %v8105_v45 = vmul.f32 %v11139_v16, %v3228_v51  ;;  %v11141_v16 = vld [vmem:[#allocation35_spill] sm:$0xff] }
 0x559   : > { %v8081_v43 = vpop.eup %5937  ;;  %v3208_v38 = vsel %vm8098_vm3, %v7996_v17, %v3204_v25  ;;  %v8119_v63 = vmul.f32 %v11141_v16, %v3228_v51  ;;  %vm3210_vm4 = vcmp.eq.f32.partialorder %v3209_v42, 8.507059e+37  ;;  %v3368_v25 = vmul.f32 %v8052_v9, %v3367_v36 }
 0x55a   : > { %v8088_v46 = vpop.eup %5939  ;;  %v3336_v4 = vmul.f32 %v8081_v43, %v8045_v27  ;;  %v8102_v7 = vpop.xlane.xlu0 %2931  ;;  %5949 = vpow2.f32 %v2793_v12  ;;  %v2993_v51 = vadd.f32 %v8047_v20, %v8042_v39  ;;  %v3213_v15 = vsel %vm3210_vm4, %v3212_v34, %v3208_v38  ;;  %v11145_v34 = vld [vmem:[#allocation6_spill] sm:$0xff] }
 0x55b   : > { %11135 = vst [vmem:[#allocation124_spill] sm:$0xff] %v8088_v46  ;;  %v8094_v0 = vpop.eup %5941  ;;  %5951 = vpow2.f32 %v2795_v22  ;;  %v2999_v42 = vadd.f32 %v8070_v6, %v8056_v57  ;;  %v3374_v36 = vand.u32 2147483647, %v8008_v28  ;;  %v3376_v16 = vand.u32 2147483648, %v8008_v28 }
 0x55c   : > { %11136 = vst [vmem:[#allocation146_spill] sm:$0xff] %v8094_v0  ;;  %v8108_v35 = vpop.eup %5943  ;;  %v3337_v3 = vsub.f32 1.0, %v3336_v4  ;;  %v3002_v24 = vadd.f32 %v8094_v0, %v8088_v46  ;;  %2946 = vadd.xlane.f32.xlu2 %v7859_v8  ;;  %5953 = vrcp.f32 %v8102_v7  ;;  %v4163_v8 = vpack.c.bf16 %v8119_v63, %v8105_v45  ;;  %v8152_v20 = vpop.xlane.xlu1 %2469  ;;  %v11149_v0 = vld [vmem:[#allocation94_spill] sm:$0xff] }
 0x55d   : > { %v8116_v18 = vpop.xlane.xlu2 %2445  ;;  %v8131_v12 = vpop.eup %5945  ;;  %v8135_v22 = vmul.f32 %v8108_v35, %v7931_v49  ;;  %v2581_v38 = vsub.f32 %v11145_v34, %v8078_v26  ;;  %11148 = vst [vmem:[#allocation16_spill] sm:$0xff] %v8152_v20  ;;  %v4043_v46 = vmul.f32 %v11149_v0, %v3213_v15  ;;  %v3369_v57 = vadd.f32 %v8052_v9, %v3368_v25 }
 0x55e   : > { %11140 = vst [vmem:[#allocation7_spill] sm:$0xff] %v8116_v18  ;;  %3003 = vadd.xlane.f32.xlu1 %v3002_v24  ;;  %v3338_v24 = vmul.f32 %v8081_v43, %v3337_v3  ;;  %v8141_v4 = vpop.eup %5947  ;;  %v4317_v17 = vunpack.c.l.b16 %v4163_v8  ;;  %v2582_v3 = vsub.f32 %v11147_v31, %v8078_v26  ;;  %v4318_v39 = vunpack.c.h.b16 %v4163_v8 }
 0x55f   : > { %11143 = vst [vmem:[#allocation35_spill] sm:$0xff] %v8131_v12  ;;  %vm3341_vm7 = vweird.f32 %v8081_v43  ;;  %v11151_v34 = vunpack.c.l.b16 %v8002_v40  ;;  %v4044_v37 = vmul.f32 %v11152_v41, %v3213_v15  ;;  %v11153_v31 = vunpack.c.h.b16 %v8002_v40 }
 0x560   : > { %11144 = vst [vmem:[#allocation126_spill] sm:$0xff] %v8141_v4  ;;  %v8147_v11 = vpop.eup %5949  ;;  %v3339_v26 = vadd.f32 %v8081_v43, %v3338_v24  ;;  %v8170_v20 = vadd.f32 %v4043_v46, %v7819_v33  ;;  %v3346_v25 = vand.u32 2147483648, %v8045_v27  ;;  %v2801_v44 = vmul.f32 1.442695, %v2581_v38 }
 0x561   : > { %11146 = vst [vmem:[#allocation6_spill] sm:$0xff] %v8147_v11  ;;  %v8155_v6 = vpop.eup %5951  ;;  %v4331_v18 = vpack.c.b16 %v11151_v34, %v4317_v17  ;;  %v4332_v8 = vpack.c.b16 %v11153_v31, %v4318_v39  ;;  %v4162_v15 = vpack.c.bf16 %v4044_v37, %v4043_v46  ;;  %vm3340_vm9 = vweird.f32 %v8045_v27 }
 0x562   : > { %11150 = vst [vmem:[#allocation94_spill] sm:$0xff] %v8155_v6  ;;  %v8162_v54 = vpop.eup %5953  ;;  %v3005_v0 = vadd.f32 %v8155_v6, %v8147_v11  ;;  %v3344_v33 = vand.u32 2147483647, %v8045_v27  ;;  %v2803_v39 = vmul.f32 1.442695, %v2582_v3  ;;  %v3373_v46 = vsel %vm8181_vm8, %v8052_v9, %v3369_v57  ;;  %vm8193_vm10 = vmor %vm3340_vm9, %vm3341_vm7 }
 0x563   : > { %v3351_v17 = vmul.f32 %v8162_v54, %v8102_v7  ;;  %4351 = vmatpush.bf16.xpose.msrb.mxu1 %v4331_v18  ;;  %4365 = vmatpush.bf16.xpose.msrb.mxu2 %v4332_v8  ;;  %v4315_v24 = vunpack.c.l.b16 %v4162_v15  ;;  %v3032_v27 = vadd.f32 %v8141_v4, %v8131_v12  ;;  %v8203_v38 = vadd.f32 %v4044_v37, %v7828_v23  ;;  %v11158_v8 = vld [vmem:[#allocation61_spill] sm:$0xff] }
 0x564   : > { %3000 = vadd.xlane.f32.xlu2 %v2999_v42  ;;  %3006 = vadd.xlane.f32.xlu0 %v3005_v0  ;;  %v3377_v42 = vor.u32 1.1754944e-38, %v3376_v16  ;;  %v4316_v9 = vunpack.c.h.b16 %v4162_v15  ;;  %v3457_v57 = vsub.f32 1.0, %v8135_v22  ;;  %vm3375_vm11 = vcmp.eq.f32.partialorder %v3374_v36, 8.507059e+37  ;;  %v8214_v22 = vpop.xlane.xlu1 %2472  ;;  %v11162_v15 = vld [vmem:[#allocation32_spill] sm:$0xff] }
 0x565   : > { %v8175_v41 = vpop.xlane.xlu2 %2940  ;;  %v3352_v18 = vsub.f32 1.0, %v3351_v17  ;;  %v3347_v3 = vor.u32 1.1754944e-38, %v3346_v25  ;;  %vm3345_vm12 = vcmp.eq.f32.partialorder %v3344_v33, 8.507059e+37  ;;  %v5131_v16 = vadd.f32 %v7983_v61, %v7513_v2  ;;  %v11161_v25 = vld [vmem:[#allocation92_spill] sm:$0xff]  ;;  %v11254_v12 = vld [vmem:[#allocation7_spill] sm:$0xff] }
 0x566   : > { %2994 = vadd.xlane.f32.xlu1 %v2993_v51  ;;  %5955 = vrcp.f32 %v8175_v41  ;;  %v3343_v51 = vsel %vm8193_vm10, %v8081_v43, %v3339_v26  ;;  %v3378_v31 = vsel %vm3375_vm11, %v3377_v42, %v3373_v46  ;;  %v5138_v43 = vadd.f32 %v7986_v10, %v11158_v8  ;;  %v11163_v46 = vld [vmem:[#allocation31_spill] sm:$0xff] }
 0x567   : > { %5957 = vpow2.f32 %v2801_v44  ;;  %v3353_v34 = vmul.f32 %v8162_v54, %v3352_v18  ;;  %v11159_v37 = vunpack.c.l.b16 %v8032_v14  ;;  %v3348_v26 = vsel %vm3345_vm12, %v3347_v3, %v3343_v51  ;;  %v11164_v18 = vld [vmem:[#allocation138_spill] sm:$0xff] }
 0x568   : > { %5959 = vpow2.f32 %v2803_v39  ;;  %vm3355_vm13 = vweird.f32 %v8102_v7  ;;  %v11160_v44 = vunpack.c.h.b16 %v8032_v14  ;;  %v8219_v17 = vmul.f32 %v11161_v25, %v3378_v31  ;;  %v11169_v25 = vld [vmem:[#allocation129_spill] sm:$0xff] }
 0x569   : > { %v4329_v23 = vpack.c.b16 %v4315_v24, %v11159_v37  ;;  %v8222_v2 = vmul.f32 %v11162_v15, %v3378_v31  ;;  %v3359_v61 = vand.u32 2147483647, %v8102_v7  ;;  %v3361_v10 = vand.u32 2147483648, %v8102_v7 }
 0x56a   : > { %v4330_v36 = vpack.c.b16 %v4316_v9, %v11160_v44  ;;  %v5103_v40 = vadd.f32 %v8105_v45, %v7688_v32  ;;  %v3354_v39 = vadd.f32 %v8162_v54, %v3353_v34  ;;  %vm3356_vm14 = vweird.f32 %v8162_v54  ;;  %v11166_v9 = vld [vmem:[#allocation85_spill] sm:$0xff] }
 0x56b   : > { %4352 = vmatpush.bf16.xpose.msrb.mxu1 %v4329_v23  ;;  %v8233_v28 = vmul.f32 %v11163_v46, %v3348_v26  ;;  %v8236_v24 = vmul.f32 %v11164_v18, %v3348_v26  ;;  %v5110_v32 = vadd.f32 %v8119_v63, %v7691_v47  ;;  %v3406_v31 = vand.u32 2147483648, %v8175_v41  ;;  %vm8259_vm15 = vmor %vm3355_vm13, %vm3356_vm14  ;;  %v11171_v46 = vld [vmem:[#allocation80_spill] sm:$0xff] }
 0x56c   : > { %v5956_v0 = vpop.eup %5955  ;;  %2976 = vadd.xlane.f32.xlu2 %v7886_v13  ;;  %4366 = vmatpush.bf16.xpose.msrb.mxu2 %v4330_v36  ;;  %v11165_v13 = vld [vmem:[#allocation91_spill] sm:$0xff]  ;;  %v8250_v8 = vadd.f32 %v5131_v16, %v8219_v17  ;;  %v8253_v37 = vadd.f32 %v5138_v43, %v8222_v2  ;;  %v3358_v16 = vsel %vm8259_vm15, %v8162_v54, %v3354_v39  ;;  %v3362_v26 = vor.u32 1.1754944e-38, %v3361_v10 }
 0x56d   : > { %v3396_v33 = vmul.f32 %v5956_v0, %v8175_v41  ;;  %v2440_v14 = vpop.xlane.xlu2 %2439  ;;  %v8238_v42 = vpop.eup %5957  ;;  %3009 = vadd.xlane.f32.xlu0 %v8022_v50  ;;  %vm3401_vm1 = vweird.f32 %v5956_v0  ;;  %v8267_v43 = vadd.f32 %v5103_v40, %v8233_v28  ;;  %v8270_v44 = vadd.f32 %v5110_v32, %v8236_v24 }
 0x56e   : > { %3033 = vadd.xlane.f32.xlu1 %v3032_v27  ;;  %v2583_v51 = vsub.f32 %v11165_v13, %v2440_v14  ;;  %v2584_v3 = vsub.f32 %v11166_v9, %v2440_v14  ;;  %v8245_v34 = vpop.eup %5959  ;;  %v3404_v27 = vand.u32 2147483647, %v8175_v41  ;;  %vm3400_vm0 = vweird.f32 %v8175_v41  ;;  %v11170_v41 = vld [vmem:[#allocation79_spill] sm:$0xff] }
 0x56f   : > { %v3397_v45 = vsub.f32 1.0, %v3396_v33  ;;  %v3011_v36 = vadd.f32 %v8245_v34, %v8238_v42  ;;  %v2594_v15 = vsub.f32 %v11169_v25, %v7650_v19  ;;  %vm3360_vm2 = vcmp.eq.f32.partialorder %v3359_v61, 8.507059e+37  ;;  %vm3402_vm3 = vmor %vm3400_vm0, %vm3401_vm1  ;;  %v11172_v61 = vld [vmem:[#allocation107_spill] sm:$0xff] }
 0x570   : > { %v2805_v63 = vmul.f32 1.442695, %v2583_v51  ;;  %v2807_v23 = vmul.f32 1.442695, %v2584_v3  ;;  %v3407_v54 = vor.u32 1.1754944e-38, %v3406_v31  ;;  %v3458_v10 = vmul.f32 %v8108_v35, %v3457_v57  ;;  %v11174_v51 = vld [vmem:[#allocation98_spill] sm:$0xff] }
 0x571   : > { %v3398_v50 = vmul.f32 %v5956_v0, %v3397_v45  ;;  %vm3405_vm4 = vcmp.eq.f32.partialorder %v3404_v27, 8.507059e+37  ;;  %v3363_v14 = vsel %vm3360_vm2, %v3362_v26, %v3358_v16  ;;  %v5159_v39 = vadd.f32 %v7872_v56, %v11170_v41  ;;  %v8284_v45 = vpop.xlane.xlu1 %2955  ;;  %v11175_v3 = vld [vmem:[#allocation140_spill] sm:$0xff] }
 0x572   : > { %5961 = vpow2.f32 %v2805_v63  ;;  %v5166_v18 = vadd.f32 %v7875_v58, %v11171_v46  ;;  %v2571_v57 = vsub.f32 %v11172_v61, %v7896_v48  ;;  %v11176_v56 = vsub.f32 %v11142_v5, %v7650_v19  ;;  %v11177_v58 = vld [vmem:[#allocation66_spill] sm:$0xff]  ;;  %v11183_v61 = vld [vmem:[#allocation53_spill] sm:$0xff] }
 0x573   : > { %v3399_v7 = vadd.f32 %v5956_v0, %v3398_v50  ;;  %5963 = vpow2.f32 %v2807_v23  ;;  %vm3461_vm5 = vweird.f32 %v8108_v35  ;;  %v8298_v47 = vmul.f32 %v11177_v58, %v3363_v14  ;;  %v11178_v50 = vld [vmem:[#allocation67_spill] sm:$0xff] }
 0x574   : > { %3012 = vadd.xlane.f32.xlu2 %v3011_v36  ;;  %v2825_v31 = vmul.f32 1.442695, %v11176_v56  ;;  %v8301_v63 = vmul.f32 %v11178_v50, %v3363_v14  ;;  %v2827_v5 = vmul.f32 1.442695, %v2594_v15  ;;  %vm3460_vm6 = vweird.f32 %v7931_v49 }
 0x575   : > { %v3403_v40 = vsel %vm3402_vm3, %v5956_v0, %v3399_v7  ;;  %v8278_v33 = vpop.xlane.xlu2 %2937  ;;  %v11173_v0 = vld [vmem:[#allocation106_spill] sm:$0xff]  ;;  %v3466_v7 = vand.u32 2147483648, %v7931_v49  ;;  %v3464_v25 = vand.u32 2147483647, %v7931_v49  ;;  %vm8320_vm7 = vmor %vm3460_vm6, %vm3461_vm5  ;;  %v8326_v46 = vadd.f32 %v7720_v52, %v8298_v47 }
 0x576   : > { %v3408_v32 = vsel %vm3405_vm4, %v3407_v54, %v3403_v40  ;;  %5965 = vrcp.f32 %v8278_v33  ;;  %v2572_v13 = vsub.f32 %v11173_v0, %v7896_v48  ;;  %v3459_v48 = vadd.f32 %v8108_v35, %v3458_v10  ;;  %v11181_v49 = vld [vmem:[#allocation82_spill] sm:$0xff] }
 0x577   : > { %v4069_v9 = vmul.f32 %v11174_v51, %v3408_v32  ;;  %v4070_v27 = vmul.f32 %v11175_v3, %v3408_v32  ;;  %5967 = vrcp.f32 %v8284_v45  ;;  %v2781_v54 = vmul.f32 1.442695, %v2571_v57  ;;  %v11182_v32 = vld [vmem:[#allocation101_spill] sm:$0xff] }
 0x578   : > { %v8303_v23 = vpop.eup %5961  ;;  %v2783_v40 = vmul.f32 1.442695, %v2572_v13  ;;  %v2553_v57 = vsub.f32 %v11183_v61, %v11182_v32  ;;  %5969 = vpow2.f32 %v2825_v31  ;;  %v3463_v0 = vsel %vm8320_vm7, %v8108_v35, %v3459_v48 }
 0x579   : > { %v8306_v16 = vadd.f32 %v5159_v39, %v4069_v9  ;;  %v8308_v26 = vadd.f32 %v5166_v18, %v4070_v27  ;;  %v8311_v19 = vpop.eup %5963  ;;  %v4175_v36 = vpack.c.bf16 %v4070_v27, %v4069_v9  ;;  %v8330_v18 = vadd.f32 %v11181_v49, %v8301_v63 }
 0x57a   : > { %v3014_v10 = vadd.f32 %v8311_v19, %v8303_v23  ;;  %5971 = vpow2.f32 %v2827_v5  ;;  %v3467_v52 = vor.u32 1.1754944e-38, %v3466_v7  ;;  %v11184_v9 = vunpack.c.l.b16 %v8086_v1 }
 0x57b   : > { %v4403_v15 = vunpack.c.l.b16 %v4175_v36  ;;  %v4404_v39 = vunpack.c.h.b16 %v4175_v36  ;;  %v11185_v27 = vunpack.c.h.b16 %v8086_v1  ;;  %vm3465_vm8 = vcmp.eq.f32.partialorder %v3464_v25, 8.507059e+37  ;;  %v11186_v1 = vld [vmem:[#allocation78_spill] sm:$0xff] }
 0x57c   : > { %v5966_v14 = vpop.eup %5965  ;;  %3015 = vadd.xlane.f32.xlu0 %v3014_v10  ;;  %2979 = vadd.xlane.f32.xlu2 %v7900_v59  ;;  %5973 = vpow2.f32 %v2781_v54  ;;  %v3391_v58 = vand.u32 2147483648, %v8278_v33  ;;  %v3035_v59 = vadd.f32 %v8024_v30, %v8012_v53  ;;  %v3468_v50 = vsel %vm3465_vm8, %v3467_v52, %v3463_v0  ;;  %v11187_v36 = vld [vmem:[#allocation54_spill] sm:$0xff]  ;;  %v694_v0 = vld [vmem:[%s10500_s5 + $0x80] sm:$0xff]  ;;  %v11344_v30 = vld [vmem:[#allocation11_spill] sm:$0xff] }
 0x57d   : > { %v3381_v13 = vmul.f32 %v5966_v14, %v8278_v33  ;;  %v8339_v51 = vpop.xlane.xlu2 %2475  ;;  %v4413_v3 = vpack.c.b16 %v11184_v9, %v4403_v15  ;;  %v4414_v56 = vpack.c.b16 %v11185_v27, %v4404_v39  ;;  %v8345_v31 = vpop.eup %5967  ;;  %5975 = vpow2.f32 %v2783_v40  ;;  %v11188_v10 = vld [vmem:[#allocation90_spill] sm:$0xff] }
 0x57e   : > { %vm3386_vm9 = vweird.f32 %v5966_v14  ;;  %v3389_v5 = vand.u32 2147483647, %v8278_v33  ;;  %v8352_v7 = vmul.f32 %v11186_v1, %v3468_v50  ;;  %v2554_v25 = vsub.f32 %v11187_v36, %v11182_v32  ;;  %v8361_v15 = vpop.eup %5969 }
 0x57f   : > { %v3382_v35 = vsub.f32 1.0, %v3381_v13  ;;  %4427 = vmatpush.bf16.xpose.msra.mxu3 %v4413_v3  ;;  %4441 = vmatpush.bf16.xpose.msrb.mxu0 %v4414_v56  ;;  %v2745_v54 = vmul.f32 1.442695, %v2553_v57  ;;  %v3471_v40 = vmul.f32 %v8345_v31, %v8284_v45  ;;  %v8359_v41 = vmul.f32 %v11188_v10, %v3468_v50  ;;  %11189 = vst [vmem:[#allocation8_spill] sm:$0xff] %v8361_v15  ;;  %v11196_v50 = vld [vmem:[#allocation97_spill] sm:$0xff] }
 0x580   : > { %vm3385_vm10 = vweird.f32 %v8278_v33  ;;  %v3038_v49 = vadd.f32 %v8038_v21, %v8034_v55  ;;  %v8368_v61 = vadd.f32 %v8267_v43, %v8352_v7  ;;  %v8370_v32 = vpop.eup %5971  ;;  %v3392_v57 = vor.u32 1.1754944e-38, %v3391_v58  ;;  %v11345_v21 = vld [vmem:[#allocation12_spill] sm:$0xff] }
 0x581   : > { %v3383_v48 = vmul.f32 %v5966_v14, %v3382_v35  ;;  %11191 = vst [vmem:[#allocation92_spill] sm:$0xff] %v8370_v32  ;;  %vm3387_vm11 = vmor %vm3385_vm10, %vm3386_vm9  ;;  %v8377_v13 = vadd.f32 %v8270_v44, %v8359_v41  ;;  %vm3390_vm12 = vcmp.eq.f32.partialorder %v3389_v5, 8.507059e+37  ;;  %v2747_v9 = vmul.f32 1.442695, %v2554_v25  ;;  %v11195_v35 = vld [vmem:[#allocation77_spill] sm:$0xff]  ;;  %v11199_v25 = vld [vmem:[#allocation120_spill] sm:$0xff] }
 0x582   : > { %11190 = vst [vmem:[#allocation61_spill] sm:$0xff] %v8368_v61  ;;  %v8379_v33 = vpop.eup %5973  ;;  %v3472_v3 = vsub.f32 1.0, %v3471_v40  ;;  %5977 = vpow2.f32 %v2745_v54  ;;  %v11200_v40 = vld [vmem:[#allocation121_spill] sm:$0xff]  ;;  %vm3476_vm13 = vweird.f32 %v8345_v31  ;;  %vm3475_vm14 = vweird.f32 %v8284_v45 }
 0x583   : > { %v3384_v39 = vadd.f32 %v5966_v14, %v3383_v48  ;;  %11192 = vst [vmem:[#allocation32_spill] sm:$0xff] %v8377_v13  ;;  %v8381_v43 = vpop.eup %5975  ;;  %v4173_v48 = vpack.c.bf16 %v8222_v2, %v8219_v17  ;;  %v3029_v17 = vadd.f32 %v8370_v32, %v8361_v15  ;;  %vm8425_vm15 = vmor %vm3475_vm14, %vm3476_vm13  ;;  %v11255_v32 = vld [vmem:[#allocation113_spill] sm:$0xff]  ;;  %v11257_v15 = vld [vmem:[#allocation114_spill] sm:$0xff] }
 0x584   : > { %11193 = vst [vmem:[#allocation31_spill] sm:$0xff] %v8379_v33  ;;  %3039 = vadd.xlane.f32.xlu0 %v3038_v49  ;;  %3036 = vadd.xlane.f32.xlu2 %v3035_v59  ;;  %v11198_v59 = vld [vmem:[#allocation27_spill] sm:$0xff]  ;;  %v2996_v2 = vadd.f32 %v8381_v43, %v8379_v33 }
 0x585   : > { %v3388_v52 = vsel %vm3387_vm11, %v5966_v14, %v3384_v39  ;;  %11194 = vst [vmem:[#allocation138_spill] sm:$0xff] %v8381_v43  ;;  %v11197_v14 = vld [vmem:[#allocation28_spill] sm:$0xff]  ;;  %v2610_v1 = vsub.f32 %v11198_v59, %v7980_v62  ;;  %v3473_v39 = vmul.f32 %v8345_v31, %v3472_v3  ;;  %v4399_v49 = vunpack.c.l.b16 %v4173_v48 }
 0x586   : > { %v3393_v27 = vsel %vm3390_vm12, %v3392_v57, %v3388_v52  ;;  %v8383_v56 = vpop.xlane.xlu2 %2958  ;;  %v2609_v5 = vsub.f32 %v11197_v14, %v7980_v62  ;;  %v2482_v14 = vpop.xlane.xlu1 %2481  ;;  %v4171_v59 = vpack.c.bf16 %v8236_v24, %v8233_v28  ;;  %v11212_v43 = vld [vmem:[#allocation76_spill] sm:$0xff] }
 0x587   : > { %792 = vperm.xlu1 %5639, %v694_v0   ;;  %v4067_v58 = vmul.f32 %v11195_v35, %v3393_v27  ;;  %v4068_v44 = vmul.f32 %v11196_v50, %v3393_v27  ;;  %5979 = vrcp.f32 %v8383_v56  ;;  %v4400_v0 = vunpack.c.h.b16 %v4173_v48  ;;  %v696_v27 = vld [vmem:[%s10500_s5 + $0x90] sm:$0xff] }
 0x588   : > { %5981 = vpow2.f32 %v2747_v9  ;;  %v2857_v52 = vmul.f32 1.442695, %v2609_v5  ;;  %v8408_v35 = vpop.eup %5977  ;;  %v2859_v9 = vmul.f32 1.442695, %v2610_v1  ;;  %v4172_v50 = vpack.c.bf16 %v8301_v63, %v8298_v47 }
 0x589   : > { %v4174_v36 = vpack.c.bf16 %v4068_v44, %v4067_v58  ;;  %v8395_v54 = vadd.f32 %v11199_v25, %v4067_v58  ;;  %v8398_v10 = vadd.f32 %v11200_v40, %v4068_v44  ;;  %11201 = vst [vmem:[#allocation91_spill] sm:$0xff] %v8408_v35  ;;  %v3474_v48 = vadd.f32 %v8345_v31, %v3473_v39  ;;  %v11205_v25 = vld [vmem:[#allocation70_spill] sm:$0xff]  ;;  %v11206_v39 = vld [vmem:[#allocation69_spill] sm:$0xff] }
 0x58a   : > { %v3481_v5 = vand.u32 2147483648, %v8284_v45  ;;  %5983 = vpow2.f32 %v2857_v52  ;;  %v3479_v47 = vand.u32 2147483647, %v8284_v45  ;;  %v2611_v40 = vsub.f32 %v11205_v25, %v2482_v14  ;;  %v11207_v45 = vld [vmem:[#allocation103_spill] sm:$0xff] }
 0x58b   : > { %v4401_v57 = vunpack.c.l.b16 %v4174_v36  ;;  %v4402_v62 = vunpack.c.h.b16 %v4174_v36  ;;  %5985 = vpow2.f32 %v2859_v9  ;;  %v2612_v28 = vsub.f32 %v11206_v39, %v2482_v14  ;;  %v11211_v39 = vld [vmem:[#allocation63_spill] sm:$0xff] }
 0x58c   : > { %3030 = vadd.xlane.f32.xlu0 %v3029_v17  ;;  %2997 = vadd.xlane.f32.xlu2 %v2996_v2  ;;  %v4397_v24 = vunpack.c.l.b16 %v4172_v50  ;;  %v3478_v17 = vsel %vm8425_vm15, %v8345_v31, %v3474_v48  ;;  %v4398_v2 = vunpack.c.h.b16 %v4172_v50  ;;  %v4395_v52 = vunpack.c.l.b16 %v4171_v59 }
 0x58d   : > { %v4411_v3 = vpack.c.b16 %v4401_v57, %v4399_v49  ;;  %v4412_v58 = vpack.c.b16 %v4402_v62, %v4400_v0  ;;  %v8412_v44 = vpop.eup %5979  ;;  %v11208_v49 = vld [vmem:[#allocation55_spill] sm:$0xff]  ;;  %v3482_v0 = vor.u32 1.1754944e-38, %v3481_v5  ;;  %vm3480_vm1 = vcmp.eq.f32.partialorder %v3479_v47, 8.507059e+37 }
 0x58e   : > { %v8419_v1 = vpop.eup %5981  ;;  %v3486_v63 = vmul.f32 %v8412_v44, %v8383_v56  ;;  %v2555_v57 = vsub.f32 %v11208_v49, %v11207_v45  ;;  %v4396_v14 = vunpack.c.h.b16 %v4171_v59  ;;  %v2861_v31 = vmul.f32 1.442695, %v2611_v40 }
 0x58f   : > { %802 = vperm.xlu1 %5639, %v696_v27   ;;  %4428 = vmatpush.bf16.xpose.msra.mxu3 %v4411_v3  ;;  %11202 = vst [vmem:[#allocation85_spill] sm:$0xff] %v8419_v1  ;;  %v2969_v62 = vadd.f32 %v8419_v1, %v8408_v35  ;;  %v11209_v27 = vld [vmem:[#allocation56_spill] sm:$0xff]  ;;  %v2863_v50 = vmul.f32 1.442695, %v2612_v28  ;;  %v4409_v48 = vpack.c.b16 %v4397_v24, %v4395_v52  ;;  %vm3491_vm0 = vweird.f32 %v8412_v44 }
 0x590   : > { %4442 = vmatpush.bf16.xpose.msrb.mxu0 %v4412_v58  ;;  %v2556_v9 = vsub.f32 %v11209_v27, %v11207_v45  ;;  %v3487_v3 = vsub.f32 1.0, %v3486_v63  ;;  %v700_v58 = vld [vmem:[%s10500_s5 + $0xb0] sm:$0xff]  ;;  %v3483_v36 = vsel %vm3480_vm1, %v3482_v0, %v3478_v17  ;;  %v8443_v5 = vpop.eup %5983  ;;  %v4410_v25 = vpack.c.b16 %v4398_v2, %v4396_v14  ;;  %v11215_v27 = vld [vmem:[#allocation117_spill] sm:$0xff] }
 0x591   : > { %11210 = vst [vmem:[#allocation129_spill] sm:$0xff] %v8443_v5  ;;  %v4079_v49 = vmul.f32 %v11211_v39, %v3483_v36  ;;  %v4080_v33 = vmul.f32 %v11212_v43, %v3483_v36  ;;  %v4179_v47 = vpack.c.bf16 %v8359_v41, %v8352_v7  ;;  %v8449_v63 = vpop.eup %5985  ;;  %v11214_v45 = vld [vmem:[#allocation99_spill] sm:$0xff]  ;;  %v2749_v43 = vmul.f32 1.442695, %v2555_v57  ;;  %v11218_v7 = vld [vmem:[#allocation122_spill] sm:$0xff]  ;;  %v11220_v14 = vld [vmem:[#allocation125_spill] sm:$0xff] }
 0x592   : > { %11213 = vst [vmem:[#allocation79_spill] sm:$0xff] %v8449_v63  ;;  %v2589_v59 = vsub.f32 %v11215_v27, %v11214_v45  ;;  %v3488_v40 = vmul.f32 %v8412_v44, %v3487_v3  ;;  %v2751_v2 = vmul.f32 1.442695, %v2556_v9  ;;  %v2590_v41 = vsub.f32 %v11218_v7, %v11214_v45  ;;  %v11227_v27 = vld [vmem:[#allocation81_spill] sm:$0xff] }
 0x593   : > { %v4180_v28 = vpack.c.bf16 %v4080_v33, %v4079_v49  ;;  %v8455_v24 = vadd.f32 %v8326_v46, %v4079_v49  ;;  %v8458_v17 = vadd.f32 %v8330_v18, %v4080_v33  ;;  %5987 = vpow2.f32 %v2861_v31 }
 0x594   : > { %2970 = vadd.xlane.f32.xlu2 %v2969_v62  ;;  %v11219_v62 = vld [vmem:[#allocation123_spill] sm:$0xff]  ;;  %5989 = vpow2.f32 %v2863_v50  ;;  %v3053_v3 = vadd.f32 %v8449_v63, %v8443_v5  ;;  %v4473_v46 = vunpack.c.l.b16 %v4179_v47  ;;  %v4474_v33 = vunpack.c.h.b16 %v4179_v47 }
 0x595   : > { %11216 = vst [vmem:[#allocation80_spill] sm:$0xff] %v8455_v24  ;;  %v2591_v52 = vsub.f32 %v11219_v62, %v7802_v60  ;;  %v4475_v18 = vunpack.c.l.b16 %v4180_v28  ;;  %v4476_v57 = vunpack.c.h.b16 %v4180_v28  ;;  %v2817_v9 = vmul.f32 1.442695, %v2589_v59  ;;  %v11250_v63 = vld [vmem:[#allocation139_spill] sm:$0xff] }
 0x596   : > { %11217 = vst [vmem:[#allocation107_spill] sm:$0xff] %v8458_v17  ;;  %v2592_v31 = vsub.f32 %v11220_v14, %v7802_v60  ;;  %vm3490_vm2 = vweird.f32 %v8383_v56  ;;  %v3494_v39 = vand.u32 2147483647, %v8383_v56  ;;  %v2601_v59 = vsub.f32 %v11227_v27, %v7877_v29 }
 0x597   : > { %822 = vperm.xlu1 %5639, %v700_v58   ;;  %4429 = vmatpush.bf16.xpose.msra.mxu3 %v4409_v48  ;;  %v8462_v0 = vpop.xlane.xlu0 %2961  ;;  %v3489_v58 = vadd.f32 %v8412_v44, %v3488_v40  ;;  %v3496_v48 = vand.u32 2147483648, %v8383_v56  ;;  %v8474_v50 = vpack.c.b16 %v4475_v18, %v4473_v46  ;;  %v8476_v36 = vpack.c.b16 %v4476_v57, %v4474_v33  ;;  %vm8482_vm3 = vmor %vm3490_vm2, %vm3491_vm0  ;;  %v11230_v46 = vld [vmem:[#allocation100_spill] sm:$0xff] }
 0x598   : > { %4443 = vmatpush.bf16.xpose.msrb.mxu0 %v4410_v25  ;;  %5991 = vrcp.f32 %v8462_v0  ;;  %v2819_v25 = vmul.f32 1.442695, %v2590_v41  ;;  %v2821_v47 = vmul.f32 1.442695, %v2591_v52  ;;  %vm3495_vm4 = vcmp.eq.f32.partialorder %v3494_v39, 8.507059e+37  ;;  %v11229_v52 = vld [vmem:[#allocation60_spill] sm:$0xff] }
 0x599   : > { %11221 = vst [vmem:[#allocation106_spill] sm:$0xff] %v8474_v50  ;;  %5993 = vpow2.f32 %v2749_v43  ;;  %v8480_v49 = vpop.eup %5987  ;;  %v3493_v40 = vsel %vm8482_vm3, %v8412_v44, %v3489_v58  ;;  %v2823_v43 = vmul.f32 1.442695, %v2592_v31  ;;  %v3497_v41 = vor.u32 1.1754944e-38, %v3496_v48  ;;  %v11231_v44 = vld [vmem:[#allocation36_spill] sm:$0xff] }
 0x59a   : > { %11222 = vst [vmem:[#allocation98_spill] sm:$0xff] %v8476_v36  ;;  %5995 = vpow2.f32 %v2751_v2  ;;  %v8486_v60 = vpop.eup %5989  ;;  %v11228_v2 = vld [vmem:[#allocation102_spill] sm:$0xff]  ;;  %v2608_v33 = vsub.f32 %v11231_v44, %v8339_v51  ;;  %v2841_v14 = vmul.f32 1.442695, %v2601_v59  ;;  %vm3505_vm10 = vweird.f32 %v8462_v0 }
 0x59b   : > { %11223 = vst [vmem:[#allocation140_spill] sm:$0xff] %v8480_v49  ;;  %5997 = vpow2.f32 %v2817_v9  ;;  %v2607_v7 = vsub.f32 %v11228_v2, %v8339_v51  ;;  %v3056_v57 = vadd.f32 %v8486_v60, %v8480_v49  ;;  %v3498_v9 = vsel %vm3495_vm4, %v3497_v41, %v3493_v40  ;;  %v11235_v51 = vld [vmem:[#allocation74_spill] sm:$0xff]  ;;  %v11237_v41 = vld [vmem:[#allocation84_spill] sm:$0xff] }
 0x59c   : > { %3054 = vadd.xlane.f32.xlu2 %v3053_v3  ;;  %11226 = vst [vmem:[#allocation66_spill] sm:$0xff] %v8486_v60  ;;  %v8516_v2 = vmul.f32 %v11235_v51, %v3498_v9 }
 0x59d   : > { %v2853_v45 = vmul.f32 1.442695, %v2607_v7 }
 0x59e   : > { %v8495_v56 = vpop.eup %5991  ;;  %v8531_v44 = vadd.f32 %v8253_v37, %v8516_v2 }
 0x59f   : > { %v8493_v28 = vpop.xlane.xlu1 %2964  ;;  %v2485_v62 = vpop.xlane.xlu0 %2484  ;;  %v3501_v31 = vmul.f32 %v8495_v56, %v8462_v0  ;;  %vm3506_vm8 = vweird.f32 %v8495_v56 }
 0x5a0   : > { %5999 = vrcp.f32 %v8493_v28  ;;  %v2613_v3 = vsub.f32 %v11229_v52, %v2485_v62  ;;  %v2614_v18 = vsub.f32 %v11230_v46, %v2485_v62  ;;  %v8506_v58 = vpop.eup %5993  ;;  %v2602_v62 = vsub.f32 %v11237_v41, %v7877_v29  ;;  %11240 = vst [vmem:[#allocation54_spill] sm:$0xff] %v8531_v44  ;;  %v11242_v29 = vld [vmem:[#allocation141_spill] sm:$0xff]  ;;  %vm8590_vm11 = vmor %vm3505_vm10, %vm3506_vm8 }
 0x5a1   : > { %6001 = vpow2.f32 %v2819_v25  ;;  %11232 = vst [vmem:[#allocation67_spill] sm:$0xff] %v8506_v58  ;;  %v8510_v39 = vpop.eup %5995  ;;  %v2855_v52 = vmul.f32 1.442695, %v2608_v33  ;;  %v2605_v33 = vsub.f32 %v11242_v29, %v8214_v22  ;;  %vm3520_vm6 = vweird.f32 %v8493_v28 }
 0x5a2   : > { %6003 = vpow2.f32 %v2821_v47  ;;  %v2865_v48 = vmul.f32 1.442695, %v2613_v3  ;;  %v2867_v25 = vmul.f32 1.442695, %v2614_v18  ;;  %11233 = vst [vmem:[#allocation82_spill] sm:$0xff] %v8510_v39  ;;  %v11234_v47 = vld [vmem:[#allocation23_spill] sm:$0xff]  ;;  %v8518_v40 = vpop.eup %5997  ;;  %v2972_v37 = vadd.f32 %v8510_v39, %v8506_v58 }
 0x5a3   : > { %6005 = vpow2.f32 %v2823_v43  ;;  %v8513_v27 = vmul.f32 %v11234_v47, %v3498_v9  ;;  %11236 = vst [vmem:[#allocation101_spill] sm:$0xff] %v8518_v40  ;;  %v3502_v3 = vsub.f32 1.0, %v3501_v31  ;;  %v11245_v31 = vld [vmem:[#allocation5_spill] sm:$0xff]  ;;  %v2849_v4 = vmul.f32 1.442695, %v2605_v33 }
 0x5a4   : > { %3057 = vadd.xlane.f32.xlu2 %v3056_v57  ;;  %6007 = vpow2.f32 %v2865_v48  ;;  %v2606_v47 = vsub.f32 %v11245_v31, %v8214_v22  ;;  %v3524_v22 = vand.u32 2147483647, %v8493_v28  ;;  %v11249_v31 = vld [vmem:[#allocation16_spill] sm:$0xff] }
 0x5a5   : > { %6009 = vpow2.f32 %v2867_v25  ;;  %v8524_v43 = vadd.f32 %v8250_v8, %v8513_v27  ;;  %v11243_v8 = vld [vmem:[#allocation86_spill] sm:$0xff]  ;;  %v11244_v25 = vld [vmem:[#allocation104_spill] sm:$0xff]  ;;  %v2603_v5 = vsub.f32 %v11250_v63, %v11249_v31  ;;  %v2587_v63 = vsub.f32 %v11255_v32, %v11254_v12 }
 0x5a6   : > { %v6000_v59 = vpop.eup %5999  ;;  %6011 = vpow2.f32 %v2841_v14  ;;  %v2851_v33 = vmul.f32 1.442695, %v2606_v47  ;;  %vm3525_vm9 = vcmp.eq.f32.partialorder %v3524_v22, 8.507059e+37 }
 0x5a7   : > { %11238 = vst [vmem:[#allocation53_spill] sm:$0xff] %v8524_v43  ;;  %v8526_v7 = vpop.eup %6001  ;;  %v3516_v46 = vmul.f32 %v6000_v59, %v8493_v28  ;;  %v2488_v18 = vpop.xlane.xlu1 %2487  ;;  %6013 = vpow2.f32 %v2853_v45  ;;  %v3526_v45 = vand.u32 2147483648, %v8493_v28  ;;  %vm3521_vm5 = vweird.f32 %v6000_v59 }
 0x5a8   : > { %11239 = vst [vmem:[#allocation78_spill] sm:$0xff] %v8526_v7  ;;  %v8533_v57 = vpop.eup %6003  ;;  %v8537_v9 = vpop.xlane.xlu0 %2988  ;;  %v2615_v48 = vsub.f32 %v11243_v8, %v2488_v18  ;;  %v2616_v14 = vsub.f32 %v11244_v25, %v2488_v18  ;;  %v3503_v18 = vmul.f32 %v8495_v56, %v3502_v3  ;;  %v2843_v25 = vmul.f32 1.442695, %v2602_v62  ;;  %vm3522_vm7 = vmor %vm3520_vm6, %vm3521_vm5 }
 0x5a9   : > { %11241 = vst [vmem:[#allocation90_spill] sm:$0xff] %v8533_v57  ;;  %v3517_v51 = vsub.f32 1.0, %v3516_v46  ;;  %6015 = vrcp.f32 %v8537_v9  ;;  %v8546_v41 = vpop.eup %6005  ;;  %vm3640_vm14 = vweird.f32 %v8537_v9 }
 0x5aa   : > { %11246 = vst [vmem:[#allocation77_spill] sm:$0xff] %v8546_v41  ;;  %6017 = vpow2.f32 %v2855_v52  ;;  %v2869_v29 = vmul.f32 1.442695, %v2615_v48  ;;  %v2871_v60 = vmul.f32 1.442695, %v2616_v14  ;;  %v8549_v49 = vpop.eup %6007 }
 0x5ab   : > { %11247 = vst [vmem:[#allocation97_spill] sm:$0xff] %v8549_v49  ;;  %v3518_v8 = vmul.f32 %v6000_v59, %v3517_v51  ;;  %v8553_v46 = vpop.eup %6009  ;;  %v11253_v51 = vld [vmem:[#allocation9_spill] sm:$0xff] }
 0x5ac   : > { %11248 = vst [vmem:[#allocation28_spill] sm:$0xff] %v8553_v46  ;;  %6019 = vpow2.f32 %v2869_v29  ;;  %2973 = vadd.xlane.f32.xlu2 %v2972_v37  ;;  %v8557_v52 = vpop.eup %6011  ;;  %v3059_v3 = vadd.f32 %v8553_v46, %v8549_v49  ;;  %v2604_v62 = vsub.f32 %v11253_v51, %v11249_v31  ;;  %v3527_v37 = vor.u32 1.1754944e-38, %v3526_v45 }
 0x5ad   : > { %11251 = vst [vmem:[#allocation27_spill] sm:$0xff] %v8557_v52  ;;  %v3519_v48 = vadd.f32 %v6000_v59, %v3518_v8  ;;  %6021 = vpow2.f32 %v2871_v60  ;;  %v8562_v14 = vpop.eup %6013  ;;  %v3504_v8 = vadd.f32 %v8495_v56, %v3503_v18  ;;  %v2588_v31 = vsub.f32 %v11257_v15, %v11254_v12  ;;  %v11258_v18 = vld [vmem:[#allocation143_spill] sm:$0xff] }
 0x5ae   : > { %11252 = vst [vmem:[#allocation120_spill] sm:$0xff] %v8562_v14  ;;  %3060 = vadd.xlane.f32.xlu0 %v3059_v3  ;;  %6023 = vpow2.f32 %v2849_v4  ;;  %v3511_v45 = vand.u32 2147483648, %v8462_v0  ;;  %v2845_v3 = vmul.f32 1.442695, %v2603_v5  ;;  %v3509_v4 = vand.u32 2147483647, %v8462_v0 }
 0x5af   : > { %v6016_v29 = vpop.eup %6015  ;;  %v3523_v60 = vsel %vm3522_vm7, %v6000_v59, %v3519_v48  ;;  %v11259_v59 = vld [vmem:[#allocation144_spill] sm:$0xff]  ;;  %6025 = vpow2.f32 %v2851_v33  ;;  %v3646_v33 = vand.u32 2147483648, %v8537_v9  ;;  %v8606_v0 = vpop.xlane.xlu1 %2991 }
 0x5b0   : > { %v8571_v28 = vpop.eup %6017  ;;  %v3528_v51 = vsel %vm3525_vm9, %v3527_v37, %v3523_v60  ;;  %v3636_v32 = vmul.f32 %v6016_v29, %v8537_v9  ;;  %v8576_v47 = vpop.xlane.xlu0 %2949  ;;  %v3508_v60 = vsel %vm8590_vm11, %v8495_v56, %v3504_v8  ;;  %vm3641_vm12 = vweird.f32 %v6016_v29 }
 0x5b1   : > { %11256 = vst [vmem:[#allocation121_spill] sm:$0xff] %v8571_v28  ;;  %v8581_v17 = vmul.f32 %v11258_v18, %v3528_v51  ;;  %v8584_v22 = vmul.f32 %v11259_v59, %v3528_v51  ;;  %v3644_v59 = vand.u32 2147483647, %v8537_v9  ;;  %6027 = vpow2.f32 %v2843_v25  ;;  %vm3642_vm15 = vmor %vm3640_vm14, %vm3641_vm12  ;;  %v11266_v9 = vld [vmem:[#allocation93_spill] sm:$0xff] }
 0x5b2   : > { %v8586_v48 = vpop.eup %6019  ;;  %v3637_v15 = vsub.f32 1.0, %v3636_v32  ;;  %v3512_v12 = vor.u32 1.1754944e-38, %v3511_v45  ;;  %v3050_v56 = vadd.f32 %v8571_v28, %v8562_v14  ;;  %v2847_v8 = vmul.f32 1.442695, %v2604_v62 }
 0x5b3   : > { %11260 = vst [vmem:[#allocation70_spill] sm:$0xff] %v8586_v48  ;;  %v8595_v37 = vpop.eup %6021  ;;  %v5161_v51 = vadd.f32 %v8306_v16, %v8581_v17  ;;  %v5168_v5 = vadd.f32 %v8308_v26, %v8584_v22  ;;  %vm3510_vm13 = vcmp.eq.f32.partialorder %v3509_v4, 8.507059e+37  ;;  %v3647_v24 = vor.u32 1.1754944e-38, %v3646_v33  ;;  %v11267_v4 = vld [vmem:[#allocation71_spill] sm:$0xff] }
 0x5b4   : > { %11263 = vst [vmem:[#allocation69_spill] sm:$0xff] %v8595_v37  ;;  %v3638_v18 = vmul.f32 %v6016_v29, %v3637_v15  ;;  %v3062_v32 = vadd.f32 %v8595_v37, %v8586_v48  ;;  %v8612_v16 = vpop.eup %6023  ;;  %v2813_v15 = vmul.f32 1.442695, %v2587_v63  ;;  %6029 = vrcp.f32 %v8606_v0 }
 0x5b5   : > { %11264 = vst [vmem:[#allocation103_spill] sm:$0xff] %v8612_v16  ;;  %v3513_v13 = vsel %vm3510_vm13, %v3512_v12, %v3508_v60  ;;  %v8616_v25 = vpop.eup %6025  ;;  %6031 = vpow2.f32 %v2845_v3  ;;  %v2815_v45 = vmul.f32 1.442695, %v2588_v31  ;;  %vm3645_vm1 = vcmp.eq.f32.partialorder %v3644_v59, 8.507059e+37  ;;  %v11270_v59 = vld [vmem:[#allocation83_spill] sm:$0xff] }
 0x5b6   : > { %v3639_v26 = vadd.f32 %v6016_v29, %v3638_v18  ;;  %3063 = vadd.xlane.f32.xlu2 %v3062_v32  ;;  %3051 = vadd.xlane.f32.xlu0 %v3050_v56  ;;  %11265 = vst [vmem:[#allocation55_spill] sm:$0xff] %v8616_v25  ;;  %v11268_v18 = vld [vmem:[#allocation58_spill] sm:$0xff]  ;;  %v3023_v3 = vadd.f32 %v8526_v7, %v8518_v40  ;;  %v11280_v7 = vld [vmem:[#allocation137_spill] sm:$0xff]  ;;  %vm3655_vm4 = vweird.f32 %v8606_v0 }
 0x5b7   : > { %v4083_v60 = vmul.f32 %v11268_v18, %v3513_v13  ;;  %v8628_v32 = vpop.eup %6027  ;;  %v4084_v12 = vmul.f32 %v11270_v59, %v3513_v13  ;;  %v11277_v59 = vld [vmem:[#allocation108_spill] sm:$0xff]  ;;  %v3026_v40 = vadd.f32 %v8546_v41, %v8533_v57  ;;  %v11282_v41 = vld [vmem:[#allocation89_spill] sm:$0xff]  ;;  %v3661_v57 = vand.u32 2147483648, %v8606_v0 }
 0x5b8   : > { %v3643_v28 = vsel %vm3642_vm15, %v6016_v29, %v3639_v26  ;;  %v8618_v14 = vpop.xlane.xlu0 %2922  ;;  %11269 = vst [vmem:[#allocation56_spill] sm:$0xff] %v8628_v32  ;;  %v8650_v26 = vpop.permute.xlu2 %797 }
 0x5b9   : > { %v3648_v62 = vsel %vm3645_vm1, %v3647_v24, %v3643_v28  ;;  %6033 = vrcp.f32 %v8618_v14  ;;  %v3047_v28 = vadd.f32 %v8616_v25, %v8612_v16  ;;  %v11279_v16 = vld [vmem:[#allocation88_spill] sm:$0xff]  ;;  %vm3310_vm2 = vweird.f32 %v8618_v14 }
 0x5ba   : > { %6035 = vpow2.f32 %v2847_v8  ;;  %v8622_v63 = vmul.f32 %v11266_v9, %v3648_v62  ;;  %v8625_v33 = vmul.f32 %v11267_v4, %v3648_v62  ;;  %v8638_v31 = vpop.eup %6029  ;;  %v8648_v8 = vadd.f32 %v8395_v54, %v4083_v60 }
 0x5bb   : > { %6037 = vpow2.f32 %v2813_v15  ;;  %v8643_v56 = vpop.eup %6031  ;;  %v4181_v54 = vpack.c.bf16 %v8516_v2, %v8513_v27  ;;  %v4182_v4 = vpack.c.bf16 %v4084_v12, %v4083_v60  ;;  %v8674_v27 = vpop.xlane.xlu1 %2982  ;;  %v3316_v60 = vand.u32 2147483648, %v8618_v14 }
 0x5bc   : > { %6039 = vpow2.f32 %v2815_v45  ;;  %v8631_v29 = vadd.f32 %v5161_v51, %v8622_v63  ;;  %v8634_v24 = vadd.f32 %v5168_v5, %v8625_v33  ;;  %11271 = vst [vmem:[#allocation63_spill] sm:$0xff] %v8643_v56  ;;  %v3041_v51 = vadd.f32 %v8628_v32, %v8557_v52  ;;  %v11278_v52 = vld [vmem:[#allocation112_spill] sm:$0xff] }
 0x5bd   : > { %11272 = vst [vmem:[#allocation76_spill] sm:$0xff] %v8648_v8  ;;  %v3651_v45 = vmul.f32 %v8638_v31, %v8606_v0  ;;  %vm3656_vm6 = vweird.f32 %v8638_v31  ;;  %v3662_v58 = vor.u32 1.1754944e-38, %v3661_v57  ;;  %v11300_v57 = vld [vmem:[#allocation24_spill] sm:$0xff]  ;;  %vm3610_vm13 = vweird.f32 %v8674_v27 }
 0x5be   : > { %3048 = vadd.xlane.f32.xlu2 %v3047_v28  ;;  %3024 = vadd.xlane.f32.xlu0 %v3023_v3  ;;  %v11276_v3 = vld [vmem:[#allocation109_spill] sm:$0xff]  ;;  %vm8721_vm9 = vmor %vm3655_vm4, %vm3656_vm6 }
 0x5bf   : > { %v6034_v5 = vpop.eup %6033  ;;  %v2585_v32 = vsub.f32 %v11277_v59, %v11276_v3  ;;  %v2586_v25 = vsub.f32 %v11278_v52, %v11276_v3  ;;  %v3652_v61 = vsub.f32 1.0, %v3651_v45  ;;  %v4477_v52 = vunpack.c.l.b16 %v4181_v54 }
 0x5c0   : > { %v8652_v15 = vpop.eup %6035  ;;  %v3306_v13 = vmul.f32 %v6034_v5, %v8618_v14  ;;  %v8657_v62 = vpop.xlane.xlu0 %2925  ;;  %vm3311_vm0 = vweird.f32 %v6034_v5  ;;  %v4479_v3 = vunpack.c.l.b16 %v4182_v4 }
 0x5c1   : > { %11273 = vst [vmem:[#allocation99_spill] sm:$0xff] %v8652_v15  ;;  %3042 = vadd.xlane.f32.xlu1 %v3041_v51  ;;  %v8659_v9 = vpop.eup %6037  ;;  %6041 = vrcp.f32 %v8657_v62  ;;  %v5075_v51 = vadd.f32 %v11280_v7, %v11279_v16  ;;  %v3044_v2 = vadd.f32 %v8652_v15, %v8643_v56  ;;  %v3314_v7 = vand.u32 2147483647, %v8618_v14  ;;  %v11283_v15 = vld [vmem:[#allocation111_spill] sm:$0xff]  ;;  %vm8689_vm3 = vmor %vm3310_vm2, %vm3311_vm0 }
 0x5c2   : > { %11274 = vst [vmem:[#allocation117_spill] sm:$0xff] %v8659_v9  ;;  %v8664_v18 = vpop.eup %6039  ;;  %v3307_v28 = vsub.f32 1.0, %v3306_v13  ;;  %v8684_v16 = vadd.f32 %v8398_v10, %v4084_v12  ;;  %v5082_v56 = vadd.f32 %v11283_v15, %v11282_v41  ;;  %6043 = vrcp.f32 %v8674_v27 }
 0x5c3   : > { %11275 = vst [vmem:[#allocation122_spill] sm:$0xff] %v8664_v18  ;;  %v3020_v13 = vadd.f32 %v8664_v18, %v8659_v9  ;;  %v8696_v14 = vpack.c.b16 %v4479_v3, %v4477_v52  ;;  %v3653_v10 = vmul.f32 %v8638_v31, %v3652_v61  ;;  %6045 = vrcp.f32 %v8576_v47  ;;  %v11295_v9 = vld [vmem:[#allocation14_spill] sm:$0xff] }
 0x5c4   : > { %v3308_v39 = vmul.f32 %v6034_v5, %v3307_v28  ;;  %11281 = vst [vmem:[#allocation123_spill] sm:$0xff] %v8684_v16  ;;  %v2809_v28 = vmul.f32 1.442695, %v2585_v32  ;;  %v3317_v12 = vor.u32 1.1754944e-38, %v3316_v60  ;;  %v4478_v15 = vunpack.c.h.b16 %v4181_v54  ;;  %v11286_v54 = vld [vmem:[#allocation127_spill] sm:$0xff] }
 0x5c5   : > { %v4480_v18 = vunpack.c.h.b16 %v4182_v4  ;;  %vm3315_vm5 = vcmp.eq.f32.partialorder %v3314_v7, 8.507059e+37  ;;  %v3659_v61 = vand.u32 2147483647, %v8606_v0  ;;  %vm3325_vm8 = vweird.f32 %v8657_v62 }
 0x5c6   : > { %v3309_v59 = vadd.f32 %v6034_v5, %v3308_v39  ;;  %3045 = vadd.xlane.f32.xlu2 %v3044_v2  ;;  %3027 = vadd.xlane.f32.xlu0 %v3026_v40  ;;  %v2811_v2 = vmul.f32 1.442695, %v2586_v25  ;;  %v3331_v3 = vand.u32 2147483648, %v8657_v62 }
 0x5c7   : > { %v6042_v45 = vpop.eup %6041  ;;  %v8694_v39 = vpop.xlane.xlu2 %2967  ;;  %vm3660_vm11 = vcmp.eq.f32.partialorder %v3659_v61, 8.507059e+37  ;;  %v11299_v61 = vld [vmem:[#allocation73_spill] sm:$0xff] }
 0x5c8   : > { %v3313_v32 = vsel %vm8689_vm3, %v6034_v5, %v3309_v59  ;;  %v3321_v41 = vmul.f32 %v6042_v45, %v8657_v62  ;;  %6047 = vrcp.f32 %v8694_v39  ;;  %v8708_v25 = vpop.xlane.xlu0 %2985  ;;  %vm3326_vm7 = vweird.f32 %v6042_v45  ;;  %v8712_v52 = vpop.eup %6043  ;;  %v11287_v59 = vld [vmem:[#allocation68_spill] sm:$0xff] }
 0x5c9   : > { %3021 = vadd.xlane.f32.xlu1 %v3020_v13  ;;  %v3318_v5 = vsel %vm3315_vm5, %v3317_v12, %v3313_v32  ;;  %v3654_v13 = vadd.f32 %v8638_v31, %v3653_v10  ;;  %v3329_v12 = vand.u32 2147483647, %v8657_v62  ;;  %6049 = vrcp.f32 %v8708_v25  ;;  %vm8731_vm10 = vmor %vm3325_vm8, %vm3326_vm7 }
 0x5ca   : > { %v3322_v40 = vsub.f32 1.0, %v3321_v41  ;;  %v4057_v4 = vmul.f32 %v11286_v54, %v3318_v5  ;;  %v4058_v7 = vmul.f32 %v11287_v59, %v3318_v5  ;;  %v8717_v41 = vpack.c.b16 %v4480_v18, %v4478_v15  ;;  %v8729_v54 = vpop.eup %6045  ;;  %v11296_v5 = vld [vmem:[#allocation96_spill] sm:$0xff] }
 0x5cb   : > { %6051 = vpow2.f32 %v2809_v28  ;;  %v3658_v62 = vsel %vm8721_vm9, %v8638_v31, %v3654_v13  ;;  %v3332_v1 = vor.u32 1.1754944e-38, %v3331_v3  ;;  %vm3330_vm12 = vcmp.eq.f32.partialorder %v3329_v12, 8.507059e+37 }
 0x5cc   : > { %v3323_v60 = vmul.f32 %v6042_v45, %v3322_v40  ;;  %v8727_v40 = vadd.f32 %v5075_v51, %v4057_v4  ;;  %v8737_v0 = vadd.f32 %v5082_v56, %v4058_v7  ;;  %6053 = vpow2.f32 %v2811_v2 }
 0x5cd   : > { %v3606_v51 = vmul.f32 %v8712_v52, %v8674_v27  ;;  %v1107_v56 = vadd.f32 %v11295_v9, %v8650_v26  ;;  %v3663_v2 = vsel %vm3660_vm11, %v3662_v58, %v3658_v62  ;;  %v4169_v48 = vpack.c.bf16 %v4058_v7, %v4057_v4 }
 0x5ce   : > { %v3324_v10 = vadd.f32 %v6042_v45, %v3323_v60  ;;  %11290 = vst [vmem:[#allocation125_spill] sm:$0xff] %v8727_v40  ;;  %v8739_v15 = vpop.eup %6047  ;;  %v11294_v60 = vld [vmem:[#allocation13_spill] sm:$0xff]  ;;  %v8766_v58 = vmul.f32 %v11299_v61, %v3663_v2  ;;  %v8769_v3 = vmul.f32 %v11300_v57, %v3663_v2  ;;  %v697_v2 = vld [vmem:[%s10500_s5 + $0x98] sm:$0xff]  ;;  %v3614_v61 = vand.u32 2147483647, %v8674_v27 }
 0x5cf   : > { %v8735_v18 = vpop.xlane.xlu2 %2946  ;;  %11293 = vst [vmem:[#allocation81_spill] sm:$0xff] %v8737_v0  ;;  %v1018_v59 = vadd.f32 %v11294_v60, %v8650_v26  ;;  %v3531_v31 = vmul.f32 %v8739_v15, %v8694_v39  ;;  %v8754_v32 = vpop.eup %6049  ;;  %vm3446_vm14 = vweird.f32 %v8729_v54  ;;  %vm3611_vm15 = vweird.f32 %v8712_v52 }
 0x5d0   : > { %v3328_v28 = vsel %vm8731_vm10, %v6042_v45, %v3324_v10  ;;  %v3441_v45 = vmul.f32 %v8729_v54, %v8576_v47  ;;  %v3607_v10 = vsub.f32 1.0, %v3606_v51  ;;  %v3621_v12 = vmul.f32 %v8754_v32, %v8708_v25  ;;  %vm8824_vm2 = vmor %vm3610_vm13, %vm3611_vm15 }
 0x5d1   : > { %v3333_v13 = vsel %vm3330_vm12, %v3332_v1, %v3328_v28  ;;  %v8759_v35 = vpop.eup %6051  ;;  %v8761_v26 = vpack.c.bf16 %v1107_v56, %v1018_v59  ;;  %v3532_v62 = vsub.f32 1.0, %v3531_v31  ;;  %v11303_v28 = vld [vmem:[#allocation62_spill] sm:$0xff]  ;;  %v8780_v37 = vpop.xlane.xlu1 %3003  ;;  %v4191_v31 = vpack.c.bf16 %v8625_v33, %v8622_v63  ;;  %v701_v33 = vld [vmem:[%s10500_s5 + $0xb8] sm:$0xff] }
 0x5d2   : > { %v4059_v60 = vmul.f32 %v11296_v5, %v3333_v13  ;;  %11297 = vst [vmem:[#allocation102_spill] sm:$0xff] %v8759_v35  ;;  %v8763_v9 = vpop.eup %6053  ;;  %v4060_v59 = vmul.f32 %v11303_v28, %v3333_v13  ;;  %v3442_v56 = vsub.f32 1.0, %v3441_v45  ;;  %v3608_v5 = vmul.f32 %v8712_v52, %v3607_v10 }
 0x5d3   : > { %11298 = vst [vmem:[#allocation60_spill] sm:$0xff] %v8763_v9  ;;  %v8791_v57 = vadd.f32 %v8763_v9, %v8759_v35  ;;  %v4192_v45 = vpack.c.bf16 %v8769_v3, %v8766_v58  ;;  %v8799_v10 = vpack.c.bf16 %v8584_v22, %v8581_v17  ;;  %v3622_v28 = vsub.f32 1.0, %v3621_v12 }
 0x5d4   : > { %v8772_v1 = vadd.f32 %v8170_v20, %v4059_v60  ;;  %11304 = vst [vmem:[#allocation23_spill] sm:$0xff] %v8780_v37  ;;  %v3533_v20 = vmul.f32 %v8739_v15, %v3532_v62  ;;  %v4170_v63 = vpack.c.bf16 %v4060_v59, %v4059_v60  ;;  %v3443_v13 = vmul.f32 %v8729_v54, %v3442_v56  ;;  %v705_v56 = vld [vmem:[%s10500_s5 + $0xd8] sm:$0xff] }
 0x5d5   : > { %v3609_v9 = vadd.f32 %v8712_v52, %v3608_v5  ;;  %6055 = vrcp.f32 %v8735_v18  ;;  %vm8810_vm1 = vcmp.eq.f32.partialorder %v3614_v61, 8.507059e+37  ;;  %v3616_v22 = vand.u32 2147483648, %v8674_v27 }
 0x5d6   : > { %11301 = vst [vmem:[#allocation100_spill] sm:$0xff] %v8772_v1  ;;  %6057 = vrcp.f32 %v8780_v37  ;;  %v4559_v7 = vunpack.c.l.b16 %v4191_v31  ;;  %vm3536_vm0 = vweird.f32 %v8739_v15  ;;  %v4561_v60 = vunpack.c.l.b16 %v4192_v45 }
 0x5d7   : > { %v8776_v51 = vpop.xlane.xlu2 %3000  ;;  %v8816_v4 = vpop.xlane.xlu0 %3006  ;;  %v4560_v12 = vunpack.c.h.b16 %v4191_v31  ;;  %v4562_v62 = vunpack.c.h.b16 %v4192_v45  ;;  %v3534_v61 = vadd.f32 %v8739_v15, %v3533_v20  ;;  %v4391_v35 = vunpack.c.l.b16 %v4169_v48 }
 0x5d8   : > { %11302 = vst [vmem:[#allocation36_spill] sm:$0xff] %v8776_v51  ;;  %v4393_v46 = vunpack.c.l.b16 %v4170_v63  ;;  %v3613_v31 = vsel %vm8824_vm2, %v8712_v52, %v3609_v9  ;;  %vm3535_vm3 = vweird.f32 %v8694_v39  ;;  %v3539_v27 = vand.u32 2147483647, %v8694_v39 }
 0x5d9   : > { %v3541_v45 = vand.u32 2147483648, %v8694_v39  ;;  %v8842_v20 = vadd.f32 %v8203_v38, %v4060_v59  ;;  %v4392_v44 = vunpack.c.h.b16 %v4169_v48  ;;  %v4394_v43 = vunpack.c.h.b16 %v4170_v63  ;;  %vm8851_vm4 = vmor %vm3535_vm3, %vm3536_vm0  ;;  %v8855_v5 = vpop.xlane.xlu1 %2994  ;;  %v699_v63 = vld [vmem:[%s10500_s5 + $0xa8] sm:$0xff] }
 0x5da   : > { %807 = vperm.xlu0 %5638, %v697_v2   ;;  %v3623_v2 = vmul.f32 %v8754_v32, %v3622_v28  ;;  %v698_v28 = vld [vmem:[%s10500_s5 + $0xa0] sm:$0xff]  ;;  %v8847_v52 = vadd.f32 %v8729_v54, %v3443_v13  ;;  %v3617_v9 = vor.u32 1.1754944e-38, %v3616_v22  ;;  %11312 = vst [vmem:[#allocation84_spill] sm:$0xff] %v8855_v5  ;;  %v4570_v38 = vpack.c.b16 %v4562_v62, %v4560_v12  ;;  %v708_v62 = vld [vmem:[%s10500_s5 + $0xf0] sm:$0xff] }
 0x5db   : > { %11309 = vst [vmem:[#allocation74_spill] sm:$0xff] %v8842_v20  ;;  %v8844_v6 = vpop.eup %6055  ;;  %vm3626_vm5 = vweird.f32 %v8754_v32  ;;  %v3538_v59 = vsel %vm8851_vm4, %v8739_v15, %v3534_v61  ;;  %v4408_v13 = vpack.c.b16 %v4394_v43, %v4392_v44  ;;  %vm3625_vm6 = vweird.f32 %v8708_v25 }
 0x5dc   : > { %v3624_v48 = vadd.f32 %v8754_v32, %v3623_v2  ;;  %v3631_v22 = vand.u32 2147483648, %v8708_v25  ;;  %v3629_v12 = vand.u32 2147483647, %v8708_v25  ;;  %vm3540_vm7 = vcmp.eq.f32.partialorder %v3539_v27, 8.507059e+37  ;;  %vm8879_vm9 = vmor %vm3625_vm6, %vm3626_vm5  ;;  %v11318_v27 = vld [vmem:[#allocation57_spill] sm:$0xff]  ;;  %v11327_v2 = vld [vmem:[#allocation135_spill] sm:$0xff] }
 0x5dd   : > { %v3426_v43 = vmul.f32 %v8844_v6, %v8735_v18  ;;  %6059 = vrcp.f32 %v8855_v5  ;;  %4444 = vmatpush.bf16.xpose.msrb.mxu0 %v4408_v13  ;;  %vm3445_vm8 = vweird.f32 %v8576_v47  ;;  %vm3430_vm12 = vweird.f32 %v8735_v18 }
 0x5de   : > { %827 = vperm.xlu2 %5640, %v701_v33   ;;  %v4407_v33 = vpack.c.b16 %v4393_v46, %v4391_v35  ;;  %v4569_v35 = vpack.c.b16 %v4561_v60, %v4559_v7  ;;  %v8857_v46 = vpop.eup %6057  ;;  %v3542_v7 = vor.u32 1.1754944e-38, %v3541_v45  ;;  %v3618_v60 = vsel %vm8810_vm1, %v3617_v9, %v3613_v31  ;;  %vm8890_vm10 = vmor %vm3445_vm8, %vm3446_vm14 }
 0x5df   : > { %v8830_v49 = vpop.xlane.xlu2 %2976  ;;  %11313 = vst [vmem:[#allocation141_spill] sm:$0xff] %v8857_v46  ;;  %v3711_v25 = vmul.f32 %v8857_v46, %v8780_v37  ;;  %v3628_v61 = vsel %vm8879_vm9, %v8754_v32, %v3624_v48  ;;  %v8901_v45 = vmul.f32 %v11318_v27, %v3618_v60  ;;  %v3632_v32 = vor.u32 1.1754944e-38, %v3631_v22 }
 0x5e0   : > { %4430 = vmatpush.bf16.xpose.msra.mxu3 %v4407_v33  ;;  %v3543_v17 = vsel %vm3540_vm7, %v3542_v7, %v3538_v59  ;;  %v8898_v31 = vpop.xlane.xlu0 %3009  ;;  %vm3630_vm11 = vcmp.eq.f32.partialorder %v3629_v12, 8.507059e+37  ;;  %v11324_v59 = vld [vmem:[#allocation110_spill] sm:$0xff]  ;;  %v3721_v22 = vand.u32 2147483648, %v8780_v37  ;;  %6061 = vrcp.f32 %v8816_v4 }
 0x5e1   : > { %11319 = vst [vmem:[#allocation86_spill] sm:$0xff] %v8901_v45  ;;  %v8918_v13 = vmul.f32 %v11324_v59, %v3543_v17  ;;  %v3712_v27 = vsub.f32 1.0, %v3711_v25  ;;  %v3633_v39 = vsel %vm3630_vm11, %v3632_v32, %v3628_v61  ;;  %v11329_v59 = vld [vmem:[#allocation136_spill] sm:$0xff]  ;;  %vm3715_vm13 = vweird.f32 %v8780_v37 }
 0x5e2   : > { %847 = vperm.xlu1 %5639, %v705_v56   ;;  %812 = vperm.xlu0 %5638, %v698_v28   ;;  %v11320_v28 = vld [vmem:[#allocation142_spill] sm:$0xff]  ;;  %v8929_v12 = vmul.f32 %v11327_v2, %v3633_v39  ;;  %v8932_v48 = vmul.f32 %v11329_v59, %v3633_v39  ;;  %v11331_v2 = vld [vmem:[#allocation95_spill] sm:$0xff]  ;;  %vm3431_vm14 = vweird.f32 %v8844_v6  ;;  %vm3716_vm15 = vweird.f32 %v8857_v46 }
 0x5e3   : > { %v8904_v33 = vmul.f32 %v11320_v28, %v3618_v60  ;;  %v11325_v60 = vld [vmem:[#allocation118_spill] sm:$0xff]  ;;  %v5175_v61 = vadd.f32 %v11331_v2, %v8918_v13  ;;  %v3713_v28 = vmul.f32 %v8857_v46, %v3712_v27  ;;  %v8956_v2 = vpop.xlane.xlu1 %3033  ;;  %v8965_v27 = vor.u32 1.1754944e-38, %v3721_v22  ;;  %vm9001_vm1 = vmor %vm3430_vm12, %vm3431_vm14 }
 0x5e4   : > { %v8922_v15 = vmul.f32 %v11325_v60, %v3543_v17  ;;  %11328 = vst [vmem:[#allocation139_spill] sm:$0xff] %v8929_v12  ;;  %v704_v17 = vld [vmem:[%s10500_s5 + $0xd0] sm:$0xff]  ;;  %v4190_v32 = vpack.c.bf16 %v8932_v48, %v8929_v12  ;;  %v11332_v60 = vld [vmem:[#allocation72_spill] sm:$0xff]  ;;  %v3736_v22 = vand.u32 2147483648, %v8816_v4  ;;  %vm9022_vm0 = vmor %vm3715_vm13, %vm3716_vm15  ;;  %vm3670_vm4 = vweird.f32 %v8855_v5 }
 0x5e5   : > { %4597 = vmatpush.bf16.xpose.msra.mxu0 %v4570_v38  ;;  %11321 = vst [vmem:[#allocation104_spill] sm:$0xff] %v8904_v33  ;;  %vm3730_vm9 = vweird.f32 %v8816_v4  ;;  %vm3700_vm11 = vweird.f32 %v8776_v51  ;;  %vm3865_vm13 = vweird.f32 %v8956_v2 }
 0x5e6   : > { %817 = vperm.xlu2 %5640, %v699_v63   ;;  %v3427_v63 = vsub.f32 1.0, %v3426_v43  ;;  %11330 = vst [vmem:[#allocation9_spill] sm:$0xff] %v8932_v48  ;;  %v4189_v43 = vpack.c.bf16 %v8904_v33, %v8901_v45  ;;  %v5182_v59 = vadd.f32 %v11332_v60, %v8922_v15  ;;  %v4557_v44 = vunpack.c.l.b16 %v4190_v32 }
 0x5e7   : > { %v8906_v9 = vpop.xlane.xlu2 %3012  ;;  %v4558_v45 = vunpack.c.h.b16 %v4190_v32  ;;  %11333 = vst [vmem:[#allocation7_spill] sm:$0xff] %v8965_v27  ;;  %v8978_v32 = vadd.f32 %v8857_v46, %v3713_v28  ;;  %v3871_v46 = vand.u32 2147483648, %v8956_v2 }
 0x5e8   : > { %4583 = vmatpush.bf16.xpose.msrb.mxu3 %v4569_v35  ;;  %v11322_v35 = vand.u32 2147483648, %v8576_v47  ;;  %v3428_v39 = vmul.f32 %v8844_v6, %v3427_v63  ;;  %6063 = vrcp.f32 %v8906_v9  ;;  %v707_v63 = vld [vmem:[%s10500_s5 + $0xe8] sm:$0xff]  ;;  %v4555_v25 = vunpack.c.l.b16 %v4189_v43 }
 0x5e9   : > { %6065 = vrcp.f32 %v8776_v51  ;;  %v4556_v33 = vunpack.c.h.b16 %v4189_v43  ;;  %11334 = vst [vmem:[#allocation113_spill] sm:$0xff] %v8978_v32  ;;  %vm3760_vm5 = vweird.f32 %v8906_v9 }
 0x5ea   : > { %v8914_v38 = vor.u32 1.1754944e-38, %v11322_v35  ;;  %862 = vperm.xlu1 %5639, %v708_v62   ;;  %v8925_v35 = vpop.eup %6059  ;;  %v3436_v62 = vand.u32 2147483648, %v8735_v18  ;;  %v8972_v48 = vadd.f32 %v8844_v6, %v3428_v39  ;;  %v4567_v8 = vpack.c.b16 %v4557_v44, %v4555_v25 }
 0x5eb   : > { %11326 = vst [vmem:[#allocation16_spill] sm:$0xff] %v8925_v35  ;;  %v3666_v7 = vmul.f32 %v8925_v35, %v8855_v5  ;;  %v4568_v12 = vpack.c.b16 %v4558_v45, %v4556_v33  ;;  %v8975_v43 = vpop.eup %6061  ;;  %v8987_v44 = vadd.f32 %v5175_v61, %v8766_v58  ;;  %v8990_v45 = vadd.f32 %v5182_v59, %v8769_v3  ;;  %v703_v33 = vld [vmem:[%s10500_s5 + $0xc8] sm:$0xff]  ;;  %v4867_v61 = vld [vmem:[%s10502_s7 + $0x10] sm:$0xff] }
 0x5ec   : > { %11323 = vst [vmem:[#allocation5_spill] sm:$0xff] %v8914_v38  ;;  %v8968_v16 = vor.u32 1.1754944e-38, %v3436_v62  ;;  %v3706_v59 = vand.u32 2147483648, %v8776_v51  ;;  %vm3671_vm2 = vweird.f32 %v8925_v35  ;;  %vm3731_vm8 = vweird.f32 %v8975_v43 }
 0x5ed   : > { %v3667_v39 = vsub.f32 1.0, %v3666_v7  ;;  %4598 = vmatpush.bf16.xpose.msra.mxu0 %v4568_v12  ;;  %vm9128_vm14 = vmor %vm3670_vm4, %vm3671_vm2 }
 0x5ee   : > { %842 = vperm.xlu2 %5640, %v704_v17   ;;  %v3676_v17 = vand.u32 2147483648, %v8855_v5  ;;  %v8983_v62 = vpop.eup %6063 }
 0x5ef   : > { %v8961_v11 = vpop.xlane.xlu0 %3015  ;;  %v8963_v60 = vpop.xlane.xlu2 %2979  ;;  %v3756_v3 = vmul.f32 %v8983_v62, %v8906_v9  ;;  %v3668_v27 = vmul.f32 %v8925_v35, %v3667_v39  ;;  %vm3761_vm3 = vweird.f32 %v8983_v62  ;;  %v9054_v39 = vor.u32 1.1754944e-38, %v3706_v59 }
 0x5f0   : > { %6067 = vrcp.f32 %v8961_v11  ;;  %4584 = vmatpush.bf16.xpose.msrb.mxu3 %v4567_v8  ;;  %v8995_v28 = vpop.eup %6065  ;;  %v9006_v58 = vor.u32 1.1754944e-38, %v3676_v17  ;;  %v3726_v17 = vmul.f32 %v8975_v43, %v8816_v4  ;;  %v9028_v8 = vor.u32 1.1754944e-38, %v3736_v22  ;;  %vm3762_vm6 = vmor %vm3760_vm5, %vm3761_vm3 }
 0x5f1   : > { %6069 = vrcp.f32 %v8956_v2  ;;  %v3757_v12 = vsub.f32 1.0, %v3756_v3  ;;  %v3696_v22 = vmul.f32 %v8995_v28, %v8776_v51  ;;  %v3766_v3 = vand.u32 2147483648, %v8906_v9  ;;  %11343 = vst [vmem:[#allocation71_spill] sm:$0xff] %v9054_v39 }
 0x5f2   : > { %857 = vperm.xlu1 %5639, %v707_v63   ;;  %6071 = vrcp.f32 %v8898_v31  ;;  %11337 = vst [vmem:[#allocation114_spill] sm:$0xff] %v9006_v58  ;;  %v11338_v63 = vmov 0  ;;  %v9067_v39 = vadd.f32 %v8925_v35, %v3668_v27  ;;  %vm3701_vm12 = vweird.f32 %v8995_v28 }
 0x5f3   : > { %6073 = vrcp.f32 %v8830_v49  ;;  %v11339_v63 = vsel %vm9022_vm0, 4294967295, %v11338_v63  ;;  %11341 = vst [vmem:[#allocation144_spill] sm:$0xff] %v9028_v8  ;;  %v3758_v8 = vmul.f32 %v8983_v62, %v3757_v12  ;;  %v3727_v12 = vsub.f32 1.0, %v3726_v17 }
 0x5f4   : > { %11340 = vst [vmem:[#allocation143_spill] sm:$0xff] %v11339_v63  ;;  %6075 = vrcp.f32 %v8963_v60  ;;  %v3764_v63 = vand.u32 2147483647, %v8906_v9  ;;  %v3697_v36 = vsub.f32 1.0, %v3696_v22 }
 0x5f5   : > { %v3759_v1 = vadd.f32 %v8983_v62, %v3758_v8  ;;  %11346 = vst [vmem:[#allocation58_spill] sm:$0xff] %v9067_v39  ;;  %v706_v8 = vld [vmem:[%s10500_s5 + $0xe0] sm:$0xff]  ;;  %v3781_v39 = vand.u32 2147483648, %v8961_v11 }
 0x5f6   : > { %837 = vperm.xlu2 %5640, %v703_v33   ;;  %v9034_v25 = vpop.eup %6067  ;;  %vm3765_vm7 = vcmp.eq.f32.partialorder %v3764_v63, 8.507059e+37  ;;  %v3698_v38 = vmul.f32 %v8995_v28, %v3697_v36  ;;  %v11353_v36 = vmov 0 }
 0x5f7   : > { %v9044_v37 = vpop.xlane.xlu2 %3036  ;;  %v9046_v33 = vpop.eup %6069  ;;  %v3771_v59 = vmul.f32 %v9034_v25, %v8961_v11  ;;  %v3763_v17 = vsel %vm3762_vm6, %v8983_v62, %v3759_v1  ;;  %v4870_v1 = vld [vmem:[%s10502_s7 + $0x28] sm:$0xff]  ;;  %v3728_v62 = vmul.f32 %v8975_v43, %v3727_v12  ;;  %v11354_v36 = vsel %vm9128_vm14, 4294967295, %v11353_v36 }
 0x5f8   : > { %11342 = vst [vmem:[#allocation93_spill] sm:$0xff] %v9046_v33  ;;  %v9052_v32 = vpop.eup %6071  ;;  %v3861_v9 = vmul.f32 %v9046_v33, %v8956_v2  ;;  %vm3866_vm4 = vweird.f32 %v9046_v33  ;;  %vm3776_vm6 = vweird.f32 %v9034_v25 }
 0x5f9   : > { %v793_v58 = vpop.permute.xlu1 %792  ;;  %v9059_v20 = vpop.eup %6073  ;;  %v3741_v27 = vmul.f32 %v9052_v32, %v8898_v31  ;;  %v3772_v40 = vsub.f32 1.0, %v3771_v59  ;;  %11355 = vst [vmem:[#allocation88_spill] sm:$0xff] %v11354_v36  ;;  %vm3746_vm5 = vweird.f32 %v9052_v32 }
 0x5fa   : > { %v1016_v53 = vadd.f32 %v11344_v30, %v793_v58  ;;  %v1105_v55 = vadd.f32 %v11345_v21, %v793_v58  ;;  %4893 = vperm.xlu1 %5639, %v4867_v61   ;;  %v3767_v21 = vor.u32 1.1754944e-38, %v3766_v3  ;;  %v9071_v58 = vpop.xlane.xlu0 %3039  ;;  %v9076_v61 = vpop.eup %6075 }
 0x5fb   : > { %6077 = vrcp.f32 %v9071_v58  ;;  %v3591_v63 = vmul.f32 %v9076_v61, %v8963_v60 }
 0x5fc   : > { %v1480_v30 = vpack.c.bf16 %v1105_v55, %v1016_v53  ;;  %v3576_v53 = vmul.f32 %v9059_v20, %v8830_v49  ;;  %v3768_v55 = vsel %vm3765_vm7, %v3767_v21, %v3763_v17  ;;  %v3742_v17 = vsub.f32 1.0, %v3741_v27  ;;  %vm9183_vm7 = vmor %vm3730_vm9, %vm3731_vm8 }
 0x5fd   : > { %v9087_v50 = vmul.f32 %v8238_v42, %v3768_v55  ;;  %v9090_v0 = vmul.f32 %v8245_v34, %v3768_v55  ;;  %v11349_v42 = vunpack.c.l.b16 %v8761_v26  ;;  %v11350_v34 = vunpack.c.h.b16 %v8761_v26  ;;  %vm9203_vm8 = vmor %vm3700_vm11, %vm3701_vm12 }
 0x5fe   : > { %v4219_v22 = vunpack.c.l.b16 %v1480_v30  ;;  %v4220_v3 = vunpack.c.h.b16 %v1480_v30  ;;  %852 = vperm.xlu2 %5640, %v706_v8   ;;  %v3862_v8 = vsub.f32 1.0, %v3861_v9  ;;  %v3577_v26 = vsub.f32 1.0, %v3576_v53  ;;  %vm9228_vm11 = vmor %vm3865_vm13, %vm3866_vm4 }
 0x5ff   : > { %11347 = vst [vmem:[#allocation83_spill] sm:$0xff] %v9087_v50  ;;  %v9104_v30 = vpop.xlane.xlu2 %2997  ;;  %v9109_v12 = vadd.f32 %v8631_v29, %v9087_v50  ;;  %v9113_v55 = vadd.f32 %v8634_v24, %v9090_v0  ;;  %6079 = vrcp.f32 %v9044_v37  ;;  %v9121_v9 = vor.u32 1.1754944e-38, %v3871_v46 }
 0x600   : > { %11348 = vst [vmem:[#allocation109_spill] sm:$0xff] %v9090_v0  ;;  %v4223_v21 = vpack.c.b16 %v11349_v42, %v4219_v22  ;;  %v4224_v59 = vpack.c.b16 %v11350_v34, %v4220_v3  ;;  %v3751_v22 = vand.u32 2147483648, %v8898_v31  ;;  %v3773_v24 = vmul.f32 %v9034_v25, %v3772_v40  ;;  %v4866_v40 = vld [vmem:[%s10502_s7 + $0x8] sm:$0xff] }
 0x601   : > { %11351 = vst [vmem:[#allocation108_spill] sm:$0xff] %v9104_v30  ;;  %v3584_v53 = vand.u32 2147483647, %v8830_v49  ;;  %v3592_v3 = vsub.f32 1.0, %v3591_v63  ;;  %v4184_v46 = vpack.c.bf16 %v8922_v15, %v8918_v13  ;;  %v3863_v34 = vmul.f32 %v9046_v33, %v3862_v8 }
 0x602   : > { %4908 = vperm.xlu1 %5639, %v4870_v1   ;;  %4275 = vmatmul.bf16.vlgmr.msra.gmra.mxu1 %v4223_v21  ;;  %11352 = vst [vmem:[#allocation112_spill] sm:$0xff] %v9121_v9  ;;  %v9140_v1 = vpop.eup %6077  ;;  %v9147_v21 = vadd.f32 %v8975_v43, %v3728_v62  ;;  %v3743_v63 = vmul.f32 %v9052_v32, %v3742_v17  ;;  %v11356_v13 = vand.u32 2147483647, %v8735_v18  ;;  %v9162_v42 = vor.u32 1.1754944e-38, %v3751_v22  ;;  %v4873_v18 = vld [vmem:[%s10502_s7 + $0x40] sm:$0xff] }
 0x603   : > { %4289 = vmatmul.bf16.vlgmr.msra.gmra.mxu2 %v4224_v59  ;;  %v9159_v59 = vadd.f32 %v8995_v28, %v3698_v38  ;;  %v3578_v62 = vmul.f32 %v9059_v20, %v3577_v26  ;;  %v3586_v8 = vand.u32 2147483648, %v8830_v49  ;;  %v3774_v17 = vadd.f32 %v9034_v25, %v3773_v24 }
 0x604   : > { %vm9154_vm3 = vcmp.eq.f32.partialorder %v11356_v13, 8.507059e+37  ;;  %11359 = vst [vmem:[#allocation137_spill] sm:$0xff] %v9162_v42  ;;  %v3593_v22 = vmul.f32 %v9076_v61, %v3592_v3  ;;  %v3891_v26 = vmul.f32 %v9140_v1, %v9071_v58  ;;  %v4483_v13 = vunpack.c.l.b16 %v4184_v46 }
 0x605   : > { %v9172_v38 = vpop.eup %6079  ;;  %v4484_v29 = vunpack.c.h.b16 %v4184_v46  ;;  %v9191_v3 = vadd.f32 %v9052_v32, %v3743_v63  ;;  %vm9194_vm15 = vcmp.eq.f32.partialorder %v3584_v53, 8.507059e+37  ;;  %vm3775_vm9 = vweird.f32 %v8961_v11  ;;  %v11394_v46 = vld [vmem:[#allocation87_spill] sm:$0xff] }
 0x606   : > { %4888 = vperm.xlu2 %5640, %v4866_v40   ;;  %v9188_v40 = vadd.f32 %v9046_v33, %v3863_v34  ;;  %v3579_v34 = vadd.f32 %v9059_v20, %v3578_v62  ;;  %v3779_v63 = vand.u32 2147483647, %v8961_v11  ;;  %v3599_v53 = vand.u32 2147483647, %v8963_v60  ;;  %vm9213_vm2 = vmor %vm3775_vm9, %vm3776_vm6 }
 0x607   : > { %v9177_v27 = vpop.xlane.xlu2 %2970  ;;  %v3601_v9 = vand.u32 2147483648, %v8963_v60  ;;  %v3876_v5 = vmul.f32 %v9172_v38, %v9044_v37  ;;  %v11369_v62 = vunpack.c.l.b16 %v8799_v10  ;;  %v11370_v50 = vunpack.c.h.b16 %v8799_v10 }
 0x608   : > { %11362 = vst [vmem:[#allocation89_spill] sm:$0xff] %v9188_v40  ;;  %v3778_v42 = vsel %vm9213_vm2, %v9034_v25, %v3774_v17  ;;  %v3594_v51 = vadd.f32 %v9076_v61, %v3593_v22  ;;  %vm3596_vm12 = vweird.f32 %v9076_v61  ;;  %v3733_v10 = vsel %vm9183_vm7, %v8975_v43, %v9147_v21 }
 0x609   : > { %v4491_v0 = vpack.c.b16 %v4483_v13, %v11369_v62  ;;  %v4492_v11 = vpack.c.b16 %v4484_v29, %v11370_v50  ;;  %v3892_v13 = vsub.f32 1.0, %v3891_v26  ;;  %v4869_v50 = vld [vmem:[%s10502_s7 + $0x20] sm:$0xff]  ;;  %vm11374_vm13 = vweird.f32 %v8898_v31 }
 0x60a   : > { %4923 = vperm.xlu1 %5639, %v4873_v18   ;;  %v11371_v18 = vmov 0  ;;  %vm9252_vm2 = vmor %vm11374_vm13, %vm3746_vm5  ;;  %v3587_v36 = vor.u32 1.1754944e-38, %v3586_v8  ;;  %v3782_v17 = vor.u32 1.1754944e-38, %v3781_v39  ;;  %vm11377_vm4 = vweird.f32 %v9059_v20  ;;  %v11392_v62 = vld [vmem:[#allocation145_spill] sm:$0xff]  ;;  %v11419_v8 = vld [vmem:[#allocation100_spill] sm:$0xff] }
 0x60b   : > { %v11372_v18 = vsel %vm9228_vm11, 4294967295, %v11371_v18  ;;  %4505 = vmatpush.bf16.xpose.msra.mxu1 %v4491_v0  ;;  %4519 = vmatpush.bf16.xpose.msra.mxu2 %v4492_v11  ;;  %vm11378_vm5 = vweird.f32 %v8830_v49  ;;  %vm3780_vm9 = vcmp.eq.f32.partialorder %v3779_v63, 8.507059e+37  ;;  %vm3595_vm13 = vweird.f32 %v8963_v60  ;;  %v4876_v63 = vld [vmem:[%s10502_s7 + $0x58] sm:$0xff] }
 0x60c   : > { %11373 = vst [vmem:[#allocation111_spill] sm:$0xff] %v11372_v18  ;;  %vm9268_vm6 = vmor %vm11378_vm5, %vm11377_vm4  ;;  %3018 = vadd.xlane.f32.xlu0 %v8791_v57  ;;  %v3783_v39 = vsel %vm3780_vm9, %v3782_v17, %v3778_v42  ;;  %v3877_v49 = vsub.f32 1.0, %v3876_v5  ;;  %v11383_v57 = vsel %vm9001_vm1, %v8844_v6, %v8972_v48  ;;  %v11384_v60 = vand.u32 2147483647, %v8576_v47  ;;  %v9308_v48 = vpop.xlane.xlu0 %3030  ;;  %v11451_v18 = vld [vmem:[#allocation53_spill] sm:$0xff] }
 0x60d   : > { %v3583_v0 = vsel %vm9268_vm6, %v9059_v20, %v3579_v34  ;;  %vm9279_vm14 = vmor %vm3595_vm13, %vm3596_vm12  ;;  %v3438_v20 = vsel %vm9154_vm3, %v8968_v16, %v11383_v57  ;;  %vm9303_vm4 = vcmp.eq.f32.partialorder %v3599_v53, 8.507059e+37  ;;  %v3602_v7 = vor.u32 1.1754944e-38, %v3601_v9 }
 0x60e   : > { %4903 = vperm.xlu2 %5640, %v4869_v50   ;;  %vm9296_vm12 = vcmp.eq.f32.partialorder %v11384_v60, 8.507059e+37  ;;  %v3598_v5 = vsel %vm9279_vm14, %v9076_v61, %v3594_v51  ;;  %v3893_v6 = vmul.f32 %v9140_v1, %v3892_v13  ;;  %vm3895_vm1 = vweird.f32 %v9071_v58  ;;  %v803_v50 = vpop.permute.xlu1 %802 }
 0x60f   : > { %v9310_v16 = vpop.xlane.xlu2 %3054  ;;  %v3899_v47 = vand.u32 2147483647, %v9071_v58  ;;  %v3901_v15 = vand.u32 2147483648, %v9071_v58  ;;  %vm3880_vm3 = vweird.f32 %v9044_v37  ;;  %v9317_v51 = vmul.f32 %v8303_v23, %v3783_v39 }
 0x610   : > { %11389 = vst [vmem:[#allocation127_spill] sm:$0xff] %v9310_v16  ;;  %v9320_v61 = vmul.f32 %v8311_v19, %v3783_v39  ;;  %v3884_v9 = vand.u32 2147483647, %v9044_v37  ;;  %v3588_v53 = vsel %vm9194_vm15, %v3587_v36, %v3583_v0  ;;  %vm3896_vm14 = vweird.f32 %v9140_v1  ;;  %v11390_v19 = vld [vmem:[#allocation59_spill] sm:$0xff]  ;;  %v4872_v0 = vld [vmem:[%s10502_s7 + $0x38] sm:$0xff] }
 0x611   : > { %v3878_v11 = vmul.f32 %v9172_v38, %v3877_v49  ;;  %6081 = vrcp.f32 %v9308_v48  ;;  %v3603_v13 = vsel %vm9303_vm4, %v3602_v7, %v3598_v5  ;;  %v3894_v23 = vadd.f32 %v9140_v1, %v3893_v6  ;;  %vm9368_vm6 = vmor %vm3895_vm1, %vm3896_vm14  ;;  %v11402_v7 = vld [vmem:[#allocation17_spill] sm:$0xff] }
 0x612   : > { %4938 = vperm.xlu1 %5639, %v4876_v63   ;;  %v9332_v17 = vmul.f32 %v11390_v19, %v3588_v53  ;;  %v9335_v39 = vmul.f32 %v11392_v62, %v3588_v53  ;;  %v9338_v36 = vmul.f32 %v11394_v46, %v3603_v13  ;;  %vm9343_vm15 = vcmp.eq.f32.partialorder %v3899_v47, 8.507059e+37  ;;  %v11398_v63 = vld [vmem:[#allocation15_spill] sm:$0xff] }
 0x613   : > { %v3902_v49 = vor.u32 1.1754944e-38, %v3901_v15  ;;  %vm3881_vm5 = vweird.f32 %v9172_v38  ;;  %4506 = vmatpush.bf16.xpose.msra.mxu1 %v8696_v14  ;;  %4520 = vmatpush.bf16.xpose.msra.mxu2 %v8717_v41  ;;  %v9351_v57 = vmul.f32 %v11398_v63, %v3603_v13  ;;  %v9355_v60 = vadd.f32 %v8987_v44, %v9317_v51  ;;  %v4879_v47 = vld [vmem:[%s10502_s7 + $0x70] sm:$0xff]  ;;  %v11403_v15 = vld [vmem:[#allocation18_spill] sm:$0xff]  ;;  %v11411_v14 = vld [vmem:[#allocation105_spill] sm:$0xff] }
 0x614   : > { %11391 = vst [vmem:[#allocation68_spill] sm:$0xff] %v9332_v17  ;;  %v9359_v5 = vadd.f32 %v8990_v45, %v9320_v61  ;;  %6083 = vrcp.f32 %v9104_v30  ;;  %v4187_v34 = vpack.c.bf16 %v9335_v39, %v9332_v17  ;;  %v3879_v41 = vadd.f32 %v9172_v38, %v3878_v11  ;;  %vm9401_vm9 = vmor %vm3880_vm3, %vm3881_vm5  ;;  %v11473_v17 = vld [vmem:[#allocation36_spill] sm:$0xff] }
 0x615   : > { %11393 = vst [vmem:[#allocation13_spill] sm:$0xff] %v9335_v39  ;;  %v3886_v44 = vand.u32 2147483648, %v9044_v37  ;;  %v1021_v45 = vadd.f32 %v11402_v7, %v803_v50  ;;  %v4188_v6 = vpack.c.bf16 %v9351_v57, %v9338_v36  ;;  %v3898_v58 = vsel %vm9368_vm6, %v9140_v1, %v3894_v23  ;;  %v11407_v7 = vld [vmem:[#allocation5_spill] sm:$0xff] }
 0x616   : > { %11395 = vst [vmem:[#allocation14_spill] sm:$0xff] %v9338_v36  ;;  %4918 = vperm.xlu2 %5640, %v4872_v0   ;;  %v1110_v53 = vadd.f32 %v11403_v15, %v803_v50  ;;  %6085 = vrcp.f32 %v9177_v27  ;;  %v4551_v11 = vunpack.c.l.b16 %v4187_v34  ;;  %v4552_v46 = vunpack.c.h.b16 %v4187_v34  ;;  %v11410_v50 = vld [vmem:[#allocation64_spill] sm:$0xff] }
 0x617   : > { %11399 = vst [vmem:[#allocation96_spill] sm:$0xff] %v9351_v57  ;;  %v9385_v13 = vpop.xlane.xlu2 %3057  ;;  %v9387_v19 = vpop.eup %6081  ;;  %v4553_v62 = vunpack.c.l.b16 %v4188_v6  ;;  %v4554_v0 = vunpack.c.h.b16 %v4188_v6  ;;  %v11406_v63 = vsel %vm8890_vm10, %v8729_v54, %v8847_v52  ;;  %v4073_v34 = vmul.f32 %v11410_v50, %v3438_v20  ;;  %v11412_v6 = vld [vmem:[#allocation128_spill] sm:$0xff]  ;;  %v11413_v54 = vld [vmem:[#allocation65_spill] sm:$0xff] }
 0x618   : > { %11404 = vst [vmem:[#allocation73_spill] sm:$0xff] %v9385_v13  ;;  %v3453_v1 = vsel %vm9296_vm12, %v11407_v7, %v11406_v63  ;;  %v4074_v56 = vmul.f32 %v11411_v14, %v3438_v20  ;;  %v3883_v42 = vsel %vm9401_vm9, %v9172_v38, %v3879_v41  ;;  %v3887_v63 = vor.u32 1.1754944e-38, %v3886_v44  ;;  %v11415_v38 = vld [vmem:[#allocation125_spill] sm:$0xff]  ;;  %v11464_v36 = vld [vmem:[#allocation28_spill] sm:$0xff] }
 0x619   : > { %11405 = vst [vmem:[#allocation24_spill] sm:$0xff] %v9387_v19  ;;  %v4075_v15 = vmul.f32 %v11412_v6, %v3453_v1  ;;  %v4076_v52 = vmul.f32 %v11413_v54, %v3453_v1  ;;  %v4565_v7 = vpack.c.b16 %v4553_v62, %v4551_v11  ;;  %v4566_v37 = vpack.c.b16 %v4554_v0, %v4552_v46  ;;  %v4875_v1 = vld [vmem:[%s10502_s7 + $0x50] sm:$0xff]  ;;  %v11416_v44 = vld [vmem:[#allocation81_spill] sm:$0xff]  ;;  %v11417_v62 = vld [vmem:[#allocation106_spill] sm:$0xff] }
 0x61a   : > { %4953 = vperm.xlu1 %5639, %v4879_v47   ;;  %v9412_v22 = vpop.eup %6083  ;;  %v9414_v29 = vpack.c.bf16 %v1110_v53, %v1021_v45  ;;  %v3846_v47 = vmul.f32 %v9387_v19, %v9308_v48  ;;  %v4177_v50 = vpack.c.bf16 %v4074_v56, %v4073_v34  ;;  %v3903_v23 = vsel %vm9343_vm15, %v3902_v49, %v3898_v58  ;;  %v11418_v46 = vld [vmem:[#allocation98_spill] sm:$0xff]  ;;  %v823_v58 = vpop.permute.xlu1 %822 }
 0x61b   : > { %11414 = vst [vmem:[#allocation62_spill] sm:$0xff] %v9412_v22  ;;  %v4178_v20 = vpack.c.bf16 %v4076_v52, %v4075_v15  ;;  %vm3885_vm10 = vcmp.eq.f32.partialorder %v3884_v9, 8.507059e+37  ;;  %4585 = vmatpush.bf16.xpose.msrb.mxu3 %v4565_v7  ;;  %4599 = vmatpush.bf16.xpose.msra.mxu0 %v4566_v37  ;;  %v9424_v41 = vadd.f32 %v11415_v38, %v4073_v34  ;;  %v11420_v34 = vld [vmem:[#allocation74_spill] sm:$0xff]  ;;  %6087 = vrcp.f32 %v9310_v16 }
 0x61c   : > { %v9427_v45 = vadd.f32 %v11416_v44, %v4074_v56  ;;  %v9429_v53 = vpop.eup %6085  ;;  %v3888_v11 = vsel %vm3885_vm10, %v3887_v63, %v3883_v42  ;;  %4507 = vmatpush.bf16.xpose.msra.mxu1 %v11417_v62  ;;  %4521 = vmatpush.bf16.xpose.msra.mxu2 %v11418_v46  ;;  %v4469_v0 = vunpack.c.l.b16 %v4177_v50  ;;  %v9434_v49 = vadd.f32 %v11419_v8, %v4075_v15  ;;  %v702_v42 = vld [vmem:[%s10500_s5 + $0xc0] sm:$0xff]  ;;  %v11424_v15 = vld [vmem:[#allocation130_spill] sm:$0xff] }
 0x61d   : > { %v4471_v14 = vunpack.c.l.b16 %v4178_v20  ;;  %v3681_v9 = vmul.f32 %v9412_v22, %v9104_v30  ;;  %v9439_v6 = vadd.f32 %v11420_v34, %v4076_v52  ;;  %v4470_v56 = vunpack.c.h.b16 %v4177_v50  ;;  %v11426_v46 = vld [vmem:[#allocation10_spill] sm:$0xff]  ;;  %v11427_v34 = vld [vmem:[#allocation75_spill] sm:$0xff] }
 0x61e   : > { %v4472_v54 = vunpack.c.h.b16 %v4178_v20  ;;  %4933 = vperm.xlu2 %5640, %v4875_v1   ;;  %v11421_v63 = vand.u32 2147483647, %v8816_v4  ;;  %v9451_v37 = vmul.f32 %v11424_v15, %v3903_v23  ;;  %v3847_v38 = vsub.f32 1.0, %v3846_v47  ;;  %v11425_v20 = vld [vmem:[#allocation132_spill] sm:$0xff]  ;;  %v11428_v47 = vld [vmem:[#allocation29_spill] sm:$0xff] }
 0x61f   : > { %v3856_v52 = vand.u32 2147483648, %v9308_v48  ;;  %v4485_v44 = vpack.c.b16 %v4471_v14, %v4469_v0  ;;  %v9454_v50 = vpop.xlane.xlu2 %2973  ;;  %v9457_v1 = vmul.f32 %v11425_v20, %v3903_v23  ;;  %v3546_v62 = vmul.f32 %v9429_v53, %v9177_v27  ;;  %v11429_v14 = vld [vmem:[#allocation30_spill] sm:$0xff] }
 0x620   : > { %vm9446_vm13 = vcmp.eq.f32.partialorder %v11421_v63, 8.507059e+37  ;;  %v4486_v4 = vpack.c.b16 %v4472_v54, %v4470_v56  ;;  %v9463_v8 = vmul.f32 %v11426_v46, %v3888_v11  ;;  %v9466_v63 = vmul.f32 %v11427_v34, %v3888_v11  ;;  %832 = vperm.xlu0 %5638, %v702_v42  }
 0x621   : > { %vm3850_vm12 = vweird.f32 %v9308_v48  ;;  %v1031_v0 = vadd.f32 %v11428_v47, %v823_v58  ;;  %v1120_v15 = vadd.f32 %v11429_v14, %v823_v58  ;;  %v3682_v56 = vsub.f32 1.0, %v3681_v9  ;;  %v9474_v54 = vpop.xlane.xlu0 %3060  ;;  %v4878_v58 = vld [vmem:[%s10502_s7 + $0x68] sm:$0xff] }
 0x622   : > { %v3848_v46 = vmul.f32 %v9387_v19, %v3847_v38  ;;  %v9477_v11 = vor.u32 1.1754944e-38, %v3856_v52  ;;  %v3691_v34 = vand.u32 2147483648, %v9104_v30  ;;  %6089 = vrcp.f32 %v9474_v54  ;;  %v11434_v38 = vld [vmem:[#allocation76_spill] sm:$0xff] }
 0x623   : > { %v9486_v42 = vadd.f32 %v9355_v60, %v9451_v37  ;;  %v9490_v9 = vadd.f32 %v9359_v5, %v9457_v1  ;;  %vm3685_vm4 = vweird.f32 %v9104_v30  ;;  %v3547_v52 = vsub.f32 1.0, %v3546_v62  ;;  %v9505_v5 = vpop.eup %6087 }
 0x624   : > { %11430 = vst [vmem:[#allocation57_spill] sm:$0xff] %v9477_v11  ;;  %v9496_v47 = vadd.f32 %v9109_v12, %v9463_v8  ;;  %v9500_v14 = vadd.f32 %v9113_v55, %v9466_v63  ;;  %vm3851_vm1 = vweird.f32 %v9387_v19  ;;  %v9503_v60 = vpack.c.bf16 %v1120_v15, %v1031_v0  ;;  %4508 = vmatpush.bf16.xpose.msra.mxu1 %v4485_v44  ;;  %v709_v12 = vld [vmem:[%s10500_s5 + $0xf8] sm:$0xff]  ;;  %v11433_v55 = vld [vmem:[#allocation139_spill] sm:$0xff] }
 0x625   : > { %4522 = vmatpush.bf16.xpose.msra.mxu2 %v4486_v4  ;;  %11432 = vst [vmem:[#allocation110_spill] sm:$0xff] %v9505_v5  ;;  %v3683_v26 = vmul.f32 %v9412_v22, %v3682_v56  ;;  %v3556_v62 = vand.u32 2147483648, %v9177_v27  ;;  %6091 = vrcp.f32 %v9385_v13  ;;  %v9515_v20 = vadd.f32 %v11434_v38, %v11433_v55  ;;  %v11437_v56 = vld [vmem:[#allocation144_spill] sm:$0xff]  ;;  %v11439_v38 = vld [vmem:[#allocation123_spill] sm:$0xff]  ;;  %vm9549_vm7 = vmor %vm3850_vm12, %vm3851_vm1 }
 0x626   : > { %11431 = vst [vmem:[#allocation142_spill] sm:$0xff] %v9503_v60  ;;  %4948 = vperm.xlu2 %5640, %v4878_v58   ;;  %v9518_v44 = vadd.f32 %v9387_v19, %v3848_v46  ;;  %vm3686_vm3 = vweird.f32 %v9412_v22  ;;  %v9521_v4 = vor.u32 1.1754944e-38, %v3691_v34  ;;  %vm3550_vm14 = vweird.f32 %v9177_v27  ;;  %v11438_v58 = vld [vmem:[#allocation9_spill] sm:$0xff]  ;;  %v11452_v11 = vld [vmem:[#allocation104_spill] sm:$0xff] }
 0x627   : > { %v3548_v0 = vmul.f32 %v9429_v53, %v3547_v52  ;;  %v3738_v46 = vsel %vm9446_vm13, %v11437_v56, %v3733_v10  ;;  %v9536_v55 = vadd.f32 %v11439_v38, %v11438_v58  ;;  %v3966_v15 = vmul.f32 %v9505_v5, %v9310_v16  ;;  %v11444_v38 = vld [vmem:[#allocation6_spill] sm:$0xff]  ;;  %vm9584_vm5 = vmor %vm3685_vm4, %vm3686_vm3 }
 0x628   : > { %11435 = vst [vmem:[#allocation118_spill] sm:$0xff] %v9518_v44  ;;  %v6090_v34 = vpop.eup %6089  ;;  %6093 = vrcp.f32 %v9454_v50  ;;  %867 = vperm.xlu0 %5638, %v709_v12   ;;  %v11440_v21 = vmov 0  ;;  %v9554_v24 = vadd.f32 %v9412_v22, %v3683_v26  ;;  %v9556_v10 = vor.u32 1.1754944e-38, %v3556_v62  ;;  %v11445_v26 = vld [vmem:[#allocation94_spill] sm:$0xff] }
 0x629   : > { %11436 = vst [vmem:[#allocation135_spill] sm:$0xff] %v9521_v4  ;;  %v9543_v43 = vpop.xlane.xlu2 %3063  ;;  %v11441_v21 = vsel %vm9549_vm7, 4294967295, %v11440_v21  ;;  %v3996_v7 = vmul.f32 %v6090_v34, %v9474_v54  ;;  %v9559_v56 = vpop.xlane.xlu0 %3051  ;;  %v3976_v58 = vand.u32 2147483648, %v9310_v16  ;;  %v9568_v52 = vmul.f32 %v11444_v38, %v3738_v46  ;;  %v11450_v12 = vld [vmem:[#allocation86_spill] sm:$0xff] }
 0x62a   : > { %11442 = vst [vmem:[#allocation136_spill] sm:$0xff] %v11441_v21  ;;  %6095 = vrcp.f32 %v9543_v43  ;;  %v9571_v23 = vmul.f32 %v11445_v26, %v3738_v46  ;;  %v9576_v4 = vadd.f32 %v9429_v53, %v3548_v0  ;;  %vm3551_vm15 = vweird.f32 %v9429_v53  ;;  %v11453_v44 = vld [vmem:[#allocation54_spill] sm:$0xff] }
 0x62b   : > { %11443 = vst [vmem:[#allocation95_spill] sm:$0xff] %v9554_v24  ;;  %v9573_v62 = vpop.eup %6091  ;;  %v3997_v33 = vsub.f32 1.0, %v3996_v7  ;;  %v11447_v38 = vmov 0  ;;  %v3967_v46 = vsub.f32 1.0, %v3966_v15  ;;  %v4006_v26 = vand.u32 2147483648, %v9474_v54  ;;  %vm9625_vm10 = vmor %vm3550_vm14, %vm3551_vm15 }
 0x62c   : > { %11446 = vst [vmem:[#allocation72_spill] sm:$0xff] %v9573_v62  ;;  %v11448_v38 = vsel %vm9584_vm5, 4294967295, %v11447_v38  ;;  %v5134_v0 = vadd.f32 %v11451_v18, %v11450_v12  ;;  %v5141_v19 = vadd.f32 %v11453_v44, %v11452_v11  ;;  %v11454_v40 = vand.u32 2147483647, %v8898_v31  ;;  %v4865_v18 = vld [vmem:[%s10502_s7] sm:$0xff] }
 0x62d   : > { %11449 = vst [vmem:[#allocation11_spill] sm:$0xff] %v11448_v38  ;;  %v3998_v15 = vmul.f32 %v6090_v34, %v3997_v33  ;;  %vm4001_vm9 = vweird.f32 %v6090_v34  ;;  %v4004_v57 = vand.u32 2147483647, %v9474_v54  ;;  %v9609_v31 = vor.u32 1.1754944e-38, %v3976_v58  ;;  %v11462_v38 = vld [vmem:[#allocation97_spill] sm:$0xff] }
 0x62e   : > { %vm9595_vm6 = vcmp.eq.f32.partialorder %v11454_v40, 8.507059e+37  ;;  %v9607_v11 = vpop.eup %6093  ;;  %v3981_v40 = vmul.f32 %v9573_v62, %v9385_v13  ;;  %v9614_v44 = vadd.f32 %v5134_v0, %v9568_v52  ;;  %v9617_v12 = vadd.f32 %v5141_v19, %v9571_v23 }
 0x62f   : > { %11457 = vst [vmem:[#allocation12_spill] sm:$0xff] %v9609_v31  ;;  %vm3971_vm13 = vweird.f32 %v9505_v5  ;;  %v3999_v58 = vadd.f32 %v6090_v34, %v3998_v15  ;;  %vm4000_vm12 = vweird.f32 %v9474_v54  ;;  %6097 = vrcp.f32 %v9559_v56 }
 0x630   : > { %11458 = vst [vmem:[#allocation59_spill] sm:$0xff] %v9614_v44  ;;  %v9619_v33 = vpop.eup %6095  ;;  %v3968_v0 = vmul.f32 %v9505_v5, %v3967_v46  ;;  %vm4002_vm4 = vmor %vm4000_vm12, %vm4001_vm9  ;;  %v4007_v31 = vor.u32 1.1754944e-38, %v4006_v26  ;;  %4883 = vperm.xlu0 %5638, %v4865_v18   ;;  %vm3970_vm1 = vweird.f32 %v9310_v16  ;;  %vm4005_vm3 = vcmp.eq.f32.partialorder %v4004_v57, 8.507059e+37  ;;  %v11506_v16 = vld [vmem:[#allocation7_spill] sm:$0xff] }
 0x631   : > { %11459 = vst [vmem:[#allocation145_spill] sm:$0xff] %v9617_v12  ;;  %v4011_v12 = vmul.f32 %v9619_v33, %v9543_v43  ;;  %v9640_v15 = vpop.xlane.xlu2 %3048  ;;  %v4003_v44 = vsel %vm4002_vm4, %v6090_v34, %v3999_v58  ;;  %v3561_v19 = vmul.f32 %v9607_v11, %v9454_v50  ;;  %v9646_v24 = vpop.xlane.xlu0 %3024  ;;  %v3982_v46 = vsub.f32 1.0, %v3981_v40  ;;  %v4868_v58 = vld [vmem:[%s10502_s7 + $0x18] sm:$0xff] }
 0x632   : > { %v3991_v26 = vand.u32 2147483648, %v9385_v13  ;;  %v4008_v22 = vsel %vm4005_vm3, %v4007_v31, %v4003_v44  ;;  %v4021_v57 = vand.u32 2147483648, %v9543_v43  ;;  %6099 = vrcp.f32 %v9640_v15 }
 0x633   : > { %v4012_v18 = vsub.f32 1.0, %v4011_v12  ;;  %v9651_v60 = vmul.f32 %v11462_v38, %v4008_v22  ;;  %v9654_v39 = vmul.f32 %v11464_v36, %v4008_v22  ;;  %v9659_v34 = vadd.f32 %v9505_v5, %v3968_v0  ;;  %v11469_v0 = vld [vmem:[#allocation23_spill] sm:$0xff] }
 0x634   : > { %vm4016_vm14 = vweird.f32 %v9619_v33  ;;  %v4019_v31 = vand.u32 2147483647, %v9543_v43  ;;  %v9664_v44 = vpop.xlane.xlu1 %3042  ;;  %v3562_v12 = vsub.f32 1.0, %v3561_v19  ;;  %6101 = vrcp.f32 %v9646_v24 }
 0x635   : > { %11463 = vst [vmem:[#allocation87_spill] sm:$0xff] %v9651_v60  ;;  %v4013_v40 = vmul.f32 %v9619_v33, %v4012_v18  ;;  %v9666_v38 = vpop.eup %6097  ;;  %v5165_v22 = vadd.f32 %v9496_v47, %v9651_v60  ;;  %v5172_v36 = vadd.f32 %v9500_v14, %v9654_v39  ;;  %v11470_v18 = vand.u32 2147483647, %v11469_v0  ;;  %v11504_v60 = vld [vmem:[#allocation113_spill] sm:$0xff] }
 0x636   : > { %11465 = vst [vmem:[#allocation15_spill] sm:$0xff] %v9654_v39  ;;  %v11474_v30 = vand.u32 2147483647, %v11473_v17  ;;  %v3983_v14 = vmul.f32 %v9573_v62, %v3982_v46  ;;  %vm4015_vm4 = vweird.f32 %v9543_v43  ;;  %v11477_v0 = vsel %vm9252_vm2, %v9052_v32, %v9191_v3 }
 0x637   : > { %11466 = vst [vmem:[#allocation17_spill] sm:$0xff] %v9659_v34  ;;  %vm9681_vm9 = vcmp.eq.f32.partialorder %v11470_v18, 8.507059e+37  ;;  %v4014_v19 = vadd.f32 %v9619_v33, %v4013_v40  ;;  %v11478_v18 = vld [vmem:[#allocation137_spill] sm:$0xff]  ;;  %v5199_v17 = vmul.f32 0.125, %v5165_v22  ;;  %vm3565_vm3 = vweird.f32 %v9454_v50  ;;  %vm4017_vm15 = vmor %vm4015_vm4, %vm4016_vm14 }
 0x638   : > { %11467 = vst [vmem:[#allocation18_spill] sm:$0xff] %v9664_v44  ;;  %vm9687_vm12 = vcmp.eq.f32.partialorder %v11474_v30, 8.507059e+37  ;;  %v3753_v39 = vsel %vm9595_vm6, %v11478_v18, %v11477_v0  ;;  %v5200_v30 = vmul.f32 0.125, %v5172_v36  ;;  %v4022_v46 = vor.u32 1.1754944e-38, %v4021_v57  ;;  %4898 = vperm.xlu0 %5638, %v4868_v58   ;;  %v9710_v3 = vpop.eup %6099  ;;  %vm9723_vm14 = vmor %vm3970_vm1, %vm3971_vm13  ;;  %v11486_v22 = vld [vmem:[#allocation69_spill] sm:$0xff]  ;;  %v11489_v18 = vld [vmem:[#allocation134_spill] sm:$0xff] }
 0x639   : > { %11468 = vst [vmem:[#allocation5_spill] sm:$0xff] %v9666_v38  ;;  %6103 = vrcp.f32 %v9664_v44  ;;  %v3569_v43 = vand.u32 2147483647, %v9454_v50  ;;  %v3951_v25 = vmul.f32 %v9666_v38, %v9559_v56  ;;  %v4018_v32 = vsel %vm4017_vm15, %v9619_v33, %v4014_v19  ;;  %v9734_v58 = vpop.xlane.xlu0 %3027  ;;  %v9736_v19 = vpop.xlane.xlu2 %3045 }
 0x63a   : > { %vm4020_vm2 = vcmp.eq.f32.partialorder %v4019_v31, 8.507059e+37  ;;  %11479 = vst [vmem:[#allocation64_spill] sm:$0xff] %v9710_v3  ;;  %vm3986_vm6 = vweird.f32 %v9573_v62  ;;  %v9713_v7 = vor.u32 1.1754944e-38, %v3991_v26  ;;  %v3563_v57 = vmul.f32 %v9607_v11, %v3562_v12  ;;  %v11484_v31 = vld [vmem:[#allocation70_spill] sm:$0xff]  ;;  %v11488_v12 = vld [vmem:[#allocation119_spill] sm:$0xff] }
 0x63b   : > { %5215 = vst [vmem:[%s9715_s24 + $0x60] sm:$0xff] %v5199_v17  ;;  %v4023_v40 = vsel %vm4020_vm2, %v4022_v46, %v4018_v32  ;;  %v11481_v33 = vmov 0  ;;  %v9739_v0 = vmul.f32 %v11488_v12, %v3753_v39  ;;  %v9742_v17 = vmul.f32 %v11489_v18, %v3753_v39  ;;  %v9744_v46 = vpop.eup %6101 }
 0x63c   : > { %11480 = vst [vmem:[#allocation105_spill] sm:$0xff] %v9713_v7  ;;  %v11482_v33 = vsel %vm9723_vm14, 4294967295, %v11481_v33  ;;  %v9729_v26 = vmul.f32 %v11484_v31, %v4023_v40  ;;  %v9732_v36 = vmul.f32 %v11486_v22, %v4023_v40  ;;  %v9757_v31 = vadd.f32 %v9573_v62, %v3983_v14 }
 0x63d   : > { %11483 = vst [vmem:[#allocation128_spill] sm:$0xff] %v11482_v33  ;;  %v3571_v22 = vand.u32 2147483648, %v9454_v50  ;;  %v9762_v39 = vpack.c.bf16 %v9571_v23, %v9568_v52  ;;  %vm9764_vm1 = vcmp.eq.f32.partialorder %v3569_v43, 8.507059e+37  ;;  %v3952_v12 = vsub.f32 1.0, %v3951_v25 }
 0x63e   : > { %5216 = vst [vmem:[%s9715_s24 + $0x68] sm:$0xff] %v5200_v30  ;;  %v11490_v30 = vand.u32 2147483647, %v9177_v27  ;;  %v5179_v18 = vadd.f32 %v9486_v42, %v9729_v26  ;;  %v3936_v14 = vmul.f32 %v9710_v3, %v9640_v15  ;;  %v3564_v7 = vadd.f32 %v9607_v11, %v3563_v57  ;;  %v4871_v42 = vld [vmem:[%s10502_s7 + $0x30] sm:$0xff] }
 0x63f   : > { %11485 = vst [vmem:[#allocation65_spill] sm:$0xff] %v9729_v26  ;;  %v9774_v40 = vpop.eup %6103  ;;  %vm3566_vm15 = vweird.f32 %v9607_v11  ;;  %v3961_v23 = vand.u32 2147483648, %v9559_v56  ;;  %6105 = vrcp.f32 %v9734_v58  ;;  %vm11497_vm4 = vweird.f32 %v9385_v13  ;;  %v11503_v26 = vld [vmem:[#allocation141_spill] sm:$0xff] }
 0x640   : > { %11487 = vst [vmem:[#allocation125_spill] sm:$0xff] %v9732_v36  ;;  %vm9748_vm13 = vcmp.eq.f32.partialorder %v11490_v30, 8.507059e+37  ;;  %v5186_v30 = vadd.f32 %v9490_v9, %v9732_v36  ;;  %vm9787_vm2 = vmor %vm11497_vm4, %vm3986_vm6  ;;  %v5201_v52 = vmul.f32 0.125, %v5179_v18  ;;  %v3816_v25 = vmul.f32 %v9744_v46, %v9646_v24  ;;  %4913 = vperm.xlu0 %5638, %v4871_v42  }
 0x641   : > { %11493 = vst [vmem:[#allocation81_spill] sm:$0xff] %v9757_v31  ;;  %v9795_v57 = vpack.c.bf16 %v9742_v17, %v9739_v0  ;;  %v3572_v5 = vor.u32 1.1754944e-38, %v3571_v22  ;;  %v11500_v18 = vsel %vm9203_vm8, %v8995_v28, %v9159_v59  ;;  %v11505_v13 = vsel %vm9022_vm0, %v11503_v26, %v11504_v60  ;;  %vm9823_vm6 = vmor %vm3565_vm3, %vm3566_vm15  ;;  %v11510_v22 = vld [vmem:[#allocation116_spill] sm:$0xff]  ;;  %v11543_v31 = vld [vmem:[#allocation22_spill] sm:$0xff] }
 0x642   : > { %11496 = vst [vmem:[#allocation106_spill] sm:$0xff] %v9774_v40  ;;  %v5202_v43 = vmul.f32 0.125, %v5186_v30  ;;  %v11501_v30 = vld [vmem:[#allocation71_spill] sm:$0xff]  ;;  %v9819_v34 = vsel %vm9681_vm9, %v11506_v16, %v11505_v13  ;;  %v3953_v28 = vmul.f32 %v9666_v38, %v3952_v12  ;;  %v3937_v59 = vsub.f32 1.0, %v3936_v14 }
 0x643   : > { %v9809_v33 = vsel %vm9687_vm12, %v11501_v30, %v11500_v18  ;;  %5217 = vst [vmem:[%s9715_s24 + $0x70] sm:$0xff] %v5201_v52  ;;  %v3906_v47 = vmul.f32 %v9774_v40, %v9664_v44  ;;  %v3568_v16 = vsel %vm9823_vm6, %v9607_v11, %v3564_v7  ;;  %vm3955_vm0 = vweird.f32 %v9559_v56  ;;  %v9865_v30 = vpop.permute.xlu2 %827 }
 0x644   : > { %v9837_v50 = vor.u32 1.1754944e-38, %v3961_v23  ;;  %5218 = vst [vmem:[%s9715_s24 + $0x78] sm:$0xff] %v5202_v43  ;;  %v3817_v54 = vsub.f32 1.0, %v3816_v25  ;;  %v3826_v26 = vand.u32 2147483648, %v9646_v24  ;;  %v9844_v12 = vmul.f32 %v11510_v22, %v9809_v33  ;;  %v11515_v22 = vld [vmem:[#allocation67_spill] sm:$0xff] }
 0x645   : > { %v9846_v14 = vpop.eup %6105  ;;  %vm3956_vm8 = vweird.f32 %v9666_v38  ;;  %v3946_v23 = vand.u32 2147483648, %v9640_v15  ;;  %v9853_v42 = vadd.f32 %v9666_v38, %v3953_v28  ;;  %v3938_v52 = vmul.f32 %v9710_v3, %v3937_v59  ;;  %v11513_v28 = vld [vmem:[#allocation91_spill] sm:$0xff] }
 0x646   : > { %11509 = vst [vmem:[#allocation98_spill] sm:$0xff] %v9837_v50  ;;  %vm3940_vm9 = vweird.f32 %v9640_v15  ;;  %v3907_v43 = vsub.f32 1.0, %v3906_v47  ;;  %v11512_v25 = vsel %vm9625_vm10, %v9429_v53, %v9576_v4  ;;  %vm3820_vm12 = vweird.f32 %v9646_v24  ;;  %v11514_v47 = vld [vmem:[#allocation85_spill] sm:$0xff]  ;;  %v4874_v53 = vld [vmem:[%s10502_s7 + $0x48] sm:$0xff]  ;;  %vm9886_vm10 = vmor %vm3955_vm0, %vm3956_vm8 }
 0x647   : > { %11511 = vst [vmem:[#allocation100_spill] sm:$0xff] %v9853_v42  ;;  %v3558_v18 = vsel %vm9748_vm13, %v9556_v10, %v11512_v25  ;;  %6107 = vrcp.f32 %v9736_v19  ;;  %v3573_v35 = vsel %vm9764_vm1, %v3572_v5, %v3568_v16  ;;  %v3818_v4 = vmul.f32 %v9744_v46, %v3817_v54  ;;  %v9893_v16 = vpop.xlane.xlu1 %3021  ;;  %v11520_v54 = vld [vmem:[#allocation82_spill] sm:$0xff] }
 0x648   : > { %v4089_v59 = vmul.f32 %v11513_v28, %v3558_v18  ;;  %v4090_v21 = vmul.f32 %v11514_v47, %v3558_v18  ;;  %v9877_v10 = vor.u32 1.1754944e-38, %v3826_v26  ;;  %v3831_v32 = vmul.f32 %v9846_v14, %v9734_v58  ;;  %4928 = vperm.xlu0 %5638, %v4874_v53  }
 0x649   : > { %v4091_v25 = vmul.f32 %v11515_v22, %v3573_v35  ;;  %v11516_v5 = vmov 0  ;;  %vm3941_vm3 = vweird.f32 %v9710_v3  ;;  %v9891_v27 = vor.u32 1.1754944e-38, %v3946_v23 }
 0x64a   : > { %v11517_v5 = vsel %vm9886_vm10, 4294967295, %v11516_v5  ;;  %v9896_v26 = vmul.f32 %v11520_v54, %v3573_v35  ;;  %v4185_v18 = vpack.c.bf16 %v4090_v21, %v4089_v59  ;;  %v3916_v47 = vand.u32 2147483648, %v9664_v44  ;;  %vm9931_vm15 = vmor %vm3940_vm9, %vm3941_vm3 }
 0x64b   : > { %11518 = vst [vmem:[#allocation74_spill] sm:$0xff] %v11517_v5  ;;  %v9904_v22 = vadd.f32 %v9424_v41, %v4089_v59  ;;  %v9907_v7 = vadd.f32 %v9427_v45, %v4090_v21  ;;  %vm3821_vm13 = vweird.f32 %v9744_v46  ;;  %v9911_v23 = vadd.f32 %v9710_v3, %v3938_v52 }
 0x64c   : > { %11519 = vst [vmem:[#allocation130_spill] sm:$0xff] %v9891_v27  ;;  %v3908_v35 = vmul.f32 %v9774_v40, %v3907_v43  ;;  %v4186_v54 = vpack.c.bf16 %v9896_v26, %v4091_v25  ;;  %v9916_v28 = vadd.f32 %v9744_v46, %v3818_v4  ;;  %v3832_v13 = vsub.f32 1.0, %v3831_v32  ;;  %v808_v36 = vpop.permute.xlu0 %807  ;;  %vm9946_vm6 = vmor %vm3820_vm12, %vm3821_vm13  ;;  %v11537_v27 = vld [vmem:[#allocation26_spill] sm:$0xff] }
 0x64d   : > { %11521 = vst [vmem:[#allocation132_spill] sm:$0xff] %v9911_v23  ;;  %v3841_v41 = vand.u32 2147483648, %v9734_v58  ;;  %6109 = vrcp.f32 %v9893_v16  ;;  %v9920_v45 = vpop.eup %6107  ;;  %v4547_v59 = vunpack.c.l.b16 %v4185_v18  ;;  %v4548_v53 = vunpack.c.h.b16 %v4185_v18 }
 0x64e   : > { %v4549_v21 = vunpack.c.l.b16 %v4186_v54  ;;  %v4550_v11 = vunpack.c.h.b16 %v4186_v54  ;;  %vm3910_vm1 = vweird.f32 %v9664_v44  ;;  %v9924_v43 = vor.u32 1.1754944e-38, %v3916_v47  ;;  %v4877_v47 = vld [vmem:[%s10502_s7 + $0x60] sm:$0xff] }
 0x64f   : > { %v11523_v32 = vmov 0  ;;  %v9936_v18 = vadd.f32 %v9774_v40, %v3908_v35  ;;  %vm3911_vm4 = vweird.f32 %v9774_v40  ;;  %v3833_v60 = vmul.f32 %v9846_v14, %v3832_v13  ;;  %v11536_v13 = vld [vmem:[#allocation25_spill] sm:$0xff] }
 0x650   : > { %11522 = vst [vmem:[#allocation10_spill] sm:$0xff] %v9924_v43  ;;  %v11524_v32 = vsel %vm9931_vm15, 4294967295, %v11523_v32  ;;  %v4563_v54 = vpack.c.b16 %v4549_v21, %v4547_v59  ;;  %v4564_v52 = vpack.c.b16 %v4550_v11, %v4548_v53  ;;  %vm3835_vm0 = vweird.f32 %v9734_v58  ;;  %v818_v11 = vpop.permute.xlu2 %817  ;;  %v11529_v59 = vld [vmem:[#allocation19_spill] sm:$0xff]  ;;  %v11530_v53 = vld [vmem:[#allocation20_spill] sm:$0xff]  ;;  %vm9973_vm8 = vmor %vm3910_vm1, %vm3911_vm4  ;;  %4943 = vperm.xlu0 %5638, %v4877_v47  }
 0x651   : > { %11525 = vst [vmem:[#allocation75_spill] sm:$0xff] %v11524_v32  ;;  %v3921_v35 = vmul.f32 %v9920_v45, %v9736_v19  ;;  %v1023_v21 = vadd.f32 %v11529_v59, %v808_v36  ;;  %v1112_v43 = vadd.f32 %v11530_v53, %v808_v36  ;;  %v9964_v42 = vor.u32 1.1754944e-38, %v3841_v41  ;;  %v11534_v53 = vld [vmem:[#allocation83_spill] sm:$0xff] }
 0x652   : > { %11526 = vst [vmem:[#allocation29_spill] sm:$0xff] %v9936_v18  ;;  %4586 = vmatpush.bf16.xpose.msrb.mxu3 %v4563_v54  ;;  %4600 = vmatpush.bf16.xpose.msra.mxu0 %v4564_v52  ;;  %v11531_v36 = vmov 0  ;;  %vm3836_vm9 = vweird.f32 %v9846_v14  ;;  %v11535_v54 = vld [vmem:[#allocation109_spill] sm:$0xff]  ;;  %v1028_v50 = vadd.f32 %v11536_v13, %v818_v11  ;;  %v1117_v23 = vadd.f32 %v11537_v27, %v818_v11 }
 0x653   : > { %v9967_v5 = vpop.eup %6109  ;;  %v11532_v36 = vsel %vm9973_vm8, 4294967295, %v11531_v36  ;;  %v4199_v52 = vpack.c.bf16 %v11535_v54, %v11534_v53  ;;  %v1483_v3 = vpack.c.bf16 %v1112_v43, %v1023_v21  ;;  %v9989_v32 = vadd.f32 %v9846_v14, %v3833_v60  ;;  %v11538_v54 = vld [vmem:[#allocation33_spill] sm:$0xff]  ;;  %v11539_v43 = vld [vmem:[#allocation34_spill] sm:$0xff]  ;;  %vm10018_vm12 = vmor %vm3835_vm0, %vm3836_vm9 }
 0x654   : > { %11533 = vst [vmem:[#allocation30_spill] sm:$0xff] %v11532_v36  ;;  %v3922_v59 = vsub.f32 1.0, %v3921_v35  ;;  %v9992_v41 = vadd.f32 %v9434_v49, %v4091_v25  ;;  %v4200_v47 = vpack.c.bf16 %v9320_v61, %v9317_v51  ;;  %v9998_v53 = vmul.f32 %v9967_v5, %v9893_v16  ;;  %v813_v11 = vpop.permute.xlu0 %812 }
 0x655   : > { %v1033_v13 = vadd.f32 %v11538_v54, %v9865_v30  ;;  %v4299_v38 = vunpack.c.l.b16 %v1483_v3  ;;  %v4300_v27 = vunpack.c.h.b16 %v1483_v3  ;;  %v1122_v60 = vadd.f32 %v11539_v43, %v9865_v30  ;;  %v4880_v54 = vld [vmem:[%s10502_s7 + $0x78] sm:$0xff]  ;;  %v11542_v3 = vld [vmem:[#allocation21_spill] sm:$0xff] }
 0x656   : > { %v4637_v35 = vunpack.c.l.b16 %v4199_v52  ;;  %v4639_v21 = vunpack.c.l.b16 %v4200_v47  ;;  %v4640_v49 = vunpack.c.h.b16 %v4200_v47  ;;  %v1485_v25 = vpack.c.bf16 %v1117_v23, %v1028_v50 }
 0x657   : > { %v11540_v18 = vunpack.c.l.b16 %v9414_v29  ;;  %v11541_v61 = vunpack.c.h.b16 %v9414_v29  ;;  %v4638_v36 = vunpack.c.h.b16 %v4199_v52  ;;  %v1026_v44 = vadd.f32 %v11542_v3, %v813_v11 }
 0x658   : > { %v1115_v30 = vadd.f32 %v11543_v31, %v813_v11  ;;  %v4647_v43 = vpack.c.b16 %v4639_v21, %v4637_v35  ;;  %v4634_v62 = vunpack.c.h.b16 %v9762_v39  ;;  %v11546_v50 = vunpack.c.l.b16 %v9762_v39  ;;  %4958 = vperm.xlu0 %5638, %v4880_v54  }
 0x659   : > { %v4301_v51 = vpack.c.b16 %v4299_v38, %v11540_v18  ;;  %v4302_v40 = vpack.c.b16 %v4300_v27, %v11541_v61  ;;  %v4648_v29 = vpack.c.b16 %v4640_v49, %v4638_v36  ;;  %v11547_v23 = vunpack.c.l.b16 %v9795_v57  ;;  %v11637_v38 = vld [vmem:[#allocation78_spill] sm:$0xff] }
 0x65a   : > { %v10028_v31 = vadd.f32 %v9515_v20, %v9739_v0  ;;  %v4636_v52 = vunpack.c.h.b16 %v9795_v57  ;;  %v3838_v47 = vsel %vm10018_vm12, %v9846_v14, %v9989_v32  ;;  %v3811_v27 = vand.u32 2147483648, %v9893_v16 }
 0x65b   : > { %4353 = vmatmul.bf16.vlgmr.msrb.gmra.mxu1 %v4301_v51  ;;  %4367 = vmatmul.bf16.vlgmr.msrb.gmra.mxu2 %v4302_v40  ;;  %v4645_v18 = vpack.c.b16 %v11547_v23, %v11546_v50  ;;  %v848_v40 = vpop.permute.xlu1 %847  ;;  %v1484_v36 = vpack.c.bf16 %v1115_v30, %v1026_v44  ;;  %v10038_v39 = vadd.f32 %v9536_v55, %v9742_v17  ;;  %v4377_v35 = vunpack.c.l.b16 %v1485_v25  ;;  %v843_v44 = vpop.permute.xlu2 %842  ;;  %v11548_v17 = vld [vmem:[#allocation43_spill] sm:$0xff]  ;;  %v11561_v23 = vld [vmem:[#allocation42_spill] sm:$0xff] }
 0x65c   : > { %4661 = vmatpush.bf16.xpose.msrb.mxu1 %v4647_v43  ;;  %v3923_v20 = vmul.f32 %v9920_v45, %v3922_v59  ;;  %v10043_v0 = vadd.f32 %v9439_v6, %v9896_v26  ;;  %4675 = vmatpush.bf16.xpose.msrb.mxu2 %v4648_v29  ;;  %v4646_v57 = vpack.c.b16 %v4636_v52, %v4634_v62  ;;  %v4378_v21 = vunpack.c.h.b16 %v1485_v25  ;;  %v11549_v59 = vld [vmem:[#allocation44_spill] sm:$0xff]  ;;  %v11560_v29 = vld [vmem:[#allocation41_spill] sm:$0xff] }
 0x65d   : > { %v4207_v11 = vpack.c.bf16 %v9466_v63, %v9463_v8  ;;  %v4375_v49 = vunpack.c.l.b16 %v1484_v36  ;;  %v4376_v51 = vunpack.c.h.b16 %v1484_v36  ;;  %v1487_v55 = vpack.c.bf16 %v1122_v60, %v1033_v13  ;;  %v11550_v8 = vld [vmem:[#allocation84_spill] sm:$0xff]  ;;  %v11562_v36 = vld [vmem:[#allocation115_spill] sm:$0xff] }
 0x65e   : > { %v1043_v61 = vadd.f32 %v11548_v17, %v848_v40  ;;  %v1132_v54 = vadd.f32 %v11549_v59, %v848_v40  ;;  %v4208_v6 = vpack.c.bf16 %v9457_v1, %v9451_v37  ;;  %v11551_v63 = vand.u32 2147483647, %v11550_v8 }
 0x65f   : > { %v4379_v26 = vpack.c.b16 %v4377_v35, %v4375_v49  ;;  %v4380_v62 = vpack.c.b16 %v4378_v21, %v4376_v51  ;;  %v4715_v3 = vunpack.c.l.b16 %v4207_v11  ;;  %v4716_v30 = vunpack.c.h.b16 %v4207_v11  ;;  %v11564_v21 = vld [vmem:[#allocation146_spill] sm:$0xff]  ;;  %v11565_v51 = vld [vmem:[#allocation108_spill] sm:$0xff] }
 0x660   : > { %vm10054_vm13 = vcmp.eq.f32.partialorder %v11551_v63, 8.507059e+37  ;;  %v11554_v43 = vand.u32 2147483647, %v8956_v2  ;;  %v11557_v60 = vand.u32 2147483647, %v9308_v48  ;;  %v3802_v1 = vsub.f32 1.0, %v9998_v53 }
 0x661   : > { %v1041_v50 = vadd.f32 %v11560_v29, %v843_v44  ;;  %v1130_v52 = vadd.f32 %v11561_v23, %v843_v44  ;;  %v4717_v40 = vunpack.c.l.b16 %v4208_v6  ;;  %4431 = vmatmul.bf16.vlgmr.msra.gmra.mxu3 %v4379_v26  ;;  %4445 = vmatmul.bf16.vlgmr.msrb.gmra.mxu0 %v4380_v62  ;;  %v4718_v2 = vunpack.c.h.b16 %v4208_v6  ;;  %v11563_v48 = vld [vmem:[#allocation124_spill] sm:$0xff]  ;;  %v11570_v6 = vld [vmem:[#allocation61_spill] sm:$0xff] }
 0x662   : > { %vm10060_vm1 = vcmp.eq.f32.partialorder %v11554_v43, 8.507059e+37  ;;  %vm10066_vm4 = vcmp.eq.f32.partialorder %v11557_v60, 8.507059e+37  ;;  %v4110_v11 = vmul.f32 %v11562_v36, %v9809_v33  ;;  %v4111_v35 = vmul.f32 %v11563_v48, %v9819_v34  ;;  %v11569_v62 = vld [vmem:[#allocation68_spill] sm:$0xff]  ;;  %v11571_v60 = vld [vmem:[#allocation13_spill] sm:$0xff] }
 0x663   : > { %v4112_v49 = vmul.f32 %v11564_v21, %v9819_v34  ;;  %v11566_v17 = vand.u32 2147483647, %v11565_v51  ;;  %v4455_v44 = vunpack.c.l.b16 %v1487_v55  ;;  %v1491_v59 = vpack.c.bf16 %v1132_v54, %v1043_v61  ;;  %v11572_v29 = vld [vmem:[#allocation32_spill] sm:$0xff] }
 0x664   : > { %v4725_v26 = vpack.c.b16 %v4717_v40, %v4715_v3  ;;  %v5106_v8 = vadd.f32 %v11570_v6, %v11569_v62  ;;  %4662 = vmatpush.bf16.xpose.msrb.mxu1 %v4645_v18  ;;  %v4726_v33 = vpack.c.b16 %v4718_v2, %v4716_v30  ;;  %v4195_v63 = vpack.c.bf16 %v4110_v11, %v9844_v12  ;;  %v11573_v30 = vld [vmem:[#allocation14_spill] sm:$0xff]  ;;  %v11574_v40 = vld [vmem:[#allocation80_spill] sm:$0xff] }
 0x665   : > { %vm10082_vm9 = vcmp.eq.f32.partialorder %v11566_v17, 8.507059e+37  ;;  %v4196_v43 = vpack.c.bf16 %v4112_v49, %v4111_v35  ;;  %v5113_v34 = vadd.f32 %v11572_v29, %v11571_v60  ;;  %v10092_v23 = vadd.f32 %v9920_v45, %v3923_v20  ;;  %4676 = vmatpush.bf16.xpose.msrb.mxu2 %v4646_v57  ;;  %v11575_v20 = vld [vmem:[#allocation142_spill] sm:$0xff]  ;;  %v11577_v57 = vld [vmem:[#allocation96_spill] sm:$0xff] }
 0x666   : > { %v4456_v36 = vunpack.c.h.b16 %v1487_v55  ;;  %v1490_v48 = vpack.c.bf16 %v1130_v52, %v1041_v50  ;;  %4739 = vmatpush.bf16.xpose.msra.mxu3 %v4725_v26  ;;  %v10095_v61 = vadd.f32 %v5106_v8, %v9844_v12  ;;  %4753 = vmatpush.bf16.xpose.msrb.mxu0 %v4726_v33  ;;  %v4629_v54 = vunpack.c.l.b16 %v4195_v63  ;;  %v11578_v52 = vld [vmem:[#allocation107_spill] sm:$0xff] }
 0x667   : > { %v4631_v18 = vunpack.c.l.b16 %v4196_v43  ;;  %v10097_v3 = vadd.f32 %v5113_v34, %v4110_v11  ;;  %v5120_v2 = vadd.f32 %v11574_v40, %v11573_v30  ;;  %v10102_v21 = vmul.f32 %v9967_v5, %v3802_v1  ;;  %v11596_v30 = vld [vmem:[#allocation93_spill] sm:$0xff] }
 0x668   : > { %v11576_v51 = vunpack.c.l.b16 %v11575_v20  ;;  %v4611_v50 = vunpack.c.l.b16 %v1491_v59  ;;  %v5127_v17 = vadd.f32 %v11578_v52, %v11577_v57  ;;  %v11579_v12 = vand.u32 2147483647, %v9646_v24  ;;  %v11597_v40 = vld [vmem:[#allocation89_spill] sm:$0xff]  ;;  %v11600_v57 = vld [vmem:[#allocation88_spill] sm:$0xff] }
 0x669   : > { %v4643_v11 = vpack.c.b16 %v4631_v18, %v4629_v54  ;;  %v10114_v62 = vadd.f32 %v5120_v2, %v4111_v35  ;;  %v4630_v6 = vunpack.c.h.b16 %v4195_v63  ;;  %v4632_v8 = vunpack.c.h.b16 %v4196_v43  ;;  %v11594_v54 = vld [vmem:[#allocation57_spill] sm:$0xff]  ;;  %v11602_v52 = vld [vmem:[#allocation16_spill] sm:$0xff]  ;;  %v11609_v18 = vld [vmem:[#allocation126_spill] sm:$0xff] }
 0x66a   : > { %v4457_v55 = vpack.c.b16 %v4455_v44, %v11576_v51  ;;  %vm10110_vm0 = vcmp.eq.f32.partialorder %v11579_v12, 8.507059e+37  ;;  %v11582_v1 = vunpack.c.h.b16 %v11575_v20  ;;  %v4609_v60 = vunpack.c.l.b16 %v1490_v48  ;;  %v11599_v20 = vld [vmem:[#allocation112_spill] sm:$0xff] }
 0x66b   : > { %v4612_v44 = vunpack.c.h.b16 %v1491_v59  ;;  %v10118_v29 = vadd.f32 %v5127_v17, %v4112_v49  ;;  %v11583_v34 = vand.u32 2147483647, %v9734_v58  ;;  %vm11586_vm8 = vweird.f32 %v9920_v45  ;;  %v11591_v59 = vld [vmem:[#allocation24_spill] sm:$0xff]  ;;  %v11592_v49 = vld [vmem:[#allocation118_spill] sm:$0xff] }
 0x66c   : > { %v4458_v33 = vpack.c.b16 %v4456_v36, %v11582_v1  ;;  %vm11587_vm10 = vweird.f32 %v9736_v19  ;;  %v4644_v63 = vpack.c.b16 %v4632_v8, %v4630_v6  ;;  %v11593_v36 = vsel %vm9549_vm7, %v11591_v59, %v11592_v49  ;;  %v11603_v17 = vld [vmem:[#allocation58_spill] sm:$0xff]  ;;  %4509 = vmatmul.bf16.vlgmr.msra.gmra.mxu1 %v4457_v55  ;;  %v11607_v43 = vld [vmem:[#allocation92_spill] sm:$0xff] }
 0x66d   : > { %vm10122_vm3 = vcmp.eq.f32.partialorder %v11583_v34, 8.507059e+37  ;;  %vm10130_vm15 = vmor %vm11587_vm10, %vm11586_vm8  ;;  %v3858_v58 = vsel %vm10066_vm4, %v11594_v54, %v11593_v36  ;;  %v11598_v2 = vsel %vm9228_vm11, %v11596_v30, %v11597_v40  ;;  %vm11601_vm10 = vnez %v11600_v57  ;;  %v11605_v6 = vld [vmem:[#allocation114_spill] sm:$0xff]  ;;  %v11606_v34 = vld [vmem:[#allocation8_spill] sm:$0xff]  ;;  %4663 = vmatpush.bf16.xpose.msrb.mxu1 %v4643_v11 }
 0x66e   : > { %v3873_v51 = vsel %vm10060_vm1, %v11599_v20, %v11598_v2  ;;  %v11604_v12 = vsel %vm11601_vm10, %v11602_v52, %v11603_v17  ;;  %v3928_v37 = vsel %vm10130_vm15, %v9920_v45, %v10092_v23  ;;  %v4610_v1 = vunpack.c.h.b16 %v1490_v48  ;;  %4523 = vmatmul.bf16.vlgmr.msra.gmra.mxu2 %v4458_v33  ;;  %v11608_v36 = vld [vmem:[#allocation35_spill] sm:$0xff]  ;;  %v11611_v40 = vld [vmem:[#allocation62_spill] sm:$0xff]  ;;  %v11689_v35 = vld [vmem:[#allocation56_spill] sm:$0xff] }
 0x66f   : > { %v3678_v8 = vsel %vm10054_vm13, %v11605_v6, %v11604_v12  ;;  %v4129_v13 = vmul.f32 %v11606_v34, %v3858_v58  ;;  %v4130_v59 = vmul.f32 %v11607_v43, %v3858_v58  ;;  %v10164_v49 = vpack.c.b16 %v4611_v50, %v4609_v60  ;;  %v11612_v2 = vld [vmem:[#allocation95_spill] sm:$0xff]  ;;  %4677 = vmatpush.bf16.xpose.msrb.mxu2 %v4644_v63 }
 0x670   : > { %v4131_v54 = vmul.f32 %v11608_v36, %v3873_v51  ;;  %v4132_v25 = vmul.f32 %v11609_v18, %v3873_v51  ;;  %v11613_v20 = vsel %vm9584_vm5, %v11611_v40, %v11612_v2  ;;  %v11614_v57 = vld [vmem:[#allocation135_spill] sm:$0xff]  ;;  %v10176_v55 = vpack.c.b16 %v4612_v44, %v4610_v1  ;;  %v11617_v51 = vld [vmem:[#allocation145_spill] sm:$0xff]  ;;  %v11624_v40 = vld [vmem:[#allocation138_spill] sm:$0xff] }
 0x671   : > { %v3693_v48 = vsel %vm10082_vm9, %v11614_v57, %v11613_v20  ;;  %v4205_v33 = vpack.c.bf16 %v4130_v59, %v4129_v13  ;;  %v11615_v50 = vld [vmem:[#allocation59_spill] sm:$0xff]  ;;  %v10183_v17 = vadd.f32 %v11617_v51, %v4130_v59  ;;  %v11618_v1 = vld [vmem:[#allocation133_spill] sm:$0xff]  ;;  %v3812_v9 = vor.u32 1.1754944e-38, %v3811_v27 }
 0x672   : > { %v10179_v60 = vadd.f32 %v11615_v50, %v4129_v13  ;;  %v11616_v11 = vld [vmem:[#allocation131_spill] sm:$0xff]  ;;  %v4206_v52 = vpack.c.bf16 %v4132_v25, %v4131_v54  ;;  %v10186_v12 = vadd.f32 %v10028_v31, %v4131_v54  ;;  %v10189_v6 = vadd.f32 %v10038_v39, %v4132_v25  ;;  %v11625_v39 = vld [vmem:[#allocation73_spill] sm:$0xff] }
 0x673   : > { %v4105_v58 = vmul.f32 %v11616_v11, %v3678_v8  ;;  %v4711_v53 = vunpack.c.l.b16 %v4205_v33  ;;  %v4712_v44 = vunpack.c.h.b16 %v4205_v33  ;;  %v4106_v63 = vmul.f32 %v11618_v1, %v3678_v8  ;;  %v11619_v34 = vld [vmem:[#allocation31_spill] sm:$0xff]  ;;  %v11639_v51 = vld [vmem:[#allocation77_spill] sm:$0xff] }
 0x674   : > { %v4107_v43 = vmul.f32 %v11619_v34, %v3693_v48  ;;  %v11620_v13 = vld [vmem:[#allocation127_spill] sm:$0xff]  ;;  %v4713_v59 = vunpack.c.l.b16 %v4206_v52  ;;  %v4714_v30 = vunpack.c.h.b16 %v4206_v52  ;;  %v4108_v31 = vmul.f32 %v11624_v40, %v3693_v48  ;;  %v11643_v34 = vld [vmem:[#allocation125_spill] sm:$0xff] }
 0x675   : > { %v11621_v36 = vand.u32 2147483647, %v11620_v13  ;;  %v10201_v54 = vadd.f32 %v9904_v22, %v4105_v58  ;;  %v11626_v25 = vand.u32 2147483647, %v11625_v39  ;;  %v4193_v8 = vpack.c.bf16 %v4106_v63, %v4105_v58  ;;  %v11641_v1 = vld [vmem:[#allocation15_spill] sm:$0xff] }
 0x676   : > { %v10210_v20 = vadd.f32 %v9907_v7, %v4106_v63  ;;  %v10213_v57 = vadd.f32 %v9992_v41, %v4107_v43  ;;  %v11629_v48 = vsel %vm9946_vm6, %v9744_v46, %v9916_v28  ;;  %v4723_v33 = vpack.c.b16 %v4713_v59, %v4711_v53  ;;  %v11630_v28 = vld [vmem:[#allocation101_spill] sm:$0xff]  ;;  %v11690_v45 = vld [vmem:[#allocation63_spill] sm:$0xff] }
 0x677   : > { %vm10195_vm11 = vcmp.eq.f32.partialorder %v11621_v36, 8.507059e+37  ;;  %vm10205_vm7 = vcmp.eq.f32.partialorder %v11626_v25, 8.507059e+37  ;;  %v3828_v22 = vsel %vm10110_vm0, %v9877_v10, %v11629_v48  ;;  %v4724_v50 = vpack.c.b16 %v4714_v30, %v4712_v44  ;;  %v11640_v44 = vld [vmem:[#allocation87_spill] sm:$0xff] }
 0x678   : > { %v4194_v11 = vpack.c.bf16 %v4108_v31, %v4107_v43  ;;  %v10224_v58 = vadd.f32 %v10043_v0, %v4108_v31  ;;  %v4625_v7 = vunpack.c.l.b16 %v4193_v8  ;;  %v4626_v52 = vunpack.c.h.b16 %v4193_v8  ;;  %4740 = vmatpush.bf16.xpose.msra.mxu3 %v4723_v33 }
 0x679   : > { %v3843_v46 = vsel %vm10122_vm3, %v9964_v42, %v3838_v47  ;;  %v4125_v4 = vmul.f32 %v11630_v28, %v3828_v22  ;;  %v11631_v10 = vand.u32 2147483647, %v9559_v56  ;;  %v11634_v0 = vand.u32 2147483647, %v9640_v15  ;;  %4754 = vmatpush.bf16.xpose.msrb.mxu0 %v4724_v50  ;;  %v11638_v47 = vld [vmem:[#allocation90_spill] sm:$0xff]  ;;  %v11642_v15 = vld [vmem:[#allocation65_spill] sm:$0xff] }
 0x67a   : > { %v4627_v14 = vunpack.c.l.b16 %v4194_v11  ;;  %v4628_v32 = vunpack.c.h.b16 %v4194_v11  ;;  %v4126_v42 = vmul.f32 %v11637_v38, %v3828_v22  ;;  %v4127_v24 = vmul.f32 %v11638_v47, %v3843_v46  ;;  %v11648_v28 = vld [vmem:[#allocation12_spill] sm:$0xff]  ;;  %v11653_v38 = vld [vmem:[#allocation129_spill] sm:$0xff]  ;;  %v11654_v47 = vld [vmem:[#allocation79_spill] sm:$0xff] }
 0x67b   : > { %vm10237_vm5 = vcmp.eq.f32.partialorder %v11631_v10, 8.507059e+37  ;;  %vm10243_vm6 = vcmp.eq.f32.partialorder %v11634_v0, 8.507059e+37  ;;  %v4128_v56 = vmul.f32 %v11639_v51, %v3843_v46  ;;  %v5108_v53 = vadd.f32 %v10095_v61, %v4125_v4  ;;  %v11646_v46 = vld [vmem:[#allocation17_spill] sm:$0xff] }
 0x67c   : > { %v4215_v63 = vpack.c.bf16 %v11641_v1, %v11640_v44  ;;  %v4216_v43 = vpack.c.bf16 %v11643_v34, %v11642_v15  ;;  %v4641_v13 = vpack.c.b16 %v4627_v14, %v4625_v7  ;;  %v4642_v36 = vpack.c.b16 %v4628_v32, %v4626_v52  ;;  %v11645_v52 = vld [vmem:[#allocation110_spill] sm:$0xff]  ;;  %v11650_v10 = vld [vmem:[#allocation81_spill] sm:$0xff]  ;;  %v11655_v1 = vld [vmem:[#allocation140_spill] sm:$0xff] }
 0x67d   : > { %v4203_v59 = vpack.c.bf16 %v4126_v42, %v4125_v4  ;;  %v5115_v30 = vadd.f32 %v10097_v3, %v4126_v42  ;;  %v4204_v40 = vpack.c.bf16 %v4128_v56, %v4127_v24  ;;  %v5122_v31 = vadd.f32 %v10114_v62, %v4127_v24  ;;  %v11649_v4 = vld [vmem:[#allocation72_spill] sm:$0xff]  ;;  %v11652_v14 = vld [vmem:[#allocation105_spill] sm:$0xff]  ;;  %v11660_v34 = vld [vmem:[#allocation66_spill] sm:$0xff] }
 0x67e   : > { %v5129_v39 = vadd.f32 %v10118_v29, %v4128_v56  ;;  %v4793_v25 = vunpack.c.l.b16 %v4215_v63  ;;  %4664 = vmatpush.bf16.xpose.msrb.mxu1 %v4641_v13  ;;  %4678 = vmatpush.bf16.xpose.msrb.mxu2 %v4642_v36  ;;  %v4795_v48 = vunpack.c.l.b16 %v4216_v43  ;;  %v4794_v22 = vunpack.c.h.b16 %v4215_v63  ;;  %v11656_v63 = vld [vmem:[#allocation18_spill] sm:$0xff] }
 0x67f   : > { %v4707_v61 = vunpack.c.l.b16 %v4203_v59  ;;  %v4708_v8 = vunpack.c.h.b16 %v4203_v59  ;;  %v4709_v33 = vunpack.c.l.b16 %v4204_v40  ;;  %v4710_v50 = vunpack.c.h.b16 %v4204_v40  ;;  %v11661_v40 = vld [vmem:[#allocation75_spill] sm:$0xff] }
 0x680   : > { %v4796_v11 = vunpack.c.h.b16 %v4216_v43  ;;  %v11647_v3 = vsel %vm9723_vm14, %v11645_v52, %v11646_v46  ;;  %v4803_v29 = vpack.c.b16 %v4795_v48, %v4793_v25  ;;  %v11651_v0 = vsel %vm9787_vm2, %v11649_v4, %v11650_v10  ;;  %v11663_v25 = vld [vmem:[#allocation64_spill] sm:$0xff]  ;;  %v11666_v48 = vld [vmem:[#allocation130_spill] sm:$0xff] }
 0x681   : > { %v3978_v62 = vsel %vm10195_vm11, %v11648_v28, %v11647_v3  ;;  %v3993_v32 = vsel %vm10205_vm7, %v11652_v14, %v11651_v0  ;;  %v4721_v51 = vpack.c.b16 %v4709_v33, %v4707_v61  ;;  %v4722_v56 = vpack.c.b16 %v4710_v50, %v4708_v8  ;;  %v11664_v61 = vld [vmem:[#allocation132_spill] sm:$0xff]  ;;  %v11667_v33 = vld [vmem:[#allocation74_spill] sm:$0xff]  ;;  %v11674_v14 = vld [vmem:[#allocation55_spill] sm:$0xff] }
 0x682   : > { %v4145_v42 = vmul.f32 %v11653_v38, %v3978_v62  ;;  %v4146_v24 = vmul.f32 %v11654_v47, %v3978_v62  ;;  %v4804_v44 = vpack.c.b16 %v4796_v11, %v4794_v22  ;;  %v4147_v18 = vmul.f32 %v11655_v1, %v3993_v32  ;;  %v11672_v11 = vld [vmem:[#allocation98_spill] sm:$0xff] }
 0x683   : > { %v11657_v15 = vand.u32 2147483647, %v11656_v63  ;;  %v4148_v43 = vmul.f32 %v11660_v34, %v3993_v32  ;;  %vm3806_vm2 = vweird.f32 %v9967_v5  ;;  %4741 = vmatpush.bf16.xpose.msra.mxu3 %v4721_v51  ;;  %4755 = vmatpush.bf16.xpose.msrb.mxu0 %v4722_v56  ;;  %vm11662_vm8 = vnez %v11661_v40  ;;  %v10317_v34 = vpop.xlane.xlu0 %3018 }
 0x684   : > { %v4213_v2 = vpack.c.bf16 %v4146_v24, %v4145_v42  ;;  %v5137_v13 = vadd.f32 %v10179_v60, %v4145_v42  ;;  %v5144_v36 = vadd.f32 %v10183_v17, %v4146_v24  ;;  %v5151_v59 = vadd.f32 %v10186_v12, %v4147_v18  ;;  %v11669_v60 = vld [vmem:[#allocation5_spill] sm:$0xff]  ;;  %v11670_v17 = vld [vmem:[#allocation100_spill] sm:$0xff] }
 0x685   : > { %vm10279_vm14 = vcmp.eq.f32.partialorder %v11657_v15, 8.507059e+37  ;;  %v11665_v8 = vsel %vm11662_vm8, %v11663_v25, %v11664_v61  ;;  %vm11668_vm12 = vnez %v11667_v33  ;;  %v4214_v12 = vpack.c.bf16 %v4148_v43, %v4147_v18  ;;  %4665 = vmatmul.bf16.vlgmr.msrb.gmra.mxu1 %v10164_v49  ;;  %4679 = vmatmul.bf16.vlgmr.msrb.gmra.mxu2 %v10176_v55  ;;  %v11675_v49 = vld [vmem:[#allocation120_spill] sm:$0xff]  ;;  %v11676_v55 = vld [vmem:[#allocation121_spill] sm:$0xff]  ;;  %v11686_v25 = vld [vmem:[#allocation10_spill] sm:$0xff] }
 0x686   : > { %4817 = vmatpush.bf16.xpose.msra.mxu1 %v4803_v29  ;;  %v3948_v22 = vsel %vm10243_vm6, %v11666_v48, %v11665_v8  ;;  %v11671_v50 = vsel %vm11668_vm12, %v11669_v60, %v11670_v17  ;;  %4831 = vmatpush.bf16.xpose.msra.mxu2 %v4804_v44  ;;  %v4789_v52 = vunpack.c.l.b16 %v4213_v2  ;;  %v5158_v46 = vadd.f32 %v10189_v6, %v4148_v43  ;;  %v11673_v29 = vld [vmem:[#allocation103_spill] sm:$0xff]  ;;  %v4276_v17 = vpop.f32.mrf.mxu1 }
 0x687   : > { %v3963_v7 = vsel %vm10237_vm5, %v11672_v11, %v11671_v50  ;;  %v5195_v3 = vmul.f32 0.125, %v5137_v13  ;;  %v5196_v26 = vmul.f32 0.125, %v5144_v36  ;;  %v5197_v28 = vmul.f32 0.125, %v5151_v59  ;;  %v11681_v13 = vld [vmem:[#allocation30_spill] sm:$0xff]  ;;  %v11684_v59 = vld [vmem:[#allocation29_spill] sm:$0xff]  ;;  %v11688_v50 = vld [vmem:[#allocation27_spill] sm:$0xff] }
 0x688   : > { %v4790_v62 = vunpack.c.h.b16 %v4213_v2  ;;  %v4141_v4 = vmul.f32 %v11673_v29, %v3948_v22  ;;  %v4791_v41 = vunpack.c.l.b16 %v4214_v12  ;;  %v5198_v10 = vmul.f32 0.125, %v5158_v46  ;;  %v11683_v36 = vld [vmem:[#allocation106_spill] sm:$0xff] }
 0x689   : > { %5211 = vst [vmem:[%s9715_s24 + $0x40] sm:$0xff] %v5195_v3  ;;  %v4792_v0 = vunpack.c.h.b16 %v4214_v12  ;;  %v4142_v32 = vmul.f32 %v11674_v14, %v3948_v22  ;;  %v3804_v6 = vadd.f32 %v9967_v5, %v10102_v21  ;;  %v4143_v38 = vmul.f32 %v11675_v49, %v3963_v7  ;;  %v11693_v29 = vld [vmem:[#allocation122_spill] sm:$0xff]  ;;  %v838_v49 = vpop.permute.xlu2 %837 }
 0x68a   : > { %5212 = vst [vmem:[%s9715_s24 + $0x48] sm:$0xff] %v5196_v26  ;;  %v4144_v42 = vmul.f32 %v11676_v55, %v3963_v7  ;;  %v5109_v47 = vadd.f32 %v5108_v53, %v4141_v4  ;;  %v4801_v24 = vpack.c.b16 %v4791_v41, %v4789_v52  ;;  %v11677_v21 = vand.u32 2147483648, %v9736_v19 }
 0x68b   : > { %5213 = vst [vmem:[%s9715_s24 + $0x50] sm:$0xff] %v5197_v28  ;;  %v4802_v51 = vpack.c.b16 %v4792_v0, %v4790_v62  ;;  %v4211_v56 = vpack.c.bf16 %v4142_v32, %v4141_v4  ;;  %v5116_v44 = vadd.f32 %v5115_v30, %v4142_v32  ;;  %v5123_v18 = vadd.f32 %v5122_v31, %v4143_v38  ;;  %v11692_v28 = vld [vmem:[#allocation117_spill] sm:$0xff] }
 0x68c   : > { %5214 = vst [vmem:[%s9715_s24 + $0x58] sm:$0xff] %v5198_v10  ;;  %v4212_v1 = vpack.c.bf16 %v4144_v42, %v4143_v38  ;;  %v5130_v63 = vadd.f32 %v5129_v39, %v4144_v42  ;;  %v5191_v15 = vmul.f32 0.125, %v5109_v47  ;;  %v3932_v43 = vor.u32 1.1754944e-38, %v11677_v21 }
 0x68d   : > { %vm3805_vm3 = vweird.f32 %v9893_v16  ;;  %v5192_v53 = vmul.f32 0.125, %v5116_v44  ;;  %6111 = vrcp.f32 %v10317_v34  ;;  %v11678_v30 = vand.u32 2147483647, %v9736_v19 }
 0x68e   : > { %4818 = vmatpush.bf16.xpose.msra.mxu1 %v4801_v24  ;;  %vm10327_vm1 = vmor %vm3805_vm3, %vm3806_vm2  ;;  %v5193_v39 = vmul.f32 0.125, %v5123_v18  ;;  %v5194_v2 = vmul.f32 0.125, %v5130_v63  ;;  %5207 = vst [vmem:[%s9715_s24 + $0x20] sm:$0xff] %v5191_v15  ;;  %vm11682_vm4 = vnez %v11681_v13  ;;  %4832 = vmatpush.bf16.xpose.msra.mxu2 %v4802_v51  ;;  %v4785_v8 = vunpack.c.l.b16 %v4211_v56  ;;  %v11695_v15 = vld [vmem:[#allocation40_spill] sm:$0xff] }
 0x68f   : > { %vm3930_vm13 = vcmp.eq.f32.partialorder %v11678_v30, 8.507059e+37  ;;  %v11685_v40 = vsel %vm11682_vm4, %v11683_v36, %v11684_v59  ;;  %v3808_v61 = vsel %vm10327_vm1, %v9967_v5, %v3804_v6  ;;  %5208 = vst [vmem:[%s9715_s24 + $0x28] sm:$0xff] %v5192_v53  ;;  %v11687_v22 = vand.u32 2147483647, %v9893_v16  ;;  %v4290_v5 = vpop.f32.mrf.mxu2  ;;  %v11696_v59 = vld [vmem:[#allocation102_spill] sm:$0xff] }
 0x690   : > { %v3918_v19 = vsel %vm10279_vm14, %v11686_v25, %v11685_v40  ;;  %v3933_v48 = vsel %vm3930_vm13, %v3932_v43, %v3928_v37  ;;  %v4787_v33 = vunpack.c.l.b16 %v4212_v1  ;;  %5209 = vst [vmem:[%s9715_s24 + $0x30] sm:$0xff] %v5193_v39  ;;  %v4786_v60 = vunpack.c.h.b16 %v4211_v56  ;;  %v11691_v37 = vld [vmem:[#allocation99_spill] sm:$0xff]  ;;  %v863_v39 = vpop.permute.xlu1 %862  ;;  %v11697_v25 = vld [vmem:[#allocation60_spill] sm:$0xff] }
 0x691   : > { %vm3810_vm0 = vcmp.eq.f32.partialorder %v11687_v22, 8.507059e+37  ;;  %5210 = vst [vmem:[%s9715_s24 + $0x38] sm:$0xff] %v5194_v2  ;;  %v10356_v11 = vmul.f32 %v11688_v50, %v3918_v19  ;;  %v10359_v7 = vmul.f32 %v11689_v35, %v3918_v19  ;;  %v4139_v23 = vmul.f32 %v11690_v45, %v3933_v48  ;;  %v11699_v22 = vld [vmem:[#allocation38_spill] sm:$0xff] }
 0x692   : > { %v4140_v12 = vmul.f32 %v11691_v37, %v3933_v48  ;;  %v4788_v52 = vunpack.c.h.b16 %v4212_v1  ;;  %v10363_v46 = vadd.f32 %v4290_v5, %v4276_v17  ;;  %v3813_v16 = vsel %vm3810_vm0, %v3812_v9, %v3808_v61  ;;  %v833_v61 = vpop.permute.xlu0 %832  ;;  %v11700_v17 = vld [vmem:[#allocation49_spill] sm:$0xff]  ;;  %v11701_v50 = vld [vmem:[#allocation50_spill] sm:$0xff] }
 0x693   : > { %v6112_v27 = vpop.eup %6111  ;;  %v4799_v3 = vpack.c.b16 %v4787_v33, %v4785_v8  ;;  %v4123_v62 = vmul.f32 %v11692_v28, %v3813_v16  ;;  %v4124_v4 = vmul.f32 %v11693_v29, %v3813_v16  ;;  %v4209_v0 = vpack.c.bf16 %v10359_v7, %v10356_v11  ;;  %v11698_v8 = vld [vmem:[#allocation37_spill] sm:$0xff] }
 0x694   : > { %v4210_v26 = vpack.c.bf16 %v4140_v12, %v4139_v23  ;;  %v3786_v41 = vmul.f32 %v6112_v27, %v10317_v34  ;;  %v4800_v10 = vpack.c.b16 %v4788_v52, %v4786_v60  ;;  %v3796_v38 = vand.u32 2147483648, %v10317_v34 }
 0x695   : > { %v5094_v14 = vadd.f32 %v10213_v57, %v4123_v62  ;;  %v5101_v6 = vadd.f32 %v10224_v58, %v4124_v4  ;;  %vm3791_vm15 = vweird.f32 %v6112_v27  ;;  %v3794_v24 = vand.u32 2147483647, %v10317_v34  ;;  %v11694_v57 = vld [vmem:[#allocation39_spill] sm:$0xff] }
 0x696   : > { %4819 = vmatpush.bf16.xpose.msra.mxu1 %v4799_v3  ;;  %v3787_v32 = vsub.f32 1.0, %v3786_v41  ;;  %4833 = vmatpush.bf16.xpose.msra.mxu2 %v4800_v10  ;;  %v4783_v55 = vunpack.c.l.b16 %v4210_v26  ;;  %v4781_v56 = vunpack.c.l.b16 %v4209_v0  ;;  %v4784_v44 = vunpack.c.h.b16 %v4210_v26 }
 0x697   : > { %v5095_v42 = vadd.f32 %v5094_v14, %v4139_v23  ;;  %v5102_v51 = vadd.f32 %v5101_v6, %v4140_v12  ;;  %v1038_v18 = vadd.f32 %v11694_v57, %v838_v49  ;;  %vm3790_vm9 = vweird.f32 %v10317_v34  ;;  %v11702_v6 = vld [vmem:[#allocation51_spill] sm:$0xff]  ;;  %v11706_v57 = vld [vmem:[#allocation45_spill] sm:$0xff] }
 0x698   : > { %v3788_v47 = vmul.f32 %v6112_v27, %v3787_v32  ;;  %v1127_v21 = vadd.f32 %v11695_v15, %v838_v49  ;;  %vm3792_vm10 = vmor %vm3790_vm9, %vm3791_vm15  ;;  %v3797_v43 = vor.u32 1.1754944e-38, %v3796_v38  ;;  %v4797_v53 = vpack.c.b16 %v4783_v55, %v4781_v56  ;;  %v858_v32 = vpop.permute.xlu1 %857  ;;  %v11703_v38 = vld [vmem:[#allocation52_spill] sm:$0xff]  ;;  %v853_v55 = vpop.permute.xlu2 %852 }
 0x699   : > { %v5189_v1 = vmul.f32 0.125, %v5095_v42  ;;  %v5190_v58 = vmul.f32 0.125, %v5102_v51  ;;  %v4782_v30 = vunpack.c.h.b16 %v4209_v0  ;;  %vm3795_vm11 = vcmp.eq.f32.partialorder %v3794_v24, 8.507059e+37  ;;  %v11704_v42 = vld [vmem:[#allocation47_spill] sm:$0xff]  ;;  %v11705_v24 = vld [vmem:[#allocation48_spill] sm:$0xff] }
 0x69a   : > { %v3789_v63 = vadd.f32 %v6112_v27, %v3788_v47  ;;  %v4202_v36 = vpack.c.bf16 %v4124_v4, %v4123_v62  ;;  %v1489_v19 = vpack.c.bf16 %v1127_v21, %v1038_v18  ;;  %v1036_v48 = vadd.f32 %v11698_v8, %v833_v61 }
 0x69b   : > { %5205 = vst [vmem:[%s9715_s24 + $0x10] sm:$0xff] %v5189_v1  ;;  %v4798_v2 = vpack.c.b16 %v4784_v44, %v4782_v30  ;;  %v1125_v9 = vadd.f32 %v11699_v22, %v833_v61  ;;  %v1051_v5 = vadd.f32 %v11700_v17, %v863_v39  ;;  %v1140_v35 = vadd.f32 %v11701_v50, %v863_v39 }
 0x69c   : > { %v3793_v31 = vsel %vm3792_vm10, %v6112_v27, %v3789_v63  ;;  %5206 = vst [vmem:[%s9715_s24 + $0x18] sm:$0xff] %v5190_v58  ;;  %v4705_v45 = vunpack.c.l.b16 %v4202_v36  ;;  %v4533_v27 = vunpack.c.l.b16 %v1489_v19  ;;  %v4534_v3 = vunpack.c.h.b16 %v1489_v19  ;;  %v11707_v63 = vld [vmem:[#allocation46_spill] sm:$0xff] }
 0x69d   : > { %v3798_v13 = vsel %vm3795_vm11, %v3797_v43, %v3793_v31  ;;  %v1488_v37 = vpack.c.bf16 %v1125_v9, %v1036_v48  ;;  %v4706_v28 = vunpack.c.h.b16 %v4202_v36  ;;  %v1494_v14 = vpack.c.bf16 %v1140_v35, %v1051_v5 }
 0x69e   : > { %4820 = vmatpush.bf16.xpose.msra.mxu1 %v4797_v53  ;;  %v4121_v40 = vmul.f32 %v11696_v59, %v3798_v13  ;;  %v4122_v34 = vmul.f32 %v11697_v25, %v3798_v13  ;;  %4834 = vmatpush.bf16.xpose.msra.mxu2 %v4798_v2  ;;  %v1048_v47 = vadd.f32 %v11704_v42, %v858_v32  ;;  %v4278_v25 = vpop.f32.mrf.mxu1 }
 0x69f   : > { %v4532_v62 = vunpack.c.h.b16 %v1488_v37  ;;  %v1137_v51 = vadd.f32 %v11705_v24, %v858_v32  ;;  %v4765_v44 = vunpack.c.l.b16 %v1494_v14  ;;  %v4766_v1 = vunpack.c.h.b16 %v1494_v14 }
 0x6a0   : > { %v4201_v33 = vpack.c.bf16 %v4122_v34, %v4121_v40  ;;  %v5080_v60 = vadd.f32 %v10201_v54, %v4121_v40  ;;  %v5087_v23 = vadd.f32 %v10210_v20, %v4122_v34  ;;  %v4531_v54 = vunpack.c.l.b16 %v1488_v37  ;;  %v4292_v34 = vpop.f32.mrf.mxu2 }
 0x6a1   : > { %v4536_v20 = vpack.c.b16 %v4534_v3, %v4532_v62  ;;  %v1046_v18 = vadd.f32 %v11706_v57, %v853_v55  ;;  %v1135_v58 = vadd.f32 %v11707_v63, %v853_v55  ;;  %v1493_v43 = vpack.c.bf16 %v1137_v51, %v1048_v47 }
 0x6a2   : > { %v4703_v12 = vunpack.c.l.b16 %v4201_v33  ;;  %v5081_v52 = vadd.f32 %v5080_v60, %v10356_v11  ;;  %v4704_v16 = vunpack.c.h.b16 %v4201_v33  ;;  %v5088_v26 = vadd.f32 %v5087_v23, %v10359_v7  ;;  %v868_v11 = vpop.permute.xlu0 %867 }
 0x6a3   : > { %v4535_v0 = vpack.c.b16 %v4533_v27, %v4531_v54  ;;  %v1053_v49 = vadd.f32 %v11702_v6, %v868_v11  ;;  %v1142_v7 = vadd.f32 %v11703_v38, %v868_v11  ;;  %4601 = vmatmul.bf16.vlgmr.msra.gmra.mxu0 %v4536_v20  ;;  %v1492_v31 = vpack.c.bf16 %v1135_v58, %v1046_v18 }
 0x6a4   : > { %v4719_v29 = vpack.c.b16 %v4705_v45, %v4703_v12  ;;  %v5187_v4 = vmul.f32 0.125, %v5081_v52  ;;  %v5188_v41 = vmul.f32 0.125, %v5088_v26  ;;  %v4720_v10 = vpack.c.b16 %v4706_v28, %v4704_v16 }
 0x6a5   : > { %4587 = vmatmul.bf16.vlgmr.msrb.gmra.mxu3 %v4535_v0  ;;  %v1495_v56 = vpack.c.bf16 %v1142_v7, %v1053_v49  ;;  %v4689_v39 = vunpack.c.l.b16 %v1493_v43  ;;  %v4690_v2 = vunpack.c.h.b16 %v1493_v43  ;;  %v4687_v13 = vunpack.c.l.b16 %v1492_v31  ;;  %v5577_v43 = vld [vmem:[%s10501_s6] sm:$0xff] }
 0x6a6   : > { %4742 = vmatpush.bf16.xpose.msra.mxu3 %v4719_v29  ;;  %5203 = vst [vmem:[%s9715_s24] sm:$0xff] %v5187_v4  ;;  %4756 = vmatpush.bf16.xpose.msrb.mxu0 %v4720_v10  ;;  %v4688_v36 = vunpack.c.h.b16 %v1492_v31  ;;  %v5581_v31 = vld [vmem:[%s10501_s6 + $0x20] sm:$0xff] }
 0x6a7   : > { %5204 = vst [vmem:[%s9715_s24 + $0x8] sm:$0xff] %v5188_v41  ;;  %v4767_v15 = vunpack.c.l.b16 %v1495_v56  ;;  %v4768_v21 = vunpack.c.h.b16 %v1495_v56  ;;  %v4691_v59 = vpack.c.b16 %v4689_v39, %v4687_v13  ;;  %v5582_v39 = vld [vmem:[%s10501_s6 + $0x28] sm:$0xff]  ;;  %v5584_v13 = vld [vmem:[%s10501_s6 + $0x38] sm:$0xff] }
 0x6a8   : > { %v4692_v40 = vpack.c.b16 %v4690_v2, %v4688_v36  ;;  %v5583_v2 = vld [vmem:[%s10501_s6 + $0x30] sm:$0xff] }
 0x6a9   : > { %v4769_v53 = vpack.c.b16 %v4767_v15, %v4765_v44  ;;  %v4770_v30 = vpack.c.b16 %v4768_v21, %v4766_v1  ;;  %v4293_v15 = vadd.f32 %v4292_v34, %v4278_v25 }
 0x6ab   : > { %4821 = vmatmul.bf16.vlgmr.msra.gmra.mxu1 %v4769_v53  ;;  %4835 = vmatmul.bf16.vlgmr.msra.gmra.mxu2 %v4770_v30  ;;  %v4857_v21 = vpack.c.bf16 %v4293_v15, %v10363_v46  ;;  %v5578_v53 = vld [vmem:[%s10501_s6 + $0x8] sm:$0xff]  ;;  %v5579_v30 = vld [vmem:[%s10501_s6 + $0x10] sm:$0xff]  ;;  %v5580_v46 = vld [vmem:[%s10501_s6 + $0x18] sm:$0xff] }
 0x6b3   : > { %4757 = vmatmul.bf16.vlgmr.msrb.gmra.mxu0 %v4692_v40 }
 0x6b5   : > { %4743 = vmatmul.bf16.vlgmr.msra.gmra.mxu3 %v4691_v59 }
 0x6d8   : > { %v4354_v19 = vpop.f32.mrf.mxu1 }
 0x6de   : > { %v4368_v61 = vpop.f32.mrf.mxu2  ;;  %v4446_v5 = vpop.f32.mrf.mxu0 }
 0x6df   : > { %v4369_v8 = vadd.f32 %v4368_v61, %v4354_v19 }
 0x6e0   : > { %v4356_v48 = vpop.f32.mrf.mxu1 }
 0x6e4   : > { %v4432_v45 = vpop.f32.mrf.mxu3 }
 0x6e5   : > { %v4447_v63 = vadd.f32 %v4446_v5, %v4432_v45 }
 0x6e6   : > { %v4370_v22 = vpop.f32.mrf.mxu2  ;;  %v4448_v23 = vpop.f32.mrf.mxu0 }
 0x6e7   : > { %v4371_v9 = vadd.f32 %v4370_v22, %v4356_v48 }
 0x6e9   : > { %v4858_v33 = vpack.c.bf16 %v4371_v9, %v4369_v8  ;;  %v4510_v60 = vpop.f32.mrf.mxu1 }
 0x6ec   : > { %v4434_v52 = vpop.f32.mrf.mxu3 }
 0x6ed   : > { %v4449_v57 = vadd.f32 %v4448_v23, %v4434_v52 }
 0x6ef   : > { %v4859_v58 = vpack.c.bf16 %v4449_v57, %v4447_v63 }
 0x6f1   : > { %v4524_v17 = vpop.f32.mrf.mxu2  ;;  %v4512_v50 = vpop.f32.mrf.mxu1 }
 0x6f2   : > { %v4525_v1 = vadd.f32 %v4524_v17, %v4510_v60 }
 0x6f9   : > { %v4526_v35 = vpop.f32.mrf.mxu2 }
 0x6fa   : > { %v4527_v56 = vadd.f32 %v4526_v35, %v4512_v50 }
 0x6fc   : > { %v4860_v18 = vpack.c.bf16 %v4527_v56, %v4525_v1 }
 0x702   : > { %v4666_v37 = vpop.f32.mrf.mxu1 }
 0x708   : > { %v4680_v12 = vpop.f32.mrf.mxu2 }
 0x709   : > { %v4681_v42 = vadd.f32 %v4680_v12, %v4666_v37 }
 0x70a   : > { %v4668_v27 = vpop.f32.mrf.mxu1 }
 0x710   : > { %v4682_v3 = vpop.f32.mrf.mxu2 }
 0x711   : > { %v4683_v7 = vadd.f32 %v4682_v3, %v4668_v27 }
 0x713   : > { %v4862_v47 = vpack.c.bf16 %v4683_v7, %v4681_v42 }
 0x720   : > { %v4602_v16 = vpop.f32.mrf.mxu0 }
 0x728   : > { %v4588_v26 = vpop.f32.mrf.mxu3  ;;  %v4604_v28 = vpop.f32.mrf.mxu0 }
 0x729   : > { %v4822_v54 = vpop.f32.mrf.mxu1  ;;  %v4603_v51 = vadd.f32 %v4602_v16, %v4588_v26 }
 0x72e   : > { %v4836_v29 = vpop.f32.mrf.mxu2 }
 0x72f   : > { %v4837_v20 = vadd.f32 %v4836_v29, %v4822_v54 }
 0x730   : > { %v4590_v62 = vpop.f32.mrf.mxu3  ;;  %v4758_v4 = vpop.f32.mrf.mxu0 }
 0x731   : > { %v4824_v41 = vpop.f32.mrf.mxu1  ;;  %v4605_v24 = vadd.f32 %v4604_v28, %v4590_v62 }
 0x733   : > { %v4861_v44 = vpack.c.bf16 %v4605_v24, %v4603_v51 }
 0x736   : > { %v4838_v0 = vpop.f32.mrf.mxu2 }
 0x737   : > { %v4839_v14 = vadd.f32 %v4838_v0, %v4824_v41 }
 0x738   : > { %v4744_v10 = vpop.f32.mrf.mxu3  ;;  %v4760_v11 = vpop.f32.mrf.mxu0 }
 0x739   : > { %v4864_v32 = vpack.c.bf16 %v4839_v14, %v4837_v20  ;;  %v4759_v49 = vadd.f32 %v4758_v4, %v4744_v10 }
 0x73b   : > { %5009 = vmatpush.bf16.msrb.mxu3 %v4864_v32 }
 0x740   : > { %v4746_v6 = vpop.f32.mrf.mxu3 }
 0x741   : > { %v4761_v38 = vadd.f32 %v4760_v11, %v4746_v6 }
 0x743   : > { %v4863_v55 = vpack.c.bf16 %v4761_v38, %v4759_v49 }
 0x745   : > { %5010 = vmatpush.bf16.msrb.mxu3 %v4863_v55 }
 0x749   : > { %5011 = vmatpush.bf16.msrb.mxu3 %v4862_v47 }
 0x74d   : > { %5012 = vmatpush.bf16.msrb.mxu3 %v4861_v44 }
 0x751   : > { %5013 = vmatpush.bf16.msrb.mxu3 %v4860_v18 }
 0x755   : > { %5014 = vmatpush.bf16.msrb.mxu3 %v4859_v58 }
 0x759   : > { %5015 = vmatpush.bf16.msrb.mxu3 %v4858_v33 }
 0x75d   : > { %5016 = vmatpush.bf16.msrb.mxu3 %v4857_v21 }
 0x760   : > { %5017 = vmatmul.bf16.vlgmr.msrb.gmra.mxu3 %v5577_v43 }
 0x770   : > { %5022 = vmatmul.bf16.gmra.mxu3 %v5578_v53 }
 0x780   : > { %5027 = vmatmul.bf16.gmra.mxu3 %v5579_v30 }
 0x790   : > { %5032 = vmatmul.bf16.gmra.mxu3 %v5580_v46 }
 0x7a0   : > { %5037 = vmatmul.bf16.gmra.mxu3 %v5581_v31 }
 0x7b0   : > { %5042 = vmatmul.bf16.gmra.mxu3 %v5582_v39 }
 0x7c0   : > { %5047 = vmatmul.bf16.gmra.mxu3 %v5583_v2 }
 0x7d0   : > { %5052 = vmatmul.bf16.gmra.mxu3 %v5584_v13 }
 0x7d1   : > { %6140 = shalt.err (!%p6137_p3)
}
 0x7d2   : > { %s6178_s0 = smov 256   ;;  %s6179_s17 = smov 16   ;;  %v4884_v36 = vpop.permute.xlu0 %4883  ;;  %vm5058_vm7 = vcmask 523264   ;;  %v4889_v25 = vpop.permute.xlu2 %4888 }
 0x7d3   : > { %5595 = dma.vmem_to_hbm [thread:$0]  (%p6268_p5), %s5241_s27, 2048, %s5243_s21, %s5225_s1, %s6178_s0, %s6178_s0, %s6179_s17   ;;  %v4894_v61 = vpop.permute.xlu1 %4893 }
 0x7d4   : > { %s11709_s23 = sshll.u32 %s6286_s25, 7 }
 0x7d5   : > { %s10444_s14 = scalar_lea.vmem %s10503_s8, %s11709_s23 }
 0x7da   : > { %v4899_v22 = vpop.permute.xlu0 %4898  ;;  %v4904_v60 = vpop.permute.xlu2 %4903 }
 0x7db   : > { %v4909_v50 = vpop.permute.xlu1 %4908 }
 0x7e2   : > { %v4914_v23 = vpop.permute.xlu0 %4913  ;;  %v4919_v52 = vpop.permute.xlu2 %4918 }
 0x7e3   : > { %v5018_v59 = vpop.f32.mrf.mxu3  ;;  %v4924_v3 = vpop.permute.xlu1 %4923 }
 0x7e4   : > { %v5019_v40 = vadd.f32 %v5018_v59, %v4884_v36 }
 0x7e6   : > { %5059 = vst.msk [vmem:[%s10444_s14] sm:$0xff] %vm5058_vm7, %v5019_v40 }
 0x7ea   : > { %v4929_v54 = vpop.permute.xlu0 %4928  ;;  %v4934_v4 = vpop.permute.xlu2 %4933 }
 0x7eb   : > { %v5020_v34 = vpop.f32.mrf.mxu3  ;;  %v4939_v0 = vpop.permute.xlu1 %4938 }
 0x7ec   : > { %v5021_v19 = vadd.f32 %v5020_v34, %v4889_v25 }
 0x7ee   : > { %5060 = vst.msk [vmem:[%s10444_s14 + $0x8] sm:$0xff] %vm5058_vm7, %v5021_v19 }
 0x7f2   : > { %v4944_v32 = vpop.permute.xlu0 %4943  ;;  %v4949_v49 = vpop.permute.xlu2 %4948 }
 0x7f3   : > { %v5023_v8 = vpop.f32.mrf.mxu3  ;;  %v4954_v55 = vpop.permute.xlu1 %4953 }
 0x7f4   : > { %v5024_v48 = vadd.f32 %v5023_v8, %v4894_v61 }
 0x7f6   : > { %5061 = vst.msk [vmem:[%s10444_s14 + $0x10] sm:$0xff] %vm5058_vm7, %v5024_v48 }
 0x7fa   : > { %v4959_v24 = vpop.permute.xlu0 %4958 }
 0x7fb   : > { %v5025_v9 = vpop.f32.mrf.mxu3 }
 0x7fc   : > { %v5026_v33 = vadd.f32 %v5025_v9, %v4899_v22 }
 0x7fe   : > { %5062 = vst.msk [vmem:[%s10444_s14 + $0x18] sm:$0xff] %vm5058_vm7, %v5026_v33 }
 0x803   : > { %v5028_v17 = vpop.f32.mrf.mxu3 }
 0x804   : > { %v5029_v5 = vadd.f32 %v5028_v17, %v4904_v60 }
 0x806   : > { %5063 = vst.msk [vmem:[%s10444_s14 + $0x20] sm:$0xff] %vm5058_vm7, %v5029_v5 }
 0x80b   : > { %v5030_v35 = vpop.f32.mrf.mxu3 }
 0x80c   : > { %v5031_v45 = vadd.f32 %v5030_v35, %v4909_v50 }
 0x80e   : > { %5064 = vst.msk [vmem:[%s10444_s14 + $0x28] sm:$0xff] %vm5058_vm7, %v5031_v45 }
 0x813   : > { %v5033_v37 = vpop.f32.mrf.mxu3 }
 0x814   : > { %v5034_v12 = vadd.f32 %v5033_v37, %v4914_v23 }
 0x816   : > { %5065 = vst.msk [vmem:[%s10444_s14 + $0x30] sm:$0xff] %vm5058_vm7, %v5034_v12 }
 0x81b   : > { %v5035_v16 = vpop.f32.mrf.mxu3 }
 0x81c   : > { %v5036_v27 = vadd.f32 %v5035_v16, %v4919_v52 }
 0x81e   : > { %5066 = vst.msk [vmem:[%s10444_s14 + $0x38] sm:$0xff] %vm5058_vm7, %v5036_v27 }
 0x823   : > { %v5038_v26 = vpop.f32.mrf.mxu3 }
 0x824   : > { %v5039_v28 = vadd.f32 %v5038_v26, %v4924_v3 }
 0x826   : > { %5067 = vst.msk [vmem:[%s10444_s14 + $0x40] sm:$0xff] %vm5058_vm7, %v5039_v28 }
 0x82b   : > { %v5040_v62 = vpop.f32.mrf.mxu3 }
 0x82c   : > { %v5041_v29 = vadd.f32 %v5040_v62, %v4929_v54 }
 0x82e   : > { %5068 = vst.msk [vmem:[%s10444_s14 + $0x48] sm:$0xff] %vm5058_vm7, %v5041_v29 }
 0x833   : > { %v5043_v41 = vpop.f32.mrf.mxu3 }
 0x834   : > { %v5044_v10 = vadd.f32 %v5043_v41, %v4934_v4 }
 0x836   : > { %5069 = vst.msk [vmem:[%s10444_s14 + $0x50] sm:$0xff] %vm5058_vm7, %v5044_v10 }
 0x83b   : > { %v5045_v20 = vpop.f32.mrf.mxu3 }
 0x83c   : > { %v5046_v14 = vadd.f32 %v5045_v20, %v4939_v0 }
 0x83e   : > { %5070 = vst.msk [vmem:[%s10444_s14 + $0x58] sm:$0xff] %vm5058_vm7, %v5046_v14 }
 0x843   : > { %v5048_v11 = vpop.f32.mrf.mxu3 }
 0x844   : > { %v5049_v6 = vadd.f32 %v5048_v11, %v4944_v32 }
 0x846   : > { %5071 = vst.msk [vmem:[%s10444_s14 + $0x60] sm:$0xff] %vm5058_vm7, %v5049_v6 }
 0x84b   : > { %v5050_v38 = vpop.f32.mrf.mxu3 }
 0x84c   : > { %v5051_v7 = vadd.f32 %v5050_v38, %v4949_v49 }
 0x84e   : > { %5072 = vst.msk [vmem:[%s10444_s14 + $0x68] sm:$0xff] %vm5058_vm7, %v5051_v7 }
 0x853   : > { %v5053_v42 = vpop.f32.mrf.mxu3 }
 0x854   : > { %v5054_v47 = vadd.f32 %v5053_v42, %v4954_v55 }
 0x856   : > { %5073 = vst.msk [vmem:[%s10444_s14 + $0x70] sm:$0xff] %vm5058_vm7, %v5054_v47 }
 0x85b   : > { %v5055_v51 = vpop.f32.mrf.mxu3 }
 0x85c   : > { %v5056_v56 = vadd.f32 %v5055_v51, %v4959_v24 }
 0x85e   : > { %5074 = vst.msk [vmem:[%s10444_s14 + $0x78] sm:$0xff] %vm5058_vm7, %v5056_v56 }
 0x85f PF: > { %p5601_p4 = scmp.ge.s32.totalorder %s6175_s12, 2  ;;  %s5265_s1 = sand.u32 1, %s6163_s30  }
 0x860   : > { %s5266_s2 = scalar_lea.sflag [#allocation3], %s5265_s1 }
 0x861   : > { %p5598_p5 = pnand %p5601_p4, %p6272_p6 }
 0x863   : > { %p5599_p7 = pneg %p5598_p5 }
 0x865   : > { %6158 = dma.done.wait (%p5599_p7), %s5266_s2, 2048  }
 0x866   : > { %6160 = vsyncadd (%p5599_p7), %s5266_s2, 4294965248  ;;  %p20_p8 = scmp.ge.s32.totalorder %s6255_s15, 4   ;;  %s11710_s30 = smov %s6167_s10 }
 0x867   : > { %s11711_s10 = smov %s6171_s11  ;;  %s11712_s11 = smov %s6266_s18 }
 0x868   : > { %s11713_s12 = smov %s6255_s15  ;;  %22 = sbr.rel (!%p20_p8) target bundleno = 7 (0x7), region = 102 }
 0x86d   :  { %5272 = vsyncpa [#allocation3], 1 }
 0x86e   :  { %5274 = vsyncpa [#allocation3 + $0x1], 1 }

</bundles_post_ra>
